<compile_context>
chip_gen: v6e
topology: v6e:2x2x1
jax: 0.10.0
libtpu: 0.0.40
codegen_flags: <defaults>
</compile_context>

<pallas_src>
import functools
import math

import jax
import jax.numpy as jnp
from jax.experimental import pallas as pl
from jax.experimental.pallas import tpu as pltpu

EPS = 1e-5
CP = 128  # all channel dims are zero-padded to 128 lanes


# ---------------------------------------------------------------------------
# Pallas kernels
# ---------------------------------------------------------------------------
def _time_sum_kernel(x_ref, te_ref, out_ref):
    # x: (T, B*C, H*W) f32 ; te: (1,1) f32 scalar in SMEM (= sum_t encoding[t])
    out_ref[...] = jnp.sum(x_ref[...], axis=0) + te_ref[0, 0]


def _conv_kernel(*args, stride, kh, kw, relu, has_res, n_x):
    """Direct conv: for one output row, accumulate kh*kw tap matmuls (MXU).

    args = (x_even[, x_odd], w, scale, bias[, res], out)
      x refs : (1, Hp, Wx, CP) bf16 padded input (column-parity split if stride=2)
      w      : (kh*kw, CP, CP) bf16
      scale/bias : (1, CP) f32 folded inference BatchNorm
      res    : (1, 1, Wo, CP) bf16 optional residual (added before ReLU)
      out    : (1, 1, Wo, CP) bf16
    """
    x_refs = args[:n_x]
    w_ref, scale_ref, bias_ref = args[n_x], args[n_x + 1], args[n_x + 2]
    if has_res:
        res_ref, out_ref = args[n_x + 3], args[n_x + 4]
    else:
        res_ref, out_ref = None, args[n_x + 3]

    ho = pl.program_id(1)
    Wo, cpo = out_ref.shape[2], out_ref.shape[3]
    acc = jnp.zeros((Wo, cpo), jnp.float32)
    for dy in range(kh):
        r = ho * stride + dy
        for dx in range(kw):
            if stride == 1:
                row = x_refs[0][0, r, pl.ds(dx, Wo), :]
            else:
                # column = wo*2 + dx  ->  parity dx % 2, start dx // 2
                src = x_refs[(dx % 2) if n_x == 2 else 0]
                row = src[0, r, pl.ds(dx // 2, Wo), :]
            acc = acc + jnp.dot(row, w_ref[dy * kw + dx],
                                preferred_element_type=jnp.float32)
    acc = acc * scale_ref[...] + bias_ref[...]
    if has_res:
        acc = acc + res_ref[0, 0].astype(jnp.float32)
    if relu:
        acc = jnp.maximum(acc, 0.0)
    out_ref[0, 0] = acc.astype(out_ref.dtype)


def _maxpool_kernel(xe_ref, xo_ref, out_ref):
    # 3x3 / stride 2 / pad 1 max pool.  Inputs are post-ReLU (>= 0), so the
    # zero spatial padding is equivalent to PyTorch's -inf padding.
    ho = pl.program_id(1)
    Wo = out_ref.shape[2]
    m = None
    for dy in range(3):
        r = ho * 2 + dy
        for dx in range(3):
            src = xe_ref if dx % 2 == 0 else xo_ref
            row = src[0, r, pl.ds(dx // 2, Wo), :]
            m = row if m is None else jnp.maximum(m, row)
    out_ref[0, 0] = m


def _avgpool_fc_kernel(x_ref, w_ref, b_ref, out_ref):
    # x: (B, H*W, CP) bf16 -> global average pool -> (B, CP) -> logits (B, CP)
    pooled = jnp.mean(x_ref[...].astype(jnp.float32), axis=1)
    out_ref[...] = (
        jnp.dot(pooled, w_ref[...], preferred_element_type=jnp.float32) + b_ref[...]
    )


# ---------------------------------------------------------------------------
# pallas_call wrappers
# ---------------------------------------------------------------------------
def time_encode_sum(x, te):
    # x: (B, T, C, H, W) -> permute to time-major, add encoding, sum over T.
    B, T, C, H, W = x.shape
    xt = jnp.transpose(x.reshape(B, T, C, H * W), (1, 0, 2, 3))
    xt = xt.reshape(T, B * C, H * W)                       # lane dim = H*W (1024)
    te_sum = jnp.sum(te).reshape(1, 1).astype(jnp.float32)  # sum_t te[t] (scalar)
    out = pl.pallas_call(
        _time_sum_kernel,
        grid=(1,),
        in_specs=[
            pl.BlockSpec((T, B * C, H * W), lambda i: (0, 0, 0)),
            pl.BlockSpec(memory_space=pltpu.MemorySpace.SMEM),
        ],
        out_specs=pl.BlockSpec((B * C, H * W), lambda i: (0, 0)),
        out_shape=jax.ShapeDtypeStruct((B * C, H * W), jnp.float32),
    )(xt, te_sum)
    h = out.reshape(B, C, H, W).transpose(0, 2, 3, 1)       # NHWC, C real = 2
    h = jnp.pad(h, ((0, 0), (0, 0), (0, 0), (0, CP - C)))   # lane-pad channels
    return h.astype(jnp.bfloat16)


def conv_bn(x, w_oihw, bn, *, stride, pad, relu, residual=None):
    """Fused direct conv + inference BatchNorm [+ residual] [+ ReLU]."""
    cout, cin, kh, kw = (int(s) for s in w_oihw.shape)
    B, H, W, cpin = x.shape
    Ho = (H + 2 * pad - kh) // stride + 1
    Wo = (W + 2 * pad - kw) // stride + 1
    xp = jnp.pad(x, ((0, 0), (pad, pad), (pad, pad), (0, 0))) if pad else x
    Hp = xp.shape[1]

    # weights: (dy, dx, cin, cout), channel-padded to CP, bf16 for the MXU
    w = jnp.transpose(w_oihw, (2, 3, 1, 0)).reshape(kh * kw, cin, cout)
    w = jnp.pad(w, ((0, 0), (0, CP - cin), (0, CP - cout))).astype(jnp.bfloat16)

    inv_std = jax.lax.rsqrt(bn["var"] + EPS)
    scale = jnp.pad(bn["gamma"] * inv_std, (0, CP - cout)).reshape(1, CP)
    bias = jnp.pad(bn["beta"] - bn["mean"] * bn["gamma"] * inv_std,
                   (0, CP - cout)).reshape(1, CP)

    # input refs: whole padded image per batch element; even/odd column split
    # for stride-2 so all in-kernel slices are unit-stride.
    if stride == 1:
        x_args = [xp]
    else:
        x_args = [xp[:, :, 0::2, :]]
        if kw > 1:
            x_args.append(xp[:, :, 1::2, :])
    n_x = len(x_args)
    x_specs = [
        pl.BlockSpec((1, Hp, xa.shape[2], CP), lambda b, h: (b, 0, 0, 0))
        for xa in x_args
    ]

    in_specs = x_specs + [
        pl.BlockSpec((kh * kw, CP, CP), lambda b, h: (0, 0, 0)),
        pl.BlockSpec((1, CP), lambda b, h: (0, 0)),
        pl.BlockSpec((1, CP), lambda b, h: (0, 0)),
    ]
    args = x_args + [w, scale, bias]
    if residual is not None:
        in_specs.append(pl.BlockSpec((1, 1, Wo, CP), lambda b, h: (b, h, 0, 0)))
        args.append(residual)

    kern = functools.partial(_conv_kernel, stride=stride, kh=kh, kw=kw,
                             relu=relu, has_res=residual is not None, n_x=n_x)
    return pl.pallas_call(
        kern,
        grid=(B, Ho),
        in_specs=in_specs,
        out_specs=pl.BlockSpec((1, 1, Wo, CP), lambda b, h: (b, h, 0, 0)),
        out_shape=jax.ShapeDtypeStruct((B, Ho, Wo, CP), jnp.bfloat16),
        compiler_params=pltpu.CompilerParams(
            dimension_semantics=("parallel", "arbitrary")),
    )(*args)


def maxpool_3x3_s2_p1(x):
    B, H, W, cp = x.shape
    Ho = (H + 2 - 3) // 2 + 1
    Wo = (W + 2 - 3) // 2 + 1
    xp = jnp.pad(x, ((0, 0), (1, 1), (1, 1), (0, 0)))   # post-ReLU: 0-pad == -inf pad
    Hp = xp.shape[1]
    xe = xp[:, :, 0::2, :]
    xo = xp[:, :, 1::2, :]
    return pl.pallas_call(
        _maxpool_kernel,
        grid=(B, Ho),
        in_specs=[
            pl.BlockSpec((1, Hp, xe.shape[2], CP), lambda b, h: (b, 0, 0, 0)),
            pl.BlockSpec((1, Hp, xo.shape[2], CP), lambda b, h: (b, 0, 0, 0)),
        ],
        out_specs=pl.BlockSpec((1, 1, Wo, CP), lambda b, h: (b, h, 0, 0)),
        out_shape=jax.ShapeDtypeStruct((B, Ho, Wo, CP), jnp.bfloat16),
        compiler_params=pltpu.CompilerParams(
            dimension_semantics=("parallel", "arbitrary")),
    )(xe, xo)


def avgpool_fc(x, w_fc, b_fc):
    B, H, W, cp = x.shape
    num_classes = int(w_fc.shape[1])
    x3 = x.reshape(B, H * W, cp)
    wp = jnp.pad(w_fc, ((0, CP - w_fc.shape[0]), (0, CP - num_classes)))
    bp = jnp.pad(b_fc, (0, CP - num_classes)).reshape(1, CP)
    out = pl.pallas_call(
        _avgpool_fc_kernel,
        grid=(1,),
        in_specs=[
            pl.BlockSpec((B, H * W, CP), lambda i: (0, 0, 0)),
            pl.BlockSpec((CP, CP), lambda i: (0, 0)),
            pl.BlockSpec((1, CP), lambda i: (0, 0)),
        ],
        out_specs=pl.BlockSpec((B, CP), lambda i: (0, 0)),
        out_shape=jax.ShapeDtypeStruct((B, CP), jnp.float32),
    )(x3, wp, bp)
    return out[:, :num_classes]


# ---------------------------------------------------------------------------
# Model assembly (BasicBlock ResNet, layers = [n1, n2, n3], planes 64/32/64)
# ---------------------------------------------------------------------------
def basic_block(x, blk):
    identity = x
    out = conv_bn(x, blk["conv1_w"], blk["bn1"], stride=blk["stride"], pad=1, relu=True)
    if "down_w" in blk:
        identity = conv_bn(
            x, blk["down_w"], blk["down_bn"], stride=blk["stride"], pad=0, relu=False
        )
    out = conv_bn(
        out, blk["conv2_w"], blk["bn2"], stride=1, pad=1, relu=True, residual=identity
    )
    return out


def resnet_forward(x, params):
    h = time_encode_sum(x, params["time_encoding"])            # (B, H, W, CP)
    h = conv_bn(h, params["conv1_w"], params["bn1"], stride=2, pad=1, relu=True)
    h = maxpool_3x3_s2_p1(h)
    for layer in ("layer1", "layer2", "layer3"):
        for blk in params[layer]:
            h = basic_block(h, blk)
    return avgpool_fc(h, params["fc_w"], params["fc_b"])


# ---------------------------------------------------------------------------
# Deterministic parameter initialization (mirrors the torch __init__ shapes)
# ---------------------------------------------------------------------------
def init_conv(key, cout, cin, kh, kw):
    fan_out = cout * kh * kw          # kaiming_normal_, mode='fan_out', relu
    std = math.sqrt(2.0 / fan_out)
    return std * jax.random.normal(key, (cout, cin, kh, kw), jnp.float32)


def init_bn(c):
    return {
        "gamma": jnp.ones((c,), jnp.float32),
        "beta": jnp.zeros((c,), jnp.float32),
        "mean": jnp.zeros((c,), jnp.float32),
        "var": jnp.ones((c,), jnp.float32),
    }


def init_resnet_params(key, layers, num_classes, T=16):
    keys = iter(jax.random.split(key, 128))
    params = {}
    params["conv1_w"] = init_conv(next(keys), 64, 2, 3, 3)
    params["bn1"] = init_bn(64)
    inplanes = 64

    def make_layer(planes, blocks, stride):
        nonlocal inplanes
        blk_list = []
        for b in range(blocks):
            s = stride if b == 0 else 1
            blk = {
                "conv1_w": init_conv(next(keys), planes, inplanes, 3, 3),
                "bn1": init_bn(planes),
                "conv2_w": init_conv(next(keys), planes, planes, 3, 3),
                "bn2": init_bn(planes),
                "stride": s,
            }
            if s != 1 or inplanes != planes:
                blk["down_w"] = init_conv(next(keys), planes, inplanes, 1, 1)
                blk["down_bn"] = init_bn(planes)
            inplanes = planes
            blk_list.append(blk)
        return blk_list

    params["layer1"] = make_layer(64, layers[0], 1)
    params["layer2"] = make_layer(32, layers[1], 2)
    params["layer3"] = make_layer(64, layers[2], 2)

    bound = 1.0 / math.sqrt(64)       # torch Linear default init
    params["fc_w"] = jax.random.uniform(
        next(keys), (64, num_classes), jnp.float32, -bound, bound
    )
    params["fc_b"] = jax.random.uniform(
        next(keys), (num_classes,), jnp.float32, -bound, bound
    )
    t = jnp.arange(1, T + 1, dtype=jnp.float32)
    params["time_encoding"] = (1.0 / 16.0) * jnp.sin(jnp.pi / (2.0 * T) * t)
    return params


if __name__ == "__main__":
    key = jax.random.PRNGKey(0)
    kx, kp = jax.random.split(key)
    B, T, C, H, W = 2, 16, 2, 32, 32          # input implied by forward: (B, T, 2, H, W)
    x = jax.random.normal(kx, (B, T, C, H, W), jnp.float32)
    params = init_resnet_params(kp, layers=[1, 1, 1], num_classes=10, T=T)
    fwd = jax.jit(lambda inp: resnet_forward(inp, params))
    logits = fwd(x)
    jax.block_until_ready(logits)
    assert logits.shape == (B, 10), logits.shape
    print("KERNEL_OK")
</pallas_src>

<mosaic_0001>
module attributes {stable_mosaic.version = 11 : i64} {
  func.func @_time_sum_kernel(%arg0: i32, %arg1: memref<16x4x1024xf32, #tpu.memory_space<vmem>>, %arg2: memref<1x1xf32, #tpu.memory_space<smem>>, %arg3: memref<4x1024xf32, #tpu.memory_space<vmem>>) attributes {dimension_semantics = [#tpu.dimension_semantics<arbitrary>], iteration_bounds = array<i64: 1>, scalar_prefetch = 0 : i64, scratch_operands = 0 : i64, tpu.core_type = #tpu.core_type<tc>, window_params = [{pipeline_mode = #tpu.pipeline_mode<synchronous>, transform_indices = @transform_0, window_bounds = array<i64: 16, 4, 1024>}, {transform_indices = @transform_1, window_bounds = array<i64: 1, 1>}, {pipeline_mode = #tpu.pipeline_mode<synchronous>, transform_indices = @transform_2, window_bounds = array<i64: 4, 1024>}]} {
    %c0 = arith.constant 0 : index
    %c0_0 = arith.constant 0 : index
    %c0_1 = arith.constant 0 : index
    %0 = vector.load %arg1[%c0, %c0_0, %c0_1] : memref<16x4x1024xf32, #tpu.memory_space<vmem>>, vector<16x4x1024xf32>
    %cst = arith.constant dense<0.000000e+00> : vector<4x1024xf32>
    %1 = vector.multi_reduction <add>, %0, %cst [0] : vector<16x4x1024xf32> to vector<4x1024xf32>
    %c0_2 = arith.constant 0 : index
    %c0_3 = arith.constant 0 : index
    %2 = memref.load %arg2[%c0_2, %c0_3] : memref<1x1xf32, #tpu.memory_space<smem>>
    %3 = vector.broadcast %2 : f32 to vector<4x1024xf32>
    %4 = arith.addf %1, %3 : vector<4x1024xf32>
    %c0_4 = arith.constant 0 : index
    %c0_5 = arith.constant 0 : index
    %5 = vector.load %arg3[%c0_4, %c0_5] : memref<4x1024xf32, #tpu.memory_space<vmem>>, vector<4x1024xf32>
    tpu.vector_store %arg3[%c0_4, %c0_5], %4 {strides = array<i32>} : memref<4x1024xf32, #tpu.memory_space<vmem>>, vector<4x1024xf32>,
    return
  }
  func.func @transform_0(%arg0: i32) -> (i32, i32, i32) {
    %c0_i32 = arith.constant 0 : i32
    %c0_i32_0 = arith.constant 0 : i32
    %c0_i32_1 = arith.constant 0 : i32
    %c0_i32_2 = arith.constant 0 : i32
    return %c0_i32, %c0_i32_0, %c0_i32_1 : i32, i32, i32
  }
  func.func @transform_1(%arg0: i32) -> (i32, i32) {
    %c0_i32 = arith.constant 0 : i32
    %c0_i32_0 = arith.constant 0 : i32
    %c0_i32_1 = arith.constant 0 : i32
    return %c0_i32, %c0_i32_0 : i32, i32
  }
  func.func @transform_2(%arg0: i32) -> (i32, i32) {
    %c0_i32 = arith.constant 0 : i32
    %c0_i32_0 = arith.constant 0 : i32
    %c0_i32_1 = arith.constant 0 : i32
    return %c0_i32, %c0_i32_0 : i32, i32
  }
}

module attributes {stable_mosaic.version = 11 : i64} {
  func.func @_conv_kernel(%arg0: i32, %arg1: i32, %arg2: memref<1x34x17x128xbf16, #tpu.memory_space<vmem>>, %arg3: memref<1x34x17x128xbf16, #tpu.memory_space<vmem>>, %arg4: memref<9x128x128xbf16, #tpu.memory_space<vmem>>, %arg5: memref<1x128xf32, #tpu.memory_space<vmem>>, %arg6: memref<1x128xf32, #tpu.memory_space<vmem>>, %arg7: memref<1x1x16x128xbf16, #tpu.memory_space<vmem>>) attributes {dimension_semantics = [#tpu.dimension_semantics<parallel>, #tpu.dimension_semantics<arbitrary>], iteration_bounds = array<i64: 2, 16>, scalar_prefetch = 0 : i64, scratch_operands = 0 : i64, tpu.core_type = #tpu.core_type<tc>, window_params = [{transform_indices = @transform_0, window_bounds = array<i64: 1, 34, 17, 128>}, {transform_indices = @transform_1, window_bounds = array<i64: 1, 34, 17, 128>}, {pipeline_mode = #tpu.pipeline_mode<synchronous>, transform_indices = @transform_2, window_bounds = array<i64: 9, 128, 128>}, {pipeline_mode = #tpu.pipeline_mode<synchronous>, transform_indices = @transform_3, window_bounds = array<i64: 1, 128>}, {pipeline_mode = #tpu.pipeline_mode<synchronous>, transform_indices = @transform_4, window_bounds = array<i64: 1, 128>}, {transform_indices = @transform_5, window_bounds = array<i64: 1, 1, 16, 128>}]} {
    %cst = arith.constant 0.000000e+00 : f32
    %0 = vector.broadcast %cst : f32 to vector<16x128xf32>
    %c2_i32 = arith.constant 2 : i32
    %1 = arith.muli %arg1, %c2_i32 : i32
    %c0_i32 = arith.constant 0 : i32
    %2 = arith.addi %1, %c0_i32 : i32
    %c0 = arith.constant 0 : index
    %3 = arith.index_cast %2 : i32 to index
    %c0_0 = arith.constant 0 : index
    %c0_1 = arith.constant 0 : index
    %4 = vector.load %arg2[%c0, %3, %c0_0, %c0_1] : memref<1x34x17x128xbf16, #tpu.memory_space<vmem>>, vector<1x1x16x128xbf16>
    %5 = vector.shape_cast %4 : vector<1x1x16x128xbf16> to vector<16x128xbf16>
    %c0_2 = arith.constant 0 : index
    %c0_3 = arith.constant 0 : index
    %c0_4 = arith.constant 0 : index
    %6 = vector.load %arg4[%c0_2, %c0_3, %c0_4] : memref<9x128x128xbf16, #tpu.memory_space<vmem>>, vector<1x128x128xbf16>
    %7 = vector.shape_cast %6 : vector<1x128x128xbf16> to vector<128x128xbf16>
    %cst_5 = arith.constant dense<0.000000e+00> : vector<16x128xf32>
    %8 = tpu.matmul %5, %7, %cst_5 {dimension_numbers = #tpu.dot_dimension_numbers<[1], [0], [0], [1], [0, 0, 1, 1], [], []>} : vector<16x128xbf16>, vector<128x128xbf16>, vector<16x128xf32> -> vector<16x128xf32>
    %9 = arith.addf %0, %8 : vector<16x128xf32>
    %c0_6 = arith.constant 0 : index
    %10 = arith.index_cast %2 : i32 to index
    %c0_7 = arith.constant 0 : index
    %c0_8 = arith.constant 0 : index
    %11 = vector.load %arg3[%c0_6, %10, %c0_7, %c0_8] : memref<1x34x17x128xbf16, #tpu.memory_space<vmem>>, vector<1x1x16x128xbf16>
    %12 = vector.shape_cast %11 : vector<1x1x16x128xbf16> to vector<16x128xbf16>
    %c1 = arith.constant 1 : index
    %c0_9 = arith.constant 0 : index
    %c0_10 = arith.constant 0 : index
    %13 = vector.load %arg4[%c1, %c0_9, %c0_10] : memref<9x128x128xbf16, #tpu.memory_space<vmem>>, vector<1x128x128xbf16>
    %14 = vector.shape_cast %13 : vector<1x128x128xbf16> to vector<128x128xbf16>
    %cst_11 = arith.constant dense<0.000000e+00> : vector<16x128xf32>
    %15 = tpu.matmul %12, %14, %cst_11 {dimension_numbers = #tpu.dot_dimension_numbers<[1], [0], [0], [1], [0, 0, 1, 1], [], []>} : vector<16x128xbf16>, vector<128x128xbf16>, vector<16x128xf32> -> vector<16x128xf32>
    %16 = arith.addf %9, %15 : vector<16x128xf32>
    %c0_12 = arith.constant 0 : index
    %17 = arith.index_cast %2 : i32 to index
    %c1_13 = arith.constant 1 : index
    %c0_14 = arith.constant 0 : index
    %18 = vector.load %arg2[%c0_12, %17, %c1_13, %c0_14] : memref<1x34x17x128xbf16, #tpu.memory_space<vmem>>, vector<1x1x16x128xbf16>
    %19 = vector.shape_cast %18 : vector<1x1x16x128xbf16> to vector<16x128xbf16>
    %c2 = arith.constant 2 : index
    %c0_15 = arith.constant 0 : index
    %c0_16 = arith.constant 0 : index
    %20 = vector.load %arg4[%c2, %c0_15, %c0_16] : memref<9x128x128xbf16, #tpu.memory_space<vmem>>, vector<1x128x128xbf16>
    %21 = vector.shape_cast %20 : vector<1x128x128xbf16> to vector<128x128xbf16>
    %cst_17 = arith.constant dense<0.000000e+00> : vector<16x128xf32>
    %22 = tpu.matmul %19, %21, %cst_17 {dimension_numbers = #tpu.dot_dimension_numbers<[1], [0], [0], [1], [0, 0, 1, 1], [], []>} : vector<16x128xbf16>, vector<128x128xbf16>, vector<16x128xf32> -> vector<16x128xf32>
    %23 = arith.addf %16, %22 : vector<16x128xf32>
    %c2_i32_18 = arith.constant 2 : i32
    %24 = arith.muli %arg1, %c2_i32_18 : i32
    %c1_i32 = arith.constant 1 : i32
    %25 = arith.addi %24, %c1_i32 : i32
    %c0_19 = arith.constant 0 : index
    %26 = arith.index_cast %25 : i32 to index
    %c0_20 = arith.constant 0 : index
    %c0_21 = arith.constant 0 : index
    %27 = vector.load %arg2[%c0_19, %26, %c0_20, %c0_21] : memref<1x34x17x128xbf16, #tpu.memory_space<vmem>>, vector<1x1x16x128xbf16>
    %28 = vector.shape_cast %27 : vector<1x1x16x128xbf16> to vector<16x128xbf16>
    %c3 = arith.constant 3 : index
    %c0_22 = arith.constant 0 : index
    %c0_23 = arith.constant 0 : index
    %29 = vector.load %arg4[%c3, %c0_22, %c0_23] : memref<9x128x128xbf16, #tpu.memory_space<vmem>>, vector<1x128x128xbf16>
    %30 = vector.shape_cast %29 : vector<1x128x128xbf16> to vector<128x128xbf16>
    %cst_24 = arith.constant dense<0.000000e+00> : vector<16x128xf32>
    %31 = tpu.matmul %28, %30, %cst_24 {dimension_numbers = #tpu.dot_dimension_numbers<[1], [0], [0], [1], [0, 0, 1, 1], [], []>} : vector<16x128xbf16>, vector<128x128xbf16>, vector<16x128xf32> -> vector<16x128xf32>
    %32 = arith.addf %23, %31 : vector<16x128xf32>
    %c0_25 = arith.constant 0 : index
    %33 = arith.index_cast %25 : i32 to index
    %c0_26 = arith.constant 0 : index
    %c0_27 = arith.constant 0 : index
    %34 = vector.load %arg3[%c0_25, %33, %c0_26, %c0_27] : memref<1x34x17x128xbf16, #tpu.memory_space<vmem>>, vector<1x1x16x128xbf16>
    %35 = vector.shape_cast %34 : vector<1x1x16x128xbf16> to vector<16x128xbf16>
    %c4 = arith.constant 4 : index
    %c0_28 = arith.constant 0 : index
    %c0_29 = arith.constant 0 : index
    %36 = vector.load %arg4[%c4, %c0_28, %c0_29] : memref<9x128x128xbf16, #tpu.memory_space<vmem>>, vector<1x128x128xbf16>
    %37 = vector.shape_cast %36 : vector<1x128x128xbf16> to vector<128x128xbf16>
    %cst_30 = arith.constant dense<0.000000e+00> : vector<16x128xf32>
    %38 = tpu.matmul %35, %37, %cst_30 {dimension_numbers = #tpu.dot_dimension_numbers<[1], [0], [0], [1], [0, 0, 1, 1], [], []>} : vector<16x128xbf16>, vector<128x128xbf16>, vector<16x128xf32> -> vector<16x128xf32>
    %39 = arith.addf %32, %38 : vector<16x128xf32>
    %c0_31 = arith.constant 0 : index
    %40 = arith.index_cast %25 : i32 to index
    %c1_32 = arith.constant 1 : index
    %c0_33 = arith.constant 0 : index
    %41 = vector.load %arg2[%c0_31, %40, %c1_32, %c0_33] : memref<1x34x17x128xbf16, #tpu.memory_space<vmem>>, vector<1x1x16x128xbf16>
    %42 = vector.shape_cast %41 : vector<1x1x16x128xbf16> to vector<16x128xbf16>
    %c5 = arith.constant 5 : index
    %c0_34 = arith.constant 0 : index
    %c0_35 = arith.constant 0 : index
    %43 = vector.load %arg4[%c5, %c0_34, %c0_35] : memref<9x128x128xbf16, #tpu.memory_space<vmem>>, vector<1x128x128xbf16>
    %44 = vector.shape_cast %43 : vector<1x128x128xbf16> to vector<128x128xbf16>
    %cst_36 = arith.constant dense<0.000000e+00> : vector<16x128xf32>
    %45 = tpu.matmul %42, %44, %cst_36 {dimension_numbers = #tpu.dot_dimension_numbers<[1], [0], [0], [1], [0, 0, 1, 1], [], []>} : vector<16x128xbf16>, vector<128x128xbf16>, vector<16x128xf32> -> vector<16x128xf32>
    %46 = arith.addf %39, %45 : vector<16x128xf32>
    %c2_i32_37 = arith.constant 2 : i32
    %47 = arith.muli %arg1, %c2_i32_37 : i32
    %c2_i32_38 = arith.constant 2 : i32
    %48 = arith.addi %47, %c2_i32_38 : i32
    %c0_39 = arith.constant 0 : index
    %49 = arith.index_cast %48 : i32 to index
    %c0_40 = arith.constant 0 : index
    %c0_41 = arith.constant 0 : index
    %50 = vector.load %arg2[%c0_39, %49, %c0_40, %c0_41] : memref<1x34x17x128xbf16, #tpu.memory_space<vmem>>, vector<1x1x16x128xbf16>
    %51 = vector.shape_cast %50 : vector<1x1x16x128xbf16> to vector<16x128xbf16>
    %c6 = arith.constant 6 : index
    %c0_42 = arith.constant 0 : index
    %c0_43 = arith.constant 0 : index
    %52 = vector.load %arg4[%c6, %c0_42, %c0_43] : memref<9x128x128xbf16, #tpu.memory_space<vmem>>, vector<1x128x128xbf16>
    %53 = vector.shape_cast %52 : vector<1x128x128xbf16> to vector<128x128xbf16>
    %cst_44 = arith.constant dense<0.000000e+00> : vector<16x128xf32>
    %54 = tpu.matmul %51, %53, %cst_44 {dimension_numbers = #tpu.dot_dimension_numbers<[1], [0], [0], [1], [0, 0, 1, 1], [], []>} : vector<16x128xbf16>, vector<128x128xbf16>, vector<16x128xf32> -> vector<16x128xf32>
    %55 = arith.addf %46, %54 : vector<16x128xf32>
    %c0_45 = arith.constant 0 : index
    %56 = arith.index_cast %48 : i32 to index
    %c0_46 = arith.constant 0 : index
    %c0_47 = arith.constant 0 : index
    %57 = vector.load %arg3[%c0_45, %56, %c0_46, %c0_47] : memref<1x34x17x128xbf16, #tpu.memory_space<vmem>>, vector<1x1x16x128xbf16>
    %58 = vector.shape_cast %57 : vector<1x1x16x128xbf16> to vector<16x128xbf16>
    %c7 = arith.constant 7 : index
    %c0_48 = arith.constant 0 : index
    %c0_49 = arith.constant 0 : index
    %59 = vector.load %arg4[%c7, %c0_48, %c0_49] : memref<9x128x128xbf16, #tpu.memory_space<vmem>>, vector<1x128x128xbf16>
    %60 = vector.shape_cast %59 : vector<1x128x128xbf16> to vector<128x128xbf16>
    %cst_50 = arith.constant dense<0.000000e+00> : vector<16x128xf32>
    %61 = tpu.matmul %58, %60, %cst_50 {dimension_numbers = #tpu.dot_dimension_numbers<[1], [0], [0], [1], [0, 0, 1, 1], [], []>} : vector<16x128xbf16>, vector<128x128xbf16>, vector<16x128xf32> -> vector<16x128xf32>
    %62 = arith.addf %55, %61 : vector<16x128xf32>
    %c0_51 = arith.constant 0 : index
    %63 = arith.index_cast %48 : i32 to index
    %c1_52 = arith.constant 1 : index
    %c0_53 = arith.constant 0 : index
    %64 = vector.load %arg2[%c0_51, %63, %c1_52, %c0_53] : memref<1x34x17x128xbf16, #tpu.memory_space<vmem>>, vector<1x1x16x128xbf16>
    %65 = vector.shape_cast %64 : vector<1x1x16x128xbf16> to vector<16x128xbf16>
    %c8 = arith.constant 8 : index
    %c0_54 = arith.constant 0 : index
    %c0_55 = arith.constant 0 : index
    %66 = vector.load %arg4[%c8, %c0_54, %c0_55] : memref<9x128x128xbf16, #tpu.memory_space<vmem>>, vector<1x128x128xbf16>
    %67 = vector.shape_cast %66 : vector<1x128x128xbf16> to vector<128x128xbf16>
    %cst_56 = arith.constant dense<0.000000e+00> : vector<16x128xf32>
    %68 = tpu.matmul %65, %67, %cst_56 {dimension_numbers = #tpu.dot_dimension_numbers<[1], [0], [0], [1], [0, 0, 1, 1], [], []>} : vector<16x128xbf16>, vector<128x128xbf16>, vector<16x128xf32> -> vector<16x128xf32>
    %69 = arith.addf %62, %68 : vector<16x128xf32>
    %c0_57 = arith.constant 0 : index
    %c0_58 = arith.constant 0 : index
    %70 = vector.load %arg5[%c0_57, %c0_58] : memref<1x128xf32, #tpu.memory_space<vmem>>, vector<1x128xf32>
    %71 = vector.broadcast %70 : vector<1x128xf32> to vector<16x128xf32>
    %72 = arith.mulf %69, %71 : vector<16x128xf32>
    %c0_59 = arith.constant 0 : index
    %c0_60 = arith.constant 0 : index
    %73 = vector.load %arg6[%c0_59, %c0_60] : memref<1x128xf32, #tpu.memory_space<vmem>>, vector<1x128xf32>
    %74 = vector.broadcast %73 : vector<1x128xf32> to vector<16x128xf32>
    %75 = arith.addf %72, %74 : vector<16x128xf32>
    %cst_61 = arith.constant 0.000000e+00 : f32
    %76 = vector.broadcast %cst_61 : f32 to vector<16x128xf32>
    %77 = arith.maximumf %75, %76 : vector<16x128xf32>
    %78 = arith.truncf %77 : vector<16x128xf32> to vector<16x128xbf16>
    %c0_62 = arith.constant 0 : index
    %c0_63 = arith.constant 0 : index
    %c0_64 = arith.constant 0 : index
    %c0_65 = arith.constant 0 : index
    %79 = vector.load %arg7[%c0_62, %c0_63, %c0_64, %c0_65] : memref<1x1x16x128xbf16, #tpu.memory_space<vmem>>, vector<1x1x16x128xbf16>
    %80 = vector.shape_cast %79 : vector<1x1x16x128xbf16> to vector<16x128xbf16>
    %81 = vector.shape_cast %78 : vector<16x128xbf16> to vector<1x1x16x128xbf16>
    tpu.vector_store %arg7[%c0_62, %c0_63, %c0_64, %c0_65], %81 {strides = array<i32>} : memref<1x1x16x128xbf16, #tpu.memory_space<vmem>>, vector<1x1x16x128xbf16>,
    return
  }
  func.func @transform_0(%arg0: i32, %arg1: i32) -> (i32, i32, i32, i32) {
    %c0_i32 = arith.constant 0 : i32
    %c0_i32_0 = arith.constant 0 : i32
    %c0_i32_1 = arith.constant 0 : i32
    %c0_i32_2 = arith.constant 0 : i32
    return %arg0, %c0_i32, %c0_i32_0, %c0_i32_1 : i32, i32, i32, i32
  }
  func.func @transform_1(%arg0: i32, %arg1: i32) -> (i32, i32, i32, i32) {
    %c0_i32 = arith.constant 0 : i32
    %c0_i32_0 = arith.constant 0 : i32
    %c0_i32_1 = arith.constant 0 : i32
    %c0_i32_2 = arith.constant 0 : i32
    return %arg0, %c0_i32, %c0_i32_0, %c0_i32_1 : i32, i32, i32, i32
  }
  func.func @transform_2(%arg0: i32, %arg1: i32) -> (i32, i32, i32) {
    %c0_i32 = arith.constant 0 : i32
    %c0_i32_0 = arith.constant 0 : i32
    %c0_i32_1 = arith.constant 0 : i32
    %c0_i32_2 = arith.constant 0 : i32
    return %c0_i32, %c0_i32_0, %c0_i32_1 : i32, i32, i32
  }
  func.func @transform_3(%arg0: i32, %arg1: i32) -> (i32, i32) {
    %c0_i32 = arith.constant 0 : i32
    %c0_i32_0 = arith.constant 0 : i32
    %c0_i32_1 = arith.constant 0 : i32
    return %c0_i32, %c0_i32_0 : i32, i32
  }
  func.func @transform_4(%arg0: i32, %arg1: i32) -> (i32, i32) {
    %c0_i32 = arith.constant 0 : i32
    %c0_i32_0 = arith.constant 0 : i32
    %c0_i32_1 = arith.constant 0 : i32
    return %c0_i32, %c0_i32_0 : i32, i32
  }
  func.func @transform_5(%arg0: i32, %arg1: i32) -> (i32, i32, i32, i32) {
    %c0_i32 = arith.constant 0 : i32
    %c0_i32_0 = arith.constant 0 : i32
    %c0_i32_1 = arith.constant 0 : i32
    return %arg0, %arg1, %c0_i32, %c0_i32_0 : i32, i32, i32, i32
  }
}

module attributes {stable_mosaic.version = 11 : i64} {
  func.func @_maxpool_kernel(%arg0: i32, %arg1: i32, %arg2: memref<1x18x9x128xbf16, #tpu.memory_space<vmem>>, %arg3: memref<1x18x9x128xbf16, #tpu.memory_space<vmem>>, %arg4: memref<1x1x8x128xbf16, #tpu.memory_space<vmem>>) attributes {dimension_semantics = [#tpu.dimension_semantics<parallel>, #tpu.dimension_semantics<arbitrary>], iteration_bounds = array<i64: 2, 8>, scalar_prefetch = 0 : i64, scratch_operands = 0 : i64, tpu.core_type = #tpu.core_type<tc>, window_params = [{transform_indices = @transform_0, window_bounds = array<i64: 1, 18, 9, 128>}, {transform_indices = @transform_1, window_bounds = array<i64: 1, 18, 9, 128>}, {transform_indices = @transform_2, window_bounds = array<i64: 1, 1, 8, 128>}]} {
    %c2_i32 = arith.constant 2 : i32
    %0 = arith.muli %arg1, %c2_i32 : i32
    %c0_i32 = arith.constant 0 : i32
    %1 = arith.addi %0, %c0_i32 : i32
    %c0 = arith.constant 0 : index
    %2 = arith.index_cast %1 : i32 to index
    %c0_0 = arith.constant 0 : index
    %c0_1 = arith.constant 0 : index
    %3 = vector.load %arg2[%c0, %2, %c0_0, %c0_1] : memref<1x18x9x128xbf16, #tpu.memory_space<vmem>>, vector<1x1x8x128xbf16>
    %4 = vector.shape_cast %3 : vector<1x1x8x128xbf16> to vector<8x128xbf16>
    %c0_2 = arith.constant 0 : index
    %5 = arith.index_cast %1 : i32 to index
    %c0_3 = arith.constant 0 : index
    %c0_4 = arith.constant 0 : index
    %6 = vector.load %arg3[%c0_2, %5, %c0_3, %c0_4] : memref<1x18x9x128xbf16, #tpu.memory_space<vmem>>, vector<1x1x8x128xbf16>
    %7 = vector.shape_cast %6 : vector<1x1x8x128xbf16> to vector<8x128xbf16>
    %8 = arith.maximumf %4, %7 : vector<8x128xbf16>
    %c0_5 = arith.constant 0 : index
    %9 = arith.index_cast %1 : i32 to index
    %c1 = arith.constant 1 : index
    %c0_6 = arith.constant 0 : index
    %10 = vector.load %arg2[%c0_5, %9, %c1, %c0_6] : memref<1x18x9x128xbf16, #tpu.memory_space<vmem>>, vector<1x1x8x128xbf16>
    %11 = vector.shape_cast %10 : vector<1x1x8x128xbf16> to vector<8x128xbf16>
    %12 = arith.maximumf %8, %11 : vector<8x128xbf16>
    %c2_i32_7 = arith.constant 2 : i32
    %13 = arith.muli %arg1, %c2_i32_7 : i32
    %c1_i32 = arith.constant 1 : i32
    %14 = arith.addi %13, %c1_i32 : i32
    %c0_8 = arith.constant 0 : index
    %15 = arith.index_cast %14 : i32 to index
    %c0_9 = arith.constant 0 : index
    %c0_10 = arith.constant 0 : index
    %16 = vector.load %arg2[%c0_8, %15, %c0_9, %c0_10] : memref<1x18x9x128xbf16, #tpu.memory_space<vmem>>, vector<1x1x8x128xbf16>
    %17 = vector.shape_cast %16 : vector<1x1x8x128xbf16> to vector<8x128xbf16>
    %18 = arith.maximumf %12, %17 : vector<8x128xbf16>
    %c0_11 = arith.constant 0 : index
    %19 = arith.index_cast %14 : i32 to index
    %c0_12 = arith.constant 0 : index
    %c0_13 = arith.constant 0 : index
    %20 = vector.load %arg3[%c0_11, %19, %c0_12, %c0_13] : memref<1x18x9x128xbf16, #tpu.memory_space<vmem>>, vector<1x1x8x128xbf16>
    %21 = vector.shape_cast %20 : vector<1x1x8x128xbf16> to vector<8x128xbf16>
    %22 = arith.maximumf %18, %21 : vector<8x128xbf16>
    %c0_14 = arith.constant 0 : index
    %23 = arith.index_cast %14 : i32 to index
    %c1_15 = arith.constant 1 : index
    %c0_16 = arith.constant 0 : index
    %24 = vector.load %arg2[%c0_14, %23, %c1_15, %c0_16] : memref<1x18x9x128xbf16, #tpu.memory_space<vmem>>, vector<1x1x8x128xbf16>
    %25 = vector.shape_cast %24 : vector<1x1x8x128xbf16> to vector<8x128xbf16>
    %26 = arith.maximumf %22, %25 : vector<8x128xbf16>
    %c2_i32_17 = arith.constant 2 : i32
    %27 = arith.muli %arg1, %c2_i32_17 : i32
    %c2_i32_18 = arith.constant 2 : i32
    %28 = arith.addi %27, %c2_i32_18 : i32
    %c0_19 = arith.constant 0 : index
    %29 = arith.index_cast %28 : i32 to index
    %c0_20 = arith.constant 0 : index
    %c0_21 = arith.constant 0 : index
    %30 = vector.load %arg2[%c0_19, %29, %c0_20, %c0_21] : memref<1x18x9x128xbf16, #tpu.memory_space<vmem>>, vector<1x1x8x128xbf16>
    %31 = vector.shape_cast %30 : vector<1x1x8x128xbf16> to vector<8x128xbf16>
    %32 = arith.maximumf %26, %31 : vector<8x128xbf16>
    %c0_22 = arith.constant 0 : index
    %33 = arith.index_cast %28 : i32 to index
    %c0_23 = arith.constant 0 : index
    %c0_24 = arith.constant 0 : index
    %34 = vector.load %arg3[%c0_22, %33, %c0_23, %c0_24] : memref<1x18x9x128xbf16, #tpu.memory_space<vmem>>, vector<1x1x8x128xbf16>
    %35 = vector.shape_cast %34 : vector<1x1x8x128xbf16> to vector<8x128xbf16>
    %36 = arith.maximumf %32, %35 : vector<8x128xbf16>
    %c0_25 = arith.constant 0 : index
    %37 = arith.index_cast %28 : i32 to index
    %c1_26 = arith.constant 1 : index
    %c0_27 = arith.constant 0 : index
    %38 = vector.load %arg2[%c0_25, %37, %c1_26, %c0_27] : memref<1x18x9x128xbf16, #tpu.memory_space<vmem>>, vector<1x1x8x128xbf16>
    %39 = vector.shape_cast %38 : vector<1x1x8x128xbf16> to vector<8x128xbf16>
    %40 = arith.maximumf %36, %39 : vector<8x128xbf16>
    %c0_28 = arith.constant 0 : index
    %c0_29 = arith.constant 0 : index
    %c0_30 = arith.constant 0 : index
    %c0_31 = arith.constant 0 : index
    %41 = vector.load %arg4[%c0_28, %c0_29, %c0_30, %c0_31] : memref<1x1x8x128xbf16, #tpu.memory_space<vmem>>, vector<1x1x8x128xbf16>
    %42 = vector.shape_cast %41 : vector<1x1x8x128xbf16> to vector<8x128xbf16>
    %43 = vector.shape_cast %40 : vector<8x128xbf16> to vector<1x1x8x128xbf16>
    tpu.vector_store %arg4[%c0_28, %c0_29, %c0_30, %c0_31], %43 {strides = array<i32>} : memref<1x1x8x128xbf16, #tpu.memory_space<vmem>>, vector<1x1x8x128xbf16>,
    return
  }
  func.func @transform_0(%arg0: i32, %arg1: i32) -> (i32, i32, i32, i32) {
    %c0_i32 = arith.constant 0 : i32
    %c0_i32_0 = arith.constant 0 : i32
    %c0_i32_1 = arith.constant 0 : i32
    %c0_i32_2 = arith.constant 0 : i32
    return %arg0, %c0_i32, %c0_i32_0, %c0_i32_1 : i32, i32, i32, i32
  }
  func.func @transform_1(%arg0: i32, %arg1: i32) -> (i32, i32, i32, i32) {
    %c0_i32 = arith.constant 0 : i32
    %c0_i32_0 = arith.constant 0 : i32
    %c0_i32_1 = arith.constant 0 : i32
    %c0_i32_2 = arith.constant 0 : i32
    return %arg0, %c0_i32, %c0_i32_0, %c0_i32_1 : i32, i32, i32, i32
  }
  func.func @transform_2(%arg0: i32, %arg1: i32) -> (i32, i32, i32, i32) {
    %c0_i32 = arith.constant 0 : i32
    %c0_i32_0 = arith.constant 0 : i32
    %c0_i32_1 = arith.constant 0 : i32
    return %arg0, %arg1, %c0_i32, %c0_i32_0 : i32, i32, i32, i32
  }
}

module attributes {stable_mosaic.version = 11 : i64} {
  func.func @_conv_kernel(%arg0: i32, %arg1: i32, %arg2: memref<1x10x10x128xbf16, #tpu.memory_space<vmem>>, %arg3: memref<9x128x128xbf16, #tpu.memory_space<vmem>>, %arg4: memref<1x128xf32, #tpu.memory_space<vmem>>, %arg5: memref<1x128xf32, #tpu.memory_space<vmem>>, %arg6: memref<1x1x8x128xbf16, #tpu.memory_space<vmem>>, %arg7: memref<1x1x8x128xbf16, #tpu.memory_space<vmem>>) attributes {dimension_semantics = [#tpu.dimension_semantics<parallel>, #tpu.dimension_semantics<arbitrary>], iteration_bounds = array<i64: 2, 8>, scalar_prefetch = 0 : i64, scratch_operands = 0 : i64, tpu.core_type = #tpu.core_type<tc>, window_params = [{transform_indices = @transform_0, window_bounds = array<i64: 1, 10, 10, 128>}, {pipeline_mode = #tpu.pipeline_mode<synchronous>, transform_indices = @transform_1, window_bounds = array<i64: 9, 128, 128>}, {pipeline_mode = #tpu.pipeline_mode<synchronous>, transform_indices = @transform_2, window_bounds = array<i64: 1, 128>}, {pipeline_mode = #tpu.pipeline_mode<synchronous>, transform_indices = @transform_3, window_bounds = array<i64: 1, 128>}, {transform_indices = @transform_4, window_bounds = array<i64: 1, 1, 8, 128>}, {transform_indices = @transform_5, window_bounds = array<i64: 1, 1, 8, 128>}]} {
    %cst = arith.constant 0.000000e+00 : f32
    %0 = vector.broadcast %cst : f32 to vector<8x128xf32>
    %c1_i32 = arith.constant 1 : i32
    %1 = arith.muli %arg1, %c1_i32 : i32
    %c0_i32 = arith.constant 0 : i32
    %2 = arith.addi %1, %c0_i32 : i32
    %c0 = arith.constant 0 : index
    %3 = arith.index_cast %2 : i32 to index
    %c0_0 = arith.constant 0 : index
    %c0_1 = arith.constant 0 : index
    %4 = vector.load %arg2[%c0, %3, %c0_0, %c0_1] : memref<1x10x10x128xbf16, #tpu.memory_space<vmem>>, vector<1x1x8x128xbf16>
    %5 = vector.shape_cast %4 : vector<1x1x8x128xbf16> to vector<8x128xbf16>
    %c0_2 = arith.constant 0 : index
    %c0_3 = arith.constant 0 : index
    %c0_4 = arith.constant 0 : index
    %6 = vector.load %arg3[%c0_2, %c0_3, %c0_4] : memref<9x128x128xbf16, #tpu.memory_space<vmem>>, vector<1x128x128xbf16>
    %7 = vector.shape_cast %6 : vector<1x128x128xbf16> to vector<128x128xbf16>
    %cst_5 = arith.constant dense<0.000000e+00> : vector<8x128xf32>
    %8 = tpu.matmul %5, %7, %cst_5 {dimension_numbers = #tpu.dot_dimension_numbers<[1], [0], [0], [1], [0, 0, 1, 1], [], []>} : vector<8x128xbf16>, vector<128x128xbf16>, vector<8x128xf32> -> vector<8x128xf32>
    %9 = arith.addf %0, %8 : vector<8x128xf32>
    %c0_6 = arith.constant 0 : index
    %10 = arith.index_cast %2 : i32 to index
    %c1 = arith.constant 1 : index
    %c0_7 = arith.constant 0 : index
    %11 = vector.load %arg2[%c0_6, %10, %c1, %c0_7] : memref<1x10x10x128xbf16, #tpu.memory_space<vmem>>, vector<1x1x8x128xbf16>
    %12 = vector.shape_cast %11 : vector<1x1x8x128xbf16> to vector<8x128xbf16>
    %c1_8 = arith.constant 1 : index
    %c0_9 = arith.constant 0 : index
    %c0_10 = arith.constant 0 : index
    %13 = vector.load %arg3[%c1_8, %c0_9, %c0_10] : memref<9x128x128xbf16, #tpu.memory_space<vmem>>, vector<1x128x128xbf16>
    %14 = vector.shape_cast %13 : vector<1x128x128xbf16> to vector<128x128xbf16>
    %cst_11 = arith.constant dense<0.000000e+00> : vector<8x128xf32>
    %15 = tpu.matmul %12, %14, %cst_11 {dimension_numbers = #tpu.dot_dimension_numbers<[1], [0], [0], [1], [0, 0, 1, 1], [], []>} : vector<8x128xbf16>, vector<128x128xbf16>, vector<8x128xf32> -> vector<8x128xf32>
    %16 = arith.addf %9, %15 : vector<8x128xf32>
    %c0_12 = arith.constant 0 : index
    %17 = arith.index_cast %2 : i32 to index
    %c2 = arith.constant 2 : index
    %c0_13 = arith.constant 0 : index
    %18 = vector.load %arg2[%c0_12, %17, %c2, %c0_13] : memref<1x10x10x128xbf16, #tpu.memory_space<vmem>>, vector<1x1x8x128xbf16>
    %19 = vector.shape_cast %18 : vector<1x1x8x128xbf16> to vector<8x128xbf16>
    %c2_14 = arith.constant 2 : index
    %c0_15 = arith.constant 0 : index
    %c0_16 = arith.constant 0 : index
    %20 = vector.load %arg3[%c2_14, %c0_15, %c0_16] : memref<9x128x128xbf16, #tpu.memory_space<vmem>>, vector<1x128x128xbf16>
    %21 = vector.shape_cast %20 : vector<1x128x128xbf16> to vector<128x128xbf16>
    %cst_17 = arith.constant dense<0.000000e+00> : vector<8x128xf32>
    %22 = tpu.matmul %19, %21, %cst_17 {dimension_numbers = #tpu.dot_dimension_numbers<[1], [0], [0], [1], [0, 0, 1, 1], [], []>} : vector<8x128xbf16>, vector<128x128xbf16>, vector<8x128xf32> -> vector<8x128xf32>
    %23 = arith.addf %16, %22 : vector<8x128xf32>
    %c1_i32_18 = arith.constant 1 : i32
    %24 = arith.muli %arg1, %c1_i32_18 : i32
    %c1_i32_19 = arith.constant 1 : i32
    %25 = arith.addi %24, %c1_i32_19 : i32
    %c0_20 = arith.constant 0 : index
    %26 = arith.index_cast %25 : i32 to index
    %c0_21 = arith.constant 0 : index
    %c0_22 = arith.constant 0 : index
    %27 = vector.load %arg2[%c0_20, %26, %c0_21, %c0_22] : memref<1x10x10x128xbf16, #tpu.memory_space<vmem>>, vector<1x1x8x128xbf16>
    %28 = vector.shape_cast %27 : vector<1x1x8x128xbf16> to vector<8x128xbf16>
    %c3 = arith.constant 3 : index
    %c0_23 = arith.constant 0 : index
    %c0_24 = arith.constant 0 : index
    %29 = vector.load %arg3[%c3, %c0_23, %c0_24] : memref<9x128x128xbf16, #tpu.memory_space<vmem>>, vector<1x128x128xbf16>
    %30 = vector.shape_cast %29 : vector<1x128x128xbf16> to vector<128x128xbf16>
    %cst_25 = arith.constant dense<0.000000e+00> : vector<8x128xf32>
    %31 = tpu.matmul %28, %30, %cst_25 {dimension_numbers = #tpu.dot_dimension_numbers<[1], [0], [0], [1], [0, 0, 1, 1], [], []>} : vector<8x128xbf16>, vector<128x128xbf16>, vector<8x128xf32> -> vector<8x128xf32>
    %32 = arith.addf %23, %31 : vector<8x128xf32>
    %c0_26 = arith.constant 0 : index
    %33 = arith.index_cast %25 : i32 to index
    %c1_27 = arith.constant 1 : index
    %c0_28 = arith.constant 0 : index
    %34 = vector.load %arg2[%c0_26, %33, %c1_27, %c0_28] : memref<1x10x10x128xbf16, #tpu.memory_space<vmem>>, vector<1x1x8x128xbf16>
    %35 = vector.shape_cast %34 : vector<1x1x8x128xbf16> to vector<8x128xbf16>
    %c4 = arith.constant 4 : index
    %c0_29 = arith.constant 0 : index
    %c0_30 = arith.constant 0 : index
    %36 = vector.load %arg3[%c4, %c0_29, %c0_30] : memref<9x128x128xbf16, #tpu.memory_space<vmem>>, vector<1x128x128xbf16>
    %37 = vector.shape_cast %36 : vector<1x128x128xbf16> to vector<128x128xbf16>
    %cst_31 = arith.constant dense<0.000000e+00> : vector<8x128xf32>
    %38 = tpu.matmul %35, %37, %cst_31 {dimension_numbers = #tpu.dot_dimension_numbers<[1], [0], [0], [1], [0, 0, 1, 1], [], []>} : vector<8x128xbf16>, vector<128x128xbf16>, vector<8x128xf32> -> vector<8x128xf32>
    %39 = arith.addf %32, %38 : vector<8x128xf32>
    %c0_32 = arith.constant 0 : index
    %40 = arith.index_cast %25 : i32 to index
    %c2_33 = arith.constant 2 : index
    %c0_34 = arith.constant 0 : index
    %41 = vector.load %arg2[%c0_32, %40, %c2_33, %c0_34] : memref<1x10x10x128xbf16, #tpu.memory_space<vmem>>, vector<1x1x8x128xbf16>
    %42 = vector.shape_cast %41 : vector<1x1x8x128xbf16> to vector<8x128xbf16>
    %c5 = arith.constant 5 : index
    %c0_35 = arith.constant 0 : index
    %c0_36 = arith.constant 0 : index
    %43 = vector.load %arg3[%c5, %c0_35, %c0_36] : memref<9x128x128xbf16, #tpu.memory_space<vmem>>, vector<1x128x128xbf16>
    %44 = vector.shape_cast %43 : vector<1x128x128xbf16> to vector<128x128xbf16>
    %cst_37 = arith.constant dense<0.000000e+00> : vector<8x128xf32>
    %45 = tpu.matmul %42, %44, %cst_37 {dimension_numbers = #tpu.dot_dimension_numbers<[1], [0], [0], [1], [0, 0, 1, 1], [], []>} : vector<8x128xbf16>, vector<128x128xbf16>, vector<8x128xf32> -> vector<8x128xf32>
    %46 = arith.addf %39, %45 : vector<8x128xf32>
    %c1_i32_38 = arith.constant 1 : i32
    %47 = arith.muli %arg1, %c1_i32_38 : i32
    %c2_i32 = arith.constant 2 : i32
    %48 = arith.addi %47, %c2_i32 : i32
    %c0_39 = arith.constant 0 : index
    %49 = arith.index_cast %48 : i32 to index
    %c0_40 = arith.constant 0 : index
    %c0_41 = arith.constant 0 : index
    %50 = vector.load %arg2[%c0_39, %49, %c0_40, %c0_41] : memref<1x10x10x128xbf16, #tpu.memory_space<vmem>>, vector<1x1x8x128xbf16>
    %51 = vector.shape_cast %50 : vector<1x1x8x128xbf16> to vector<8x128xbf16>
    %c6 = arith.constant 6 : index
    %c0_42 = arith.constant 0 : index
    %c0_43 = arith.constant 0 : index
    %52 = vector.load %arg3[%c6, %c0_42, %c0_43] : memref<9x128x128xbf16, #tpu.memory_space<vmem>>, vector<1x128x128xbf16>
    %53 = vector.shape_cast %52 : vector<1x128x128xbf16> to vector<128x128xbf16>
    %cst_44 = arith.constant dense<0.000000e+00> : vector<8x128xf32>
    %54 = tpu.matmul %51, %53, %cst_44 {dimension_numbers = #tpu.dot_dimension_numbers<[1], [0], [0], [1], [0, 0, 1, 1], [], []>} : vector<8x128xbf16>, vector<128x128xbf16>, vector<8x128xf32> -> vector<8x128xf32>
    %55 = arith.addf %46, %54 : vector<8x128xf32>
    %c0_45 = arith.constant 0 : index
    %56 = arith.index_cast %48 : i32 to index
    %c1_46 = arith.constant 1 : index
    %c0_47 = arith.constant 0 : index
    %57 = vector.load %arg2[%c0_45, %56, %c1_46, %c0_47] : memref<1x10x10x128xbf16, #tpu.memory_space<vmem>>, vector<1x1x8x128xbf16>
    %58 = vector.shape_cast %57 : vector<1x1x8x128xbf16> to vector<8x128xbf16>
    %c7 = arith.constant 7 : index
    %c0_48 = arith.constant 0 : index
    %c0_49 = arith.constant 0 : index
    %59 = vector.load %arg3[%c7, %c0_48, %c0_49] : memref<9x128x128xbf16, #tpu.memory_space<vmem>>, vector<1x128x128xbf16>
    %60 = vector.shape_cast %59 : vector<1x128x128xbf16> to vector<128x128xbf16>
    %cst_50 = arith.constant dense<0.000000e+00> : vector<8x128xf32>
    %61 = tpu.matmul %58, %60, %cst_50 {dimension_numbers = #tpu.dot_dimension_numbers<[1], [0], [0], [1], [0, 0, 1, 1], [], []>} : vector<8x128xbf16>, vector<128x128xbf16>, vector<8x128xf32> -> vector<8x128xf32>
    %62 = arith.addf %55, %61 : vector<8x128xf32>
    %c0_51 = arith.constant 0 : index
    %63 = arith.index_cast %48 : i32 to index
    %c2_52 = arith.constant 2 : index
    %c0_53 = arith.constant 0 : index
    %64 = vector.load %arg2[%c0_51, %63, %c2_52, %c0_53] : memref<1x10x10x128xbf16, #tpu.memory_space<vmem>>, vector<1x1x8x128xbf16>
    %65 = vector.shape_cast %64 : vector<1x1x8x128xbf16> to vector<8x128xbf16>
    %c8 = arith.constant 8 : index
    %c0_54 = arith.constant 0 : index
    %c0_55 = arith.constant 0 : index
    %66 = vector.load %arg3[%c8, %c0_54, %c0_55] : memref<9x128x128xbf16, #tpu.memory_space<vmem>>, vector<1x128x128xbf16>
    %67 = vector.shape_cast %66 : vector<1x128x128xbf16> to vector<128x128xbf16>
    %cst_56 = arith.constant dense<0.000000e+00> : vector<8x128xf32>
    %68 = tpu.matmul %65, %67, %cst_56 {dimension_numbers = #tpu.dot_dimension_numbers<[1], [0], [0], [1], [0, 0, 1, 1], [], []>} : vector<8x128xbf16>, vector<128x128xbf16>, vector<8x128xf32> -> vector<8x128xf32>
    %69 = arith.addf %62, %68 : vector<8x128xf32>
    %c0_57 = arith.constant 0 : index
    %c0_58 = arith.constant 0 : index
    %70 = vector.load %arg4[%c0_57, %c0_58] : memref<1x128xf32, #tpu.memory_space<vmem>>, vector<1x128xf32>
    %71 = vector.broadcast %70 : vector<1x128xf32> to vector<8x128xf32>
    %72 = arith.mulf %69, %71 : vector<8x128xf32>
    %c0_59 = arith.constant 0 : index
    %c0_60 = arith.constant 0 : index
    %73 = vector.load %arg5[%c0_59, %c0_60] : memref<1x128xf32, #tpu.memory_space<vmem>>, vector<1x128xf32>
    %74 = vector.broadcast %73 : vector<1x128xf32> to vector<8x128xf32>
    %75 = arith.addf %72, %74 : vector<8x128xf32>
    %c0_61 = arith.constant 0 : index
    %c0_62 = arith.constant 0 : index
    %c0_63 = arith.constant 0 : index
    %c0_64 = arith.constant 0 : index
    %76 = vector.load %arg6[%c0_61, %c0_62, %c0_63, %c0_64] : memref<1x1x8x128xbf16, #tpu.memory_space<vmem>>, vector<1x1x8x128xbf16>
    %77 = vector.shape_cast %76 : vector<1x1x8x128xbf16> to vector<8x128xbf16>
    %78 = arith.extf %77 : vector<8x128xbf16> to vector<8x128xf32>
    %79 = arith.addf %75, %78 : vector<8x128xf32>
    %cst_65 = arith.constant 0.000000e+00 : f32
    %80 = vector.broadcast %cst_65 : f32 to vector<8x128xf32>
    %81 = arith.maximumf %79, %80 : vector<8x128xf32>
    %82 = arith.truncf %81 : vector<8x128xf32> to vector<8x128xbf16>
    %c0_66 = arith.constant 0 : index
    %c0_67 = arith.constant 0 : index
    %c0_68 = arith.constant 0 : index
    %c0_69 = arith.constant 0 : index
    %83 = vector.load %arg7[%c0_66, %c0_67, %c0_68, %c0_69] : memref<1x1x8x128xbf16, #tpu.memory_space<vmem>>, vector<1x1x8x128xbf16>
    %84 = vector.shape_cast %83 : vector<1x1x8x128xbf16> to vector<8x128xbf16>
    %85 = vector.shape_cast %82 : vector<8x128xbf16> to vector<1x1x8x128xbf16>
    tpu.vector_store %arg7[%c0_66, %c0_67, %c0_68, %c0_69], %85 {strides = array<i32>} : memref<1x1x8x128xbf16, #tpu.memory_space<vmem>>, vector<1x1x8x128xbf16>,
    return
  }
  func.func @transform_0(%arg0: i32, %arg1: i32) -> (i32, i32, i32, i32) {
    %c0_i32 = arith.constant 0 : i32
    %c0_i32_0 = arith.constant 0 : i32
    %c0_i32_1 = arith.constant 0 : i32
    %c0_i32_2 = arith.constant 0 : i32
    return %arg0, %c0_i32, %c0_i32_0, %c0_i32_1 : i32, i32, i32, i32
  }
  func.func @transform_1(%arg0: i32, %arg1: i32) -> (i32, i32, i32) {
    %c0_i32 = arith.constant 0 : i32
    %c0_i32_0 = arith.constant 0 : i32
    %c0_i32_1 = arith.constant 0 : i32
    %c0_i32_2 = arith.constant 0 : i32
    return %c0_i32, %c0_i32_0, %c0_i32_1 : i32, i32, i32
  }
  func.func @transform_2(%arg0: i32, %arg1: i32) -> (i32, i32) {
    %c0_i32 = arith.constant 0 : i32
    %c0_i32_0 = arith.constant 0 : i32
    %c0_i32_1 = arith.constant 0 : i32
    return %c0_i32, %c0_i32_0 : i32, i32
  }
  func.func @transform_3(%arg0: i32, %arg1: i32) -> (i32, i32) {
    %c0_i32 = arith.constant 0 : i32
    %c0_i32_0 = arith.constant 0 : i32
    %c0_i32_1 = arith.constant 0 : i32
    return %c0_i32, %c0_i32_0 : i32, i32
  }
  func.func @transform_4(%arg0: i32, %arg1: i32) -> (i32, i32, i32, i32) {
    %c0_i32 = arith.constant 0 : i32
    %c0_i32_0 = arith.constant 0 : i32
    %c0_i32_1 = arith.constant 0 : i32
    return %arg0, %arg1, %c0_i32, %c0_i32_0 : i32, i32, i32, i32
  }
  func.func @transform_5(%arg0: i32, %arg1: i32) -> (i32, i32, i32, i32) {
    %c0_i32 = arith.constant 0 : i32
    %c0_i32_0 = arith.constant 0 : i32
    %c0_i32_1 = arith.constant 0 : i32
    return %arg0, %arg1, %c0_i32, %c0_i32_0 : i32, i32, i32, i32
  }
}

module attributes {stable_mosaic.version = 11 : i64} {
  func.func @_conv_kernel(%arg0: i32, %arg1: i32, %arg2: memref<1x10x10x128xbf16, #tpu.memory_space<vmem>>, %arg3: memref<9x128x128xbf16, #tpu.memory_space<vmem>>, %arg4: memref<1x128xf32, #tpu.memory_space<vmem>>, %arg5: memref<1x128xf32, #tpu.memory_space<vmem>>, %arg6: memref<1x1x8x128xbf16, #tpu.memory_space<vmem>>) attributes {dimension_semantics = [#tpu.dimension_semantics<parallel>, #tpu.dimension_semantics<arbitrary>], iteration_bounds = array<i64: 2, 8>, scalar_prefetch = 0 : i64, scratch_operands = 0 : i64, tpu.core_type = #tpu.core_type<tc>, window_params = [{transform_indices = @transform_0, window_bounds = array<i64: 1, 10, 10, 128>}, {pipeline_mode = #tpu.pipeline_mode<synchronous>, transform_indices = @transform_1, window_bounds = array<i64: 9, 128, 128>}, {pipeline_mode = #tpu.pipeline_mode<synchronous>, transform_indices = @transform_2, window_bounds = array<i64: 1, 128>}, {pipeline_mode = #tpu.pipeline_mode<synchronous>, transform_indices = @transform_3, window_bounds = array<i64: 1, 128>}, {transform_indices = @transform_4, window_bounds = array<i64: 1, 1, 8, 128>}]} {
    %cst = arith.constant 0.000000e+00 : f32
    %0 = vector.broadcast %cst : f32 to vector<8x128xf32>
    %c1_i32 = arith.constant 1 : i32
    %1 = arith.muli %arg1, %c1_i32 : i32
    %c0_i32 = arith.constant 0 : i32
    %2 = arith.addi %1, %c0_i32 : i32
    %c0 = arith.constant 0 : index
    %3 = arith.index_cast %2 : i32 to index
    %c0_0 = arith.constant 0 : index
    %c0_1 = arith.constant 0 : index
    %4 = vector.load %arg2[%c0, %3, %c0_0, %c0_1] : memref<1x10x10x128xbf16, #tpu.memory_space<vmem>>, vector<1x1x8x128xbf16>
    %5 = vector.shape_cast %4 : vector<1x1x8x128xbf16> to vector<8x128xbf16>
    %c0_2 = arith.constant 0 : index
    %c0_3 = arith.constant 0 : index
    %c0_4 = arith.constant 0 : index
    %6 = vector.load %arg3[%c0_2, %c0_3, %c0_4] : memref<9x128x128xbf16, #tpu.memory_space<vmem>>, vector<1x128x128xbf16>
    %7 = vector.shape_cast %6 : vector<1x128x128xbf16> to vector<128x128xbf16>
    %cst_5 = arith.constant dense<0.000000e+00> : vector<8x128xf32>
    %8 = tpu.matmul %5, %7, %cst_5 {dimension_numbers = #tpu.dot_dimension_numbers<[1], [0], [0], [1], [0, 0, 1, 1], [], []>} : vector<8x128xbf16>, vector<128x128xbf16>, vector<8x128xf32> -> vector<8x128xf32>
    %9 = arith.addf %0, %8 : vector<8x128xf32>
    %c0_6 = arith.constant 0 : index
    %10 = arith.index_cast %2 : i32 to index
    %c1 = arith.constant 1 : index
    %c0_7 = arith.constant 0 : index
    %11 = vector.load %arg2[%c0_6, %10, %c1, %c0_7] : memref<1x10x10x128xbf16, #tpu.memory_space<vmem>>, vector<1x1x8x128xbf16>
    %12 = vector.shape_cast %11 : vector<1x1x8x128xbf16> to vector<8x128xbf16>
    %c1_8 = arith.constant 1 : index
    %c0_9 = arith.constant 0 : index
    %c0_10 = arith.constant 0 : index
    %13 = vector.load %arg3[%c1_8, %c0_9, %c0_10] : memref<9x128x128xbf16, #tpu.memory_space<vmem>>, vector<1x128x128xbf16>
    %14 = vector.shape_cast %13 : vector<1x128x128xbf16> to vector<128x128xbf16>
    %cst_11 = arith.constant dense<0.000000e+00> : vector<8x128xf32>
    %15 = tpu.matmul %12, %14, %cst_11 {dimension_numbers = #tpu.dot_dimension_numbers<[1], [0], [0], [1], [0, 0, 1, 1], [], []>} : vector<8x128xbf16>, vector<128x128xbf16>, vector<8x128xf32> -> vector<8x128xf32>
    %16 = arith.addf %9, %15 : vector<8x128xf32>
    %c0_12 = arith.constant 0 : index
    %17 = arith.index_cast %2 : i32 to index
    %c2 = arith.constant 2 : index
    %c0_13 = arith.constant 0 : index
    %18 = vector.load %arg2[%c0_12, %17, %c2, %c0_13] : memref<1x10x10x128xbf16, #tpu.memory_space<vmem>>, vector<1x1x8x128xbf16>
    %19 = vector.shape_cast %18 : vector<1x1x8x128xbf16> to vector<8x128xbf16>
    %c2_14 = arith.constant 2 : index
    %c0_15 = arith.constant 0 : index
    %c0_16 = arith.constant 0 : index
    %20 = vector.load %arg3[%c2_14, %c0_15, %c0_16] : memref<9x128x128xbf16, #tpu.memory_space<vmem>>, vector<1x128x128xbf16>
    %21 = vector.shape_cast %20 : vector<1x128x128xbf16> to vector<128x128xbf16>
    %cst_17 = arith.constant dense<0.000000e+00> : vector<8x128xf32>
    %22 = tpu.matmul %19, %21, %cst_17 {dimension_numbers = #tpu.dot_dimension_numbers<[1], [0], [0], [1], [0, 0, 1, 1], [], []>} : vector<8x128xbf16>, vector<128x128xbf16>, vector<8x128xf32> -> vector<8x128xf32>
    %23 = arith.addf %16, %22 : vector<8x128xf32>
    %c1_i32_18 = arith.constant 1 : i32
    %24 = arith.muli %arg1, %c1_i32_18 : i32
    %c1_i32_19 = arith.constant 1 : i32
    %25 = arith.addi %24, %c1_i32_19 : i32
    %c0_20 = arith.constant 0 : index
    %26 = arith.index_cast %25 : i32 to index
    %c0_21 = arith.constant 0 : index
    %c0_22 = arith.constant 0 : index
    %27 = vector.load %arg2[%c0_20, %26, %c0_21, %c0_22] : memref<1x10x10x128xbf16, #tpu.memory_space<vmem>>, vector<1x1x8x128xbf16>
    %28 = vector.shape_cast %27 : vector<1x1x8x128xbf16> to vector<8x128xbf16>
    %c3 = arith.constant 3 : index
    %c0_23 = arith.constant 0 : index
    %c0_24 = arith.constant 0 : index
    %29 = vector.load %arg3[%c3, %c0_23, %c0_24] : memref<9x128x128xbf16, #tpu.memory_space<vmem>>, vector<1x128x128xbf16>
    %30 = vector.shape_cast %29 : vector<1x128x128xbf16> to vector<128x128xbf16>
    %cst_25 = arith.constant dense<0.000000e+00> : vector<8x128xf32>
    %31 = tpu.matmul %28, %30, %cst_25 {dimension_numbers = #tpu.dot_dimension_numbers<[1], [0], [0], [1], [0, 0, 1, 1], [], []>} : vector<8x128xbf16>, vector<128x128xbf16>, vector<8x128xf32> -> vector<8x128xf32>
    %32 = arith.addf %23, %31 : vector<8x128xf32>
    %c0_26 = arith.constant 0 : index
    %33 = arith.index_cast %25 : i32 to index
    %c1_27 = arith.constant 1 : index
    %c0_28 = arith.constant 0 : index
    %34 = vector.load %arg2[%c0_26, %33, %c1_27, %c0_28] : memref<1x10x10x128xbf16, #tpu.memory_space<vmem>>, vector<1x1x8x128xbf16>
    %35 = vector.shape_cast %34 : vector<1x1x8x128xbf16> to vector<8x128xbf16>
    %c4 = arith.constant 4 : index
    %c0_29 = arith.constant 0 : index
    %c0_30 = arith.constant 0 : index
    %36 = vector.load %arg3[%c4, %c0_29, %c0_30] : memref<9x128x128xbf16, #tpu.memory_space<vmem>>, vector<1x128x128xbf16>
    %37 = vector.shape_cast %36 : vector<1x128x128xbf16> to vector<128x128xbf16>
    %cst_31 = arith.constant dense<0.000000e+00> : vector<8x128xf32>
    %38 = tpu.matmul %35, %37, %cst_31 {dimension_numbers = #tpu.dot_dimension_numbers<[1], [0], [0], [1], [0, 0, 1, 1], [], []>} : vector<8x128xbf16>, vector<128x128xbf16>, vector<8x128xf32> -> vector<8x128xf32>
    %39 = arith.addf %32, %38 : vector<8x128xf32>
    %c0_32 = arith.constant 0 : index
    %40 = arith.index_cast %25 : i32 to index
    %c2_33 = arith.constant 2 : index
    %c0_34 = arith.constant 0 : index
    %41 = vector.load %arg2[%c0_32, %40, %c2_33, %c0_34] : memref<1x10x10x128xbf16, #tpu.memory_space<vmem>>, vector<1x1x8x128xbf16>
    %42 = vector.shape_cast %41 : vector<1x1x8x128xbf16> to vector<8x128xbf16>
    %c5 = arith.constant 5 : index
    %c0_35 = arith.constant 0 : index
    %c0_36 = arith.constant 0 : index
    %43 = vector.load %arg3[%c5, %c0_35, %c0_36] : memref<9x128x128xbf16, #tpu.memory_space<vmem>>, vector<1x128x128xbf16>
    %44 = vector.shape_cast %43 : vector<1x128x128xbf16> to vector<128x128xbf16>
    %cst_37 = arith.constant dense<0.000000e+00> : vector<8x128xf32>
    %45 = tpu.matmul %42, %44, %cst_37 {dimension_numbers = #tpu.dot_dimension_numbers<[1], [0], [0], [1], [0, 0, 1, 1], [], []>} : vector<8x128xbf16>, vector<128x128xbf16>, vector<8x128xf32> -> vector<8x128xf32>
    %46 = arith.addf %39, %45 : vector<8x128xf32>
    %c1_i32_38 = arith.constant 1 : i32
    %47 = arith.muli %arg1, %c1_i32_38 : i32
    %c2_i32 = arith.constant 2 : i32
    %48 = arith.addi %47, %c2_i32 : i32
    %c0_39 = arith.constant 0 : index
    %49 = arith.index_cast %48 : i32 to index
    %c0_40 = arith.constant 0 : index
    %c0_41 = arith.constant 0 : index
    %50 = vector.load %arg2[%c0_39, %49, %c0_40, %c0_41] : memref<1x10x10x128xbf16, #tpu.memory_space<vmem>>, vector<1x1x8x128xbf16>
    %51 = vector.shape_cast %50 : vector<1x1x8x128xbf16> to vector<8x128xbf16>
    %c6 = arith.constant 6 : index
    %c0_42 = arith.constant 0 : index
    %c0_43 = arith.constant 0 : index
    %52 = vector.load %arg3[%c6, %c0_42, %c0_43] : memref<9x128x128xbf16, #tpu.memory_space<vmem>>, vector<1x128x128xbf16>
    %53 = vector.shape_cast %52 : vector<1x128x128xbf16> to vector<128x128xbf16>
    %cst_44 = arith.constant dense<0.000000e+00> : vector<8x128xf32>
    %54 = tpu.matmul %51, %53, %cst_44 {dimension_numbers = #tpu.dot_dimension_numbers<[1], [0], [0], [1], [0, 0, 1, 1], [], []>} : vector<8x128xbf16>, vector<128x128xbf16>, vector<8x128xf32> -> vector<8x128xf32>
    %55 = arith.addf %46, %54 : vector<8x128xf32>
    %c0_45 = arith.constant 0 : index
    %56 = arith.index_cast %48 : i32 to index
    %c1_46 = arith.constant 1 : index
    %c0_47 = arith.constant 0 : index
    %57 = vector.load %arg2[%c0_45, %56, %c1_46, %c0_47] : memref<1x10x10x128xbf16, #tpu.memory_space<vmem>>, vector<1x1x8x128xbf16>
    %58 = vector.shape_cast %57 : vector<1x1x8x128xbf16> to vector<8x128xbf16>
    %c7 = arith.constant 7 : index
    %c0_48 = arith.constant 0 : index
    %c0_49 = arith.constant 0 : index
    %59 = vector.load %arg3[%c7, %c0_48, %c0_49] : memref<9x128x128xbf16, #tpu.memory_space<vmem>>, vector<1x128x128xbf16>
    %60 = vector.shape_cast %59 : vector<1x128x128xbf16> to vector<128x128xbf16>
    %cst_50 = arith.constant dense<0.000000e+00> : vector<8x128xf32>
    %61 = tpu.matmul %58, %60, %cst_50 {dimension_numbers = #tpu.dot_dimension_numbers<[1], [0], [0], [1], [0, 0, 1, 1], [], []>} : vector<8x128xbf16>, vector<128x128xbf16>, vector<8x128xf32> -> vector<8x128xf32>
    %62 = arith.addf %55, %61 : vector<8x128xf32>
    %c0_51 = arith.constant 0 : index
    %63 = arith.index_cast %48 : i32 to index
    %c2_52 = arith.constant 2 : index
    %c0_53 = arith.constant 0 : index
    %64 = vector.load %arg2[%c0_51, %63, %c2_52, %c0_53] : memref<1x10x10x128xbf16, #tpu.memory_space<vmem>>, vector<1x1x8x128xbf16>
    %65 = vector.shape_cast %64 : vector<1x1x8x128xbf16> to vector<8x128xbf16>
    %c8 = arith.constant 8 : index
    %c0_54 = arith.constant 0 : index
    %c0_55 = arith.constant 0 : index
    %66 = vector.load %arg3[%c8, %c0_54, %c0_55] : memref<9x128x128xbf16, #tpu.memory_space<vmem>>, vector<1x128x128xbf16>
    %67 = vector.shape_cast %66 : vector<1x128x128xbf16> to vector<128x128xbf16>
    %cst_56 = arith.constant dense<0.000000e+00> : vector<8x128xf32>
    %68 = tpu.matmul %65, %67, %cst_56 {dimension_numbers = #tpu.dot_dimension_numbers<[1], [0], [0], [1], [0, 0, 1, 1], [], []>} : vector<8x128xbf16>, vector<128x128xbf16>, vector<8x128xf32> -> vector<8x128xf32>
    %69 = arith.addf %62, %68 : vector<8x128xf32>
    %c0_57 = arith.constant 0 : index
    %c0_58 = arith.constant 0 : index
    %70 = vector.load %arg4[%c0_57, %c0_58] : memref<1x128xf32, #tpu.memory_space<vmem>>, vector<1x128xf32>
    %71 = vector.broadcast %70 : vector<1x128xf32> to vector<8x128xf32>
    %72 = arith.mulf %69, %71 : vector<8x128xf32>
    %c0_59 = arith.constant 0 : index
    %c0_60 = arith.constant 0 : index
    %73 = vector.load %arg5[%c0_59, %c0_60] : memref<1x128xf32, #tpu.memory_space<vmem>>, vector<1x128xf32>
    %74 = vector.broadcast %73 : vector<1x128xf32> to vector<8x128xf32>
    %75 = arith.addf %72, %74 : vector<8x128xf32>
    %cst_61 = arith.constant 0.000000e+00 : f32
    %76 = vector.broadcast %cst_61 : f32 to vector<8x128xf32>
    %77 = arith.maximumf %75, %76 : vector<8x128xf32>
    %78 = arith.truncf %77 : vector<8x128xf32> to vector<8x128xbf16>
    %c0_62 = arith.constant 0 : index
    %c0_63 = arith.constant 0 : index
    %c0_64 = arith.constant 0 : index
    %c0_65 = arith.constant 0 : index
    %79 = vector.load %arg6[%c0_62, %c0_63, %c0_64, %c0_65] : memref<1x1x8x128xbf16, #tpu.memory_space<vmem>>, vector<1x1x8x128xbf16>
    %80 = vector.shape_cast %79 : vector<1x1x8x128xbf16> to vector<8x128xbf16>
    %81 = vector.shape_cast %78 : vector<8x128xbf16> to vector<1x1x8x128xbf16>
    tpu.vector_store %arg6[%c0_62, %c0_63, %c0_64, %c0_65], %81 {strides = array<i32>} : memref<1x1x8x128xbf16, #tpu.memory_space<vmem>>, vector<1x1x8x128xbf16>,
    return
  }
  func.func @transform_0(%arg0: i32, %arg1: i32) -> (i32, i32, i32, i32) {
    %c0_i32 = arith.constant 0 : i32
    %c0_i32_0 = arith.constant 0 : i32
    %c0_i32_1 = arith.constant 0 : i32
    %c0_i32_2 = arith.constant 0 : i32
    return %arg0, %c0_i32, %c0_i32_0, %c0_i32_1 : i32, i32, i32, i32
  }
  func.func @transform_1(%arg0: i32, %arg1: i32) -> (i32, i32, i32) {
    %c0_i32 = arith.constant 0 : i32
    %c0_i32_0 = arith.constant 0 : i32
    %c0_i32_1 = arith.constant 0 : i32
    %c0_i32_2 = arith.constant 0 : i32
    return %c0_i32, %c0_i32_0, %c0_i32_1 : i32, i32, i32
  }
  func.func @transform_2(%arg0: i32, %arg1: i32) -> (i32, i32) {
    %c0_i32 = arith.constant 0 : i32
    %c0_i32_0 = arith.constant 0 : i32
    %c0_i32_1 = arith.constant 0 : i32
    return %c0_i32, %c0_i32_0 : i32, i32
  }
  func.func @transform_3(%arg0: i32, %arg1: i32) -> (i32, i32) {
    %c0_i32 = arith.constant 0 : i32
    %c0_i32_0 = arith.constant 0 : i32
    %c0_i32_1 = arith.constant 0 : i32
    return %c0_i32, %c0_i32_0 : i32, i32
  }
  func.func @transform_4(%arg0: i32, %arg1: i32) -> (i32, i32, i32, i32) {
    %c0_i32 = arith.constant 0 : i32
    %c0_i32_0 = arith.constant 0 : i32
    %c0_i32_1 = arith.constant 0 : i32
    return %arg0, %arg1, %c0_i32, %c0_i32_0 : i32, i32, i32, i32
  }
}

module attributes {stable_mosaic.version = 11 : i64} {
  func.func @_conv_kernel(%arg0: i32, %arg1: i32, %arg2: memref<1x10x5x128xbf16, #tpu.memory_space<vmem>>, %arg3: memref<1x10x5x128xbf16, #tpu.memory_space<vmem>>, %arg4: memref<9x128x128xbf16, #tpu.memory_space<vmem>>, %arg5: memref<1x128xf32, #tpu.memory_space<vmem>>, %arg6: memref<1x128xf32, #tpu.memory_space<vmem>>, %arg7: memref<1x1x4x128xbf16, #tpu.memory_space<vmem>>) attributes {dimension_semantics = [#tpu.dimension_semantics<parallel>, #tpu.dimension_semantics<arbitrary>], iteration_bounds = array<i64: 2, 4>, scalar_prefetch = 0 : i64, scratch_operands = 0 : i64, tpu.core_type = #tpu.core_type<tc>, window_params = [{transform_indices = @transform_0, window_bounds = array<i64: 1, 10, 5, 128>}, {transform_indices = @transform_1, window_bounds = array<i64: 1, 10, 5, 128>}, {pipeline_mode = #tpu.pipeline_mode<synchronous>, transform_indices = @transform_2, window_bounds = array<i64: 9, 128, 128>}, {pipeline_mode = #tpu.pipeline_mode<synchronous>, transform_indices = @transform_3, window_bounds = array<i64: 1, 128>}, {pipeline_mode = #tpu.pipeline_mode<synchronous>, transform_indices = @transform_4, window_bounds = array<i64: 1, 128>}, {transform_indices = @transform_5, window_bounds = array<i64: 1, 1, 4, 128>}]} {
    %cst = arith.constant 0.000000e+00 : f32
    %0 = vector.broadcast %cst : f32 to vector<4x128xf32>
    %c2_i32 = arith.constant 2 : i32
    %1 = arith.muli %arg1, %c2_i32 : i32
    %c0_i32 = arith.constant 0 : i32
    %2 = arith.addi %1, %c0_i32 : i32
    %c0 = arith.constant 0 : index
    %3 = arith.index_cast %2 : i32 to index
    %c0_0 = arith.constant 0 : index
    %c0_1 = arith.constant 0 : index
    %4 = vector.load %arg2[%c0, %3, %c0_0, %c0_1] : memref<1x10x5x128xbf16, #tpu.memory_space<vmem>>, vector<1x1x4x128xbf16>
    %5 = vector.shape_cast %4 : vector<1x1x4x128xbf16> to vector<4x128xbf16>
    %c0_2 = arith.constant 0 : index
    %c0_3 = arith.constant 0 : index
    %c0_4 = arith.constant 0 : index
    %6 = vector.load %arg4[%c0_2, %c0_3, %c0_4] : memref<9x128x128xbf16, #tpu.memory_space<vmem>>, vector<1x128x128xbf16>
    %7 = vector.shape_cast %6 : vector<1x128x128xbf16> to vector<128x128xbf16>
    %cst_5 = arith.constant dense<0.000000e+00> : vector<4x128xf32>
    %8 = tpu.matmul %5, %7, %cst_5 {dimension_numbers = #tpu.dot_dimension_numbers<[1], [0], [0], [1], [0, 0, 1, 1], [], []>} : vector<4x128xbf16>, vector<128x128xbf16>, vector<4x128xf32> -> vector<4x128xf32>
    %9 = arith.addf %0, %8 : vector<4x128xf32>
    %c0_6 = arith.constant 0 : index
    %10 = arith.index_cast %2 : i32 to index
    %c0_7 = arith.constant 0 : index
    %c0_8 = arith.constant 0 : index
    %11 = vector.load %arg3[%c0_6, %10, %c0_7, %c0_8] : memref<1x10x5x128xbf16, #tpu.memory_space<vmem>>, vector<1x1x4x128xbf16>
    %12 = vector.shape_cast %11 : vector<1x1x4x128xbf16> to vector<4x128xbf16>
    %c1 = arith.constant 1 : index
    %c0_9 = arith.constant 0 : index
    %c0_10 = arith.constant 0 : index
    %13 = vector.load %arg4[%c1, %c0_9, %c0_10] : memref<9x128x128xbf16, #tpu.memory_space<vmem>>, vector<1x128x128xbf16>
    %14 = vector.shape_cast %13 : vector<1x128x128xbf16> to vector<128x128xbf16>
    %cst_11 = arith.constant dense<0.000000e+00> : vector<4x128xf32>
    %15 = tpu.matmul %12, %14, %cst_11 {dimension_numbers = #tpu.dot_dimension_numbers<[1], [0], [0], [1], [0, 0, 1, 1], [], []>} : vector<4x128xbf16>, vector<128x128xbf16>, vector<4x128xf32> -> vector<4x128xf32>
    %16 = arith.addf %9, %15 : vector<4x128xf32>
    %c0_12 = arith.constant 0 : index
    %17 = arith.index_cast %2 : i32 to index
    %c1_13 = arith.constant 1 : index
    %c0_14 = arith.constant 0 : index
    %18 = vector.load %arg2[%c0_12, %17, %c1_13, %c0_14] : memref<1x10x5x128xbf16, #tpu.memory_space<vmem>>, vector<1x1x4x128xbf16>
    %19 = vector.shape_cast %18 : vector<1x1x4x128xbf16> to vector<4x128xbf16>
    %c2 = arith.constant 2 : index
    %c0_15 = arith.constant 0 : index
    %c0_16 = arith.constant 0 : index
    %20 = vector.load %arg4[%c2, %c0_15, %c0_16] : memref<9x128x128xbf16, #tpu.memory_space<vmem>>, vector<1x128x128xbf16>
    %21 = vector.shape_cast %20 : vector<1x128x128xbf16> to vector<128x128xbf16>
    %cst_17 = arith.constant dense<0.000000e+00> : vector<4x128xf32>
    %22 = tpu.matmul %19, %21, %cst_17 {dimension_numbers = #tpu.dot_dimension_numbers<[1], [0], [0], [1], [0, 0, 1, 1], [], []>} : vector<4x128xbf16>, vector<128x128xbf16>, vector<4x128xf32> -> vector<4x128xf32>
    %23 = arith.addf %16, %22 : vector<4x128xf32>
    %c2_i32_18 = arith.constant 2 : i32
    %24 = arith.muli %arg1, %c2_i32_18 : i32
    %c1_i32 = arith.constant 1 : i32
    %25 = arith.addi %24, %c1_i32 : i32
    %c0_19 = arith.constant 0 : index
    %26 = arith.index_cast %25 : i32 to index
    %c0_20 = arith.constant 0 : index
    %c0_21 = arith.constant 0 : index
    %27 = vector.load %arg2[%c0_19, %26, %c0_20, %c0_21] : memref<1x10x5x128xbf16, #tpu.memory_space<vmem>>, vector<1x1x4x128xbf16>
    %28 = vector.shape_cast %27 : vector<1x1x4x128xbf16> to vector<4x128xbf16>
    %c3 = arith.constant 3 : index
    %c0_22 = arith.constant 0 : index
    %c0_23 = arith.constant 0 : index
    %29 = vector.load %arg4[%c3, %c0_22, %c0_23] : memref<9x128x128xbf16, #tpu.memory_space<vmem>>, vector<1x128x128xbf16>
    %30 = vector.shape_cast %29 : vector<1x128x128xbf16> to vector<128x128xbf16>
    %cst_24 = arith.constant dense<0.000000e+00> : vector<4x128xf32>
    %31 = tpu.matmul %28, %30, %cst_24 {dimension_numbers = #tpu.dot_dimension_numbers<[1], [0], [0], [1], [0, 0, 1, 1], [], []>} : vector<4x128xbf16>, vector<128x128xbf16>, vector<4x128xf32> -> vector<4x128xf32>
    %32 = arith.addf %23, %31 : vector<4x128xf32>
    %c0_25 = arith.constant 0 : index
    %33 = arith.index_cast %25 : i32 to index
    %c0_26 = arith.constant 0 : index
    %c0_27 = arith.constant 0 : index
    %34 = vector.load %arg3[%c0_25, %33, %c0_26, %c0_27] : memref<1x10x5x128xbf16, #tpu.memory_space<vmem>>, vector<1x1x4x128xbf16>
    %35 = vector.shape_cast %34 : vector<1x1x4x128xbf16> to vector<4x128xbf16>
    %c4 = arith.constant 4 : index
    %c0_28 = arith.constant 0 : index
    %c0_29 = arith.constant 0 : index
    %36 = vector.load %arg4[%c4, %c0_28, %c0_29] : memref<9x128x128xbf16, #tpu.memory_space<vmem>>, vector<1x128x128xbf16>
    %37 = vector.shape_cast %36 : vector<1x128x128xbf16> to vector<128x128xbf16>
    %cst_30 = arith.constant dense<0.000000e+00> : vector<4x128xf32>
    %38 = tpu.matmul %35, %37, %cst_30 {dimension_numbers = #tpu.dot_dimension_numbers<[1], [0], [0], [1], [0, 0, 1, 1], [], []>} : vector<4x128xbf16>, vector<128x128xbf16>, vector<4x128xf32> -> vector<4x128xf32>
    %39 = arith.addf %32, %38 : vector<4x128xf32>
    %c0_31 = arith.constant 0 : index
    %40 = arith.index_cast %25 : i32 to index
    %c1_32 = arith.constant 1 : index
    %c0_33 = arith.constant 0 : index
    %41 = vector.load %arg2[%c0_31, %40, %c1_32, %c0_33] : memref<1x10x5x128xbf16, #tpu.memory_space<vmem>>, vector<1x1x4x128xbf16>
    %42 = vector.shape_cast %41 : vector<1x1x4x128xbf16> to vector<4x128xbf16>
    %c5 = arith.constant 5 : index
    %c0_34 = arith.constant 0 : index
    %c0_35 = arith.constant 0 : index
    %43 = vector.load %arg4[%c5, %c0_34, %c0_35] : memref<9x128x128xbf16, #tpu.memory_space<vmem>>, vector<1x128x128xbf16>
    %44 = vector.shape_cast %43 : vector<1x128x128xbf16> to vector<128x128xbf16>
    %cst_36 = arith.constant dense<0.000000e+00> : vector<4x128xf32>
    %45 = tpu.matmul %42, %44, %cst_36 {dimension_numbers = #tpu.dot_dimension_numbers<[1], [0], [0], [1], [0, 0, 1, 1], [], []>} : vector<4x128xbf16>, vector<128x128xbf16>, vector<4x128xf32> -> vector<4x128xf32>
    %46 = arith.addf %39, %45 : vector<4x128xf32>
    %c2_i32_37 = arith.constant 2 : i32
    %47 = arith.muli %arg1, %c2_i32_37 : i32
    %c2_i32_38 = arith.constant 2 : i32
    %48 = arith.addi %47, %c2_i32_38 : i32
    %c0_39 = arith.constant 0 : index
    %49 = arith.index_cast %48 : i32 to index
    %c0_40 = arith.constant 0 : index
    %c0_41 = arith.constant 0 : index
    %50 = vector.load %arg2[%c0_39, %49, %c0_40, %c0_41] : memref<1x10x5x128xbf16, #tpu.memory_space<vmem>>, vector<1x1x4x128xbf16>
    %51 = vector.shape_cast %50 : vector<1x1x4x128xbf16> to vector<4x128xbf16>
    %c6 = arith.constant 6 : index
    %c0_42 = arith.constant 0 : index
    %c0_43 = arith.constant 0 : index
    %52 = vector.load %arg4[%c6, %c0_42, %c0_43] : memref<9x128x128xbf16, #tpu.memory_space<vmem>>, vector<1x128x128xbf16>
    %53 = vector.shape_cast %52 : vector<1x128x128xbf16> to vector<128x128xbf16>
    %cst_44 = arith.constant dense<0.000000e+00> : vector<4x128xf32>
    %54 = tpu.matmul %51, %53, %cst_44 {dimension_numbers = #tpu.dot_dimension_numbers<[1], [0], [0], [1], [0, 0, 1, 1], [], []>} : vector<4x128xbf16>, vector<128x128xbf16>, vector<4x128xf32> -> vector<4x128xf32>
    %55 = arith.addf %46, %54 : vector<4x128xf32>
    %c0_45 = arith.constant 0 : index
    %56 = arith.index_cast %48 : i32 to index
    %c0_46 = arith.constant 0 : index
    %c0_47 = arith.constant 0 : index
    %57 = vector.load %arg3[%c0_45, %56, %c0_46, %c0_47] : memref<1x10x5x128xbf16, #tpu.memory_space<vmem>>, vector<1x1x4x128xbf16>
    %58 = vector.shape_cast %57 : vector<1x1x4x128xbf16> to vector<4x128xbf16>
    %c7 = arith.constant 7 : index
    %c0_48 = arith.constant 0 : index
    %c0_49 = arith.constant 0 : index
    %59 = vector.load %arg4[%c7, %c0_48, %c0_49] : memref<9x128x128xbf16, #tpu.memory_space<vmem>>, vector<1x128x128xbf16>
    %60 = vector.shape_cast %59 : vector<1x128x128xbf16> to vector<128x128xbf16>
    %cst_50 = arith.constant dense<0.000000e+00> : vector<4x128xf32>
    %61 = tpu.matmul %58, %60, %cst_50 {dimension_numbers = #tpu.dot_dimension_numbers<[1], [0], [0], [1], [0, 0, 1, 1], [], []>} : vector<4x128xbf16>, vector<128x128xbf16>, vector<4x128xf32> -> vector<4x128xf32>
    %62 = arith.addf %55, %61 : vector<4x128xf32>
    %c0_51 = arith.constant 0 : index
    %63 = arith.index_cast %48 : i32 to index
    %c1_52 = arith.constant 1 : index
    %c0_53 = arith.constant 0 : index
    %64 = vector.load %arg2[%c0_51, %63, %c1_52, %c0_53] : memref<1x10x5x128xbf16, #tpu.memory_space<vmem>>, vector<1x1x4x128xbf16>
    %65 = vector.shape_cast %64 : vector<1x1x4x128xbf16> to vector<4x128xbf16>
    %c8 = arith.constant 8 : index
    %c0_54 = arith.constant 0 : index
    %c0_55 = arith.constant 0 : index
    %66 = vector.load %arg4[%c8, %c0_54, %c0_55] : memref<9x128x128xbf16, #tpu.memory_space<vmem>>, vector<1x128x128xbf16>
    %67 = vector.shape_cast %66 : vector<1x128x128xbf16> to vector<128x128xbf16>
    %cst_56 = arith.constant dense<0.000000e+00> : vector<4x128xf32>
    %68 = tpu.matmul %65, %67, %cst_56 {dimension_numbers = #tpu.dot_dimension_numbers<[1], [0], [0], [1], [0, 0, 1, 1], [], []>} : vector<4x128xbf16>, vector<128x128xbf16>, vector<4x128xf32> -> vector<4x128xf32>
    %69 = arith.addf %62, %68 : vector<4x128xf32>
    %c0_57 = arith.constant 0 : index
    %c0_58 = arith.constant 0 : index
    %70 = vector.load %arg5[%c0_57, %c0_58] : memref<1x128xf32, #tpu.memory_space<vmem>>, vector<1x128xf32>
    %71 = vector.broadcast %70 : vector<1x128xf32> to vector<4x128xf32>
    %72 = arith.mulf %69, %71 : vector<4x128xf32>
    %c0_59 = arith.constant 0 : index
    %c0_60 = arith.constant 0 : index
    %73 = vector.load %arg6[%c0_59, %c0_60] : memref<1x128xf32, #tpu.memory_space<vmem>>, vector<1x128xf32>
    %74 = vector.broadcast %73 : vector<1x128xf32> to vector<4x128xf32>
    %75 = arith.addf %72, %74 : vector<4x128xf32>
    %cst_61 = arith.constant 0.000000e+00 : f32
    %76 = vector.broadcast %cst_61 : f32 to vector<4x128xf32>
    %77 = arith.maximumf %75, %76 : vector<4x128xf32>
    %78 = arith.truncf %77 : vector<4x128xf32> to vector<4x128xbf16>
    %c0_62 = arith.constant 0 : index
    %c0_63 = arith.constant 0 : index
    %c0_64 = arith.constant 0 : index
    %c0_65 = arith.constant 0 : index
    %79 = vector.load %arg7[%c0_62, %c0_63, %c0_64, %c0_65] : memref<1x1x4x128xbf16, #tpu.memory_space<vmem>>, vector<1x1x4x128xbf16>
    %80 = vector.shape_cast %79 : vector<1x1x4x128xbf16> to vector<4x128xbf16>
    %81 = vector.shape_cast %78 : vector<4x128xbf16> to vector<1x1x4x128xbf16>
    tpu.vector_store %arg7[%c0_62, %c0_63, %c0_64, %c0_65], %81 {strides = array<i32>} : memref<1x1x4x128xbf16, #tpu.memory_space<vmem>>, vector<1x1x4x128xbf16>,
    return
  }
  func.func @transform_0(%arg0: i32, %arg1: i32) -> (i32, i32, i32, i32) {
    %c0_i32 = arith.constant 0 : i32
    %c0_i32_0 = arith.constant 0 : i32
    %c0_i32_1 = arith.constant 0 : i32
    %c0_i32_2 = arith.constant 0 : i32
    return %arg0, %c0_i32, %c0_i32_0, %c0_i32_1 : i32, i32, i32, i32
  }
  func.func @transform_1(%arg0: i32, %arg1: i32) -> (i32, i32, i32, i32) {
    %c0_i32 = arith.constant 0 : i32
    %c0_i32_0 = arith.constant 0 : i32
    %c0_i32_1 = arith.constant 0 : i32
    %c0_i32_2 = arith.constant 0 : i32
    return %arg0, %c0_i32, %c0_i32_0, %c0_i32_1 : i32, i32, i32, i32
  }
  func.func @transform_2(%arg0: i32, %arg1: i32) -> (i32, i32, i32) {
    %c0_i32 = arith.constant 0 : i32
    %c0_i32_0 = arith.constant 0 : i32
    %c0_i32_1 = arith.constant 0 : i32
    %c0_i32_2 = arith.constant 0 : i32
    return %c0_i32, %c0_i32_0, %c0_i32_1 : i32, i32, i32
  }
  func.func @transform_3(%arg0: i32, %arg1: i32) -> (i32, i32) {
    %c0_i32 = arith.constant 0 : i32
    %c0_i32_0 = arith.constant 0 : i32
    %c0_i32_1 = arith.constant 0 : i32
    return %c0_i32, %c0_i32_0 : i32, i32
  }
  func.func @transform_4(%arg0: i32, %arg1: i32) -> (i32, i32) {
    %c0_i32 = arith.constant 0 : i32
    %c0_i32_0 = arith.constant 0 : i32
    %c0_i32_1 = arith.constant 0 : i32
    return %c0_i32, %c0_i32_0 : i32, i32
  }
  func.func @transform_5(%arg0: i32, %arg1: i32) -> (i32, i32, i32, i32) {
    %c0_i32 = arith.constant 0 : i32
    %c0_i32_0 = arith.constant 0 : i32
    %c0_i32_1 = arith.constant 0 : i32
    return %arg0, %arg1, %c0_i32, %c0_i32_0 : i32, i32, i32, i32
  }
}

module attributes {stable_mosaic.version = 11 : i64} {
  func.func @_conv_kernel(%arg0: i32, %arg1: i32, %arg2: memref<1x8x4x128xbf16, #tpu.memory_space<vmem>>, %arg3: memref<1x128x128xbf16, #tpu.memory_space<vmem>>, %arg4: memref<1x128xf32, #tpu.memory_space<vmem>>, %arg5: memref<1x128xf32, #tpu.memory_space<vmem>>, %arg6: memref<1x1x4x128xbf16, #tpu.memory_space<vmem>>) attributes {dimension_semantics = [#tpu.dimension_semantics<parallel>, #tpu.dimension_semantics<arbitrary>], iteration_bounds = array<i64: 2, 4>, scalar_prefetch = 0 : i64, scratch_operands = 0 : i64, tpu.core_type = #tpu.core_type<tc>, window_params = [{transform_indices = @transform_0, window_bounds = array<i64: 1, 8, 4, 128>}, {pipeline_mode = #tpu.pipeline_mode<synchronous>, transform_indices = @transform_1, window_bounds = array<i64: 1, 128, 128>}, {pipeline_mode = #tpu.pipeline_mode<synchronous>, transform_indices = @transform_2, window_bounds = array<i64: 1, 128>}, {pipeline_mode = #tpu.pipeline_mode<synchronous>, transform_indices = @transform_3, window_bounds = array<i64: 1, 128>}, {transform_indices = @transform_4, window_bounds = array<i64: 1, 1, 4, 128>}]} {
    %cst = arith.constant 0.000000e+00 : f32
    %0 = vector.broadcast %cst : f32 to vector<4x128xf32>
    %c2_i32 = arith.constant 2 : i32
    %1 = arith.muli %arg1, %c2_i32 : i32
    %c0_i32 = arith.constant 0 : i32
    %2 = arith.addi %1, %c0_i32 : i32
    %c0 = arith.constant 0 : index
    %3 = arith.index_cast %2 : i32 to index
    %c0_0 = arith.constant 0 : index
    %c0_1 = arith.constant 0 : index
    %4 = vector.load %arg2[%c0, %3, %c0_0, %c0_1] : memref<1x8x4x128xbf16, #tpu.memory_space<vmem>>, vector<1x1x4x128xbf16>
    %5 = vector.shape_cast %4 : vector<1x1x4x128xbf16> to vector<4x128xbf16>
    %c0_2 = arith.constant 0 : index
    %c0_3 = arith.constant 0 : index
    %c0_4 = arith.constant 0 : index
    %6 = vector.load %arg3[%c0_2, %c0_3, %c0_4] : memref<1x128x128xbf16, #tpu.memory_space<vmem>>, vector<1x128x128xbf16>
    %7 = vector.shape_cast %6 : vector<1x128x128xbf16> to vector<128x128xbf16>
    %cst_5 = arith.constant dense<0.000000e+00> : vector<4x128xf32>
    %8 = tpu.matmul %5, %7, %cst_5 {dimension_numbers = #tpu.dot_dimension_numbers<[1], [0], [0], [1], [0, 0, 1, 1], [], []>} : vector<4x128xbf16>, vector<128x128xbf16>, vector<4x128xf32> -> vector<4x128xf32>
    %9 = arith.addf %0, %8 : vector<4x128xf32>
    %c0_6 = arith.constant 0 : index
    %c0_7 = arith.constant 0 : index
    %10 = vector.load %arg4[%c0_6, %c0_7] : memref<1x128xf32, #tpu.memory_space<vmem>>, vector<1x128xf32>
    %11 = vector.broadcast %10 : vector<1x128xf32> to vector<4x128xf32>
    %12 = arith.mulf %9, %11 : vector<4x128xf32>
    %c0_8 = arith.constant 0 : index
    %c0_9 = arith.constant 0 : index
    %13 = vector.load %arg5[%c0_8, %c0_9] : memref<1x128xf32, #tpu.memory_space<vmem>>, vector<1x128xf32>
    %14 = vector.broadcast %13 : vector<1x128xf32> to vector<4x128xf32>
    %15 = arith.addf %12, %14 : vector<4x128xf32>
    %16 = arith.truncf %15 : vector<4x128xf32> to vector<4x128xbf16>
    %c0_10 = arith.constant 0 : index
    %c0_11 = arith.constant 0 : index
    %c0_12 = arith.constant 0 : index
    %c0_13 = arith.constant 0 : index
    %17 = vector.load %arg6[%c0_10, %c0_11, %c0_12, %c0_13] : memref<1x1x4x128xbf16, #tpu.memory_space<vmem>>, vector<1x1x4x128xbf16>
    %18 = vector.shape_cast %17 : vector<1x1x4x128xbf16> to vector<4x128xbf16>
    %19 = vector.shape_cast %16 : vector<4x128xbf16> to vector<1x1x4x128xbf16>
    tpu.vector_store %arg6[%c0_10, %c0_11, %c0_12, %c0_13], %19 {strides = array<i32>} : memref<1x1x4x128xbf16, #tpu.memory_space<vmem>>, vector<1x1x4x128xbf16>,
    return
  }
  func.func @transform_0(%arg0: i32, %arg1: i32) -> (i32, i32, i32, i32) {
    %c0_i32 = arith.constant 0 : i32
    %c0_i32_0 = arith.constant 0 : i32
    %c0_i32_1 = arith.constant 0 : i32
    %c0_i32_2 = arith.constant 0 : i32
    return %arg0, %c0_i32, %c0_i32_0, %c0_i32_1 : i32, i32, i32, i32
  }
  func.func @transform_1(%arg0: i32, %arg1: i32) -> (i32, i32, i32) {
    %c0_i32 = arith.constant 0 : i32
    %c0_i32_0 = arith.constant 0 : i32
    %c0_i32_1 = arith.constant 0 : i32
    %c0_i32_2 = arith.constant 0 : i32
    return %c0_i32, %c0_i32_0, %c0_i32_1 : i32, i32, i32
  }
  func.func @transform_2(%arg0: i32, %arg1: i32) -> (i32, i32) {
    %c0_i32 = arith.constant 0 : i32
    %c0_i32_0 = arith.constant 0 : i32
    %c0_i32_1 = arith.constant 0 : i32
    return %c0_i32, %c0_i32_0 : i32, i32
  }
  func.func @transform_3(%arg0: i32, %arg1: i32) -> (i32, i32) {
    %c0_i32 = arith.constant 0 : i32
    %c0_i32_0 = arith.constant 0 : i32
    %c0_i32_1 = arith.constant 0 : i32
    return %c0_i32, %c0_i32_0 : i32, i32
  }
  func.func @transform_4(%arg0: i32, %arg1: i32) -> (i32, i32, i32, i32) {
    %c0_i32 = arith.constant 0 : i32
    %c0_i32_0 = arith.constant 0 : i32
    %c0_i32_1 = arith.constant 0 : i32
    return %arg0, %arg1, %c0_i32, %c0_i32_0 : i32, i32, i32, i32
  }
}

module attributes {stable_mosaic.version = 11 : i64} {
  func.func @_conv_kernel(%arg0: i32, %arg1: i32, %arg2: memref<1x6x6x128xbf16, #tpu.memory_space<vmem>>, %arg3: memref<9x128x128xbf16, #tpu.memory_space<vmem>>, %arg4: memref<1x128xf32, #tpu.memory_space<vmem>>, %arg5: memref<1x128xf32, #tpu.memory_space<vmem>>, %arg6: memref<1x1x4x128xbf16, #tpu.memory_space<vmem>>, %arg7: memref<1x1x4x128xbf16, #tpu.memory_space<vmem>>) attributes {dimension_semantics = [#tpu.dimension_semantics<parallel>, #tpu.dimension_semantics<arbitrary>], iteration_bounds = array<i64: 2, 4>, scalar_prefetch = 0 : i64, scratch_operands = 0 : i64, tpu.core_type = #tpu.core_type<tc>, window_params = [{transform_indices = @transform_0, window_bounds = array<i64: 1, 6, 6, 128>}, {pipeline_mode = #tpu.pipeline_mode<synchronous>, transform_indices = @transform_1, window_bounds = array<i64: 9, 128, 128>}, {pipeline_mode = #tpu.pipeline_mode<synchronous>, transform_indices = @transform_2, window_bounds = array<i64: 1, 128>}, {pipeline_mode = #tpu.pipeline_mode<synchronous>, transform_indices = @transform_3, window_bounds = array<i64: 1, 128>}, {transform_indices = @transform_4, window_bounds = array<i64: 1, 1, 4, 128>}, {transform_indices = @transform_5, window_bounds = array<i64: 1, 1, 4, 128>}]} {
    %cst = arith.constant 0.000000e+00 : f32
    %0 = vector.broadcast %cst : f32 to vector<4x128xf32>
    %c1_i32 = arith.constant 1 : i32
    %1 = arith.muli %arg1, %c1_i32 : i32
    %c0_i32 = arith.constant 0 : i32
    %2 = arith.addi %1, %c0_i32 : i32
    %c0 = arith.constant 0 : index
    %3 = arith.index_cast %2 : i32 to index
    %c0_0 = arith.constant 0 : index
    %c0_1 = arith.constant 0 : index
    %4 = vector.load %arg2[%c0, %3, %c0_0, %c0_1] : memref<1x6x6x128xbf16, #tpu.memory_space<vmem>>, vector<1x1x4x128xbf16>
    %5 = vector.shape_cast %4 : vector<1x1x4x128xbf16> to vector<4x128xbf16>
    %c0_2 = arith.constant 0 : index
    %c0_3 = arith.constant 0 : index
    %c0_4 = arith.constant 0 : index
    %6 = vector.load %arg3[%c0_2, %c0_3, %c0_4] : memref<9x128x128xbf16, #tpu.memory_space<vmem>>, vector<1x128x128xbf16>
    %7 = vector.shape_cast %6 : vector<1x128x128xbf16> to vector<128x128xbf16>
    %cst_5 = arith.constant dense<0.000000e+00> : vector<4x128xf32>
    %8 = tpu.matmul %5, %7, %cst_5 {dimension_numbers = #tpu.dot_dimension_numbers<[1], [0], [0], [1], [0, 0, 1, 1], [], []>} : vector<4x128xbf16>, vector<128x128xbf16>, vector<4x128xf32> -> vector<4x128xf32>
    %9 = arith.addf %0, %8 : vector<4x128xf32>
    %c0_6 = arith.constant 0 : index
    %10 = arith.index_cast %2 : i32 to index
    %c1 = arith.constant 1 : index
    %c0_7 = arith.constant 0 : index
    %11 = vector.load %arg2[%c0_6, %10, %c1, %c0_7] : memref<1x6x6x128xbf16, #tpu.memory_space<vmem>>, vector<1x1x4x128xbf16>
    %12 = vector.shape_cast %11 : vector<1x1x4x128xbf16> to vector<4x128xbf16>
    %c1_8 = arith.constant 1 : index
    %c0_9 = arith.constant 0 : index
    %c0_10 = arith.constant 0 : index
    %13 = vector.load %arg3[%c1_8, %c0_9, %c0_10] : memref<9x128x128xbf16, #tpu.memory_space<vmem>>, vector<1x128x128xbf16>
    %14 = vector.shape_cast %13 : vector<1x128x128xbf16> to vector<128x128xbf16>
    %cst_11 = arith.constant dense<0.000000e+00> : vector<4x128xf32>
    %15 = tpu.matmul %12, %14, %cst_11 {dimension_numbers = #tpu.dot_dimension_numbers<[1], [0], [0], [1], [0, 0, 1, 1], [], []>} : vector<4x128xbf16>, vector<128x128xbf16>, vector<4x128xf32> -> vector<4x128xf32>
    %16 = arith.addf %9, %15 : vector<4x128xf32>
    %c0_12 = arith.constant 0 : index
    %17 = arith.index_cast %2 : i32 to index
    %c2 = arith.constant 2 : index
    %c0_13 = arith.constant 0 : index
    %18 = vector.load %arg2[%c0_12, %17, %c2, %c0_13] : memref<1x6x6x128xbf16, #tpu.memory_space<vmem>>, vector<1x1x4x128xbf16>
    %19 = vector.shape_cast %18 : vector<1x1x4x128xbf16> to vector<4x128xbf16>
    %c2_14 = arith.constant 2 : index
    %c0_15 = arith.constant 0 : index
    %c0_16 = arith.constant 0 : index
    %20 = vector.load %arg3[%c2_14, %c0_15, %c0_16] : memref<9x128x128xbf16, #tpu.memory_space<vmem>>, vector<1x128x128xbf16>
    %21 = vector.shape_cast %20 : vector<1x128x128xbf16> to vector<128x128xbf16>
    %cst_17 = arith.constant dense<0.000000e+00> : vector<4x128xf32>
    %22 = tpu.matmul %19, %21, %cst_17 {dimension_numbers = #tpu.dot_dimension_numbers<[1], [0], [0], [1], [0, 0, 1, 1], [], []>} : vector<4x128xbf16>, vector<128x128xbf16>, vector<4x128xf32> -> vector<4x128xf32>
    %23 = arith.addf %16, %22 : vector<4x128xf32>
    %c1_i32_18 = arith.constant 1 : i32
    %24 = arith.muli %arg1, %c1_i32_18 : i32
    %c1_i32_19 = arith.constant 1 : i32
    %25 = arith.addi %24, %c1_i32_19 : i32
    %c0_20 = arith.constant 0 : index
    %26 = arith.index_cast %25 : i32 to index
    %c0_21 = arith.constant 0 : index
    %c0_22 = arith.constant 0 : index
    %27 = vector.load %arg2[%c0_20, %26, %c0_21, %c0_22] : memref<1x6x6x128xbf16, #tpu.memory_space<vmem>>, vector<1x1x4x128xbf16>
    %28 = vector.shape_cast %27 : vector<1x1x4x128xbf16> to vector<4x128xbf16>
    %c3 = arith.constant 3 : index
    %c0_23 = arith.constant 0 : index
    %c0_24 = arith.constant 0 : index
    %29 = vector.load %arg3[%c3, %c0_23, %c0_24] : memref<9x128x128xbf16, #tpu.memory_space<vmem>>, vector<1x128x128xbf16>
    %30 = vector.shape_cast %29 : vector<1x128x128xbf16> to vector<128x128xbf16>
    %cst_25 = arith.constant dense<0.000000e+00> : vector<4x128xf32>
    %31 = tpu.matmul %28, %30, %cst_25 {dimension_numbers = #tpu.dot_dimension_numbers<[1], [0], [0], [1], [0, 0, 1, 1], [], []>} : vector<4x128xbf16>, vector<128x128xbf16>, vector<4x128xf32> -> vector<4x128xf32>
    %32 = arith.addf %23, %31 : vector<4x128xf32>
    %c0_26 = arith.constant 0 : index
    %33 = arith.index_cast %25 : i32 to index
    %c1_27 = arith.constant 1 : index
    %c0_28 = arith.constant 0 : index
    %34 = vector.load %arg2[%c0_26, %33, %c1_27, %c0_28] : memref<1x6x6x128xbf16, #tpu.memory_space<vmem>>, vector<1x1x4x128xbf16>
    %35 = vector.shape_cast %34 : vector<1x1x4x128xbf16> to vector<4x128xbf16>
    %c4 = arith.constant 4 : index
    %c0_29 = arith.constant 0 : index
    %c0_30 = arith.constant 0 : index
    %36 = vector.load %arg3[%c4, %c0_29, %c0_30] : memref<9x128x128xbf16, #tpu.memory_space<vmem>>, vector<1x128x128xbf16>
    %37 = vector.shape_cast %36 : vector<1x128x128xbf16> to vector<128x128xbf16>
    %cst_31 = arith.constant dense<0.000000e+00> : vector<4x128xf32>
    %38 = tpu.matmul %35, %37, %cst_31 {dimension_numbers = #tpu.dot_dimension_numbers<[1], [0], [0], [1], [0, 0, 1, 1], [], []>} : vector<4x128xbf16>, vector<128x128xbf16>, vector<4x128xf32> -> vector<4x128xf32>
    %39 = arith.addf %32, %38 : vector<4x128xf32>
    %c0_32 = arith.constant 0 : index
    %40 = arith.index_cast %25 : i32 to index
    %c2_33 = arith.constant 2 : index
    %c0_34 = arith.constant 0 : index
    %41 = vector.load %arg2[%c0_32, %40, %c2_33, %c0_34] : memref<1x6x6x128xbf16, #tpu.memory_space<vmem>>, vector<1x1x4x128xbf16>
    %42 = vector.shape_cast %41 : vector<1x1x4x128xbf16> to vector<4x128xbf16>
    %c5 = arith.constant 5 : index
    %c0_35 = arith.constant 0 : index
    %c0_36 = arith.constant 0 : index
    %43 = vector.load %arg3[%c5, %c0_35, %c0_36] : memref<9x128x128xbf16, #tpu.memory_space<vmem>>, vector<1x128x128xbf16>
    %44 = vector.shape_cast %43 : vector<1x128x128xbf16> to vector<128x128xbf16>
    %cst_37 = arith.constant dense<0.000000e+00> : vector<4x128xf32>
    %45 = tpu.matmul %42, %44, %cst_37 {dimension_numbers = #tpu.dot_dimension_numbers<[1], [0], [0], [1], [0, 0, 1, 1], [], []>} : vector<4x128xbf16>, vector<128x128xbf16>, vector<4x128xf32> -> vector<4x128xf32>
    %46 = arith.addf %39, %45 : vector<4x128xf32>
    %c1_i32_38 = arith.constant 1 : i32
    %47 = arith.muli %arg1, %c1_i32_38 : i32
    %c2_i32 = arith.constant 2 : i32
    %48 = arith.addi %47, %c2_i32 : i32
    %c0_39 = arith.constant 0 : index
    %49 = arith.index_cast %48 : i32 to index
    %c0_40 = arith.constant 0 : index
    %c0_41 = arith.constant 0 : index
    %50 = vector.load %arg2[%c0_39, %49, %c0_40, %c0_41] : memref<1x6x6x128xbf16, #tpu.memory_space<vmem>>, vector<1x1x4x128xbf16>
    %51 = vector.shape_cast %50 : vector<1x1x4x128xbf16> to vector<4x128xbf16>
    %c6 = arith.constant 6 : index
    %c0_42 = arith.constant 0 : index
    %c0_43 = arith.constant 0 : index
    %52 = vector.load %arg3[%c6, %c0_42, %c0_43] : memref<9x128x128xbf16, #tpu.memory_space<vmem>>, vector<1x128x128xbf16>
    %53 = vector.shape_cast %52 : vector<1x128x128xbf16> to vector<128x128xbf16>
    %cst_44 = arith.constant dense<0.000000e+00> : vector<4x128xf32>
    %54 = tpu.matmul %51, %53, %cst_44 {dimension_numbers = #tpu.dot_dimension_numbers<[1], [0], [0], [1], [0, 0, 1, 1], [], []>} : vector<4x128xbf16>, vector<128x128xbf16>, vector<4x128xf32> -> vector<4x128xf32>
    %55 = arith.addf %46, %54 : vector<4x128xf32>
    %c0_45 = arith.constant 0 : index
    %56 = arith.index_cast %48 : i32 to index
    %c1_46 = arith.constant 1 : index
    %c0_47 = arith.constant 0 : index
    %57 = vector.load %arg2[%c0_45, %56, %c1_46, %c0_47] : memref<1x6x6x128xbf16, #tpu.memory_space<vmem>>, vector<1x1x4x128xbf16>
    %58 = vector.shape_cast %57 : vector<1x1x4x128xbf16> to vector<4x128xbf16>
    %c7 = arith.constant 7 : index
    %c0_48 = arith.constant 0 : index
    %c0_49 = arith.constant 0 : index
    %59 = vector.load %arg3[%c7, %c0_48, %c0_49] : memref<9x128x128xbf16, #tpu.memory_space<vmem>>, vector<1x128x128xbf16>
    %60 = vector.shape_cast %59 : vector<1x128x128xbf16> to vector<128x128xbf16>
    %cst_50 = arith.constant dense<0.000000e+00> : vector<4x128xf32>
    %61 = tpu.matmul %58, %60, %cst_50 {dimension_numbers = #tpu.dot_dimension_numbers<[1], [0], [0], [1], [0, 0, 1, 1], [], []>} : vector<4x128xbf16>, vector<128x128xbf16>, vector<4x128xf32> -> vector<4x128xf32>
    %62 = arith.addf %55, %61 : vector<4x128xf32>
    %c0_51 = arith.constant 0 : index
    %63 = arith.index_cast %48 : i32 to index
    %c2_52 = arith.constant 2 : index
    %c0_53 = arith.constant 0 : index
    %64 = vector.load %arg2[%c0_51, %63, %c2_52, %c0_53] : memref<1x6x6x128xbf16, #tpu.memory_space<vmem>>, vector<1x1x4x128xbf16>
    %65 = vector.shape_cast %64 : vector<1x1x4x128xbf16> to vector<4x128xbf16>
    %c8 = arith.constant 8 : index
    %c0_54 = arith.constant 0 : index
    %c0_55 = arith.constant 0 : index
    %66 = vector.load %arg3[%c8, %c0_54, %c0_55] : memref<9x128x128xbf16, #tpu.memory_space<vmem>>, vector<1x128x128xbf16>
    %67 = vector.shape_cast %66 : vector<1x128x128xbf16> to vector<128x128xbf16>
    %cst_56 = arith.constant dense<0.000000e+00> : vector<4x128xf32>
    %68 = tpu.matmul %65, %67, %cst_56 {dimension_numbers = #tpu.dot_dimension_numbers<[1], [0], [0], [1], [0, 0, 1, 1], [], []>} : vector<4x128xbf16>, vector<128x128xbf16>, vector<4x128xf32> -> vector<4x128xf32>
    %69 = arith.addf %62, %68 : vector<4x128xf32>
    %c0_57 = arith.constant 0 : index
    %c0_58 = arith.constant 0 : index
    %70 = vector.load %arg4[%c0_57, %c0_58] : memref<1x128xf32, #tpu.memory_space<vmem>>, vector<1x128xf32>
    %71 = vector.broadcast %70 : vector<1x128xf32> to vector<4x128xf32>
    %72 = arith.mulf %69, %71 : vector<4x128xf32>
    %c0_59 = arith.constant 0 : index
    %c0_60 = arith.constant 0 : index
    %73 = vector.load %arg5[%c0_59, %c0_60] : memref<1x128xf32, #tpu.memory_space<vmem>>, vector<1x128xf32>
    %74 = vector.broadcast %73 : vector<1x128xf32> to vector<4x128xf32>
    %75 = arith.addf %72, %74 : vector<4x128xf32>
    %c0_61 = arith.constant 0 : index
    %c0_62 = arith.constant 0 : index
    %c0_63 = arith.constant 0 : index
    %c0_64 = arith.constant 0 : index
    %76 = vector.load %arg6[%c0_61, %c0_62, %c0_63, %c0_64] : memref<1x1x4x128xbf16, #tpu.memory_space<vmem>>, vector<1x1x4x128xbf16>
    %77 = vector.shape_cast %76 : vector<1x1x4x128xbf16> to vector<4x128xbf16>
    %78 = arith.extf %77 : vector<4x128xbf16> to vector<4x128xf32>
    %79 = arith.addf %75, %78 : vector<4x128xf32>
    %cst_65 = arith.constant 0.000000e+00 : f32
    %80 = vector.broadcast %cst_65 : f32 to vector<4x128xf32>
    %81 = arith.maximumf %79, %80 : vector<4x128xf32>
    %82 = arith.truncf %81 : vector<4x128xf32> to vector<4x128xbf16>
    %c0_66 = arith.constant 0 : index
    %c0_67 = arith.constant 0 : index
    %c0_68 = arith.constant 0 : index
    %c0_69 = arith.constant 0 : index
    %83 = vector.load %arg7[%c0_66, %c0_67, %c0_68, %c0_69] : memref<1x1x4x128xbf16, #tpu.memory_space<vmem>>, vector<1x1x4x128xbf16>
    %84 = vector.shape_cast %83 : vector<1x1x4x128xbf16> to vector<4x128xbf16>
    %85 = vector.shape_cast %82 : vector<4x128xbf16> to vector<1x1x4x128xbf16>
    tpu.vector_store %arg7[%c0_66, %c0_67, %c0_68, %c0_69], %85 {strides = array<i32>} : memref<1x1x4x128xbf16, #tpu.memory_space<vmem>>, vector<1x1x4x128xbf16>,
    return
  }
  func.func @transform_0(%arg0: i32, %arg1: i32) -> (i32, i32, i32, i32) {
    %c0_i32 = arith.constant 0 : i32
    %c0_i32_0 = arith.constant 0 : i32
    %c0_i32_1 = arith.constant 0 : i32
    %c0_i32_2 = arith.constant 0 : i32
    return %arg0, %c0_i32, %c0_i32_0, %c0_i32_1 : i32, i32, i32, i32
  }
  func.func @transform_1(%arg0: i32, %arg1: i32) -> (i32, i32, i32) {
    %c0_i32 = arith.constant 0 : i32
    %c0_i32_0 = arith.constant 0 : i32
    %c0_i32_1 = arith.constant 0 : i32
    %c0_i32_2 = arith.constant 0 : i32
    return %c0_i32, %c0_i32_0, %c0_i32_1 : i32, i32, i32
  }
  func.func @transform_2(%arg0: i32, %arg1: i32) -> (i32, i32) {
    %c0_i32 = arith.constant 0 : i32
    %c0_i32_0 = arith.constant 0 : i32
    %c0_i32_1 = arith.constant 0 : i32
    return %c0_i32, %c0_i32_0 : i32, i32
  }
  func.func @transform_3(%arg0: i32, %arg1: i32) -> (i32, i32) {
    %c0_i32 = arith.constant 0 : i32
    %c0_i32_0 = arith.constant 0 : i32
    %c0_i32_1 = arith.constant 0 : i32
    return %c0_i32, %c0_i32_0 : i32, i32
  }
  func.func @transform_4(%arg0: i32, %arg1: i32) -> (i32, i32, i32, i32) {
    %c0_i32 = arith.constant 0 : i32
    %c0_i32_0 = arith.constant 0 : i32
    %c0_i32_1 = arith.constant 0 : i32
    return %arg0, %arg1, %c0_i32, %c0_i32_0 : i32, i32, i32, i32
  }
  func.func @transform_5(%arg0: i32, %arg1: i32) -> (i32, i32, i32, i32) {
    %c0_i32 = arith.constant 0 : i32
    %c0_i32_0 = arith.constant 0 : i32
    %c0_i32_1 = arith.constant 0 : i32
    return %arg0, %arg1, %c0_i32, %c0_i32_0 : i32, i32, i32, i32
  }
}

module attributes {stable_mosaic.version = 11 : i64} {
  func.func @_conv_kernel(%arg0: i32, %arg1: i32, %arg2: memref<1x6x3x128xbf16, #tpu.memory_space<vmem>>, %arg3: memref<1x6x3x128xbf16, #tpu.memory_space<vmem>>, %arg4: memref<9x128x128xbf16, #tpu.memory_space<vmem>>, %arg5: memref<1x128xf32, #tpu.memory_space<vmem>>, %arg6: memref<1x128xf32, #tpu.memory_space<vmem>>, %arg7: memref<1x1x2x128xbf16, #tpu.memory_space<vmem>>) attributes {dimension_semantics = [#tpu.dimension_semantics<parallel>, #tpu.dimension_semantics<arbitrary>], iteration_bounds = array<i64: 2, 2>, scalar_prefetch = 0 : i64, scratch_operands = 0 : i64, tpu.core_type = #tpu.core_type<tc>, window_params = [{transform_indices = @transform_0, window_bounds = array<i64: 1, 6, 3, 128>}, {transform_indices = @transform_1, window_bounds = array<i64: 1, 6, 3, 128>}, {pipeline_mode = #tpu.pipeline_mode<synchronous>, transform_indices = @transform_2, window_bounds = array<i64: 9, 128, 128>}, {pipeline_mode = #tpu.pipeline_mode<synchronous>, transform_indices = @transform_3, window_bounds = array<i64: 1, 128>}, {pipeline_mode = #tpu.pipeline_mode<synchronous>, transform_indices = @transform_4, window_bounds = array<i64: 1, 128>}, {transform_indices = @transform_5, window_bounds = array<i64: 1, 1, 2, 128>}]} {
    %cst = arith.constant 0.000000e+00 : f32
    %0 = vector.broadcast %cst : f32 to vector<2x128xf32>
    %c2_i32 = arith.constant 2 : i32
    %1 = arith.muli %arg1, %c2_i32 : i32
    %c0_i32 = arith.constant 0 : i32
    %2 = arith.addi %1, %c0_i32 : i32
    %c0 = arith.constant 0 : index
    %3 = arith.index_cast %2 : i32 to index
    %c0_0 = arith.constant 0 : index
    %c0_1 = arith.constant 0 : index
    %4 = vector.load %arg2[%c0, %3, %c0_0, %c0_1] : memref<1x6x3x128xbf16, #tpu.memory_space<vmem>>, vector<1x1x2x128xbf16>
    %5 = vector.shape_cast %4 : vector<1x1x2x128xbf16> to vector<2x128xbf16>
    %c0_2 = arith.constant 0 : index
    %c0_3 = arith.constant 0 : index
    %c0_4 = arith.constant 0 : index
    %6 = vector.load %arg4[%c0_2, %c0_3, %c0_4] : memref<9x128x128xbf16, #tpu.memory_space<vmem>>, vector<1x128x128xbf16>
    %7 = vector.shape_cast %6 : vector<1x128x128xbf16> to vector<128x128xbf16>
    %cst_5 = arith.constant dense<0.000000e+00> : vector<2x128xf32>
    %8 = tpu.matmul %5, %7, %cst_5 {dimension_numbers = #tpu.dot_dimension_numbers<[1], [0], [0], [1], [0, 0, 1, 1], [], []>} : vector<2x128xbf16>, vector<128x128xbf16>, vector<2x128xf32> -> vector<2x128xf32>
    %9 = arith.addf %0, %8 : vector<2x128xf32>
    %c0_6 = arith.constant 0 : index
    %10 = arith.index_cast %2 : i32 to index
    %c0_7 = arith.constant 0 : index
    %c0_8 = arith.constant 0 : index
    %11 = vector.load %arg3[%c0_6, %10, %c0_7, %c0_8] : memref<1x6x3x128xbf16, #tpu.memory_space<vmem>>, vector<1x1x2x128xbf16>
    %12 = vector.shape_cast %11 : vector<1x1x2x128xbf16> to vector<2x128xbf16>
    %c1 = arith.constant 1 : index
    %c0_9 = arith.constant 0 : index
    %c0_10 = arith.constant 0 : index
    %13 = vector.load %arg4[%c1, %c0_9, %c0_10] : memref<9x128x128xbf16, #tpu.memory_space<vmem>>, vector<1x128x128xbf16>
    %14 = vector.shape_cast %13 : vector<1x128x128xbf16> to vector<128x128xbf16>
    %cst_11 = arith.constant dense<0.000000e+00> : vector<2x128xf32>
    %15 = tpu.matmul %12, %14, %cst_11 {dimension_numbers = #tpu.dot_dimension_numbers<[1], [0], [0], [1], [0, 0, 1, 1], [], []>} : vector<2x128xbf16>, vector<128x128xbf16>, vector<2x128xf32> -> vector<2x128xf32>
    %16 = arith.addf %9, %15 : vector<2x128xf32>
    %c0_12 = arith.constant 0 : index
    %17 = arith.index_cast %2 : i32 to index
    %c1_13 = arith.constant 1 : index
    %c0_14 = arith.constant 0 : index
    %18 = vector.load %arg2[%c0_12, %17, %c1_13, %c0_14] : memref<1x6x3x128xbf16, #tpu.memory_space<vmem>>, vector<1x1x2x128xbf16>
    %19 = vector.shape_cast %18 : vector<1x1x2x128xbf16> to vector<2x128xbf16>
    %c2 = arith.constant 2 : index
    %c0_15 = arith.constant 0 : index
    %c0_16 = arith.constant 0 : index
    %20 = vector.load %arg4[%c2, %c0_15, %c0_16] : memref<9x128x128xbf16, #tpu.memory_space<vmem>>, vector<1x128x128xbf16>
    %21 = vector.shape_cast %20 : vector<1x128x128xbf16> to vector<128x128xbf16>
    %cst_17 = arith.constant dense<0.000000e+00> : vector<2x128xf32>
    %22 = tpu.matmul %19, %21, %cst_17 {dimension_numbers = #tpu.dot_dimension_numbers<[1], [0], [0], [1], [0, 0, 1, 1], [], []>} : vector<2x128xbf16>, vector<128x128xbf16>, vector<2x128xf32> -> vector<2x128xf32>
    %23 = arith.addf %16, %22 : vector<2x128xf32>
    %c2_i32_18 = arith.constant 2 : i32
    %24 = arith.muli %arg1, %c2_i32_18 : i32
    %c1_i32 = arith.constant 1 : i32
    %25 = arith.addi %24, %c1_i32 : i32
    %c0_19 = arith.constant 0 : index
    %26 = arith.index_cast %25 : i32 to index
    %c0_20 = arith.constant 0 : index
    %c0_21 = arith.constant 0 : index
    %27 = vector.load %arg2[%c0_19, %26, %c0_20, %c0_21] : memref<1x6x3x128xbf16, #tpu.memory_space<vmem>>, vector<1x1x2x128xbf16>
    %28 = vector.shape_cast %27 : vector<1x1x2x128xbf16> to vector<2x128xbf16>
    %c3 = arith.constant 3 : index
    %c0_22 = arith.constant 0 : index
    %c0_23 = arith.constant 0 : index
    %29 = vector.load %arg4[%c3, %c0_22, %c0_23] : memref<9x128x128xbf16, #tpu.memory_space<vmem>>, vector<1x128x128xbf16>
    %30 = vector.shape_cast %29 : vector<1x128x128xbf16> to vector<128x128xbf16>
    %cst_24 = arith.constant dense<0.000000e+00> : vector<2x128xf32>
    %31 = tpu.matmul %28, %30, %cst_24 {dimension_numbers = #tpu.dot_dimension_numbers<[1], [0], [0], [1], [0, 0, 1, 1], [], []>} : vector<2x128xbf16>, vector<128x128xbf16>, vector<2x128xf32> -> vector<2x128xf32>
    %32 = arith.addf %23, %31 : vector<2x128xf32>
    %c0_25 = arith.constant 0 : index
    %33 = arith.index_cast %25 : i32 to index
    %c0_26 = arith.constant 0 : index
    %c0_27 = arith.constant 0 : index
    %34 = vector.load %arg3[%c0_25, %33, %c0_26, %c0_27] : memref<1x6x3x128xbf16, #tpu.memory_space<vmem>>, vector<1x1x2x128xbf16>
    %35 = vector.shape_cast %34 : vector<1x1x2x128xbf16> to vector<2x128xbf16>
    %c4 = arith.constant 4 : index
    %c0_28 = arith.constant 0 : index
    %c0_29 = arith.constant 0 : index
    %36 = vector.load %arg4[%c4, %c0_28, %c0_29] : memref<9x128x128xbf16, #tpu.memory_space<vmem>>, vector<1x128x128xbf16>
    %37 = vector.shape_cast %36 : vector<1x128x128xbf16> to vector<128x128xbf16>
    %cst_30 = arith.constant dense<0.000000e+00> : vector<2x128xf32>
    %38 = tpu.matmul %35, %37, %cst_30 {dimension_numbers = #tpu.dot_dimension_numbers<[1], [0], [0], [1], [0, 0, 1, 1], [], []>} : vector<2x128xbf16>, vector<128x128xbf16>, vector<2x128xf32> -> vector<2x128xf32>
    %39 = arith.addf %32, %38 : vector<2x128xf32>
    %c0_31 = arith.constant 0 : index
    %40 = arith.index_cast %25 : i32 to index
    %c1_32 = arith.constant 1 : index
    %c0_33 = arith.constant 0 : index
    %41 = vector.load %arg2[%c0_31, %40, %c1_32, %c0_33] : memref<1x6x3x128xbf16, #tpu.memory_space<vmem>>, vector<1x1x2x128xbf16>
    %42 = vector.shape_cast %41 : vector<1x1x2x128xbf16> to vector<2x128xbf16>
    %c5 = arith.constant 5 : index
    %c0_34 = arith.constant 0 : index
    %c0_35 = arith.constant 0 : index
    %43 = vector.load %arg4[%c5, %c0_34, %c0_35] : memref<9x128x128xbf16, #tpu.memory_space<vmem>>, vector<1x128x128xbf16>
    %44 = vector.shape_cast %43 : vector<1x128x128xbf16> to vector<128x128xbf16>
    %cst_36 = arith.constant dense<0.000000e+00> : vector<2x128xf32>
    %45 = tpu.matmul %42, %44, %cst_36 {dimension_numbers = #tpu.dot_dimension_numbers<[1], [0], [0], [1], [0, 0, 1, 1], [], []>} : vector<2x128xbf16>, vector<128x128xbf16>, vector<2x128xf32> -> vector<2x128xf32>
    %46 = arith.addf %39, %45 : vector<2x128xf32>
    %c2_i32_37 = arith.constant 2 : i32
    %47 = arith.muli %arg1, %c2_i32_37 : i32
    %c2_i32_38 = arith.constant 2 : i32
    %48 = arith.addi %47, %c2_i32_38 : i32
    %c0_39 = arith.constant 0 : index
    %49 = arith.index_cast %48 : i32 to index
    %c0_40 = arith.constant 0 : index
    %c0_41 = arith.constant 0 : index
    %50 = vector.load %arg2[%c0_39, %49, %c0_40, %c0_41] : memref<1x6x3x128xbf16, #tpu.memory_space<vmem>>, vector<1x1x2x128xbf16>
    %51 = vector.shape_cast %50 : vector<1x1x2x128xbf16> to vector<2x128xbf16>
    %c6 = arith.constant 6 : index
    %c0_42 = arith.constant 0 : index
    %c0_43 = arith.constant 0 : index
    %52 = vector.load %arg4[%c6, %c0_42, %c0_43] : memref<9x128x128xbf16, #tpu.memory_space<vmem>>, vector<1x128x128xbf16>
    %53 = vector.shape_cast %52 : vector<1x128x128xbf16> to vector<128x128xbf16>
    %cst_44 = arith.constant dense<0.000000e+00> : vector<2x128xf32>
    %54 = tpu.matmul %51, %53, %cst_44 {dimension_numbers = #tpu.dot_dimension_numbers<[1], [0], [0], [1], [0, 0, 1, 1], [], []>} : vector<2x128xbf16>, vector<128x128xbf16>, vector<2x128xf32> -> vector<2x128xf32>
    %55 = arith.addf %46, %54 : vector<2x128xf32>
    %c0_45 = arith.constant 0 : index
    %56 = arith.index_cast %48 : i32 to index
    %c0_46 = arith.constant 0 : index
    %c0_47 = arith.constant 0 : index
    %57 = vector.load %arg3[%c0_45, %56, %c0_46, %c0_47] : memref<1x6x3x128xbf16, #tpu.memory_space<vmem>>, vector<1x1x2x128xbf16>
    %58 = vector.shape_cast %57 : vector<1x1x2x128xbf16> to vector<2x128xbf16>
    %c7 = arith.constant 7 : index
    %c0_48 = arith.constant 0 : index
    %c0_49 = arith.constant 0 : index
    %59 = vector.load %arg4[%c7, %c0_48, %c0_49] : memref<9x128x128xbf16, #tpu.memory_space<vmem>>, vector<1x128x128xbf16>
    %60 = vector.shape_cast %59 : vector<1x128x128xbf16> to vector<128x128xbf16>
    %cst_50 = arith.constant dense<0.000000e+00> : vector<2x128xf32>
    %61 = tpu.matmul %58, %60, %cst_50 {dimension_numbers = #tpu.dot_dimension_numbers<[1], [0], [0], [1], [0, 0, 1, 1], [], []>} : vector<2x128xbf16>, vector<128x128xbf16>, vector<2x128xf32> -> vector<2x128xf32>
    %62 = arith.addf %55, %61 : vector<2x128xf32>
    %c0_51 = arith.constant 0 : index
    %63 = arith.index_cast %48 : i32 to index
    %c1_52 = arith.constant 1 : index
    %c0_53 = arith.constant 0 : index
    %64 = vector.load %arg2[%c0_51, %63, %c1_52, %c0_53] : memref<1x6x3x128xbf16, #tpu.memory_space<vmem>>, vector<1x1x2x128xbf16>
    %65 = vector.shape_cast %64 : vector<1x1x2x128xbf16> to vector<2x128xbf16>
    %c8 = arith.constant 8 : index
    %c0_54 = arith.constant 0 : index
    %c0_55 = arith.constant 0 : index
    %66 = vector.load %arg4[%c8, %c0_54, %c0_55] : memref<9x128x128xbf16, #tpu.memory_space<vmem>>, vector<1x128x128xbf16>
    %67 = vector.shape_cast %66 : vector<1x128x128xbf16> to vector<128x128xbf16>
    %cst_56 = arith.constant dense<0.000000e+00> : vector<2x128xf32>
    %68 = tpu.matmul %65, %67, %cst_56 {dimension_numbers = #tpu.dot_dimension_numbers<[1], [0], [0], [1], [0, 0, 1, 1], [], []>} : vector<2x128xbf16>, vector<128x128xbf16>, vector<2x128xf32> -> vector<2x128xf32>
    %69 = arith.addf %62, %68 : vector<2x128xf32>
    %c0_57 = arith.constant 0 : index
    %c0_58 = arith.constant 0 : index
    %70 = vector.load %arg5[%c0_57, %c0_58] : memref<1x128xf32, #tpu.memory_space<vmem>>, vector<1x128xf32>
    %71 = vector.broadcast %70 : vector<1x128xf32> to vector<2x128xf32>
    %72 = arith.mulf %69, %71 : vector<2x128xf32>
    %c0_59 = arith.constant 0 : index
    %c0_60 = arith.constant 0 : index
    %73 = vector.load %arg6[%c0_59, %c0_60] : memref<1x128xf32, #tpu.memory_space<vmem>>, vector<1x128xf32>
    %74 = vector.broadcast %73 : vector<1x128xf32> to vector<2x128xf32>
    %75 = arith.addf %72, %74 : vector<2x128xf32>
    %cst_61 = arith.constant 0.000000e+00 : f32
    %76 = vector.broadcast %cst_61 : f32 to vector<2x128xf32>
    %77 = arith.maximumf %75, %76 : vector<2x128xf32>
    %78 = arith.truncf %77 : vector<2x128xf32> to vector<2x128xbf16>
    %c0_62 = arith.constant 0 : index
    %c0_63 = arith.constant 0 : index
    %c0_64 = arith.constant 0 : index
    %c0_65 = arith.constant 0 : index
    %79 = vector.load %arg7[%c0_62, %c0_63, %c0_64, %c0_65] : memref<1x1x2x128xbf16, #tpu.memory_space<vmem>>, vector<1x1x2x128xbf16>
    %80 = vector.shape_cast %79 : vector<1x1x2x128xbf16> to vector<2x128xbf16>
    %81 = vector.shape_cast %78 : vector<2x128xbf16> to vector<1x1x2x128xbf16>
    tpu.vector_store %arg7[%c0_62, %c0_63, %c0_64, %c0_65], %81 {strides = array<i32>} : memref<1x1x2x128xbf16, #tpu.memory_space<vmem>>, vector<1x1x2x128xbf16>,
    return
  }
  func.func @transform_0(%arg0: i32, %arg1: i32) -> (i32, i32, i32, i32) {
    %c0_i32 = arith.constant 0 : i32
    %c0_i32_0 = arith.constant 0 : i32
    %c0_i32_1 = arith.constant 0 : i32
    %c0_i32_2 = arith.constant 0 : i32
    return %arg0, %c0_i32, %c0_i32_0, %c0_i32_1 : i32, i32, i32, i32
  }
  func.func @transform_1(%arg0: i32, %arg1: i32) -> (i32, i32, i32, i32) {
    %c0_i32 = arith.constant 0 : i32
    %c0_i32_0 = arith.constant 0 : i32
    %c0_i32_1 = arith.constant 0 : i32
    %c0_i32_2 = arith.constant 0 : i32
    return %arg0, %c0_i32, %c0_i32_0, %c0_i32_1 : i32, i32, i32, i32
  }
  func.func @transform_2(%arg0: i32, %arg1: i32) -> (i32, i32, i32) {
    %c0_i32 = arith.constant 0 : i32
    %c0_i32_0 = arith.constant 0 : i32
    %c0_i32_1 = arith.constant 0 : i32
    %c0_i32_2 = arith.constant 0 : i32
    return %c0_i32, %c0_i32_0, %c0_i32_1 : i32, i32, i32
  }
  func.func @transform_3(%arg0: i32, %arg1: i32) -> (i32, i32) {
    %c0_i32 = arith.constant 0 : i32
    %c0_i32_0 = arith.constant 0 : i32
    %c0_i32_1 = arith.constant 0 : i32
    return %c0_i32, %c0_i32_0 : i32, i32
  }
  func.func @transform_4(%arg0: i32, %arg1: i32) -> (i32, i32) {
    %c0_i32 = arith.constant 0 : i32
    %c0_i32_0 = arith.constant 0 : i32
    %c0_i32_1 = arith.constant 0 : i32
    return %c0_i32, %c0_i32_0 : i32, i32
  }
  func.func @transform_5(%arg0: i32, %arg1: i32) -> (i32, i32, i32, i32) {
    %c0_i32 = arith.constant 0 : i32
    %c0_i32_0 = arith.constant 0 : i32
    %c0_i32_1 = arith.constant 0 : i32
    return %arg0, %arg1, %c0_i32, %c0_i32_0 : i32, i32, i32, i32
  }
}

module attributes {stable_mosaic.version = 11 : i64} {
  func.func @_conv_kernel(%arg0: i32, %arg1: i32, %arg2: memref<1x4x2x128xbf16, #tpu.memory_space<vmem>>, %arg3: memref<1x128x128xbf16, #tpu.memory_space<vmem>>, %arg4: memref<1x128xf32, #tpu.memory_space<vmem>>, %arg5: memref<1x128xf32, #tpu.memory_space<vmem>>, %arg6: memref<1x1x2x128xbf16, #tpu.memory_space<vmem>>) attributes {dimension_semantics = [#tpu.dimension_semantics<parallel>, #tpu.dimension_semantics<arbitrary>], iteration_bounds = array<i64: 2, 2>, scalar_prefetch = 0 : i64, scratch_operands = 0 : i64, tpu.core_type = #tpu.core_type<tc>, window_params = [{transform_indices = @transform_0, window_bounds = array<i64: 1, 4, 2, 128>}, {pipeline_mode = #tpu.pipeline_mode<synchronous>, transform_indices = @transform_1, window_bounds = array<i64: 1, 128, 128>}, {pipeline_mode = #tpu.pipeline_mode<synchronous>, transform_indices = @transform_2, window_bounds = array<i64: 1, 128>}, {pipeline_mode = #tpu.pipeline_mode<synchronous>, transform_indices = @transform_3, window_bounds = array<i64: 1, 128>}, {transform_indices = @transform_4, window_bounds = array<i64: 1, 1, 2, 128>}]} {
    %cst = arith.constant 0.000000e+00 : f32
    %0 = vector.broadcast %cst : f32 to vector<2x128xf32>
    %c2_i32 = arith.constant 2 : i32
    %1 = arith.muli %arg1, %c2_i32 : i32
    %c0_i32 = arith.constant 0 : i32
    %2 = arith.addi %1, %c0_i32 : i32
    %c0 = arith.constant 0 : index
    %3 = arith.index_cast %2 : i32 to index
    %c0_0 = arith.constant 0 : index
    %c0_1 = arith.constant 0 : index
    %4 = vector.load %arg2[%c0, %3, %c0_0, %c0_1] : memref<1x4x2x128xbf16, #tpu.memory_space<vmem>>, vector<1x1x2x128xbf16>
    %5 = vector.shape_cast %4 : vector<1x1x2x128xbf16> to vector<2x128xbf16>
    %c0_2 = arith.constant 0 : index
    %c0_3 = arith.constant 0 : index
    %c0_4 = arith.constant 0 : index
    %6 = vector.load %arg3[%c0_2, %c0_3, %c0_4] : memref<1x128x128xbf16, #tpu.memory_space<vmem>>, vector<1x128x128xbf16>
    %7 = vector.shape_cast %6 : vector<1x128x128xbf16> to vector<128x128xbf16>
    %cst_5 = arith.constant dense<0.000000e+00> : vector<2x128xf32>
    %8 = tpu.matmul %5, %7, %cst_5 {dimension_numbers = #tpu.dot_dimension_numbers<[1], [0], [0], [1], [0, 0, 1, 1], [], []>} : vector<2x128xbf16>, vector<128x128xbf16>, vector<2x128xf32> -> vector<2x128xf32>
    %9 = arith.addf %0, %8 : vector<2x128xf32>
    %c0_6 = arith.constant 0 : index
    %c0_7 = arith.constant 0 : index
    %10 = vector.load %arg4[%c0_6, %c0_7] : memref<1x128xf32, #tpu.memory_space<vmem>>, vector<1x128xf32>
    %11 = vector.broadcast %10 : vector<1x128xf32> to vector<2x128xf32>
    %12 = arith.mulf %9, %11 : vector<2x128xf32>
    %c0_8 = arith.constant 0 : index
    %c0_9 = arith.constant 0 : index
    %13 = vector.load %arg5[%c0_8, %c0_9] : memref<1x128xf32, #tpu.memory_space<vmem>>, vector<1x128xf32>
    %14 = vector.broadcast %13 : vector<1x128xf32> to vector<2x128xf32>
    %15 = arith.addf %12, %14 : vector<2x128xf32>
    %16 = arith.truncf %15 : vector<2x128xf32> to vector<2x128xbf16>
    %c0_10 = arith.constant 0 : index
    %c0_11 = arith.constant 0 : index
    %c0_12 = arith.constant 0 : index
    %c0_13 = arith.constant 0 : index
    %17 = vector.load %arg6[%c0_10, %c0_11, %c0_12, %c0_13] : memref<1x1x2x128xbf16, #tpu.memory_space<vmem>>, vector<1x1x2x128xbf16>
    %18 = vector.shape_cast %17 : vector<1x1x2x128xbf16> to vector<2x128xbf16>
    %19 = vector.shape_cast %16 : vector<2x128xbf16> to vector<1x1x2x128xbf16>
    tpu.vector_store %arg6[%c0_10, %c0_11, %c0_12, %c0_13], %19 {strides = array<i32>} : memref<1x1x2x128xbf16, #tpu.memory_space<vmem>>, vector<1x1x2x128xbf16>,
    return
  }
  func.func @transform_0(%arg0: i32, %arg1: i32) -> (i32, i32, i32, i32) {
    %c0_i32 = arith.constant 0 : i32
    %c0_i32_0 = arith.constant 0 : i32
    %c0_i32_1 = arith.constant 0 : i32
    %c0_i32_2 = arith.constant 0 : i32
    return %arg0, %c0_i32, %c0_i32_0, %c0_i32_1 : i32, i32, i32, i32
  }
  func.func @transform_1(%arg0: i32, %arg1: i32) -> (i32, i32, i32) {
    %c0_i32 = arith.constant 0 : i32
    %c0_i32_0 = arith.constant 0 : i32
    %c0_i32_1 = arith.constant 0 : i32
    %c0_i32_2 = arith.constant 0 : i32
    return %c0_i32, %c0_i32_0, %c0_i32_1 : i32, i32, i32
  }
  func.func @transform_2(%arg0: i32, %arg1: i32) -> (i32, i32) {
    %c0_i32 = arith.constant 0 : i32
    %c0_i32_0 = arith.constant 0 : i32
    %c0_i32_1 = arith.constant 0 : i32
    return %c0_i32, %c0_i32_0 : i32, i32
  }
  func.func @transform_3(%arg0: i32, %arg1: i32) -> (i32, i32) {
    %c0_i32 = arith.constant 0 : i32
    %c0_i32_0 = arith.constant 0 : i32
    %c0_i32_1 = arith.constant 0 : i32
    return %c0_i32, %c0_i32_0 : i32, i32
  }
  func.func @transform_4(%arg0: i32, %arg1: i32) -> (i32, i32, i32, i32) {
    %c0_i32 = arith.constant 0 : i32
    %c0_i32_0 = arith.constant 0 : i32
    %c0_i32_1 = arith.constant 0 : i32
    return %arg0, %arg1, %c0_i32, %c0_i32_0 : i32, i32, i32, i32
  }
}

module attributes {stable_mosaic.version = 11 : i64} {
  func.func @_conv_kernel(%arg0: i32, %arg1: i32, %arg2: memref<1x4x4x128xbf16, #tpu.memory_space<vmem>>, %arg3: memref<9x128x128xbf16, #tpu.memory_space<vmem>>, %arg4: memref<1x128xf32, #tpu.memory_space<vmem>>, %arg5: memref<1x128xf32, #tpu.memory_space<vmem>>, %arg6: memref<1x1x2x128xbf16, #tpu.memory_space<vmem>>, %arg7: memref<1x1x2x128xbf16, #tpu.memory_space<vmem>>) attributes {dimension_semantics = [#tpu.dimension_semantics<parallel>, #tpu.dimension_semantics<arbitrary>], iteration_bounds = array<i64: 2, 2>, scalar_prefetch = 0 : i64, scratch_operands = 0 : i64, tpu.core_type = #tpu.core_type<tc>, window_params = [{transform_indices = @transform_0, window_bounds = array<i64: 1, 4, 4, 128>}, {pipeline_mode = #tpu.pipeline_mode<synchronous>, transform_indices = @transform_1, window_bounds = array<i64: 9, 128, 128>}, {pipeline_mode = #tpu.pipeline_mode<synchronous>, transform_indices = @transform_2, window_bounds = array<i64: 1, 128>}, {pipeline_mode = #tpu.pipeline_mode<synchronous>, transform_indices = @transform_3, window_bounds = array<i64: 1, 128>}, {transform_indices = @transform_4, window_bounds = array<i64: 1, 1, 2, 128>}, {transform_indices = @transform_5, window_bounds = array<i64: 1, 1, 2, 128>}]} {
    %cst = arith.constant 0.000000e+00 : f32
    %0 = vector.broadcast %cst : f32 to vector<2x128xf32>
    %c1_i32 = arith.constant 1 : i32
    %1 = arith.muli %arg1, %c1_i32 : i32
    %c0_i32 = arith.constant 0 : i32
    %2 = arith.addi %1, %c0_i32 : i32
    %c0 = arith.constant 0 : index
    %3 = arith.index_cast %2 : i32 to index
    %c0_0 = arith.constant 0 : index
    %c0_1 = arith.constant 0 : index
    %4 = vector.load %arg2[%c0, %3, %c0_0, %c0_1] : memref<1x4x4x128xbf16, #tpu.memory_space<vmem>>, vector<1x1x2x128xbf16>
    %5 = vector.shape_cast %4 : vector<1x1x2x128xbf16> to vector<2x128xbf16>
    %c0_2 = arith.constant 0 : index
    %c0_3 = arith.constant 0 : index
    %c0_4 = arith.constant 0 : index
    %6 = vector.load %arg3[%c0_2, %c0_3, %c0_4] : memref<9x128x128xbf16, #tpu.memory_space<vmem>>, vector<1x128x128xbf16>
    %7 = vector.shape_cast %6 : vector<1x128x128xbf16> to vector<128x128xbf16>
    %cst_5 = arith.constant dense<0.000000e+00> : vector<2x128xf32>
    %8 = tpu.matmul %5, %7, %cst_5 {dimension_numbers = #tpu.dot_dimension_numbers<[1], [0], [0], [1], [0, 0, 1, 1], [], []>} : vector<2x128xbf16>, vector<128x128xbf16>, vector<2x128xf32> -> vector<2x128xf32>
    %9 = arith.addf %0, %8 : vector<2x128xf32>
    %c0_6 = arith.constant 0 : index
    %10 = arith.index_cast %2 : i32 to index
    %c1 = arith.constant 1 : index
    %c0_7 = arith.constant 0 : index
    %11 = vector.load %arg2[%c0_6, %10, %c1, %c0_7] : memref<1x4x4x128xbf16, #tpu.memory_space<vmem>>, vector<1x1x2x128xbf16>
    %12 = vector.shape_cast %11 : vector<1x1x2x128xbf16> to vector<2x128xbf16>
    %c1_8 = arith.constant 1 : index
    %c0_9 = arith.constant 0 : index
    %c0_10 = arith.constant 0 : index
    %13 = vector.load %arg3[%c1_8, %c0_9, %c0_10] : memref<9x128x128xbf16, #tpu.memory_space<vmem>>, vector<1x128x128xbf16>
    %14 = vector.shape_cast %13 : vector<1x128x128xbf16> to vector<128x128xbf16>
    %cst_11 = arith.constant dense<0.000000e+00> : vector<2x128xf32>
    %15 = tpu.matmul %12, %14, %cst_11 {dimension_numbers = #tpu.dot_dimension_numbers<[1], [0], [0], [1], [0, 0, 1, 1], [], []>} : vector<2x128xbf16>, vector<128x128xbf16>, vector<2x128xf32> -> vector<2x128xf32>
    %16 = arith.addf %9, %15 : vector<2x128xf32>
    %c0_12 = arith.constant 0 : index
    %17 = arith.index_cast %2 : i32 to index
    %c2 = arith.constant 2 : index
    %c0_13 = arith.constant 0 : index
    %18 = vector.load %arg2[%c0_12, %17, %c2, %c0_13] : memref<1x4x4x128xbf16, #tpu.memory_space<vmem>>, vector<1x1x2x128xbf16>
    %19 = vector.shape_cast %18 : vector<1x1x2x128xbf16> to vector<2x128xbf16>
    %c2_14 = arith.constant 2 : index
    %c0_15 = arith.constant 0 : index
    %c0_16 = arith.constant 0 : index
    %20 = vector.load %arg3[%c2_14, %c0_15, %c0_16] : memref<9x128x128xbf16, #tpu.memory_space<vmem>>, vector<1x128x128xbf16>
    %21 = vector.shape_cast %20 : vector<1x128x128xbf16> to vector<128x128xbf16>
    %cst_17 = arith.constant dense<0.000000e+00> : vector<2x128xf32>
    %22 = tpu.matmul %19, %21, %cst_17 {dimension_numbers = #tpu.dot_dimension_numbers<[1], [0], [0], [1], [0, 0, 1, 1], [], []>} : vector<2x128xbf16>, vector<128x128xbf16>, vector<2x128xf32> -> vector<2x128xf32>
    %23 = arith.addf %16, %22 : vector<2x128xf32>
    %c1_i32_18 = arith.constant 1 : i32
    %24 = arith.muli %arg1, %c1_i32_18 : i32
    %c1_i32_19 = arith.constant 1 : i32
    %25 = arith.addi %24, %c1_i32_19 : i32
    %c0_20 = arith.constant 0 : index
    %26 = arith.index_cast %25 : i32 to index
    %c0_21 = arith.constant 0 : index
    %c0_22 = arith.constant 0 : index
    %27 = vector.load %arg2[%c0_20, %26, %c0_21, %c0_22] : memref<1x4x4x128xbf16, #tpu.memory_space<vmem>>, vector<1x1x2x128xbf16>
    %28 = vector.shape_cast %27 : vector<1x1x2x128xbf16> to vector<2x128xbf16>
    %c3 = arith.constant 3 : index
    %c0_23 = arith.constant 0 : index
    %c0_24 = arith.constant 0 : index
    %29 = vector.load %arg3[%c3, %c0_23, %c0_24] : memref<9x128x128xbf16, #tpu.memory_space<vmem>>, vector<1x128x128xbf16>
    %30 = vector.shape_cast %29 : vector<1x128x128xbf16> to vector<128x128xbf16>
    %cst_25 = arith.constant dense<0.000000e+00> : vector<2x128xf32>
    %31 = tpu.matmul %28, %30, %cst_25 {dimension_numbers = #tpu.dot_dimension_numbers<[1], [0], [0], [1], [0, 0, 1, 1], [], []>} : vector<2x128xbf16>, vector<128x128xbf16>, vector<2x128xf32> -> vector<2x128xf32>
    %32 = arith.addf %23, %31 : vector<2x128xf32>
    %c0_26 = arith.constant 0 : index
    %33 = arith.index_cast %25 : i32 to index
    %c1_27 = arith.constant 1 : index
    %c0_28 = arith.constant 0 : index
    %34 = vector.load %arg2[%c0_26, %33, %c1_27, %c0_28] : memref<1x4x4x128xbf16, #tpu.memory_space<vmem>>, vector<1x1x2x128xbf16>
    %35 = vector.shape_cast %34 : vector<1x1x2x128xbf16> to vector<2x128xbf16>
    %c4 = arith.constant 4 : index
    %c0_29 = arith.constant 0 : index
    %c0_30 = arith.constant 0 : index
    %36 = vector.load %arg3[%c4, %c0_29, %c0_30] : memref<9x128x128xbf16, #tpu.memory_space<vmem>>, vector<1x128x128xbf16>
    %37 = vector.shape_cast %36 : vector<1x128x128xbf16> to vector<128x128xbf16>
    %cst_31 = arith.constant dense<0.000000e+00> : vector<2x128xf32>
    %38 = tpu.matmul %35, %37, %cst_31 {dimension_numbers = #tpu.dot_dimension_numbers<[1], [0], [0], [1], [0, 0, 1, 1], [], []>} : vector<2x128xbf16>, vector<128x128xbf16>, vector<2x128xf32> -> vector<2x128xf32>
    %39 = arith.addf %32, %38 : vector<2x128xf32>
    %c0_32 = arith.constant 0 : index
    %40 = arith.index_cast %25 : i32 to index
    %c2_33 = arith.constant 2 : index
    %c0_34 = arith.constant 0 : index
    %41 = vector.load %arg2[%c0_32, %40, %c2_33, %c0_34] : memref<1x4x4x128xbf16, #tpu.memory_space<vmem>>, vector<1x1x2x128xbf16>
    %42 = vector.shape_cast %41 : vector<1x1x2x128xbf16> to vector<2x128xbf16>
    %c5 = arith.constant 5 : index
    %c0_35 = arith.constant 0 : index
    %c0_36 = arith.constant 0 : index
    %43 = vector.load %arg3[%c5, %c0_35, %c0_36] : memref<9x128x128xbf16, #tpu.memory_space<vmem>>, vector<1x128x128xbf16>
    %44 = vector.shape_cast %43 : vector<1x128x128xbf16> to vector<128x128xbf16>
    %cst_37 = arith.constant dense<0.000000e+00> : vector<2x128xf32>
    %45 = tpu.matmul %42, %44, %cst_37 {dimension_numbers = #tpu.dot_dimension_numbers<[1], [0], [0], [1], [0, 0, 1, 1], [], []>} : vector<2x128xbf16>, vector<128x128xbf16>, vector<2x128xf32> -> vector<2x128xf32>
    %46 = arith.addf %39, %45 : vector<2x128xf32>
    %c1_i32_38 = arith.constant 1 : i32
    %47 = arith.muli %arg1, %c1_i32_38 : i32
    %c2_i32 = arith.constant 2 : i32
    %48 = arith.addi %47, %c2_i32 : i32
    %c0_39 = arith.constant 0 : index
    %49 = arith.index_cast %48 : i32 to index
    %c0_40 = arith.constant 0 : index
    %c0_41 = arith.constant 0 : index
    %50 = vector.load %arg2[%c0_39, %49, %c0_40, %c0_41] : memref<1x4x4x128xbf16, #tpu.memory_space<vmem>>, vector<1x1x2x128xbf16>
    %51 = vector.shape_cast %50 : vector<1x1x2x128xbf16> to vector<2x128xbf16>
    %c6 = arith.constant 6 : index
    %c0_42 = arith.constant 0 : index
    %c0_43 = arith.constant 0 : index
    %52 = vector.load %arg3[%c6, %c0_42, %c0_43] : memref<9x128x128xbf16, #tpu.memory_space<vmem>>, vector<1x128x128xbf16>
    %53 = vector.shape_cast %52 : vector<1x128x128xbf16> to vector<128x128xbf16>
    %cst_44 = arith.constant dense<0.000000e+00> : vector<2x128xf32>
    %54 = tpu.matmul %51, %53, %cst_44 {dimension_numbers = #tpu.dot_dimension_numbers<[1], [0], [0], [1], [0, 0, 1, 1], [], []>} : vector<2x128xbf16>, vector<128x128xbf16>, vector<2x128xf32> -> vector<2x128xf32>
    %55 = arith.addf %46, %54 : vector<2x128xf32>
    %c0_45 = arith.constant 0 : index
    %56 = arith.index_cast %48 : i32 to index
    %c1_46 = arith.constant 1 : index
    %c0_47 = arith.constant 0 : index
    %57 = vector.load %arg2[%c0_45, %56, %c1_46, %c0_47] : memref<1x4x4x128xbf16, #tpu.memory_space<vmem>>, vector<1x1x2x128xbf16>
    %58 = vector.shape_cast %57 : vector<1x1x2x128xbf16> to vector<2x128xbf16>
    %c7 = arith.constant 7 : index
    %c0_48 = arith.constant 0 : index
    %c0_49 = arith.constant 0 : index
    %59 = vector.load %arg3[%c7, %c0_48, %c0_49] : memref<9x128x128xbf16, #tpu.memory_space<vmem>>, vector<1x128x128xbf16>
    %60 = vector.shape_cast %59 : vector<1x128x128xbf16> to vector<128x128xbf16>
    %cst_50 = arith.constant dense<0.000000e+00> : vector<2x128xf32>
    %61 = tpu.matmul %58, %60, %cst_50 {dimension_numbers = #tpu.dot_dimension_numbers<[1], [0], [0], [1], [0, 0, 1, 1], [], []>} : vector<2x128xbf16>, vector<128x128xbf16>, vector<2x128xf32> -> vector<2x128xf32>
    %62 = arith.addf %55, %61 : vector<2x128xf32>
    %c0_51 = arith.constant 0 : index
    %63 = arith.index_cast %48 : i32 to index
    %c2_52 = arith.constant 2 : index
    %c0_53 = arith.constant 0 : index
    %64 = vector.load %arg2[%c0_51, %63, %c2_52, %c0_53] : memref<1x4x4x128xbf16, #tpu.memory_space<vmem>>, vector<1x1x2x128xbf16>
    %65 = vector.shape_cast %64 : vector<1x1x2x128xbf16> to vector<2x128xbf16>
    %c8 = arith.constant 8 : index
    %c0_54 = arith.constant 0 : index
    %c0_55 = arith.constant 0 : index
    %66 = vector.load %arg3[%c8, %c0_54, %c0_55] : memref<9x128x128xbf16, #tpu.memory_space<vmem>>, vector<1x128x128xbf16>
    %67 = vector.shape_cast %66 : vector<1x128x128xbf16> to vector<128x128xbf16>
    %cst_56 = arith.constant dense<0.000000e+00> : vector<2x128xf32>
    %68 = tpu.matmul %65, %67, %cst_56 {dimension_numbers = #tpu.dot_dimension_numbers<[1], [0], [0], [1], [0, 0, 1, 1], [], []>} : vector<2x128xbf16>, vector<128x128xbf16>, vector<2x128xf32> -> vector<2x128xf32>
    %69 = arith.addf %62, %68 : vector<2x128xf32>
    %c0_57 = arith.constant 0 : index
    %c0_58 = arith.constant 0 : index
    %70 = vector.load %arg4[%c0_57, %c0_58] : memref<1x128xf32, #tpu.memory_space<vmem>>, vector<1x128xf32>
    %71 = vector.broadcast %70 : vector<1x128xf32> to vector<2x128xf32>
    %72 = arith.mulf %69, %71 : vector<2x128xf32>
    %c0_59 = arith.constant 0 : index
    %c0_60 = arith.constant 0 : index
    %73 = vector.load %arg5[%c0_59, %c0_60] : memref<1x128xf32, #tpu.memory_space<vmem>>, vector<1x128xf32>
    %74 = vector.broadcast %73 : vector<1x128xf32> to vector<2x128xf32>
    %75 = arith.addf %72, %74 : vector<2x128xf32>
    %c0_61 = arith.constant 0 : index
    %c0_62 = arith.constant 0 : index
    %c0_63 = arith.constant 0 : index
    %c0_64 = arith.constant 0 : index
    %76 = vector.load %arg6[%c0_61, %c0_62, %c0_63, %c0_64] : memref<1x1x2x128xbf16, #tpu.memory_space<vmem>>, vector<1x1x2x128xbf16>
    %77 = vector.shape_cast %76 : vector<1x1x2x128xbf16> to vector<2x128xbf16>
    %78 = arith.extf %77 : vector<2x128xbf16> to vector<2x128xf32>
    %79 = arith.addf %75, %78 : vector<2x128xf32>
    %cst_65 = arith.constant 0.000000e+00 : f32
    %80 = vector.broadcast %cst_65 : f32 to vector<2x128xf32>
    %81 = arith.maximumf %79, %80 : vector<2x128xf32>
    %82 = arith.truncf %81 : vector<2x128xf32> to vector<2x128xbf16>
    %c0_66 = arith.constant 0 : index
    %c0_67 = arith.constant 0 : index
    %c0_68 = arith.constant 0 : index
    %c0_69 = arith.constant 0 : index
    %83 = vector.load %arg7[%c0_66, %c0_67, %c0_68, %c0_69] : memref<1x1x2x128xbf16, #tpu.memory_space<vmem>>, vector<1x1x2x128xbf16>
    %84 = vector.shape_cast %83 : vector<1x1x2x128xbf16> to vector<2x128xbf16>
    %85 = vector.shape_cast %82 : vector<2x128xbf16> to vector<1x1x2x128xbf16>
    tpu.vector_store %arg7[%c0_66, %c0_67, %c0_68, %c0_69], %85 {strides = array<i32>} : memref<1x1x2x128xbf16, #tpu.memory_space<vmem>>, vector<1x1x2x128xbf16>,
    return
  }
  func.func @transform_0(%arg0: i32, %arg1: i32) -> (i32, i32, i32, i32) {
    %c0_i32 = arith.constant 0 : i32
    %c0_i32_0 = arith.constant 0 : i32
    %c0_i32_1 = arith.constant 0 : i32
    %c0_i32_2 = arith.constant 0 : i32
    return %arg0, %c0_i32, %c0_i32_0, %c0_i32_1 : i32, i32, i32, i32
  }
  func.func @transform_1(%arg0: i32, %arg1: i32) -> (i32, i32, i32) {
    %c0_i32 = arith.constant 0 : i32
    %c0_i32_0 = arith.constant 0 : i32
    %c0_i32_1 = arith.constant 0 : i32
    %c0_i32_2 = arith.constant 0 : i32
    return %c0_i32, %c0_i32_0, %c0_i32_1 : i32, i32, i32
  }
  func.func @transform_2(%arg0: i32, %arg1: i32) -> (i32, i32) {
    %c0_i32 = arith.constant 0 : i32
    %c0_i32_0 = arith.constant 0 : i32
    %c0_i32_1 = arith.constant 0 : i32
    return %c0_i32, %c0_i32_0 : i32, i32
  }
  func.func @transform_3(%arg0: i32, %arg1: i32) -> (i32, i32) {
    %c0_i32 = arith.constant 0 : i32
    %c0_i32_0 = arith.constant 0 : i32
    %c0_i32_1 = arith.constant 0 : i32
    return %c0_i32, %c0_i32_0 : i32, i32
  }
  func.func @transform_4(%arg0: i32, %arg1: i32) -> (i32, i32, i32, i32) {
    %c0_i32 = arith.constant 0 : i32
    %c0_i32_0 = arith.constant 0 : i32
    %c0_i32_1 = arith.constant 0 : i32
    return %arg0, %arg1, %c0_i32, %c0_i32_0 : i32, i32, i32, i32
  }
  func.func @transform_5(%arg0: i32, %arg1: i32) -> (i32, i32, i32, i32) {
    %c0_i32 = arith.constant 0 : i32
    %c0_i32_0 = arith.constant 0 : i32
    %c0_i32_1 = arith.constant 0 : i32
    return %arg0, %arg1, %c0_i32, %c0_i32_0 : i32, i32, i32, i32
  }
}

module attributes {stable_mosaic.version = 11 : i64} {
  func.func @_avgpool_fc_kernel(%arg0: i32, %arg1: memref<2x4x128xbf16, #tpu.memory_space<vmem>>, %arg2: memref<128x128xf32, #tpu.memory_space<vmem>>, %arg3: memref<1x128xf32, #tpu.memory_space<vmem>>, %arg4: memref<2x128xf32, #tpu.memory_space<vmem>>) attributes {dimension_semantics = [#tpu.dimension_semantics<arbitrary>], iteration_bounds = array<i64: 1>, scalar_prefetch = 0 : i64, scratch_operands = 0 : i64, tpu.core_type = #tpu.core_type<tc>, window_params = [{pipeline_mode = #tpu.pipeline_mode<synchronous>, transform_indices = @transform_0, window_bounds = array<i64: 2, 4, 128>}, {pipeline_mode = #tpu.pipeline_mode<synchronous>, transform_indices = @transform_1, window_bounds = array<i64: 128, 128>}, {pipeline_mode = #tpu.pipeline_mode<synchronous>, transform_indices = @transform_2, window_bounds = array<i64: 1, 128>}, {pipeline_mode = #tpu.pipeline_mode<synchronous>, transform_indices = @transform_3, window_bounds = array<i64: 2, 128>}]} {
    %c0 = arith.constant 0 : index
    %c0_0 = arith.constant 0 : index
    %c0_1 = arith.constant 0 : index
    %0 = vector.load %arg1[%c0, %c0_0, %c0_1] : memref<2x4x128xbf16, #tpu.memory_space<vmem>>, vector<2x4x128xbf16>
    %1 = arith.extf %0 : vector<2x4x128xbf16> to vector<2x4x128xf32>
    %cst = arith.constant dense<0.000000e+00> : vector<2x128xf32>
    %2 = vector.multi_reduction <add>, %1, %cst [1] : vector<2x4x128xf32> to vector<2x128xf32>
    %cst_2 = arith.constant 4.000000e+00 : f32
    %3 = vector.broadcast %cst_2 : f32 to vector<2x128xf32>
    %4 = arith.divf %2, %3 : vector<2x128xf32>
    %c0_3 = arith.constant 0 : index
    %c0_4 = arith.constant 0 : index
    %5 = vector.load %arg2[%c0_3, %c0_4] : memref<128x128xf32, #tpu.memory_space<vmem>>, vector<128x128xf32>
    %cst_5 = arith.constant dense<0.000000e+00> : vector<2x128xf32>
    %6 = tpu.matmul %4, %5, %cst_5 {dimension_numbers = #tpu.dot_dimension_numbers<[1], [0], [0], [1], [0, 0, 1, 1], [], []>} : vector<2x128xf32>, vector<128x128xf32>, vector<2x128xf32> -> vector<2x128xf32>
    %c0_6 = arith.constant 0 : index
    %c0_7 = arith.constant 0 : index
    %7 = vector.load %arg3[%c0_6, %c0_7] : memref<1x128xf32, #tpu.memory_space<vmem>>, vector<1x128xf32>
    %8 = vector.broadcast %7 : vector<1x128xf32> to vector<2x128xf32>
    %9 = arith.addf %6, %8 : vector<2x128xf32>
    %c0_8 = arith.constant 0 : index
    %c0_9 = arith.constant 0 : index
    %10 = vector.load %arg4[%c0_8, %c0_9] : memref<2x128xf32, #tpu.memory_space<vmem>>, vector<2x128xf32>
    tpu.vector_store %arg4[%c0_8, %c0_9], %9 {strides = array<i32>} : memref<2x128xf32, #tpu.memory_space<vmem>>, vector<2x128xf32>,
    return
  }
  func.func @transform_0(%arg0: i32) -> (i32, i32, i32) {
    %c0_i32 = arith.constant 0 : i32
    %c0_i32_0 = arith.constant 0 : i32
    %c0_i32_1 = arith.constant 0 : i32
    %c0_i32_2 = arith.constant 0 : i32
    return %c0_i32, %c0_i32_0, %c0_i32_1 : i32, i32, i32
  }
  func.func @transform_1(%arg0: i32) -> (i32, i32) {
    %c0_i32 = arith.constant 0 : i32
    %c0_i32_0 = arith.constant 0 : i32
    %c0_i32_1 = arith.constant 0 : i32
    return %c0_i32, %c0_i32_0 : i32, i32
  }
  func.func @transform_2(%arg0: i32) -> (i32, i32) {
    %c0_i32 = arith.constant 0 : i32
    %c0_i32_0 = arith.constant 0 : i32
    %c0_i32_1 = arith.constant 0 : i32
    return %c0_i32, %c0_i32_0 : i32, i32
  }
  func.func @transform_3(%arg0: i32) -> (i32, i32) {
    %c0_i32 = arith.constant 0 : i32
    %c0_i32_0 = arith.constant 0 : i32
    %c0_i32_1 = arith.constant 0 : i32
    return %c0_i32, %c0_i32_0 : i32, i32
  }
}

</mosaic_0001>

<bundles_post_ra>
// kernel: _lambda_.12
= control target key start
LH: loop header
LB: loop body
LE: loop exit
PB: predicated region body
PF: predicated region fallthrough
CT: control target
= control target key end

     0   :  { %vm268_vm0 = vcmask 1043456   ;;  %s1435_s0 = inlined_call_operand.vmem [shape: f32[16,4,1024], index: 0, kind: input, shape index: {}]   ;;  %s1436_s1 = inlined_call_operand.<no memory space> [shape: f32[1,1], index: 1, kind: input, shape index: {}]   ;;  %s1437_s2 = inlined_call_operand.vmem [shape: f32[4,1024], index: 2, kind: output, shape index: {}]  }
   0x1   :  { %v633_v0 = vld [vmem:[%s1435_s0] sm:$0xff]  ;;  %v654_v7 = vld [vmem:[%s1435_s0 + $0x8] sm:$0xff]  ;;  %v664_v10 = vld [vmem:[%s1435_s0 + $0x10] sm:$0xff]  ;;  %v712_v23 = vstv %s1436_s1 }
   0x2   :  { %v638_v1 = vld [vmem:[%s1435_s0 + $0x20] sm:$0xff]  ;;  %v269_v2 = vsel %vm268_vm0, %v633_v0, 0.0  ;;  %v669_v11 = vld [vmem:[%s1435_s0 + $0x18] sm:$0xff]  ;;  %v674_v12 = vld [vmem:[%s1435_s0 + $0x28] sm:$0xff]  ;;  %v140_v20 = vcombine.high %v633_v0, %v633_v0  ;;  %1455 = vst [vmem:[#allocation3_spill] sm:$0xff] %v712_v23 }
   0x3   :  { %v270_v3 = vsel %vm268_vm0, %v638_v1, 0.0  ;;  %v647_v4 = vld [vmem:[%s1435_s0 + $0x40] sm:$0xff]  ;;  %v681_v14 = vld [vmem:[%s1435_s0 + $0x30] sm:$0xff]  ;;  %v686_v15 = vld [vmem:[%s1435_s0 + $0x38] sm:$0xff]  ;;  %v144_v29 = vcombine.high %v638_v1, %v638_v1 }
   0x4   :  { %v271_v5 = vadd.f32 %v270_v3, %v269_v2  ;;  %v272_v6 = vsel %vm268_vm0, %v647_v4, 0.0  ;;  %v659_v8 = vld [vmem:[%s1435_s0 + $0x60] sm:$0xff]  ;;  %v696_v18 = vld [vmem:[%s1435_s0 + $0x48] sm:$0xff]  ;;  %v701_v19 = vld [vmem:[%s1435_s0 + $0x50] sm:$0xff]  ;;  %v148_v41 = vcombine.high %v647_v4, %v647_v4 }
   0x5   :  { %v274_v13 = vsel %vm268_vm0, %v659_v8, 0.0  ;;  %v691_v16 = vld [vmem:[%s1435_s0 + $0x80] sm:$0xff]  ;;  %v717_v24 = vld [vmem:[%s1435_s0 + $0x58] sm:$0xff]  ;;  %v722_v25 = vld [vmem:[%s1435_s0 + $0x68] sm:$0xff]  ;;  %v301_v0 = vsel %vm268_vm0, %v144_v29, 0.0 }
   0x6   :  { %v273_v9 = vadd.f32 %v272_v6, %v271_v5  ;;  %v276_v22 = vsel %vm268_vm0, %v691_v16, 0.0  ;;  %v727_v26 = vld [vmem:[%s1435_s0 + $0xa0] sm:$0xff]  ;;  %v738_v31 = vld [vmem:[%s1435_s0 + $0x70] sm:$0xff]  ;;  %v743_v32 = vld [vmem:[%s1435_s0 + $0x78] sm:$0xff] }
   0x7   :  { %1456 = vst [vmem:[#allocation4_spill] sm:$0xff] %v743_v32  ;;  %v748_v33 = vld [vmem:[%s1435_s0 + $0x88] sm:$0xff]  ;;  %v278_v37 = vsel %vm268_vm0, %v727_v26, 0.0  ;;  %v761_v38 = vld [vmem:[%s1435_s0 + $0x90] sm:$0xff]  ;;  %v766_v39 = vld [vmem:[%s1435_s0 + $0x98] sm:$0xff] }
   0x8   :  { %v275_v17 = vadd.f32 %v274_v13, %v273_v9  ;;  %1457 = vst [vmem:[#allocation5_spill] sm:$0xff] %v766_v39  ;;  %v771_v40 = vld [vmem:[%s1435_s0 + $0xc0] sm:$0xff]  ;;  %v782_v45 = vld [vmem:[%s1435_s0 + $0xa8] sm:$0xff]  ;;  %v787_v46 = vld [vmem:[%s1435_s0 + $0xb0] sm:$0xff] }
   0x9   :  { %v280_v50 = vsel %vm268_vm0, %v771_v40, 0.0  ;;  %v800_v51 = vld [vmem:[%s1435_s0 + $0xb8] sm:$0xff]  ;;  %v805_v52 = vld [vmem:[%s1435_s0 + $0xc8] sm:$0xff]  ;;  %v810_v53 = vld [vmem:[%s1435_s0 + $0xe0] sm:$0xff] }
   0xa   :  { %v277_v30 = vadd.f32 %v276_v22, %v275_v17  ;;  %1458 = vst [vmem:[#allocation6_spill] sm:$0xff] %v800_v51  ;;  %v821_v58 = vld [vmem:[%s1435_s0 + $0xd0] sm:$0xff]  ;;  %v826_v59 = vld [vmem:[%s1435_s0 + $0xd8] sm:$0xff]  ;;  %v831_v60 = vld [vmem:[%s1435_s0 + $0xe8] sm:$0xff]  ;;  %v282_v2 = vsel %vm268_vm0, %v810_v53, 0.0  ;;  %v336_v51 = vsel %vm268_vm0, %v722_v25, 0.0 }
   0xb   :  { %1459 = vst [vmem:[#allocation7_spill] sm:$0xff] %v826_v59  ;;  %v844_v3 = vld [vmem:[%s1435_s0 + $0xf0] sm:$0xff]  ;;  %v849_v5 = vld [vmem:[%s1435_s0 + $0xf8] sm:$0xff]  ;;  %v854_v6 = vld [vmem:[%s1435_s0 + $0x100] sm:$0xff] }
   0xc   :  { %v279_v44 = vadd.f32 %v278_v37, %v277_v30  ;;  %1460 = vst [vmem:[#allocation8_spill] sm:$0xff] %v849_v5  ;;  %v865_v30 = vld [vmem:[%s1435_s0 + $0x108] sm:$0xff]  ;;  %v870_v37 = vld [vmem:[%s1435_s0 + $0x110] sm:$0xff]  ;;  %v888_v55 = vld [vmem:[%s1435_s0 + $0x120] sm:$0xff] }
   0xd   :  { %v904_v62 = vld [vmem:[%s1435_s0 + $0x130] sm:$0xff]  ;;  %v909_v54 = vld [vmem:[%s1435_s0 + $0x138] sm:$0xff]  ;;  %v914_v47 = vld [vmem:[%s1435_s0 + $0x140] sm:$0xff]  ;;  %v286_v43 = vsel %vm268_vm0, %v888_v55, 0.0 }
   0xe   :  { %v281_v57 = vadd.f32 %v280_v50, %v279_v44  ;;  %v893_v44 = vld [vmem:[%s1435_s0 + $0x128] sm:$0xff]  ;;  %1462 = vst [vmem:[#allocation10_spill] sm:$0xff] %v909_v54  ;;  %v932_v27 = vld [vmem:[%s1435_s0 + $0x150] sm:$0xff]  ;;  %v288_v36 = vsel %vm268_vm0, %v914_v47, 0.0  ;;  %v180_v34 = vcombine.high %v914_v47, %v914_v47  ;;  %v987_v49 = vld [vmem:[%s1435_s0 + $0x1a0] sm:$0xff]  ;;  %v331_v54 = vsel %vm268_vm0, %v654_v7, 0.0 }
   0xf   :  { %v927_v35 = vld [vmem:[%s1435_s0 + $0x148] sm:$0xff]  ;;  %v1005_v50 = vld [vmem:[%s1435_s0 + $0x1b0] sm:$0xff]  ;;  %v68_v56 = vld [vmem:[%s1435_s0 + $0x1c0] sm:$0xff]  ;;  %v192_v4 = vcombine.high %v987_v49, %v987_v49  ;;  %v294_v23 = vsel %vm268_vm0, %v987_v49, 0.0  ;;  %v332_v49 = vsel %vm268_vm0, %v674_v12, 0.0 }
  0x10   :  { %v283_v22 = vadd.f32 %v282_v2, %v281_v57  ;;  %v284_v57 = vsel %vm268_vm0, %v854_v6, 0.0  ;;  %v883_v2 = vld [vmem:[%s1435_s0 + $0x118] sm:$0xff]  ;;  %v948_v61 = vld [vmem:[%s1435_s0 + $0x168] sm:$0xff]  ;;  %v1038_v63 = vld [vmem:[%s1435_s0 + $0x1d0] sm:$0xff]  ;;  %v333_v39 = vadd.f32 %v332_v49, %v331_v54  ;;  %v296_v32 = vsel %vm268_vm0, %v68_v56, 0.0 }
  0x11   :  { %1461 = vst [vmem:[#allocation9_spill] sm:$0xff] %v883_v2  ;;  %v977_v42 = vld [vmem:[%s1435_s0 + $0x188] sm:$0xff]  ;;  %1463 = vst [vmem:[#allocation11_spill] sm:$0xff] %v1038_v63  ;;  %v1467_v63 = vcombine.high %v771_v40, %v771_v40  ;;  %v1469_v54 = vcombine.high %v854_v6, %v854_v6  ;;  %v319_v40 = vsel %vm268_vm0, %v180_v34, 0.0  ;;  %v1471_v6 = vcombine.high %v654_v7, %v654_v7 }
  0x12   :  { %v285_v17 = vadd.f32 %v284_v57, %v283_v22  ;;  %v937_v22 = vld [vmem:[%s1435_s0 + $0x160] sm:$0xff]  ;;  %v982_v57 = vld [vmem:[%s1435_s0 + $0x190] sm:$0xff]  ;;  %v1000_v28 = vld [vmem:[%s1435_s0 + $0x1a8] sm:$0xff]  ;;  %v1131_v7 = vsel %vm268_vm0, %v192_v4, 0.0 }
  0x13   :  { %v184_v47 = vcombine.high %v937_v22, %v937_v22  ;;  %v1021_v48 = vld [vmem:[%s1435_s0 + $0x1c8] sm:$0xff] }
  0x14   :  { %v287_v13 = vadd.f32 %v286_v43, %v285_v17  ;;  %v961_v43 = vld [vmem:[%s1435_s0 + $0x170] sm:$0xff]  ;;  %v966_v17 = vld [vmem:[%s1435_s0 + $0x180] sm:$0xff] }
  0x15   :  { %v292_v9 = vsel %vm268_vm0, %v966_v17, 0.0  ;;  %v321_v49 = vsel %vm268_vm0, %v184_v47, 0.0 }
  0x16   :  { %v289_v21 = vadd.f32 %v288_v36, %v287_v13  ;;  %v290_v13 = vsel %vm268_vm0, %v937_v22, 0.0  ;;  %v300_v22 = vsel %vm268_vm0, %v140_v20, 0.0  ;;  %v303_v20 = vsel %vm268_vm0, %v148_v41, 0.0  ;;  %v1052_v41 = vld [vmem:[%s1435_s0 + $0x1e8] sm:$0xff] }
  0x17   :  { %v302_v29 = vadd.f32 %v301_v0, %v300_v22  ;;  %v1065_v22 = vld [vmem:[%s1435_s0 + $0x1f0] sm:$0xff]  ;;  %v196_v0 = vcombine.high %v68_v56, %v68_v56  ;;  %v315_v56 = vsel %vm268_vm0, %v1469_v54, 0.0  ;;  %v1474_v54 = vcombine.high %v722_v25, %v722_v25 }
  0x18   :  { %v291_v36 = vadd.f32 %v290_v13, %v289_v21  ;;  %v188_v13 = vcombine.high %v966_v17, %v966_v17  ;;  %v72_v21 = vld [vmem:[%s1435_s0 + $0x1e0] sm:$0xff]  ;;  %v1464_v17 = vcombine.high %v659_v8, %v659_v8  ;;  %v1465_v8 = vcombine.high %v691_v16, %v691_v16 }
  0x19   :  { %v304_v59 = vadd.f32 %v303_v20, %v302_v29  ;;  %v334_v20 = vsel %vm268_vm0, %v696_v18, 0.0  ;;  %v1466_v16 = vcombine.high %v727_v26, %v727_v26  ;;  %v311_v29 = vsel %vm268_vm0, %v1467_v63, 0.0 }
  0x1a   :  { %v293_v2 = vadd.f32 %v292_v9, %v291_v36  ;;  %v305_v1 = vsel %vm268_vm0, %v1464_v17, 0.0  ;;  %v200_v36 = vcombine.high %v72_v21, %v72_v21  ;;  %v307_v17 = vsel %vm268_vm0, %v1465_v8, 0.0 }
  0x1b   :  { %v306_v5 = vadd.f32 %v305_v1, %v304_v59  ;;  %v309_v8 = vsel %vm268_vm0, %v1466_v16, 0.0  ;;  %v298_v59 = vsel %vm268_vm0, %v72_v21, 0.0  ;;  %v1470_v21 = vcombine.high %v888_v55, %v888_v55 }
  0x1c   :  { %v295_v9 = vadd.f32 %v294_v23, %v293_v2  ;;  %v1468_v23 = vcombine.high %v810_v53, %v810_v53  ;;  %v335_v2 = vadd.f32 %v334_v20, %v333_v39  ;;  %v338_v63 = vsel %vm268_vm0, %v748_v33, 0.0 }
  0x1d   :  { %v308_v1 = vadd.f32 %v307_v17, %v306_v5  ;;  %v317_v17 = vsel %vm268_vm0, %v1470_v21, 0.0  ;;  %v362_v39 = vsel %vm268_vm0, %v1471_v6, 0.0  ;;  %v340_v55 = vsel %vm268_vm0, %v782_v45, 0.0 }
  0x1e   :  { %v313_v26 = vsel %vm268_vm0, %v1468_v23, 0.0  ;;  %v297_v53 = vadd.f32 %v296_v32, %v295_v9  ;;  %v337_v16 = vadd.f32 %v336_v51, %v335_v2  ;;  %v1473_v32 = vcombine.high %v696_v18, %v696_v18 }
  0x1f   :  { %v310_v5 = vadd.f32 %v309_v8, %v308_v1  ;;  %v1472_v8 = vcombine.high %v674_v12, %v674_v12  ;;  %v323_v51 = vsel %vm268_vm0, %v188_v13, 0.0  ;;  %v1134_v23 = vsel %vm268_vm0, %v196_v0, 0.0 }
  0x20   :  { %v365_v47 = vsel %vm268_vm0, %v1473_v32, 0.0  ;;  %v339_v9 = vadd.f32 %v338_v63, %v337_v16  ;;  %v342_v12 = vsel %vm268_vm0, %v805_v52, 0.0  ;;  %v367_v18 = vsel %vm268_vm0, %v1474_v54, 0.0 }
  0x21   :  { %v312_v20 = vadd.f32 %v311_v29, %v310_v5  ;;  %v363_v34 = vsel %vm268_vm0, %v1472_v8, 0.0  ;;  %v1142_v2 = vadd.f32 %v298_v59, %v297_v53  ;;  %v1145_v13 = vsel %vm268_vm0, %v200_v36, 0.0 }
  0x22   :  { %v364_v29 = vadd.f32 %v363_v34, %v362_v39  ;;  %v341_v4 = vadd.f32 %v340_v55, %v339_v9  ;;  %v344_v0 = vsel %vm268_vm0, %v831_v60, 0.0  ;;  %v1475_v63 = vcombine.high %v748_v33, %v748_v33 }
  0x23   :  { %v314_v1 = vadd.f32 %v313_v26, %v312_v20  ;;  %v346_v26 = vsel %vm268_vm0, %v865_v30, 0.0  ;;  %v348_v59 = vsel %vm268_vm0, %v893_v44, 0.0  ;;  %v1476_v53 = vcombine.high %v782_v45, %v782_v45 }
  0x24   :  { %v366_v5 = vadd.f32 %v365_v47, %v364_v29  ;;  %v369_v25 = vsel %vm268_vm0, %v1475_v63, 0.0  ;;  %v343_v16 = vadd.f32 %v342_v12, %v341_v4  ;;  %v393_v39 = vsel %vm268_vm0, %v664_v10, 0.0 }
  0x25   :  { %v316_v21 = vadd.f32 %v315_v56, %v314_v1  ;;  %v371_v56 = vsel %vm268_vm0, %v1476_v53, 0.0  ;;  %v394_v20 = vsel %vm268_vm0, %v681_v14, 0.0  ;;  %v396_v33 = vsel %vm268_vm0, %v701_v19, 0.0 }
  0x26   :  { %v368_v36 = vadd.f32 %v367_v18, %v366_v5  ;;  %v345_v55 = vadd.f32 %v344_v0, %v343_v16  ;;  %v350_v8 = vsel %vm268_vm0, %v927_v35, 0.0  ;;  %v395_v32 = vadd.f32 %v394_v20, %v393_v39 }
  0x27   :  { %v318_v6 = vadd.f32 %v317_v17, %v316_v21  ;;  %v352_v45 = vsel %vm268_vm0, %v948_v61, 0.0  ;;  %v1477_v17 = vcombine.high %v805_v52, %v805_v52  ;;  %v398_v29 = vsel %vm268_vm0, %v738_v31, 0.0 }
  0x28   :  { %v370_v34 = vadd.f32 %v369_v25, %v368_v36  ;;  %v347_v1 = vadd.f32 %v346_v26, %v345_v55  ;;  %v354_v12 = vsel %vm268_vm0, %v977_v42, 0.0  ;;  %v397_v18 = vadd.f32 %v396_v33, %v395_v32 }
  0x29   :  { %v320_v47 = vadd.f32 %v319_v40, %v318_v6  ;;  %v373_v9 = vsel %vm268_vm0, %v1477_v17, 0.0  ;;  %v1181_v40 = vsel %vm268_vm0, %v1000_v28, 0.0  ;;  %v1185_v4 = vsel %vm268_vm0, %v1021_v48, 0.0 }
  0x2a   :  { %v372_v54 = vadd.f32 %v371_v56, %v370_v34  ;;  %v1478_v52 = vcombine.high %v831_v60, %v831_v60  ;;  %v400_v21 = vsel %vm268_vm0, %v761_v38, 0.0  ;;  %v349_v0 = vadd.f32 %v348_v59, %v347_v1 }
  0x2b   :  { %v1195_v26 = vsel %vm268_vm0, %v1052_v41, 0.0  ;;  %v399_v25 = vadd.f32 %v398_v29, %v397_v18  ;;  %v322_v16 = vadd.f32 %v321_v49, %v320_v47  ;;  %v1479_v36 = vcombine.high %v865_v30, %v865_v30 }
  0x2c   :  { %v375_v5 = vsel %vm268_vm0, %v1478_v52, 0.0  ;;  %v374_v63 = vadd.f32 %v373_v9, %v372_v54  ;;  %v1480_v60 = vcombine.high %v893_v44, %v893_v44  ;;  %v402_v59 = vsel %vm268_vm0, %v787_v46, 0.0 }
  0x2d   :  { %v377_v53 = vsel %vm268_vm0, %v1479_v36, 0.0  ;;  %v1481_v39 = vcombine.high %v927_v35, %v927_v35  ;;  %v401_v49 = vadd.f32 %v400_v21, %v399_v25  ;;  %v404_v30 = vsel %vm268_vm0, %v821_v58, 0.0 }
  0x2e   :  { %v379_v56 = vsel %vm268_vm0, %v1480_v60, 0.0  ;;  %v376_v6 = vadd.f32 %v375_v5, %v374_v63  ;;  %v351_v33 = vadd.f32 %v350_v8, %v349_v0  ;;  %v1482_v55 = vcombine.high %v664_v10, %v664_v10 }
  0x2f   :  { %v381_v20 = vsel %vm268_vm0, %v1481_v39, 0.0  ;;  %v1483_v34 = vcombine.high %v681_v14, %v681_v14  ;;  %v1484_v35 = vcombine.high %v701_v19, %v701_v19  ;;  %v1485_v9 = vcombine.high %v948_v61, %v948_v61 }
  0x30   :  { %v424_v44 = vsel %vm268_vm0, %v1482_v55, 0.0  ;;  %v378_v17 = vadd.f32 %v377_v53, %v376_v6  ;;  %v403_v29 = vadd.f32 %v402_v59, %v401_v49  ;;  %v324_v1 = vadd.f32 %v323_v51, %v322_v16 }
  0x31   :  { %v425_v32 = vsel %vm268_vm0, %v1483_v34, 0.0  ;;  %v427_v47 = vsel %vm268_vm0, %v1484_v35, 0.0  ;;  %v383_v8 = vsel %vm268_vm0, %v1485_v9, 0.0  ;;  %v1486_v54 = vcombine.high %v977_v42, %v977_v42 }
  0x32   :  { %v426_v10 = vadd.f32 %v425_v32, %v424_v44  ;;  %v406_v18 = vsel %vm268_vm0, %v844_v3, 0.0  ;;  %v1487_v19 = vcombine.high %v738_v31, %v738_v31  ;;  %v380_v5 = vadd.f32 %v379_v56, %v378_v17 }
  0x33   :  { %v385_v14 = vsel %vm268_vm0, %v1486_v54, 0.0  ;;  %v1488_v61 = vcombine.high %v1000_v28, %v1000_v28  ;;  %v405_v51 = vadd.f32 %v404_v30, %v403_v29  ;;  %v353_v63 = vadd.f32 %v352_v45, %v351_v33 }
  0x34   :  { %v429_v52 = vsel %vm268_vm0, %v1487_v19, 0.0  ;;  %v428_v0 = vadd.f32 %v427_v47, %v426_v10  ;;  %v1489_v42 = vcombine.high %v1021_v48, %v1021_v48  ;;  %v408_v16 = vsel %vm268_vm0, %v870_v37, 0.0  ;;  %v1495_v10 = vld [vmem:[#allocation11_spill] sm:$0xff] }
  0x35   :  { %v387_v21 = vsel %vm268_vm0, %v1488_v61, 0.0  ;;  %v1490_v31 = vcombine.high %v761_v38, %v761_v38  ;;  %v382_v53 = vadd.f32 %v381_v20, %v380_v5  ;;  %v1491_v28 = vcombine.high %v1052_v41, %v1052_v41 }
  0x36   :  { %v389_v25 = vsel %vm268_vm0, %v1489_v42, 0.0  ;;  %v407_v45 = vadd.f32 %v406_v18, %v405_v51  ;;  %v430_v56 = vadd.f32 %v429_v52, %v428_v0  ;;  %v326_v48 = vadd.f32 %v1131_v7, %v324_v1  ;;  %v1497_v52 = vld [vmem:[#allocation4_spill] sm:$0xff] }
  0x37   :  { %v431_v36 = vsel %vm268_vm0, %v1490_v31, 0.0  ;;  %v1257_v60 = vsel %vm268_vm0, %v1491_v28, 0.0  ;;  %v410_v59 = vsel %vm268_vm0, %v904_v62, 0.0  ;;  %v412_v6 = vsel %vm268_vm0, %v932_v27, 0.0  ;;  %v1500_v31 = vld [vmem:[#allocation5_spill] sm:$0xff] }
  0x38   :  { %v1492_v38 = vcombine.high %v787_v46, %v787_v46  ;;  %v384_v20 = vadd.f32 %v383_v8, %v382_v53  ;;  %v409_v41 = vadd.f32 %v408_v16, %v407_v45  ;;  %v414_v49 = vsel %vm268_vm0, %v961_v43, 0.0 }
  0x39   :  { %v432_v30 = vadd.f32 %v431_v36, %v430_v56  ;;  %v355_v33 = vadd.f32 %v354_v12, %v353_v63  ;;  %v416_v7 = vsel %vm268_vm0, %v982_v57, 0.0  ;;  %v1493_v55 = vcombine.high %v821_v58, %v821_v58 }
  0x3a   :  { %v433_v39 = vsel %vm268_vm0, %v1492_v38, 0.0  ;;  %v455_v46 = vsel %vm268_vm0, %v669_v11, 0.0  ;;  %v386_v34 = vadd.f32 %v385_v14, %v384_v20  ;;  %v411_v32 = vadd.f32 %v410_v59, %v409_v41  ;;  %v1502_v59 = vld [vmem:[#allocation6_spill] sm:$0xff] }
  0x3b   :  { %v435_v44 = vsel %vm268_vm0, %v1493_v55, 0.0  ;;  %v418_v35 = vsel %vm268_vm0, %v1005_v50, 0.0  ;;  %v434_v47 = vadd.f32 %v433_v39, %v432_v30  ;;  %v328_v17 = vadd.f32 %v1134_v23, %v326_v48  ;;  %v1506_v30 = vld [vmem:[#allocation7_spill] sm:$0xff] }
  0x3c   :  { %v1494_v12 = vcombine.high %v844_v3, %v844_v3  ;;  %v456_v58 = vsel %vm268_vm0, %v686_v15, 0.0  ;;  %v458_v8 = vsel %vm268_vm0, %v717_v24, 0.0  ;;  %v413_v29 = vadd.f32 %v412_v6, %v411_v32 }
  0x3d   :  { %v420_v1 = vsel %vm268_vm0, %v1495_v10, 0.0  ;;  %v436_v54 = vadd.f32 %v435_v44, %v434_v47  ;;  %v457_v14 = vadd.f32 %v456_v58, %v455_v46  ;;  %v357_v18 = vadd.f32 %v1181_v40, %v355_v33 }
  0x3e   :  { %v437_v9 = vsel %vm268_vm0, %v1494_v12, 0.0  ;;  %v388_v23 = vadd.f32 %v387_v21, %v386_v34  ;;  %v1496_v3 = vcombine.high %v870_v37, %v870_v37  ;;  %v460_v5 = vsel %vm268_vm0, %v1497_v52, 0.0 }
  0x3f   :  { %v415_v61 = vadd.f32 %v414_v49, %v413_v29  ;;  %v422_v51 = vsel %vm268_vm0, %v1065_v22, 0.0  ;;  %v438_v0 = vadd.f32 %v437_v9, %v436_v54  ;;  %v459_v63 = vadd.f32 %v458_v8, %v457_v14 }
  0x40   :  { %v439_v19 = vsel %vm268_vm0, %v1496_v3, 0.0  ;;  %v330_v42 = vadd.f32 %v1145_v13, %v328_v17  ;;  %v1498_v40 = vcombine.high %v904_v62, %v904_v62  ;;  %v1499_v37 = vcombine.high %v932_v27, %v932_v27  ;;  %v1510_v17 = vld [vmem:[#allocation8_spill] sm:$0xff] }
  0x41   :  { %v462_v36 = vsel %vm268_vm0, %v1500_v31, 0.0  ;;  %v417_v53 = vadd.f32 %v416_v7, %v415_v61  ;;  %v440_v28 = vadd.f32 %v439_v19, %v438_v0  ;;  %v1501_v45 = vcombine.high %v961_v43, %v961_v43 }
  0x42   :  { %v441_v21 = vsel %vm268_vm0, %v1498_v40, 0.0  ;;  %v443_v16 = vsel %vm268_vm0, %v1499_v37, 0.0  ;;  %v461_v56 = vadd.f32 %v460_v5, %v459_v63  ;;  %v359_v62 = vadd.f32 %v1185_v4, %v357_v18  ;;  %v1514_v18 = vld [vmem:[#allocation10_spill] sm:$0xff]  ;;  %v1517_v40 = vld [vmem:[#allocation3_spill] sm:$0xff] }
  0x43   :  { %v445_v13 = vsel %vm268_vm0, %v1501_v45, 0.0  ;;  %v390_v48 = vadd.f32 %v389_v25, %v388_v23  ;;  %v464_v6 = vsel %vm268_vm0, %v1502_v59, 0.0  ;;  %v1503_v27 = vcombine.high %v669_v11, %v669_v11 }
  0x44   :  { %v419_v39 = vadd.f32 %v418_v35, %v417_v53  ;;  %v442_v20 = vadd.f32 %v441_v21, %v440_v28  ;;  %v463_v41 = vadd.f32 %v462_v36, %v461_v56  ;;  %v1504_v43 = vcombine.high %v686_v15, %v686_v15 }
  0x45   :  { %v486_v38 = vsel %vm268_vm0, %v1503_v27, 0.0  ;;  %v1505_v4 = vcombine.high %v982_v57, %v982_v57  ;;  %v466_v33 = vsel %vm268_vm0, %v1506_v30, 0.0  ;;  %v1507_v11 = vcombine.high %v717_v24, %v717_v24 }
  0x46   :  { %v487_v49 = vsel %vm268_vm0, %v1504_v43, 0.0  ;;  %v444_v44 = vadd.f32 %v443_v16, %v442_v20  ;;  %v1508_v15 = vcombine.high %v1005_v50, %v1005_v50  ;;  %v465_v34 = vadd.f32 %v464_v6, %v463_v41  ;;  %v55_v16 = vld [vmem:[%s1435_s0 + $0x158] sm:$0xff] }
  0x47   :  { %v447_v25 = vsel %vm268_vm0, %v1505_v4, 0.0  ;;  %v488_v7 = vadd.f32 %v487_v49, %v486_v38  ;;  %v489_v55 = vsel %vm268_vm0, %v1507_v11, 0.0  ;;  %v1509_v57 = vcombine.high %v1497_v52, %v1497_v52  ;;  %v63_v20 = vld [vmem:[%s1435_s0 + $0x198] sm:$0xff] }
  0x48   :  { %v449_v46 = vsel %vm268_vm0, %v1508_v15, 0.0  ;;  %v361_v35 = vadd.f32 %v1195_v26, %v359_v62  ;;  %v421_v47 = vadd.f32 %v420_v1, %v419_v39  ;;  %v468_v24 = vsel %vm268_vm0, %v1510_v17, 0.0  ;;  %v1513_v26 = vld [vmem:[#allocation9_spill] sm:$0xff] }
  0x49   :  { %v491_v32 = vsel %vm268_vm0, %v1509_v57, 0.0  ;;  %v490_v12 = vadd.f32 %v489_v55, %v488_v7  ;;  %v392_v9 = vadd.f32 %v1257_v60, %v390_v48  ;;  %v446_v58 = vadd.f32 %v445_v13, %v444_v44  ;;  %v67_v7 = vld [vmem:[%s1435_s0 + $0x1b8] sm:$0xff] }
  0x4a   :  { %v467_v8 = vadd.f32 %v466_v33, %v465_v34  ;;  %v1511_v50 = vcombine.high %v1500_v31, %v1500_v31  ;;  %v1512_v54 = vcombine.high %v1495_v10, %v1495_v10  ;;  %v470_v1 = vsel %vm268_vm0, %v1513_v26, 0.0 }
  0x4b   :  { %v472_v23 = vsel %vm268_vm0, %v1514_v18, 0.0  ;;  %v492_v3 = vadd.f32 %v491_v32, %v490_v12  ;;  %v448_v60 = vadd.f32 %v447_v25, %v446_v58  ;;  %v1515_v52 = vcombine.high %v1502_v59, %v1502_v59 }
  0x4c   :  { %v493_v29 = vsel %vm268_vm0, %v1511_v50, 0.0  ;;  %v451_v14 = vsel %vm268_vm0, %v1512_v54, 0.0  ;;  %v469_v19 = vadd.f32 %v468_v24, %v467_v8  ;;  %v1516_v61 = vcombine.high %v1506_v30, %v1506_v30  ;;  %v71_v24 = vld [vmem:[%s1435_s0 + $0x1d8] sm:$0xff] }
  0x4d   :  { %v495_v5 = vsel %vm268_vm0, %v1515_v52, 0.0  ;;  %v423_v0 = vadd.f32 %v422_v51, %v421_v47  ;;  %v494_v63 = vadd.f32 %v493_v29, %v492_v3  ;;  %v519_v21 = vadd.f32 %v1517_v40, %v1142_v2  ;;  %v75_v29 = vld [vmem:[%s1435_s0 + $0x1f8] sm:$0xff] }
  0x4e   :  { %v497_v10 = vsel %vm268_vm0, %v1516_v61, 0.0  ;;  %v520_v37 = vadd.f32 %v1517_v40, %v330_v42  ;;  %v450_v31 = vadd.f32 %v449_v46, %v448_v60  ;;  %v471_v36 = vadd.f32 %v470_v1, %v469_v19  ;;  %v59_v42 = vld [vmem:[%s1435_s0 + $0x178] sm:$0xff] }
  0x4f   :  { %v521_v53 = vadd.f32 %v1517_v40, %v361_v35  ;;  %v522_v28 = vadd.f32 %v1517_v40, %v392_v9  ;;  %v1518_v45 = vcombine.high %v1065_v22, %v1065_v22  ;;  %v474_v13 = vsel %vm268_vm0, %v55_v16, 0.0 }
  0x50   :  { %v496_v2 = vadd.f32 %v495_v5, %v494_v63  ;;  %v535_v56 = vcombine.low %v519_v21, %v520_v37  ;;  %v452_v62 = vadd.f32 %v451_v14, %v450_v31  ;;  %v473_v48 = vadd.f32 %v472_v23, %v471_v36 }
  0x51   :  { %v453_v51 = vsel %vm268_vm0, %v1518_v45, 0.0  ;;  %v1519_v59 = vcombine.high %v1510_v17, %v1510_v17  ;;  %v536_v27 = vcombine.low %v521_v53, %v522_v28  ;;  %v183_v38 = vcombine.high %v55_v16, %v55_v16 }
  0x52   :  { %v476_v22 = vsel %vm268_vm0, %v59_v42, 0.0  ;;  %v498_v39 = vadd.f32 %v497_v10, %v496_v2  ;;  %543 = vst [vmem:[%s1437_s2] sm:$0xff] %v535_v56  ;;  %v454_v41 = vadd.f32 %v453_v51, %v452_v62  ;;  %v475_v43 = vadd.f32 %v474_v13, %v473_v48 }
  0x53   :  { %v499_v6 = vsel %vm268_vm0, %v1519_v59, 0.0  ;;  %v1520_v49 = vcombine.high %v1513_v26, %v1513_v26  ;;  %v523_v25 = vadd.f32 %v1517_v40, %v423_v0  ;;  %544 = vst [vmem:[%s1437_s2 + $0x8] sm:$0xff] %v536_v27  ;;  %v478_v30 = vsel %vm268_vm0, %v63_v20, 0.0 }
  0x54   :  { %v500_v33 = vadd.f32 %v499_v6, %v498_v39  ;;  %v187_v11 = vcombine.high %v59_v42, %v59_v42  ;;  %v477_v55 = vadd.f32 %v476_v22, %v475_v43  ;;  %v1521_v44 = vcombine.high %v1514_v18, %v1514_v18 }
  0x55   :  { %v501_v4 = vsel %vm268_vm0, %v1520_v49, 0.0  ;;  %v524_v46 = vadd.f32 %v1517_v40, %v454_v41  ;;  %v480_v34 = vsel %vm268_vm0, %v67_v7, 0.0  ;;  %v191_v32 = vcombine.high %v63_v20, %v63_v20 }
  0x56   :  { %v503_v15 = vsel %vm268_vm0, %v1521_v44, 0.0  ;;  %v502_v57 = vadd.f32 %v501_v4, %v500_v33  ;;  %v479_v35 = vadd.f32 %v478_v30, %v477_v55  ;;  %v505_v47 = vsel %vm268_vm0, %v183_v38, 0.0 }
  0x57   :  { %v537_v17 = vcombine.low %v523_v25, %v524_v46  ;;  %v195_v9 = vcombine.high %v67_v7, %v67_v7  ;;  %v482_v8 = vsel %vm268_vm0, %v71_v24, 0.0  ;;  %v507_v50 = vsel %vm268_vm0, %v187_v11, 0.0 }
  0x58   :  { %v504_v12 = vadd.f32 %v503_v15, %v502_v57  ;;  %v481_v58 = vadd.f32 %v480_v34, %v479_v35  ;;  %v199_v14 = vcombine.high %v71_v24, %v71_v24  ;;  %v509_v26 = vsel %vm268_vm0, %v191_v32, 0.0 }
  0x59   :  { %545 = vst [vmem:[%s1437_s2 + $0x10] sm:$0xff] %v537_v17  ;;  %v203_v23 = vcombine.high %v75_v29, %v75_v29  ;;  %v484_v3 = vsel %vm268_vm0, %v75_v29, 0.0  ;;  %v511_v60 = vsel %vm268_vm0, %v195_v9, 0.0 }
  0x5a   :  { %v506_v54 = vadd.f32 %v505_v47, %v504_v12  ;;  %v483_v1 = vadd.f32 %v482_v8, %v481_v58  ;;  %v513_v52 = vsel %vm268_vm0, %v199_v14, 0.0 }
  0x5b   :  { %v515_v10 = vsel %vm268_vm0, %v203_v23, 0.0 }
  0x5c   :  { %v508_v18 = vadd.f32 %v507_v50, %v506_v54  ;;  %v485_v5 = vadd.f32 %v484_v3, %v483_v1 }
  0x5e   :  { %v510_v19 = vadd.f32 %v509_v26, %v508_v18  ;;  %v525_v21 = vadd.f32 %v1517_v40, %v485_v5 }
  0x60   :  { %v512_v61 = vadd.f32 %v511_v60, %v510_v19 }
  0x62   :  { %v514_v0 = vadd.f32 %v513_v52, %v512_v61 }
  0x64   :  { %v516_v63 = vadd.f32 %v515_v10, %v514_v0 }
  0x66   :  { %v526_v37 = vadd.f32 %v1517_v40, %v516_v63 }
  0x68   :  { %v538_v16 = vcombine.low %v525_v21, %v526_v37 }
  0x6a   :  { %546 = vst [vmem:[%s1437_s2 + $0x18] sm:$0xff] %v538_v16 }

// kernel: _lambda_.14
= control target key start
LH: loop header
LB: loop body
LE: loop exit
PB: predicated region body
PF: predicated region fallthrough
CT: control target
= control target key end

     0   :  { %s512_s9 = smov 0   ;;  %s514_s10 = smov 0   ;;  %s600_s0 = inlined_call_operand.vmem [shape: bf16[2,18,9,128], index: 0, kind: input, shape index: {}]   ;;  %s601_s1 = inlined_call_operand.vmem [shape: bf16[2,18,9,128], index: 1, kind: input, shape index: {}]   ;;  %s602_s2 = inlined_call_operand.vmem [shape: bf16[2,8,8,128], index: 2, kind: output, shape index: {}]  }
   0x1   :  { %s516_s11 = smov 0   ;;  %s518_s12 = smov 0  }
   0x2   :  { %s520_s13 = smov 0  }
   0x3 LB: > { %s21_s14 = sadd.s32 1, %s487_s11  ;;  %s24_s15 = sadd.s32 1, %s491_s12  ;;  %s495_s13 = sphi %s520_s13, %s12_s13   ;;  %s491_s12 = sphi %s518_s12, %s608_s12   ;;  %s487_s11 = sphi %s516_s11, %s607_s11   ;;  %s483_s10 = sphi %s514_s10, %s606_s10   ;;  %s479_s9 = sphi %s512_s9, %s605_s9  }
   0x4   : > { %p22_p0 = scmp.ge.s32.totalorder %s21_s14, 8  ;;  %p384_p1 = scmp.ge.s32.totalorder %s495_s13, 1 }
   0x5   : > { %p136_p2 = scmp.lt.s32.totalorder %s495_s13, 17 }
   0x6   : > { %s610_s14 = smov (%p22_p0, %s21_s14), 0  ;;  %s612_s15 = smov (!%p22_p0, %s24_s15), %s491_s12 }
   0x7   : > { %p137_p3 = pnand %p384_p1, %p136_p2  ;;  %p26_p4 = scmp.ge.s32.totalorder %s612_s15, 2 }
   0x8   : > { %p166_p5 = scmp.lt.s32.totalorder (!%p137_p3), %s483_s10, 1  ;;  %s410_s17 = sshll.u32 (!%p137_p3), %s479_s9, 4 }
   0x9   : > { %s614_s15 = smov (%p26_p4, %s612_s15), 0  ;;  %140 = sbr.rel (%p137_p3) target bundleno = 44 (0x2c), region = 28 }
   0xa   : > { %p178_p6 = scmp.lt.s32.totalorder (!%p137_p3), %s479_s9, 7 }
   0xe   : > { %s616_s10 = smov (!%p166_p5, %s483_s10), 1  ;;  %vm194_vm0 = vsmask.f32 3328  ;;  %vm195_vm1 = vsmask.f32 7440  ;;  %s618_s9 = smov (!%p178_p6, %s479_s9), 7 }
   0xf   : > { %s416_s16 = smul.u32 144, %s616_s10  ;;  %vm566_vm2 = vmor %vm194_vm0, %vm195_vm1  ;;  %s387_s26 = sshll.u32 %s616_s10, 3 }
  0x10   : > { %s181_s27 = sadd.s32 %s387_s26, %s618_s9 }
  0x11   : > { %s170_s20 = scalar_lea.vmem %s600_s0, %s416_s16  ;;  %s175_s23 = scalar_lea.vmem %s601_s1, %s416_s16 }
  0x12   : > { %s554_s24 = scalar_lea.vmem %s170_s20, %s410_s17  ;;  %s557_s25 = scalar_lea.vmem %s175_s23, %s410_s17 }
  0x13   : > { %v188_v0 = vld [vmem:[%s554_s24] sm:$0xf]  ;;  %v193_v1 = vld [vmem:[%s554_s24 + $0x4] sm:$0x1]  ;;  %v395_v2 = vld [vmem:[%s554_s24 + $0x8] sm:$0xf] }
  0x14   : > { %v198_v3 = vshrl.u32 %v188_v0, 16  ;;  %v201_v4 = vshll.u32 %v188_v0, 16  ;;  %v207_v5 = vshll.u32 %v193_v1, 16  ;;  %v225_v6 = vshrl.u32 %v395_v2, 16  ;;  %v191_v7 = vld [vmem:[%s557_s25] sm:$0xf] }
  0x15   : > { %v399_v8 = vld [vmem:[%s554_s24 + $0xc] sm:$0x1]  ;;  %v228_v9 = vshll.u32 %v395_v2, 16  ;;  %v402_v13 = vld [vmem:[%s554_s24 + $0x10] sm:$0xf]  ;;  %v192_v20 = vmax.bf16 %v191_v7, %v188_v0  ;;  %s388_s28 = sshll.u32 %s181_s27, 2 }
  0x16   : > { %v200_v10 = vrot.slane %v198_v3, 4  ;;  %v203_v11 = vrot.slane %v201_v4, 5  ;;  %v227_v12 = vrot.slane %v225_v6, 4  ;;  %v209_v14 = vrot.slane %v207_v5, 5  ;;  %v406_v26 = vld [vmem:[%s554_s24 + $0x14] sm:$0x1]  ;;  %s183_s3 = scalar_lea.vmem %s602_s2, %s388_s28 }
  0x17   : > { %v230_v15 = vrot.slane %v228_v9, 5  ;;  %v234_v17 = vshll.u32 %v399_v8, 16  ;;  %v252_v18 = vshrl.u32 %v402_v13, 16  ;;  %v255_v19 = vshll.u32 %v402_v13, 16  ;;  %v398_v31 = vld [vmem:[%s557_s25 + $0x8] sm:$0xf] }
  0x18   : > { %v204_v16 = vor.u32 %v203_v11, %v200_v10  ;;  %v261_v33 = vshll.u32 %v406_v26, 16  ;;  %v405_v40 = vld [vmem:[%s557_s25 + $0x10] sm:$0xf] }
  0x19   : > { %v231_v22 = vor.u32 %v230_v15, %v227_v12  ;;  %v254_v24 = vrot.slane %v252_v18, 4  ;;  %v257_v25 = vrot.slane %v255_v19, 5  ;;  %v236_v29 = vrot.slane %v234_v17, 5 }
  0x1a   : > { %v205_v23 = vrot.slane %v204_v16, 4  ;;  %v263_v38 = vrot.slane %v261_v33, 5 }
  0x1b   : > { %v232_v28 = vrot.slane %v231_v22, 4  ;;  %v258_v32 = vor.u32 %v257_v25, %v254_v24 }
  0x1c   : > { %v210_v27 = vsel %vm566_vm2, %v205_v23, %v209_v14 }
  0x1d   : > { %v212_v30 = vmax.bf16 %v210_v27, %v192_v20  ;;  %v237_v35 = vsel %vm566_vm2, %v232_v28, %v236_v29  ;;  %v259_v37 = vrot.slane %v258_v32, 4 }
  0x1f   : > { %v218_v34 = vmax.bf16 %v395_v2, %v212_v30  ;;  %v264_v42 = vsel %vm566_vm2, %v259_v37, %v263_v38 }
  0x21   : > { %v222_v36 = vmax.bf16 %v398_v31, %v218_v34 }
  0x23   : > { %v239_v39 = vmax.bf16 %v237_v35, %v222_v36 }
  0x25   : > { %v245_v41 = vmax.bf16 %v402_v13, %v239_v39 }
  0x27   : > { %v249_v43 = vmax.bf16 %v405_v40, %v245_v41 }
  0x29   : > { %v266_v44 = vmax.bf16 %v264_v42, %v249_v43 }
  0x2b   : > { %267 = vst [vmem:[%s183_s3] sm:$0xf] %v266_v44 }
  0x2c PF: > { %s12_s13 = sadd.s32 1, %s495_s13   ;;  %s605_s9 = smov %s487_s11 }
  0x2d   : > { %p9_p7 = scmp.ge.s32.totalorder %s12_s13, 18   ;;  %s606_s10 = smov %s491_s12 }
  0x2e   : > { %s607_s11 = smov %s610_s14  ;;  %s608_s12 = smov %s614_s15 }
  0x2f   :  { %11 = sbr.rel (!%p9_p7) target bundleno = 3 (0x3), region = 67 }

// kernel: _lambda_.13
= control target key start
LH: loop header
LB: loop body
LE: loop exit
PB: predicated region body
PF: predicated region fallthrough
CT: control target
= control target key end

     0   :  { %s2245_s18 = smov 0   ;;  %s2247_s19 = smov 0   ;;  %s2643_s0 = inlined_call_operand.vmem [shape: bf16[2,34,17,128], index: 0, kind: input, shape index: {}]   ;;  %s2644_s1 = inlined_call_operand.vmem [shape: bf16[2,34,17,128], index: 1, kind: input, shape index: {}]   ;;  %s2645_s2 = inlined_call_operand.vmem [shape: bf16[9,128,128], index: 2, kind: input, shape index: {}]   ;;  %s2646_s3 = inlined_call_operand.vmem [shape: f32[1,128], index: 3, kind: input, shape index: {}]   ;;  %s2647_s4 = inlined_call_operand.vmem [shape: f32[1,128], index: 4, kind: input, shape index: {}]   ;;  %s2648_s5 = inlined_call_operand.vmem [shape: bf16[2,16,16,128], index: 5, kind: output, shape index: {}]  }
   0x1   :  { %s2249_s20 = smov 0   ;;  %s2251_s21 = smov 0  }
   0x2   :  { %s2253_s22 = smov 0  }
   0x3 LB: > { %s24_s23 = sadd.s32 1, %s2203_s20  ;;  %s27_s24 = sadd.s32 1, %s2207_s21  ;;  %s2211_s22 = sphi %s2253_s22, %s15_s22   ;;  %s2207_s21 = sphi %s2251_s21, %s2652_s21   ;;  %s2203_s20 = sphi %s2249_s20, %s2651_s20   ;;  %s2199_s19 = sphi %s2247_s19, %s2650_s19   ;;  %s2195_s18 = sphi %s2245_s18, %s2649_s18  }
   0x4   : > { %p25_p0 = scmp.ge.s32.totalorder %s24_s23, 16  ;;  %p1526_p1 = scmp.ge.s32.totalorder %s2211_s22, 1 }
   0x5   : > { %p211_p2 = scmp.lt.s32.totalorder %s2211_s22, 33 }
   0x6   : > { %s2654_s23 = smov (%p25_p0, %s24_s23), 0  ;;  %s2656_s24 = smov (!%p25_p0, %s27_s24), %s2207_s21 }
   0x7   : > { %p212_p3 = pnand %p1526_p1, %p211_p2  ;;  %p29_p4 = scmp.ge.s32.totalorder %s2656_s24, 2 }
   0x8   : > { %p248_p5 = scmp.lt.s32.totalorder (!%p212_p3), %s2199_s19, 1  ;;  %s1776_s17 = smul.u32 (!%p212_p3), 24, %s2195_s18 }
   0x9   : > { %s2658_s24 = smov (%p29_p4, %s2656_s24), 0  ;;  %215 = sbr.rel (%p212_p3) target bundleno = 383 (0x17f), region = 40 }
   0xa   : > { %p260_p6 = scmp.lt.s32.totalorder (!%p212_p3), %s2195_s18, 15 }
   0xe   : > { %v2089_v0 = vld [vmem:[%s2645_s2 + $0x78] sm:$0xff]   ;;  %v2213_v1 = vmov 0.0   ;;  %v2091_v3 = vld [vmem:[%s2645_s2 + $0x70] sm:$0xff]   ;;  %vm2214_vm0 = vmmov 0   ;;  %s2660_s19 = smov (!%p248_p5, %s2199_s19), 1  ;;  %v2093_v5 = vld [vmem:[%s2645_s2 + $0x68] sm:$0xff]  }
   0xf   : > { %1866 = vmatprep.subr.bf16.mxu0 %v2213_v1  ;;  %1886 = vmatprep.subr.bf16.mxu1 %v2213_v1  ;;  %v2090_v2 = vld [vmem:[%s2645_s2 + $0x38] sm:$0xff]   ;;  %v2092_v4 = vld [vmem:[%s2645_s2 + $0x30] sm:$0xff]   ;;  %v2094_v6 = vld [vmem:[%s2645_s2 + $0x28] sm:$0xff]   ;;  %s2046_s12 = smul.u32 408, %s2660_s19  ;;  %vm529_vm1 = vsmask.f32 7424 }
  0x10   : > { %1867 = vmatpush3.bf16.msra.mxu0 %v2089_v0  ;;  %1882 = vmatprep.mubr.msk.bf16.mxu0 %vm2214_vm0, %v2213_v1  ;;  %v2095_v7 = vld [vmem:[%s2645_s2 + $0x60] sm:$0xff]   ;;  %v2097_v9 = vld [vmem:[%s2645_s2 + $0x58] sm:$0xff]   ;;  %v2099_v11 = vld [vmem:[%s2645_s2 + $0x50] sm:$0xff]   ;;  %s2662_s18 = smov (!%p260_p6, %s2195_s18), 15  ;;  %s1530_s7 = sshll.u32 %s2660_s19, 5 }
  0x11   : > { %1887 = vmatpush3.bf16.msra.mxu1 %v2090_v2  ;;  %1868 = vmatprep.subr.bf16.mxu0 %v2213_v1  ;;  %v2096_v8 = vld [vmem:[%s2645_s2 + $0x20] sm:$0xff]   ;;  %s257_s27 = scalar_lea.vmem %s2644_s1, %s2046_s12  ;;  %s252_s30 = scalar_lea.vmem %s2643_s0, %s2046_s12  ;;  %v2098_v10 = vld [vmem:[%s2645_s2 + $0x18] sm:$0xff]   ;;  %v2100_v12 = vld [vmem:[%s2645_s2 + $0x10] sm:$0xff]  }
  0x12   : > { %1888 = vmatprep.subr.bf16.mxu1 %v2213_v1  ;;  %1902 = vmatprep.mubr.msk.bf16.mxu1 %vm2214_vm0, %v2213_v1  ;;  %s2334_s10 = scalar_lea.vmem %s257_s27, %s1776_s17  ;;  %s2337_s11 = scalar_lea.vmem %s252_s30, %s1776_s17  ;;  %v2101_v13 = vld [vmem:[%s2645_s2 + $0x48] sm:$0xff]   ;;  %v2103_v15 = vld [vmem:[%s2645_s2 + $0x40] sm:$0xff]   ;;  %v2107_v19 = vld [vmem:[%s2645_s2 + $0xb8] sm:$0xff]  }
  0x13   : > { %v2102_v14 = vld [vmem:[%s2645_s2 + $0x8] sm:$0xff]   ;;  %v2104_v16 = vld [vmem:[%s2645_s2] sm:$0xff]   ;;  %v2108_v20 = vld [vmem:[%s2645_s2 + $0xf8] sm:$0xff]   ;;  %s1529_s6 = sshll.u32 %s2662_s18, 1 }
  0x14   : > { %1869 = vmatpush3.bf16.msra.mxu0 %v2091_v3  ;;  %v2105_v17 = vld [vmem:[%s2334_s10] sm:$0xff]   ;;  %v2109_v21 = vld [vmem:[%s2645_s2 + $0xb0] sm:$0xff]   ;;  %v2111_v23 = vld [vmem:[%s2645_s2 + $0xa8] sm:$0xff]   ;;  %s264_s12 = sadd.s32 %s1530_s7, %s1529_s6 }
  0x15   : > { %1889 = vmatpush3.bf16.msra.mxu1 %v2092_v4  ;;  %1870 = vmatprep.subr.bf16.mxu0 %v2213_v1  ;;  %v2106_v18 = vld [vmem:[%s2337_s11] sm:$0xff]   ;;  %v2110_v22 = vld [vmem:[%s2645_s2 + $0xf0] sm:$0xff]   ;;  %v2112_v24 = vld [vmem:[%s2645_s2 + $0xe8] sm:$0xff]  }
  0x16   : > { %1890 = vmatprep.subr.bf16.mxu1 %v2213_v1  ;;  %v2113_v25 = vld [vmem:[%s2645_s2 + $0xa0] sm:$0xff]   ;;  %v2115_v27 = vld [vmem:[%s2645_s2 + $0x98] sm:$0xff]   ;;  %v2124_v30 = vld [vmem:[%s2337_s11 + $0x8] ss:$0 sps:$4 sm:$0x11]  }
  0x17   : > { %v2114_v26 = vld [vmem:[%s2645_s2 + $0xe0] sm:$0xff]   ;;  %v2116_v29 = vld [vmem:[%s2645_s2 + $0xd8] sm:$0xff]   ;;  %v2117_v31 = vld [vmem:[%s2645_s2 + $0x90] sm:$0xff]   ;;  %v538_v37 = vshll.u32 %v2124_v30, 16 }
  0x18   : > { %1871 = vmatpush3.bf16.msra.mxu0 %v2093_v5  ;;  %v2123_v28 = vld [vmem:[%s2337_s11] sm:$0xff]   ;;  %v2118_v33 = vld [vmem:[%s2645_s2 + $0xd0] sm:$0xff]   ;;  %v2119_v34 = vld [vmem:[%s2645_s2 + $0x88] sm:$0xff]  }
  0x19   : > { %1891 = vmatpush3.bf16.msra.mxu1 %v2094_v6  ;;  %1872 = vmatprep.subr.bf16.mxu0 %v2213_v1  ;;  %v533_v32 = vshll.u32 %v2123_v28, 16  ;;  %v531_v35 = vshrl.u32 %v2123_v28, 16  ;;  %v2120_v38 = vld [vmem:[%s2645_s2 + $0xc8] sm:$0xff]   ;;  %v2121_v39 = vld [vmem:[%s2645_s2 + $0x80] sm:$0xff]   ;;  %v540_v42 = vrot.slane %v538_v37, 1  ;;  %v2125_v43 = vld [vmem:[%s2645_s2 + $0x138] sm:$0xff]  }
  0x1a   : > { %1892 = vmatprep.subr.bf16.mxu1 %v2213_v1  ;;  %v2122_v40 = vld [vmem:[%s2645_s2 + $0xc0] sm:$0xff]   ;;  %v2126_v45 = vld [vmem:[%s2337_s11 + $0xc] sm:$0xff]   ;;  %v2127_v46 = vld [vmem:[%s2645_s2 + $0x178] sm:$0xff]  }
  0x1b   : > { %v535_v36 = vrot.slane %v533_v32, 1  ;;  %v2128_v47 = vld [vmem:[%s2645_s2 + $0x130] sm:$0xff]   ;;  %v2130_v49 = vld [vmem:[%s2645_s2 + $0x128] sm:$0xff]   ;;  %v2132_v51 = vld [vmem:[%s2645_s2 + $0x120] sm:$0xff]  }
  0x1c   : > { %1873 = vmatpush3.bf16.msra.mxu0 %v2095_v7  ;;  %v2129_v48 = vld [vmem:[%s2645_s2 + $0x170] sm:$0xff]   ;;  %v2131_v50 = vld [vmem:[%s2645_s2 + $0x168] sm:$0xff]   ;;  %v2133_v52 = vld [vmem:[%s2645_s2 + $0x160] sm:$0xff]  }
  0x1d   : > { %1893 = vmatpush3.bf16.msra.mxu1 %v2096_v8  ;;  %1874 = vmatprep.subr.bf16.mxu0 %v2213_v1  ;;  %v536_v41 = vor.u32 %v535_v36, %v531_v35  ;;  %v2134_v53 = vld [vmem:[%s2645_s2 + $0x118] sm:$0xff]   ;;  %v2144_v55 = vld [vmem:[%s2337_s11 + $0xc] sm:$0xff]   ;;  %v2145_v58 = vld [vmem:[%s2337_s11 + $0x14] ss:$0 sps:$4 sm:$0x11]  }
  0x1e   : > { %1894 = vmatprep.subr.bf16.mxu1 %v2213_v1  ;;  %v2135_v54 = vld [vmem:[%s2645_s2 + $0x158] sm:$0xff]   ;;  %v2136_v56 = vld [vmem:[%s2645_s2 + $0x110] sm:$0xff]   ;;  %v903_v59 = vshll.u32 %v2144_v55, 16  ;;  %v2138_v60 = vld [vmem:[%s2645_s2 + $0x108] sm:$0xff]   ;;  %v901_v62 = vshrl.u32 %v2144_v55, 16  ;;  %v908_v0 = vshll.u32 %v2145_v58, 16 }
  0x1f   : > { %v541_v44 = vsel %vm529_vm1, %v536_v41, %v540_v42  ;;  %v2137_v57 = vld [vmem:[%s2645_s2 + $0x150] sm:$0xff]   ;;  %v2139_v61 = vld [vmem:[%s2645_s2 + $0x148] sm:$0xff]   ;;  %v2140_v2 = vld [vmem:[%s2645_s2 + $0x100] sm:$0xff]  }
  0x20   : > { %1875 = vmatpush3.bf16.msra.mxu0 %v2097_v9  ;;  %v905_v63 = vrot.slane %v903_v59, 1  ;;  %v2141_v3 = vld [vmem:[%s2645_s2 + $0x140] sm:$0xff]   ;;  %v910_v5 = vrot.slane %v908_v0, 1  ;;  %v2142_v6 = vld [vmem:[%s2334_s10 + $0xc] sm:$0xff]   ;;  %v2143_v7 = vld [vmem:[%s2645_s2 + $0x1b8] sm:$0xff]  }
  0x21   : > { %1895 = vmatpush3.bf16.msra.mxu1 %v2098_v10  ;;  %1876 = vmatprep.subr.bf16.mxu0 %v2213_v1  ;;  %v2146_v9 = vld [vmem:[%s2645_s2 + $0x1f8] sm:$0xff]   ;;  %v2147_v10 = vld [vmem:[%s2645_s2 + $0x1b0] sm:$0xff]   ;;  %v2165_v28 = vld [vmem:[%s2645_s2 + $0x228] sm:$0xff]  }
  0x22   : > { %1896 = vmatprep.subr.bf16.mxu1 %v2213_v1  ;;  %v906_v4 = vor.u32 %v905_v63, %v901_v62  ;;  %v2167_v30 = vld [vmem:[%s2645_s2 + $0x218] sm:$0xff]   ;;  %v2168_v32 = vld [vmem:[%s2645_s2 + $0x210] sm:$0xff]   ;;  %v2169_v35 = vld [vmem:[%s2645_s2 + $0x208] sm:$0xff]  }
  0x24   : > { %1877 = vmatpush3.bf16.msra.mxu0 %v2099_v11  ;;  %v911_v8 = vsel %vm529_vm1, %v906_v4, %v910_v5  ;;  %v2148_v11 = vld [vmem:[%s2645_s2 + $0x1f0] sm:$0xff]  }
  0x25   : > { %1897 = vmatpush3.bf16.msra.mxu1 %v2100_v12  ;;  %1878 = vmatprep.subr.bf16.mxu0 %v2213_v1  ;;  %v2149_v12 = vld [vmem:[%s2645_s2 + $0x1a8] sm:$0xff]  }
  0x26   : > { %1898 = vmatprep.subr.bf16.mxu1 %v2213_v1 }
  0x28   : > { %1879 = vmatpush3.bf16.msra.mxu0 %v2101_v13  ;;  %v2150_v13 = vld [vmem:[%s2645_s2 + $0x1e8] sm:$0xff]  }
  0x29   : > { %1899 = vmatpush3.bf16.msra.mxu1 %v2102_v14  ;;  %1880 = vmatprep.subr.bf16.mxu0 %v2213_v1  ;;  %v2151_v14 = vld [vmem:[%s2645_s2 + $0x1a0] sm:$0xff]  }
  0x2a   : > { %1900 = vmatprep.subr.bf16.mxu1 %v2213_v1 }
  0x2c   : > { %1881 = vmatpush3.bf16.msra.mxu0 %v2103_v15  ;;  %v2152_v15 = vld [vmem:[%s2645_s2 + $0x1e0] sm:$0xff]  }
  0x2d   : > { %1901 = vmatpush3.bf16.msra.mxu1 %v2104_v16  ;;  %1906 = vmatprep.subr.bf16.mxu0 %v2213_v1  ;;  %v2153_v16 = vld [vmem:[%s2645_s2 + $0x198] sm:$0xff]  }
  0x2e   : > { %1926 = vmatprep.subr.bf16.mxu1 %v2213_v1 }
  0x2f   : > { %1883 = vmatmul.mubr.bf16.vlgmr.msra.gmra.mxu0 %v2105_v17  ;;  %v2154_v17 = vld [vmem:[%s2645_s2 + $0x1d8] sm:$0xff]  }
  0x30   : > { %1903 = vmatmul.mubr.bf16.vlgmr.msra.gmra.mxu1 %v2106_v18  ;;  %1907 = vmatpush3.bf16.msra.mxu0 %v2107_v19  ;;  %v2155_v18 = vld [vmem:[%s2645_s2 + $0x190] sm:$0xff]  }
  0x31   : > { %1927 = vmatpush3.bf16.msra.mxu1 %v2108_v20  ;;  %1908 = vmatprep.subr.bf16.mxu0 %v2213_v1  ;;  %v2156_v19 = vld [vmem:[%s2645_s2 + $0x1d0] sm:$0xff]   ;;  %v2157_v20 = vld [vmem:[%s2645_s2 + $0x188] sm:$0xff]  }
  0x32   : > { %1928 = vmatprep.subr.bf16.mxu1 %v2213_v1  ;;  %1922 = vmatprep.mubr.msk.bf16.mxu0 %vm2214_vm0, %v2213_v1 }
  0x33   : > { %1942 = vmatprep.mubr.msk.bf16.mxu1 %vm2214_vm0, %v2213_v1 }
  0x34   : > { %1909 = vmatpush3.bf16.msra.mxu0 %v2109_v21  ;;  %v2158_v21 = vld [vmem:[%s2645_s2 + $0x1c8] sm:$0xff]  }
  0x35   : > { %1929 = vmatpush3.bf16.msra.mxu1 %v2110_v22  ;;  %1910 = vmatprep.subr.bf16.mxu0 %v2213_v1  ;;  %v2159_v22 = vld [vmem:[%s2645_s2 + $0x180] sm:$0xff]  }
  0x36   : > { %1930 = vmatprep.subr.bf16.mxu1 %v2213_v1 }
  0x38   : > { %1911 = vmatpush3.bf16.msra.mxu0 %v2111_v23  ;;  %v2160_v23 = vld [vmem:[%s2645_s2 + $0x1c0] sm:$0xff]  }
  0x39   : > { %1931 = vmatpush3.bf16.msra.mxu1 %v2112_v24  ;;  %1912 = vmatprep.subr.bf16.mxu0 %v2213_v1  ;;  %v2161_v24 = vld [vmem:[%s2337_s11 + $0x18] sm:$0xff]  }
  0x3a   : > { %1932 = vmatprep.subr.bf16.mxu1 %v2213_v1 }
  0x3c   : > { %1913 = vmatpush3.bf16.msra.mxu0 %v2113_v25  ;;  %v2162_v25 = vld [vmem:[%s2645_s2 + $0x238] sm:$0xff]  }
  0x3d   : > { %1933 = vmatpush3.bf16.msra.mxu1 %v2114_v26  ;;  %1914 = vmatprep.subr.bf16.mxu0 %v2213_v1  ;;  %v2163_v26 = vld [vmem:[%s2334_s10 + $0x18] sm:$0xff]   ;;  %s1531_s10 = sshll.u32 %s264_s12, 2 }
  0x3e   : > { %1934 = vmatprep.subr.bf16.mxu1 %v2213_v1  ;;  %s266_s15 = scalar_lea.vmem %s2648_s5, %s1531_s10 }
  0x40   : > { %1915 = vmatpush3.bf16.msra.mxu0 %v2115_v27  ;;  %v2164_v27 = vld [vmem:[%s2645_s2 + $0x230] sm:$0xff]  }
  0x41   : > { %1935 = vmatpush3.bf16.msra.mxu1 %v2116_v29  ;;  %1916 = vmatprep.subr.bf16.mxu0 %v2213_v1  ;;  %v2166_v29 = vld [vmem:[%s2645_s2 + $0x220] sm:$0xff]  }
  0x42   : > { %1936 = vmatprep.subr.bf16.mxu1 %v2213_v1 }
  0x44   : > { %1917 = vmatpush3.bf16.msra.mxu0 %v2117_v31  ;;  %v2171_v31 = vld [vmem:[%s2337_s11 + $0x18] sm:$0xff]  }
  0x45   : > { %1937 = vmatpush3.bf16.msra.mxu1 %v2118_v33  ;;  %1918 = vmatprep.subr.bf16.mxu0 %v2213_v1  ;;  %v2172_v33 = vld [vmem:[%s2337_s11 + $0x20] ss:$0 sps:$4 sm:$0x11]   ;;  %v1271_v36 = vshrl.u32 %v2171_v31, 16 }
  0x46   : > { %1938 = vmatprep.subr.bf16.mxu1 %v2213_v1 }
  0x48   : > { %1919 = vmatpush3.bf16.msra.mxu0 %v2119_v34  ;;  %v1273_v34 = vshll.u32 %v2171_v31, 16 }
  0x49   : > { %1939 = vmatpush3.bf16.msra.mxu1 %v2120_v38  ;;  %1920 = vmatprep.subr.bf16.mxu0 %v2213_v1  ;;  %v1278_v38 = vshll.u32 %v2172_v33, 16 }
  0x4a   : > { %1940 = vmatprep.subr.bf16.mxu1 %v2213_v1  ;;  %v1275_v37 = vrot.slane %v1273_v34, 1 }
  0x4b   : > { %v1280_v41 = vrot.slane %v1278_v38, 1 }
  0x4c   : > { %1921 = vmatpush3.bf16.msra.mxu0 %v2121_v39  ;;  %v2170_v39 = vld [vmem:[%s2645_s2 + $0x200] sm:$0xff]  }
  0x4d   : > { %1941 = vmatpush3.bf16.msra.mxu1 %v2122_v40  ;;  %1946 = vmatprep.subr.bf16.mxu0 %v2213_v1  ;;  %v1276_v40 = vor.u32 %v1275_v37, %v1271_v36 }
  0x4e   : > { %1966 = vmatprep.subr.bf16.mxu1 %v2213_v1 }
  0x4f   : > { %1923 = vmatmul.mubr.bf16.vlgmr.msra.gmra.mxu0 %v541_v44  ;;  %v1281_v42 = vsel %vm529_vm1, %v1276_v40, %v1280_v41 }
  0x50   : > { %1947 = vmatpush3.bf16.msra.mxu0 %v2125_v43  ;;  %1943 = vmatmul.mubr.bf16.vlgmr.msra.gmra.mxu1 %v2126_v45 }
  0x51   : > { %1967 = vmatpush3.bf16.msra.mxu1 %v2127_v46  ;;  %1948 = vmatprep.subr.bf16.mxu0 %v2213_v1 }
  0x52   : > { %1968 = vmatprep.subr.bf16.mxu1 %v2213_v1  ;;  %1962 = vmatprep.mubr.msk.bf16.mxu0 %vm2214_vm0, %v2213_v1 }
  0x53   : > { %1982 = vmatprep.mubr.msk.bf16.mxu1 %vm2214_vm0, %v2213_v1 }
  0x54   : > { %1949 = vmatpush3.bf16.msra.mxu0 %v2128_v47 }
  0x55   : > { %1969 = vmatpush3.bf16.msra.mxu1 %v2129_v48  ;;  %1950 = vmatprep.subr.bf16.mxu0 %v2213_v1 }
  0x56   : > { %1970 = vmatprep.subr.bf16.mxu1 %v2213_v1 }
  0x58   : > { %1951 = vmatpush3.bf16.msra.mxu0 %v2130_v49 }
  0x59   : > { %1971 = vmatpush3.bf16.msra.mxu1 %v2131_v50  ;;  %1952 = vmatprep.subr.bf16.mxu0 %v2213_v1 }
  0x5a   : > { %1972 = vmatprep.subr.bf16.mxu1 %v2213_v1 }
  0x5c   : > { %1953 = vmatpush3.bf16.msra.mxu0 %v2132_v51 }
  0x5d   : > { %1973 = vmatpush3.bf16.msra.mxu1 %v2133_v52  ;;  %1954 = vmatprep.subr.bf16.mxu0 %v2213_v1 }
  0x5e   : > { %1974 = vmatprep.subr.bf16.mxu1 %v2213_v1 }
  0x60   : > { %1955 = vmatpush3.bf16.msra.mxu0 %v2134_v53 }
  0x61   : > { %1975 = vmatpush3.bf16.msra.mxu1 %v2135_v54  ;;  %1956 = vmatprep.subr.bf16.mxu0 %v2213_v1 }
  0x62   : > { %1976 = vmatprep.subr.bf16.mxu1 %v2213_v1 }
  0x64   : > { %1957 = vmatpush3.bf16.msra.mxu0 %v2136_v56 }
  0x65   : > { %1977 = vmatpush3.bf16.msra.mxu1 %v2137_v57  ;;  %1958 = vmatprep.subr.bf16.mxu0 %v2213_v1 }
  0x66   : > { %1978 = vmatprep.subr.bf16.mxu1 %v2213_v1 }
  0x68   : > { %1959 = vmatpush3.bf16.msra.mxu0 %v2138_v60 }
  0x69   : > { %1979 = vmatpush3.bf16.msra.mxu1 %v2139_v61  ;;  %1960 = vmatprep.subr.bf16.mxu0 %v2213_v1 }
  0x6a   : > { %1980 = vmatprep.subr.bf16.mxu1 %v2213_v1 }
  0x6c   : > { %1961 = vmatpush3.bf16.msra.mxu0 %v2140_v2 }
  0x6d   : > { %1981 = vmatpush3.bf16.msra.mxu1 %v2141_v3  ;;  %1986 = vmatprep.subr.bf16.mxu0 %v2213_v1 }
  0x6e   : > { %2006 = vmatprep.subr.bf16.mxu1 %v2213_v1 }
  0x6f   : > { %1963 = vmatmul.mubr.bf16.vlgmr.msra.gmra.mxu0 %v2142_v6 }
  0x70   : > { %1987 = vmatpush3.bf16.msra.mxu0 %v2143_v7  ;;  %1983 = vmatmul.mubr.bf16.vlgmr.msra.gmra.mxu1 %v911_v8 }
  0x71   : > { %2007 = vmatpush3.bf16.msra.mxu1 %v2146_v9  ;;  %1988 = vmatprep.subr.bf16.mxu0 %v2213_v1 }
  0x72   : > { %2008 = vmatprep.subr.bf16.mxu1 %v2213_v1  ;;  %2002 = vmatprep.mubr.msk.bf16.mxu0 %vm2214_vm0, %v2213_v1 }
  0x73   : > { %2022 = vmatprep.mubr.msk.bf16.mxu1 %vm2214_vm0, %v2213_v1 }
  0x74   : > { %1989 = vmatpush3.bf16.msra.mxu0 %v2147_v10 }
  0x75   : > { %2009 = vmatpush3.bf16.msra.mxu1 %v2148_v11  ;;  %1990 = vmatprep.subr.bf16.mxu0 %v2213_v1 }
  0x76   : > { %2010 = vmatprep.subr.bf16.mxu1 %v2213_v1 }
  0x78   : > { %1991 = vmatpush3.bf16.msra.mxu0 %v2149_v12 }
  0x79   : > { %2011 = vmatpush3.bf16.msra.mxu1 %v2150_v13  ;;  %1992 = vmatprep.subr.bf16.mxu0 %v2213_v1 }
  0x7a   : > { %2012 = vmatprep.subr.bf16.mxu1 %v2213_v1 }
  0x7c   : > { %1993 = vmatpush3.bf16.msra.mxu0 %v2151_v14 }
  0x7d   : > { %2013 = vmatpush3.bf16.msra.mxu1 %v2152_v15  ;;  %1994 = vmatprep.subr.bf16.mxu0 %v2213_v1 }
  0x7e   : > { %2014 = vmatprep.subr.bf16.mxu1 %v2213_v1 }
  0x80   : > { %1995 = vmatpush3.bf16.msra.mxu0 %v2153_v16 }
  0x81   : > { %2015 = vmatpush3.bf16.msra.mxu1 %v2154_v17  ;;  %1996 = vmatprep.subr.bf16.mxu0 %v2213_v1 }
  0x82   : > { %2016 = vmatprep.subr.bf16.mxu1 %v2213_v1 }
  0x84   : > { %1997 = vmatpush3.bf16.msra.mxu0 %v2155_v18 }
  0x85   : > { %2017 = vmatpush3.bf16.msra.mxu1 %v2156_v19  ;;  %1998 = vmatprep.subr.bf16.mxu0 %v2213_v1 }
  0x86   : > { %2018 = vmatprep.subr.bf16.mxu1 %v2213_v1 }
  0x88   : > { %1999 = vmatpush3.bf16.msra.mxu0 %v2157_v20 }
  0x89   : > { %2019 = vmatpush3.bf16.msra.mxu1 %v2158_v21  ;;  %2000 = vmatprep.subr.bf16.mxu0 %v2213_v1 }
  0x8a   : > { %2020 = vmatprep.subr.bf16.mxu1 %v2213_v1 }
  0x8c   : > { %2001 = vmatpush3.bf16.msra.mxu0 %v2159_v22 }
  0x8d   : > { %2021 = vmatpush3.bf16.msra.mxu1 %v2160_v23  ;;  %2026 = vmatprep.subr.bf16.mxu0 %v2213_v1 }
  0x8f   : > { %2003 = vmatmul.mubr.bf16.vlgmr.msra.gmra.mxu0 %v2161_v24 }
  0x90   : > { %2027 = vmatpush3.bf16.msra.mxu0 %v2162_v25  ;;  %2023 = vmatmul.mubr.bf16.vlgmr.msra.gmra.mxu1 %v2163_v26  ;;  %v1770_v25 = vld [vmem:[%s2646_s3] ss:$0 sm:$0xff] }
  0x91   : > { %2028 = vmatprep.subr.bf16.mxu0 %v2213_v1  ;;  %2042 = vmatprep.mubr.msk.bf16.mxu0 %vm2214_vm0, %v2213_v1 }
  0x94   : > { %2029 = vmatpush3.bf16.msra.mxu0 %v2164_v27 }
  0x95   : > { %2030 = vmatprep.subr.bf16.mxu0 %v2213_v1 }
  0x98   : > { %2031 = vmatpush3.bf16.msra.mxu0 %v2165_v28 }
  0x99   : > { %2032 = vmatprep.subr.bf16.mxu0 %v2213_v1 }
  0x9c   : > { %2033 = vmatpush3.bf16.msra.mxu0 %v2166_v29 }
  0x9d   : > { %2034 = vmatprep.subr.bf16.mxu0 %v2213_v1 }
  0xa0   : > { %2035 = vmatpush3.bf16.msra.mxu0 %v2167_v30  ;;  %v1771_v30 = vld [vmem:[%s2647_s4] ss:$0 sm:$0xff] }
  0xa1   : > { %2036 = vmatprep.subr.bf16.mxu0 %v2213_v1 }
  0xa4   : > { %2037 = vmatpush3.bf16.msra.mxu0 %v2168_v32 }
  0xa5   : > { %2038 = vmatprep.subr.bf16.mxu0 %v2213_v1 }
  0xa8   : > { %2039 = vmatpush3.bf16.msra.mxu0 %v2169_v35 }
  0xa9   : > { %2040 = vmatprep.subr.bf16.mxu0 %v2213_v1 }
  0xac   : > { %2041 = vmatpush3.bf16.msra.mxu0 %v2170_v39 }
  0xaf   : > { %2043 = vmatmul.mubr.bf16.vlgmr.msra.gmra.mxu0 %v1281_v42 }
  0xef   : > { %v399_v43 = vpop.f32.mrf.mxu0 }
  0xf0   : > { %v494_v44 = vpop.f32.mrf.mxu1 }
  0xf1   : > { %v495_v45 = vadd.f32 %v494_v44, %v399_v43  ;;  %v1884_v46 = vpop.f32.mrf.mxu0 }
  0xf2   : > { %v1904_v47 = vpop.f32.mrf.mxu1 }
  0xf3   : > { %v402_v48 = vpop.f32.mrf.mxu0 }
  0xf4   : > { %v497_v49 = vpop.f32.mrf.mxu1 }
  0xf5   : > { %v498_v50 = vadd.f32 %v497_v49, %v402_v48  ;;  %v1885_v51 = vpop.f32.mrf.mxu0 }
  0xf6   : > { %v1905_v52 = vpop.f32.mrf.mxu1 }
 0x10f   : > { %v625_v53 = vpop.f32.mrf.mxu0 }
 0x110   : > { %v632_v54 = vadd.f32 %v625_v53, %v495_v45  ;;  %v745_v55 = vpop.f32.mrf.mxu1 }
 0x111   : > { %v1924_v56 = vpop.f32.mrf.mxu0 }
 0x112   : > { %v752_v57 = vadd.f32 %v745_v55, %v632_v54  ;;  %v1944_v1 = vpop.f32.mrf.mxu1 }
 0x113   : > { %v628_v58 = vpop.f32.mrf.mxu0 }
 0x114   : > { %v633_v59 = vadd.f32 %v628_v58, %v498_v50  ;;  %v748_v60 = vpop.f32.mrf.mxu1 }
 0x115   : > { %v1925_v61 = vpop.f32.mrf.mxu0 }
 0x116   : > { %v753_v62 = vadd.f32 %v748_v60, %v633_v59  ;;  %v1945_v63 = vpop.f32.mrf.mxu1 }
 0x12f   : > { %v863_v0 = vpop.f32.mrf.mxu0 }
 0x130   : > { %v995_v2 = vpop.f32.mrf.mxu1  ;;  %v870_v17 = vadd.f32 %v863_v0, %v752_v57 }
 0x131   : > { %v1964_v3 = vpop.f32.mrf.mxu0 }
 0x132   : > { %v1984_v4 = vpop.f32.mrf.mxu1  ;;  %v1002_v18 = vadd.f32 %v995_v2, %v870_v17 }
 0x133   : > { %v866_v5 = vpop.f32.mrf.mxu0 }
 0x134   : > { %v998_v6 = vpop.f32.mrf.mxu1  ;;  %v871_v19 = vadd.f32 %v866_v5, %v753_v62 }
 0x135   : > { %v1965_v7 = vpop.f32.mrf.mxu0 }
 0x136   : > { %v1985_v8 = vpop.f32.mrf.mxu1  ;;  %v1003_v21 = vadd.f32 %v998_v6, %v871_v19 }
 0x14f   : > { %v1115_v9 = vpop.f32.mrf.mxu0 }
 0x150   : > { %v1233_v10 = vpop.f32.mrf.mxu1  ;;  %v1122_v20 = vadd.f32 %v1115_v9, %v1002_v18 }
 0x151   : > { %v2004_v11 = vpop.f32.mrf.mxu0 }
 0x152   : > { %v2024_v12 = vpop.f32.mrf.mxu1  ;;  %v1240_v22 = vadd.f32 %v1233_v10, %v1122_v20 }
 0x153   : > { %v1118_v13 = vpop.f32.mrf.mxu0 }
 0x154   : > { %v1236_v14 = vpop.f32.mrf.mxu1  ;;  %v1123_v23 = vadd.f32 %v1118_v13, %v1003_v21 }
 0x155   : > { %v2005_v15 = vpop.f32.mrf.mxu0 }
 0x156   : > { %v2025_v16 = vpop.f32.mrf.mxu1  ;;  %v1241_v28 = vadd.f32 %v1236_v14, %v1123_v23 }
 0x16f   : > { %v1365_v24 = vpop.f32.mrf.mxu0 }
 0x170   : > { %v1372_v26 = vadd.f32 %v1365_v24, %v1240_v22 }
 0x171   : > { %v2044_v27 = vpop.f32.mrf.mxu0 }
 0x172   : > { %v1381_v29 = vmul.f32 %v1770_v25, %v1372_v26 }
 0x173   : > { %v1368_v31 = vpop.f32.mrf.mxu0 }
 0x174   : > { %v1373_v32 = vadd.f32 %v1368_v31, %v1241_v28  ;;  %v1390_v34 = vadd.f32 %v1771_v30, %v1381_v29 }
 0x175   : > { %v2045_v33 = vpop.f32.mrf.mxu0 }
 0x176   : > { %v1382_v35 = vmul.f32 %v1770_v25, %v1373_v32  ;;  %v1392_v37 = vmax.f32 %v1390_v34, 0.0 }
 0x178   : > { %v1391_v36 = vadd.f32 %v1771_v30, %v1382_v35 }
 0x17a   : > { %v1393_v38 = vmax.f32 %v1391_v36, 0.0 }
 0x17c   : > { %v1783_v39 = vpack.c.bf16 %v1393_v38, %v1392_v37 }
 0x17e   : > { %1784 = vst [vmem:[%s266_s15] sm:$0xff] %v1783_v39  }
 0x17f PF: > { %s15_s22 = sadd.s32 1, %s2211_s22   ;;  %s2649_s18 = smov %s2203_s20 }
 0x180   : > { %p12_p7 = scmp.ge.s32.totalorder %s15_s22, 34   ;;  %s2650_s19 = smov %s2207_s21 }
 0x181   : > { %s2651_s20 = smov %s2654_s23  ;;  %s2652_s21 = smov %s2658_s24 }
 0x182   :  { %14 = sbr.rel (!%p12_p7) target bundleno = 3 (0x3), region = 87 }

// kernel: _lambda_.16
= control target key start
LH: loop header
LB: loop body
LE: loop exit
PB: predicated region body
PF: predicated region fallthrough
CT: control target
= control target key end

     0   :  { %s2119_s18 = smov 0   ;;  %s2121_s19 = smov 0   ;;  %s2511_s0 = inlined_call_operand.vmem [shape: bf16[2,10,10,128], index: 0, kind: input, shape index: {}]   ;;  %s2512_s1 = inlined_call_operand.vmem [shape: bf16[9,128,128], index: 1, kind: input, shape index: {}]   ;;  %s2513_s2 = inlined_call_operand.vmem [shape: f32[1,128], index: 2, kind: input, shape index: {}]   ;;  %s2514_s3 = inlined_call_operand.vmem [shape: f32[1,128], index: 3, kind: input, shape index: {}]   ;;  %s2515_s4 = inlined_call_operand.vmem [shape: bf16[2,8,8,128], index: 4, kind: input, shape index: {}]   ;;  %s2516_s5 = inlined_call_operand.vmem [shape: bf16[2,8,8,128], index: 5, kind: output, shape index: {}]  }
   0x1   :  { %s2123_s20 = smov 0   ;;  %s2125_s21 = smov 0  }
   0x2   :  { %s2127_s22 = smov 0  }
   0x3 LB: > { %s24_s23 = sadd.s32 1, %s2077_s20  ;;  %s27_s24 = sadd.s32 1, %s2081_s21  ;;  %s2085_s22 = sphi %s2127_s22, %s15_s22   ;;  %s2081_s21 = sphi %s2125_s21, %s2520_s21   ;;  %s2077_s20 = sphi %s2123_s20, %s2519_s20   ;;  %s2073_s19 = sphi %s2121_s19, %s2518_s19   ;;  %s2069_s18 = sphi %s2119_s18, %s2517_s18  }
   0x4   : > { %p25_p0 = scmp.ge.s32.totalorder %s24_s23, 8  ;;  %p1436_p1 = scmp.ge.s32.totalorder %s2085_s22, 1 }
   0x5   : > { %p216_p2 = scmp.lt.s32.totalorder %s2085_s22, 17 }
   0x6   : > { %s2522_s23 = smov (%p25_p0, %s24_s23), 0  ;;  %s2524_s24 = smov (!%p25_p0, %s27_s24), %s2081_s21 }
   0x7   : > { %p217_p3 = pnand %p1436_p1, %p216_p2  ;;  %p29_p4 = scmp.ge.s32.totalorder %s2524_s24, 2 }
   0x8   : > { %p255_p5 = scmp.lt.s32.totalorder (!%p217_p3), %s2073_s19, 1  ;;  %s1664_s25 = sshll.u32 (!%p217_p3), %s2069_s18, 3 }
   0x9   : > { %s2526_s24 = smov (%p29_p4, %s2524_s24), 0  ;;  %220 = sbr.rel (%p217_p3) target bundleno = 381 (0x17d), region = 40 }
   0xa   : > { %p262_p6 = scmp.lt.s32.totalorder (!%p217_p3), %s2069_s18, 7 }
   0xe   : > { %v1969_v0 = vld [vmem:[%s2512_s1 + $0x78] sm:$0xff]   ;;  %v2087_v1 = vmov 0.0   ;;  %v1971_v3 = vld [vmem:[%s2512_s1 + $0x70] sm:$0xff]   ;;  %vm2088_vm0 = vmmov 0   ;;  %s2528_s19 = smov (!%p255_p5, %s2073_s19), 1  ;;  %v1973_v5 = vld [vmem:[%s2512_s1 + $0x68] sm:$0xff]  }
   0xf   : > { %1746 = vmatprep.subr.bf16.mxu0 %v2087_v1  ;;  %1766 = vmatprep.subr.bf16.mxu1 %v2087_v1  ;;  %v1970_v2 = vld [vmem:[%s2512_s1 + $0x38] sm:$0xff]   ;;  %v1972_v4 = vld [vmem:[%s2512_s1 + $0x30] sm:$0xff]   ;;  %s1926_s10 = smul.u32 80, %s2528_s19  ;;  %v1974_v6 = vld [vmem:[%s2512_s1 + $0x28] sm:$0xff]   ;;  %s2530_s18 = smov (!%p262_p6, %s2069_s18), 7 }
  0x10   : > { %1747 = vmatpush3.bf16.msra.mxu0 %v1969_v0  ;;  %1762 = vmatprep.mubr.msk.bf16.mxu0 %vm2088_vm0, %v2087_v1  ;;  %v1975_v7 = vld [vmem:[%s2512_s1 + $0x60] sm:$0xff]   ;;  %v1977_v9 = vld [vmem:[%s2512_s1 + $0x58] sm:$0xff]   ;;  %v1979_v14 = vld [vmem:[%s2512_s1 + $0x50] sm:$0xff]  }
  0x11   : > { %1767 = vmatpush3.bf16.msra.mxu1 %v1970_v2  ;;  %1748 = vmatprep.subr.bf16.mxu0 %v2087_v1  ;;  %s259_s17 = scalar_lea.vmem %s2511_s0, %s1926_s10  ;;  %v1976_v8 = vld [vmem:[%s2512_s1 + $0x20] sm:$0xff]   ;;  %v1978_v10 = vld [vmem:[%s2512_s1 + $0x18] sm:$0xff]   ;;  %v1980_v15 = vld [vmem:[%s2512_s1 + $0x10] sm:$0xff]  }
  0x12   : > { %1768 = vmatprep.subr.bf16.mxu1 %v2087_v1  ;;  %1782 = vmatprep.mubr.msk.bf16.mxu1 %vm2088_vm0, %v2087_v1  ;;  %s2194_s28 = scalar_lea.vmem %s259_s17, %s1664_s25  ;;  %v1981_v17 = vld [vmem:[%s2512_s1 + $0x48] sm:$0xff]   ;;  %v1983_v21 = vld [vmem:[%s2512_s1 + $0x40] sm:$0xff]   ;;  %v1986_v24 = vld [vmem:[%s2512_s1 + $0xb8] sm:$0xff]  }
  0x13   : > { %v280_v11 = vld [vmem:[%s2194_s28] sm:$0xf]  ;;  %v2206_v12 = vld [vmem:[%s2194_s28 + $0x4] sm:$0x1]  ;;  %v1982_v18 = vld [vmem:[%s2512_s1 + $0x8] sm:$0xff]  }
  0x14   : > { %1749 = vmatpush3.bf16.msra.mxu0 %v1971_v3  ;;  %v1460_v13 = vcombine.low %v280_v11, %v2206_v12  ;;  %v1984_v22 = vld [vmem:[%s2512_s1] sm:$0xff]   ;;  %v1987_v25 = vld [vmem:[%s2512_s1 + $0xf8] sm:$0xff]   ;;  %v1988_v26 = vld [vmem:[%s2512_s1 + $0xb0] sm:$0xff]  }
  0x15   : > { %1769 = vmatpush3.bf16.msra.mxu1 %v1972_v4  ;;  %1750 = vmatprep.subr.bf16.mxu0 %v2087_v1  ;;  %v1989_v27 = vld [vmem:[%s2512_s1 + $0xf0] sm:$0xff]   ;;  %v1990_v28 = vld [vmem:[%s2512_s1 + $0xa8] sm:$0xff]   ;;  %v1992_v30 = vld [vmem:[%s2512_s1 + $0xa0] sm:$0xff]  }
  0x16   : > { %1770 = vmatprep.subr.bf16.mxu1 %v2087_v1  ;;  %v323_v16 = vshll.u32 %v1460_v13, 16  ;;  %v321_v19 = vshrl.u32 %v1460_v13, 16  ;;  %v1991_v29 = vld [vmem:[%s2512_s1 + $0xe8] sm:$0xff]   ;;  %v1993_v31 = vld [vmem:[%s2512_s1 + $0xe0] sm:$0xff]   ;;  %v1994_v32 = vld [vmem:[%s2512_s1 + $0x98] sm:$0xff]  }
  0x17   : > { %v1995_v33 = vld [vmem:[%s2512_s1 + $0xd8] sm:$0xff]   ;;  %v1996_v34 = vld [vmem:[%s2512_s1 + $0x90] sm:$0xff]   ;;  %v1998_v36 = vld [vmem:[%s2512_s1 + $0x88] sm:$0xff]  }
  0x18   : > { %1751 = vmatpush3.bf16.msra.mxu0 %v1973_v5  ;;  %v325_v20 = vrot.slane %v323_v16, 1  ;;  %v1997_v35 = vld [vmem:[%s2512_s1 + $0xd0] sm:$0xff]   ;;  %v1999_v37 = vld [vmem:[%s2512_s1 + $0xc8] sm:$0xff]   ;;  %v504_v38 = vld [vmem:[%s2194_s28] sm:$0xe] }
  0x19   : > { %1771 = vmatpush3.bf16.msra.mxu1 %v1974_v6  ;;  %1752 = vmatprep.subr.bf16.mxu0 %v2087_v1  ;;  %v1493_v39 = vcombine.low %v504_v38, %v2206_v12  ;;  %v2000_v40 = vld [vmem:[%s2512_s1 + $0x80] sm:$0xff]   ;;  %v2003_v43 = vld [vmem:[%s2512_s1 + $0x138] sm:$0xff]   ;;  %v1503_v44 = vld [vmem:[%s2194_s28 + $0x8] sm:$0xf] }
  0x1a   : > { %1772 = vmatprep.subr.bf16.mxu1 %v2087_v1  ;;  %v326_v23 = vor.u32 %v325_v20, %v321_v19  ;;  %v2001_v41 = vld [vmem:[%s2512_s1 + $0xc0] sm:$0xff]   ;;  %v2004_v45 = vld [vmem:[%s2512_s1 + $0x178] sm:$0xff]   ;;  %v2005_v46 = vld [vmem:[%s2512_s1 + $0x130] sm:$0xff]  }
  0x1b   : > { %v525_v42 = vrot.slane %v1493_v39, 1  ;;  %v2006_v47 = vld [vmem:[%s2512_s1 + $0x170] sm:$0xff]   ;;  %v2007_v48 = vld [vmem:[%s2512_s1 + $0x128] sm:$0xff]   ;;  %v2009_v50 = vld [vmem:[%s2512_s1 + $0x120] sm:$0xff]  }
  0x1c   : > { %1753 = vmatpush3.bf16.msra.mxu0 %v1975_v7  ;;  %v2008_v49 = vld [vmem:[%s2512_s1 + $0x168] sm:$0xff]   ;;  %v2010_v51 = vld [vmem:[%s2512_s1 + $0x160] sm:$0xff]   ;;  %v2011_v52 = vld [vmem:[%s2512_s1 + $0x118] sm:$0xff]  }
  0x1d   : > { %1773 = vmatpush3.bf16.msra.mxu1 %v1976_v8  ;;  %1754 = vmatprep.subr.bf16.mxu0 %v2087_v1  ;;  %v1528_v53 = vld [vmem:[%s2194_s28 + $0x8] sm:$0xf]  ;;  %v1529_v54 = vld [vmem:[%s2194_s28 + $0xc] sm:$0x1]  ;;  %v2012_v55 = vld [vmem:[%s2512_s1 + $0x158] sm:$0xff]  }
  0x1e   : > { %1774 = vmatprep.subr.bf16.mxu1 %v2087_v1  ;;  %v1546_v56 = vcombine.low %v1528_v53, %v1529_v54  ;;  %v2013_v57 = vld [vmem:[%s2512_s1 + $0x110] sm:$0xff]   ;;  %v2015_v60 = vld [vmem:[%s2512_s1 + $0x108] sm:$0xff]   ;;  %v2017_v2 = vld [vmem:[%s2512_s1 + $0x100] sm:$0xff]  }
  0x1f   : > { %v2014_v58 = vld [vmem:[%s2512_s1 + $0x150] sm:$0xff]   ;;  %v2016_v61 = vld [vmem:[%s2512_s1 + $0x148] sm:$0xff]   ;;  %v2018_v4 = vld [vmem:[%s2512_s1 + $0x140] sm:$0xff]  }
  0x20   : > { %1755 = vmatpush3.bf16.msra.mxu0 %v1977_v9  ;;  %v754_v59 = vshll.u32 %v1546_v56, 16  ;;  %v1555_v62 = vld [vmem:[%s2194_s28 + $0x8] sm:$0xe]  ;;  %v752_v63 = vshrl.u32 %v1546_v56, 16  ;;  %v2020_v6 = vld [vmem:[%s2512_s1 + $0x1b8] sm:$0xff]   ;;  %v2023_v9 = vld [vmem:[%s2512_s1 + $0x1b0] sm:$0xff]  }
  0x21   : > { %1775 = vmatpush3.bf16.msra.mxu1 %v1978_v10  ;;  %1756 = vmatprep.subr.bf16.mxu0 %v2087_v1  ;;  %v1572_v3 = vcombine.low %v1555_v62, %v1529_v54  ;;  %v2022_v8 = vld [vmem:[%s2512_s1 + $0x1f8] sm:$0xff]   ;;  %v2024_v10 = vld [vmem:[%s2512_s1 + $0x1f0] sm:$0xff]   ;;  %v2026_v12 = vld [vmem:[%s2512_s1 + $0x1e8] sm:$0xff]  }
  0x22   : > { %1776 = vmatprep.subr.bf16.mxu1 %v2087_v1  ;;  %v756_v0 = vrot.slane %v754_v59, 1  ;;  %v2027_v13 = vld [vmem:[%s2512_s1 + $0x1a0] sm:$0xff]   ;;  %v2030_v16 = vld [vmem:[%s2512_s1 + $0x1d8] sm:$0xff]   ;;  %v2031_v19 = vld [vmem:[%s2512_s1 + $0x190] sm:$0xff]  }
  0x23   : > { %v869_v7 = vrot.slane %v1572_v3, 1  ;;  %v1634_v38 = vld [vmem:[%s2194_s28 + $0x10] sm:$0xe] }
  0x24   : > { %1757 = vmatpush3.bf16.msra.mxu0 %v1979_v14  ;;  %v757_v5 = vor.u32 %v756_v0, %v752_v63  ;;  %v2028_v14 = vld [vmem:[%s2512_s1 + $0x1e0] sm:$0xff]  }
  0x25   : > { %1777 = vmatpush3.bf16.msra.mxu1 %v1980_v15  ;;  %1758 = vmatprep.subr.bf16.mxu0 %v2087_v1  ;;  %v2029_v15 = vld [vmem:[%s2512_s1 + $0x198] sm:$0xff]  }
  0x26   : > { %1778 = vmatprep.subr.bf16.mxu1 %v2087_v1 }
  0x28   : > { %1759 = vmatpush3.bf16.msra.mxu0 %v1981_v17  ;;  %v1607_v17 = vld [vmem:[%s2194_s28 + $0x10] sm:$0xf] }
  0x29   : > { %1779 = vmatpush3.bf16.msra.mxu1 %v1982_v18  ;;  %1760 = vmatprep.subr.bf16.mxu0 %v2087_v1  ;;  %v1608_v18 = vld [vmem:[%s2194_s28 + $0x14] sm:$0x1] }
  0x2a   : > { %1780 = vmatprep.subr.bf16.mxu1 %v2087_v1  ;;  %v1625_v20 = vcombine.low %v1607_v17, %v1608_v18  ;;  %v1651_v39 = vcombine.low %v1634_v38, %v1608_v18  ;;  %v1660_v18 = vld [vmem:[%s2513_s2] ss:$0 sm:$0xff] }
  0x2c   : > { %1761 = vmatpush3.bf16.msra.mxu0 %v1983_v21  ;;  %v2032_v21 = vld [vmem:[%s2512_s1 + $0x1d0] sm:$0xff]  }
  0x2d   : > { %1781 = vmatpush3.bf16.msra.mxu1 %v1984_v22  ;;  %1786 = vmatprep.subr.bf16.mxu0 %v2087_v1  ;;  %v2033_v22 = vld [vmem:[%s2512_s1 + $0x188] sm:$0xff]  }
  0x2e   : > { %1806 = vmatprep.subr.bf16.mxu1 %v2087_v1 }
  0x2f   : > { %1763 = vmatmul.mubr.bf16.vlgmr.msra.gmra.mxu0 %v326_v23  ;;  %v1098_v23 = vshll.u32 %v1625_v20, 16 }
  0x30   : > { %1783 = vmatmul.mubr.bf16.vlgmr.msra.gmra.mxu1 %v280_v11  ;;  %1787 = vmatpush3.bf16.msra.mxu0 %v1986_v24  ;;  %v2025_v11 = vld [vmem:[%s2512_s1 + $0x1a8] sm:$0xff]  }
  0x31   : > { %1807 = vmatpush3.bf16.msra.mxu1 %v1987_v25  ;;  %1788 = vmatprep.subr.bf16.mxu0 %v2087_v1  ;;  %v2034_v24 = vld [vmem:[%s2512_s1 + $0x1c8] sm:$0xff]   ;;  %v2035_v25 = vld [vmem:[%s2512_s1 + $0x180] sm:$0xff]  }
  0x32   : > { %1808 = vmatprep.subr.bf16.mxu1 %v2087_v1  ;;  %1802 = vmatprep.mubr.msk.bf16.mxu0 %vm2088_vm0, %v2087_v1 }
  0x33   : > { %1822 = vmatprep.mubr.msk.bf16.mxu1 %vm2088_vm0, %v2087_v1 }
  0x34   : > { %1789 = vmatpush3.bf16.msra.mxu0 %v1988_v26  ;;  %v1096_v26 = vshrl.u32 %v1625_v20, 16 }
  0x35   : > { %1809 = vmatpush3.bf16.msra.mxu1 %v1989_v27  ;;  %1790 = vmatprep.subr.bf16.mxu0 %v2087_v1  ;;  %v1100_v27 = vrot.slane %v1098_v23, 1 }
  0x36   : > { %1810 = vmatprep.subr.bf16.mxu1 %v2087_v1 }
  0x38   : > { %1791 = vmatpush3.bf16.msra.mxu0 %v1990_v28  ;;  %v2036_v28 = vld [vmem:[%s2512_s1 + $0x1c0] sm:$0xff]  }
  0x39   : > { %1811 = vmatpush3.bf16.msra.mxu1 %v1991_v29  ;;  %1792 = vmatprep.subr.bf16.mxu0 %v2087_v1  ;;  %v1582_v29 = vld [vmem:[%s2194_s28 + $0x10] sm:$0xf]  ;;  %s1438_s28 = sshll.u32 %s2528_s19, 3 }
  0x3a   : > { %1812 = vmatprep.subr.bf16.mxu1 %v2087_v1  ;;  %s265_s13 = sadd.s32 %s1438_s28, %s2530_s18 }
  0x3b   : > { %s1439_s14 = sshll.u32 %s265_s13, 2 }
  0x3c   : > { %1793 = vmatpush3.bf16.msra.mxu0 %v1992_v30  ;;  %v2037_v30 = vld [vmem:[%s2512_s1 + $0x238] sm:$0xff]   ;;  %s267_s17 = scalar_lea.vmem %s2515_s4, %s1439_s14  ;;  %s275_s30 = scalar_lea.vmem %s2516_s5, %s1439_s14 }
  0x3d   : > { %1813 = vmatpush3.bf16.msra.mxu1 %v1993_v31  ;;  %1794 = vmatprep.subr.bf16.mxu0 %v2087_v1  ;;  %v1101_v31 = vor.u32 %v1100_v27, %v1096_v26 }
  0x3e   : > { %1814 = vmatprep.subr.bf16.mxu1 %v2087_v1 }
  0x40   : > { %1795 = vmatpush3.bf16.msra.mxu0 %v1994_v32  ;;  %v2039_v32 = vld [vmem:[%s2512_s1 + $0x230] sm:$0xff]  }
  0x41   : > { %1815 = vmatpush3.bf16.msra.mxu1 %v1995_v33  ;;  %1796 = vmatprep.subr.bf16.mxu0 %v2087_v1  ;;  %v2040_v33 = vld [vmem:[%s2512_s1 + $0x228] sm:$0xff]  }
  0x42   : > { %1816 = vmatprep.subr.bf16.mxu1 %v2087_v1 }
  0x44   : > { %1797 = vmatpush3.bf16.msra.mxu0 %v1996_v34  ;;  %v2041_v34 = vld [vmem:[%s2512_s1 + $0x220] sm:$0xff]  }
  0x45   : > { %1817 = vmatpush3.bf16.msra.mxu1 %v1997_v35  ;;  %1798 = vmatprep.subr.bf16.mxu0 %v2087_v1  ;;  %v2042_v35 = vld [vmem:[%s2512_s1 + $0x218] sm:$0xff]  }
  0x46   : > { %1818 = vmatprep.subr.bf16.mxu1 %v2087_v1 }
  0x48   : > { %1799 = vmatpush3.bf16.msra.mxu0 %v1998_v36  ;;  %v2043_v36 = vld [vmem:[%s2512_s1 + $0x210] sm:$0xff]  }
  0x49   : > { %1819 = vmatpush3.bf16.msra.mxu1 %v1999_v37  ;;  %1800 = vmatprep.subr.bf16.mxu0 %v2087_v1  ;;  %v2044_v37 = vld [vmem:[%s2512_s1 + $0x208] sm:$0xff]  }
  0x4a   : > { %1820 = vmatprep.subr.bf16.mxu1 %v2087_v1 }
  0x4c   : > { %1801 = vmatpush3.bf16.msra.mxu0 %v2000_v40  ;;  %v2045_v40 = vld [vmem:[%s2512_s1 + $0x200] sm:$0xff]  }
  0x4d   : > { %1821 = vmatpush3.bf16.msra.mxu1 %v2001_v41  ;;  %1826 = vmatprep.subr.bf16.mxu0 %v2087_v1  ;;  %v1213_v41 = vrot.slane %v1651_v39, 1 }
  0x4e   : > { %1846 = vmatprep.subr.bf16.mxu1 %v2087_v1 }
  0x4f   : > { %1803 = vmatmul.mubr.bf16.vlgmr.msra.gmra.mxu0 %v525_v42 }
  0x50   : > { %1827 = vmatpush3.bf16.msra.mxu0 %v2003_v43  ;;  %1823 = vmatmul.mubr.bf16.vlgmr.msra.gmra.mxu1 %v1503_v44 }
  0x51   : > { %1847 = vmatpush3.bf16.msra.mxu1 %v2004_v45  ;;  %1828 = vmatprep.subr.bf16.mxu0 %v2087_v1 }
  0x52   : > { %1848 = vmatprep.subr.bf16.mxu1 %v2087_v1  ;;  %1842 = vmatprep.mubr.msk.bf16.mxu0 %vm2088_vm0, %v2087_v1 }
  0x53   : > { %1862 = vmatprep.mubr.msk.bf16.mxu1 %vm2088_vm0, %v2087_v1 }
  0x54   : > { %1829 = vmatpush3.bf16.msra.mxu0 %v2005_v46 }
  0x55   : > { %1849 = vmatpush3.bf16.msra.mxu1 %v2006_v47  ;;  %1830 = vmatprep.subr.bf16.mxu0 %v2087_v1 }
  0x56   : > { %1850 = vmatprep.subr.bf16.mxu1 %v2087_v1 }
  0x58   : > { %1831 = vmatpush3.bf16.msra.mxu0 %v2007_v48 }
  0x59   : > { %1851 = vmatpush3.bf16.msra.mxu1 %v2008_v49  ;;  %1832 = vmatprep.subr.bf16.mxu0 %v2087_v1 }
  0x5a   : > { %1852 = vmatprep.subr.bf16.mxu1 %v2087_v1 }
  0x5c   : > { %1833 = vmatpush3.bf16.msra.mxu0 %v2009_v50 }
  0x5d   : > { %1853 = vmatpush3.bf16.msra.mxu1 %v2010_v51  ;;  %1834 = vmatprep.subr.bf16.mxu0 %v2087_v1 }
  0x5e   : > { %1854 = vmatprep.subr.bf16.mxu1 %v2087_v1 }
  0x60   : > { %1835 = vmatpush3.bf16.msra.mxu0 %v2011_v52 }
  0x61   : > { %1855 = vmatpush3.bf16.msra.mxu1 %v2012_v55  ;;  %1836 = vmatprep.subr.bf16.mxu0 %v2087_v1 }
  0x62   : > { %1856 = vmatprep.subr.bf16.mxu1 %v2087_v1 }
  0x64   : > { %1837 = vmatpush3.bf16.msra.mxu0 %v2013_v57 }
  0x65   : > { %1857 = vmatpush3.bf16.msra.mxu1 %v2014_v58  ;;  %1838 = vmatprep.subr.bf16.mxu0 %v2087_v1 }
  0x66   : > { %1858 = vmatprep.subr.bf16.mxu1 %v2087_v1 }
  0x68   : > { %1839 = vmatpush3.bf16.msra.mxu0 %v2015_v60 }
  0x69   : > { %1859 = vmatpush3.bf16.msra.mxu1 %v2016_v61  ;;  %1840 = vmatprep.subr.bf16.mxu0 %v2087_v1 }
  0x6a   : > { %1860 = vmatprep.subr.bf16.mxu1 %v2087_v1 }
  0x6c   : > { %1841 = vmatpush3.bf16.msra.mxu0 %v2017_v2 }
  0x6d   : > { %1861 = vmatpush3.bf16.msra.mxu1 %v2018_v4  ;;  %1866 = vmatprep.subr.bf16.mxu0 %v2087_v1 }
  0x6e   : > { %1886 = vmatprep.subr.bf16.mxu1 %v2087_v1 }
  0x6f   : > { %1843 = vmatmul.mubr.bf16.vlgmr.msra.gmra.mxu0 %v757_v5 }
  0x70   : > { %1867 = vmatpush3.bf16.msra.mxu0 %v2020_v6  ;;  %1863 = vmatmul.mubr.bf16.vlgmr.msra.gmra.mxu1 %v869_v7 }
  0x71   : > { %1887 = vmatpush3.bf16.msra.mxu1 %v2022_v8  ;;  %1868 = vmatprep.subr.bf16.mxu0 %v2087_v1 }
  0x72   : > { %1888 = vmatprep.subr.bf16.mxu1 %v2087_v1  ;;  %1882 = vmatprep.mubr.msk.bf16.mxu0 %vm2088_vm0, %v2087_v1 }
  0x73   : > { %1902 = vmatprep.mubr.msk.bf16.mxu1 %vm2088_vm0, %v2087_v1 }
  0x74   : > { %1869 = vmatpush3.bf16.msra.mxu0 %v2023_v9 }
  0x75   : > { %1889 = vmatpush3.bf16.msra.mxu1 %v2024_v10  ;;  %1870 = vmatprep.subr.bf16.mxu0 %v2087_v1 }
  0x76   : > { %1890 = vmatprep.subr.bf16.mxu1 %v2087_v1 }
  0x78   : > { %1871 = vmatpush3.bf16.msra.mxu0 %v2025_v11 }
  0x79   : > { %1891 = vmatpush3.bf16.msra.mxu1 %v2026_v12  ;;  %1872 = vmatprep.subr.bf16.mxu0 %v2087_v1 }
  0x7a   : > { %1892 = vmatprep.subr.bf16.mxu1 %v2087_v1 }
  0x7c   : > { %1873 = vmatpush3.bf16.msra.mxu0 %v2027_v13 }
  0x7d   : > { %1893 = vmatpush3.bf16.msra.mxu1 %v2028_v14  ;;  %1874 = vmatprep.subr.bf16.mxu0 %v2087_v1 }
  0x7e   : > { %1894 = vmatprep.subr.bf16.mxu1 %v2087_v1 }
  0x80   : > { %1875 = vmatpush3.bf16.msra.mxu0 %v2029_v15 }
  0x81   : > { %1895 = vmatpush3.bf16.msra.mxu1 %v2030_v16  ;;  %1876 = vmatprep.subr.bf16.mxu0 %v2087_v1 }
  0x82   : > { %1896 = vmatprep.subr.bf16.mxu1 %v2087_v1 }
  0x84   : > { %1877 = vmatpush3.bf16.msra.mxu0 %v2031_v19  ;;  %v1320_v19 = vld [vmem:[%s267_s17] sm:$0xf] }
  0x85   : > { %1897 = vmatpush3.bf16.msra.mxu1 %v2032_v21  ;;  %1878 = vmatprep.subr.bf16.mxu0 %v2087_v1  ;;  %v1661_v21 = vld [vmem:[%s2514_s3] ss:$0 sm:$0xff] }
  0x86   : > { %1898 = vmatprep.subr.bf16.mxu1 %v2087_v1 }
  0x88   : > { %1879 = vmatpush3.bf16.msra.mxu0 %v2033_v22 }
  0x89   : > { %1899 = vmatpush3.bf16.msra.mxu1 %v2034_v24  ;;  %1880 = vmatprep.subr.bf16.mxu0 %v2087_v1  ;;  %v1321_v24 = vunpack.c.l.bf16 %v1320_v19 }
  0x8a   : > { %1900 = vmatprep.subr.bf16.mxu1 %v2087_v1 }
  0x8c   : > { %1881 = vmatpush3.bf16.msra.mxu0 %v2035_v25 }
  0x8d   : > { %1901 = vmatpush3.bf16.msra.mxu1 %v2036_v28  ;;  %1906 = vmatprep.subr.bf16.mxu0 %v2087_v1 }
  0x8f   : > { %1883 = vmatmul.mubr.bf16.vlgmr.msra.gmra.mxu0 %v1582_v29 }
  0x90   : > { %1907 = vmatpush3.bf16.msra.mxu0 %v2037_v30  ;;  %1903 = vmatmul.mubr.bf16.vlgmr.msra.gmra.mxu1 %v1101_v31 }
  0x91   : > { %1908 = vmatprep.subr.bf16.mxu0 %v2087_v1  ;;  %1922 = vmatprep.mubr.msk.bf16.mxu0 %vm2088_vm0, %v2087_v1 }
  0x94   : > { %1909 = vmatpush3.bf16.msra.mxu0 %v2039_v32 }
  0x95   : > { %1910 = vmatprep.subr.bf16.mxu0 %v2087_v1 }
  0x98   : > { %1911 = vmatpush3.bf16.msra.mxu0 %v2040_v33 }
  0x99   : > { %1912 = vmatprep.subr.bf16.mxu0 %v2087_v1 }
  0x9c   : > { %1913 = vmatpush3.bf16.msra.mxu0 %v2041_v34 }
  0x9d   : > { %1914 = vmatprep.subr.bf16.mxu0 %v2087_v1 }
  0xa0   : > { %1915 = vmatpush3.bf16.msra.mxu0 %v2042_v35 }
  0xa1   : > { %1916 = vmatprep.subr.bf16.mxu0 %v2087_v1 }
  0xa4   : > { %1917 = vmatpush3.bf16.msra.mxu0 %v2043_v36 }
  0xa5   : > { %1918 = vmatprep.subr.bf16.mxu0 %v2087_v1 }
  0xa8   : > { %1919 = vmatpush3.bf16.msra.mxu0 %v2044_v37 }
  0xa9   : > { %1920 = vmatprep.subr.bf16.mxu0 %v2087_v1 }
  0xac   : > { %1921 = vmatpush3.bf16.msra.mxu0 %v2045_v40 }
  0xaf   : > { %1923 = vmatmul.mubr.bf16.vlgmr.msra.gmra.mxu0 %v1213_v41 }
  0xef   : > { %v410_v42 = vpop.f32.mrf.mxu0 }
  0xf0   : > { %v498_v43 = vpop.f32.mrf.mxu1 }
  0xf1   : > { %v499_v44 = vadd.f32 %v498_v43, %v410_v42  ;;  %v1764_v45 = vpop.f32.mrf.mxu0 }
  0xf2   : > { %v1784_v46 = vpop.f32.mrf.mxu1 }
  0xf3   : > { %v413_v47 = vpop.f32.mrf.mxu0 }
  0xf4   : > { %v501_v48 = vpop.f32.mrf.mxu1 }
  0xf5   : > { %v1765_v49 = vpop.f32.mrf.mxu0 }
  0xf6   : > { %v1785_v50 = vpop.f32.mrf.mxu1 }
 0x10f   : > { %v609_v51 = vpop.f32.mrf.mxu0 }
 0x110   : > { %v615_v52 = vadd.f32 %v609_v51, %v499_v44  ;;  %v720_v53 = vpop.f32.mrf.mxu1 }
 0x111   : > { %v1804_v54 = vpop.f32.mrf.mxu0 }
 0x112   : > { %v726_v55 = vadd.f32 %v720_v53, %v615_v52  ;;  %v1824_v56 = vpop.f32.mrf.mxu1 }
 0x113   : > { %v612_v57 = vpop.f32.mrf.mxu0 }
 0x114   : > { %v723_v1 = vpop.f32.mrf.mxu1 }
 0x115   : > { %v1805_v58 = vpop.f32.mrf.mxu0 }
 0x116   : > { %v1825_v59 = vpop.f32.mrf.mxu1 }
 0x12f   : > { %v841_v60 = vpop.f32.mrf.mxu0 }
 0x130   : > { %v953_v61 = vpop.f32.mrf.mxu1  ;;  %v847_v13 = vadd.f32 %v841_v60, %v726_v55 }
 0x131   : > { %v1844_v62 = vpop.f32.mrf.mxu0 }
 0x132   : > { %v1864_v63 = vpop.f32.mrf.mxu1  ;;  %v959_v14 = vadd.f32 %v953_v61, %v847_v13 }
 0x133   : > { %v844_v0 = vpop.f32.mrf.mxu0 }
 0x134   : > { %v956_v2 = vpop.f32.mrf.mxu1 }
 0x135   : > { %v1845_v3 = vpop.f32.mrf.mxu0 }
 0x136   : > { %v1865_v4 = vpop.f32.mrf.mxu1 }
 0x14f   : > { %v1064_v5 = vpop.f32.mrf.mxu0 }
 0x150   : > { %v1185_v6 = vpop.f32.mrf.mxu1  ;;  %v1070_v15 = vadd.f32 %v1064_v5, %v959_v14 }
 0x151   : > { %v1884_v7 = vpop.f32.mrf.mxu0 }
 0x152   : > { %v1904_v8 = vpop.f32.mrf.mxu1  ;;  %v1191_v16 = vadd.f32 %v1185_v6, %v1070_v15 }
 0x153   : > { %v1067_v9 = vpop.f32.mrf.mxu0 }
 0x154   : > { %v1188_v10 = vpop.f32.mrf.mxu1 }
 0x155   : > { %v1885_v11 = vpop.f32.mrf.mxu0 }
 0x156   : > { %v1905_v12 = vpop.f32.mrf.mxu1 }
 0x16f   : > { %v1297_v17 = vpop.f32.mrf.mxu0 }
 0x170   : > { %v1303_v20 = vadd.f32 %v1297_v17, %v1191_v16 }
 0x171   : > { %v1924_v22 = vpop.f32.mrf.mxu0 }
 0x172   : > { %v1311_v23 = vmul.f32 %v1660_v18, %v1303_v20 }
 0x173   : > { %v1300_v25 = vpop.f32.mrf.mxu0 }
 0x174   : > { %v1319_v26 = vadd.f32 %v1661_v21, %v1311_v23 }
 0x175   : > { %v1925_v27 = vpop.f32.mrf.mxu0 }
 0x176   : > { %v1322_v28 = vadd.f32 %v1321_v24, %v1319_v26 }
 0x178   : > { %v1323_v29 = vmax.f32 %v1322_v28, 0.0 }
 0x17a   : > { %v1324_v30 = vpack.c.bf16 %v1323_v29, %v1323_v29 }
 0x17c   : > { %1325 = vst [vmem:[%s275_s30] sm:$0xf] %v1324_v30 }
 0x17d PF: > { %s15_s22 = sadd.s32 1, %s2085_s22   ;;  %s2517_s18 = smov %s2077_s20 }
 0x17e   : > { %p12_p7 = scmp.ge.s32.totalorder %s15_s22, 18   ;;  %s2518_s19 = smov %s2081_s21 }
 0x17f   : > { %s2519_s20 = smov %s2522_s23  ;;  %s2520_s21 = smov %s2526_s24 }
 0x180   :  { %14 = sbr.rel (!%p12_p7) target bundleno = 3 (0x3), region = 84 }

// kernel: _lambda_.15
= control target key start
LH: loop header
LB: loop body
LE: loop exit
PB: predicated region body
PF: predicated region fallthrough
CT: control target
= control target key end

     0   :  { %s2033_s15 = smov 0   ;;  %s2035_s16 = smov 0   ;;  %s2422_s0 = inlined_call_operand.vmem [shape: bf16[2,10,10,128], index: 0, kind: input, shape index: {}]   ;;  %s2423_s1 = inlined_call_operand.vmem [shape: bf16[9,128,128], index: 1, kind: input, shape index: {}]   ;;  %s2424_s2 = inlined_call_operand.vmem [shape: f32[1,128], index: 2, kind: input, shape index: {}]   ;;  %s2425_s3 = inlined_call_operand.vmem [shape: f32[1,128], index: 3, kind: input, shape index: {}]   ;;  %s2426_s4 = inlined_call_operand.vmem [shape: bf16[2,8,8,128], index: 4, kind: output, shape index: {}]  }
   0x1   :  { %s2037_s17 = smov 0   ;;  %s2039_s18 = smov 0  }
   0x2   :  { %s2041_s19 = smov 0  }
   0x3 LB: > { %s23_s20 = sadd.s32 1, %s1996_s17  ;;  %s26_s21 = sadd.s32 1, %s2000_s18  ;;  %s2004_s19 = sphi %s2041_s19, %s14_s19   ;;  %s2000_s18 = sphi %s2039_s18, %s2430_s18   ;;  %s1996_s17 = sphi %s2037_s17, %s2429_s17   ;;  %s1992_s16 = sphi %s2035_s16, %s2428_s16   ;;  %s1988_s15 = sphi %s2033_s15, %s2427_s15  }
   0x4   : > { %p24_p0 = scmp.ge.s32.totalorder %s23_s20, 8  ;;  %p1357_p1 = scmp.ge.s32.totalorder %s2004_s19, 1 }
   0x5   : > { %p176_p2 = scmp.lt.s32.totalorder %s2004_s19, 17 }
   0x6   : > { %s2432_s20 = smov (%p24_p0, %s23_s20), 0  ;;  %s2434_s21 = smov (!%p24_p0, %s26_s21), %s2000_s18 }
   0x7   : > { %p177_p3 = pnand %p1357_p1, %p176_p2  ;;  %p28_p4 = scmp.ge.s32.totalorder %s2434_s21, 2 }
   0x8   : > { %p205_p5 = scmp.lt.s32.totalorder (!%p177_p3), %s1992_s16, 1  ;;  %s1583_s14 = sshll.u32 (!%p177_p3), %s1988_s15, 3 }
   0x9   : > { %s2436_s21 = smov (%p28_p4, %s2434_s21), 0  ;;  %180 = sbr.rel (%p177_p3) target bundleno = 379 (0x17b), region = 36 }
   0xa   : > { %p212_p6 = scmp.lt.s32.totalorder (!%p177_p3), %s1988_s15, 7 }
   0xe   : > { %v1888_v0 = vld [vmem:[%s2423_s1 + $0x78] sm:$0xff]   ;;  %v2006_v1 = vmov 0.0   ;;  %v1890_v3 = vld [vmem:[%s2423_s1 + $0x70] sm:$0xff]   ;;  %vm2007_vm0 = vmmov 0   ;;  %s2438_s16 = smov (!%p205_p5, %s1992_s16), 1  ;;  %v1892_v5 = vld [vmem:[%s2423_s1 + $0x68] sm:$0xff]  }
   0xf   : > { %1665 = vmatprep.subr.bf16.mxu0 %v2006_v1  ;;  %1685 = vmatprep.subr.bf16.mxu1 %v2006_v1  ;;  %v1889_v2 = vld [vmem:[%s2423_s1 + $0x38] sm:$0xff]   ;;  %v1891_v4 = vld [vmem:[%s2423_s1 + $0x30] sm:$0xff]   ;;  %s1845_s6 = smul.u32 80, %s2438_s16  ;;  %v1893_v6 = vld [vmem:[%s2423_s1 + $0x28] sm:$0xff]   ;;  %s2440_s15 = smov (!%p212_p6, %s1988_s15), 7 }
  0x10   : > { %1666 = vmatpush3.bf16.msra.mxu0 %v1888_v0  ;;  %1681 = vmatprep.mubr.msk.bf16.mxu0 %vm2007_vm0, %v2006_v1  ;;  %v1894_v7 = vld [vmem:[%s2423_s1 + $0x60] sm:$0xff]   ;;  %v1896_v9 = vld [vmem:[%s2423_s1 + $0x58] sm:$0xff]   ;;  %v1898_v14 = vld [vmem:[%s2423_s1 + $0x50] sm:$0xff]  }
  0x11   : > { %1686 = vmatpush3.bf16.msra.mxu1 %v1889_v2  ;;  %1667 = vmatprep.subr.bf16.mxu0 %v2006_v1  ;;  %s209_s13 = scalar_lea.vmem %s2422_s0, %s1845_s6  ;;  %v1895_v8 = vld [vmem:[%s2423_s1 + $0x20] sm:$0xff]   ;;  %v1897_v10 = vld [vmem:[%s2423_s1 + $0x18] sm:$0xff]   ;;  %v1899_v15 = vld [vmem:[%s2423_s1 + $0x10] sm:$0xff]  }
  0x12   : > { %1687 = vmatprep.subr.bf16.mxu1 %v2006_v1  ;;  %1701 = vmatprep.mubr.msk.bf16.mxu1 %vm2007_vm0, %v2006_v1  ;;  %s2108_s24 = scalar_lea.vmem %s209_s13, %s1583_s14  ;;  %v1900_v17 = vld [vmem:[%s2423_s1 + $0x48] sm:$0xff]   ;;  %v1902_v21 = vld [vmem:[%s2423_s1 + $0x40] sm:$0xff]   ;;  %v1905_v24 = vld [vmem:[%s2423_s1 + $0xb8] sm:$0xff]  }
  0x13   : > { %v222_v11 = vld [vmem:[%s2108_s24] sm:$0xf]  ;;  %v2120_v12 = vld [vmem:[%s2108_s24 + $0x4] sm:$0x1]  ;;  %v1901_v18 = vld [vmem:[%s2423_s1 + $0x8] sm:$0xff]  }
  0x14   : > { %1668 = vmatpush3.bf16.msra.mxu0 %v1890_v3  ;;  %v1379_v13 = vcombine.low %v222_v11, %v2120_v12  ;;  %v1903_v22 = vld [vmem:[%s2423_s1] sm:$0xff]   ;;  %v1906_v25 = vld [vmem:[%s2423_s1 + $0xf8] sm:$0xff]   ;;  %v1907_v26 = vld [vmem:[%s2423_s1 + $0xb0] sm:$0xff]  }
  0x15   : > { %1688 = vmatpush3.bf16.msra.mxu1 %v1891_v4  ;;  %1669 = vmatprep.subr.bf16.mxu0 %v2006_v1  ;;  %v1908_v27 = vld [vmem:[%s2423_s1 + $0xf0] sm:$0xff]   ;;  %v1909_v28 = vld [vmem:[%s2423_s1 + $0xa8] sm:$0xff]   ;;  %v1911_v30 = vld [vmem:[%s2423_s1 + $0xa0] sm:$0xff]  }
  0x16   : > { %1689 = vmatprep.subr.bf16.mxu1 %v2006_v1  ;;  %v265_v16 = vshll.u32 %v1379_v13, 16  ;;  %v263_v19 = vshrl.u32 %v1379_v13, 16  ;;  %v1910_v29 = vld [vmem:[%s2423_s1 + $0xe8] sm:$0xff]   ;;  %v1912_v31 = vld [vmem:[%s2423_s1 + $0xe0] sm:$0xff]   ;;  %v1913_v32 = vld [vmem:[%s2423_s1 + $0x98] sm:$0xff]  }
  0x17   : > { %v1914_v33 = vld [vmem:[%s2423_s1 + $0xd8] sm:$0xff]   ;;  %v1915_v34 = vld [vmem:[%s2423_s1 + $0x90] sm:$0xff]   ;;  %v1917_v36 = vld [vmem:[%s2423_s1 + $0x88] sm:$0xff]  }
  0x18   : > { %1670 = vmatpush3.bf16.msra.mxu0 %v1892_v5  ;;  %v267_v20 = vrot.slane %v265_v16, 1  ;;  %v1916_v35 = vld [vmem:[%s2423_s1 + $0xd0] sm:$0xff]   ;;  %v1918_v37 = vld [vmem:[%s2423_s1 + $0xc8] sm:$0xff]   ;;  %v446_v38 = vld [vmem:[%s2108_s24] sm:$0xe] }
  0x19   : > { %1690 = vmatpush3.bf16.msra.mxu1 %v1893_v6  ;;  %1671 = vmatprep.subr.bf16.mxu0 %v2006_v1  ;;  %v1412_v39 = vcombine.low %v446_v38, %v2120_v12  ;;  %v1919_v40 = vld [vmem:[%s2423_s1 + $0x80] sm:$0xff]   ;;  %v1922_v43 = vld [vmem:[%s2423_s1 + $0x138] sm:$0xff]   ;;  %v1422_v44 = vld [vmem:[%s2108_s24 + $0x8] sm:$0xf] }
  0x1a   : > { %1691 = vmatprep.subr.bf16.mxu1 %v2006_v1  ;;  %v268_v23 = vor.u32 %v267_v20, %v263_v19  ;;  %v1920_v41 = vld [vmem:[%s2423_s1 + $0xc0] sm:$0xff]   ;;  %v1923_v45 = vld [vmem:[%s2423_s1 + $0x178] sm:$0xff]   ;;  %v1924_v46 = vld [vmem:[%s2423_s1 + $0x130] sm:$0xff]  }
  0x1b   : > { %v467_v42 = vrot.slane %v1412_v39, 1  ;;  %v1925_v47 = vld [vmem:[%s2423_s1 + $0x170] sm:$0xff]   ;;  %v1926_v48 = vld [vmem:[%s2423_s1 + $0x128] sm:$0xff]   ;;  %v1928_v50 = vld [vmem:[%s2423_s1 + $0x120] sm:$0xff]  }
  0x1c   : > { %1672 = vmatpush3.bf16.msra.mxu0 %v1894_v7  ;;  %v1927_v49 = vld [vmem:[%s2423_s1 + $0x168] sm:$0xff]   ;;  %v1929_v51 = vld [vmem:[%s2423_s1 + $0x160] sm:$0xff]   ;;  %v1930_v52 = vld [vmem:[%s2423_s1 + $0x118] sm:$0xff]  }
  0x1d   : > { %1692 = vmatpush3.bf16.msra.mxu1 %v1895_v8  ;;  %1673 = vmatprep.subr.bf16.mxu0 %v2006_v1  ;;  %v1447_v53 = vld [vmem:[%s2108_s24 + $0x8] sm:$0xf]  ;;  %v1448_v54 = vld [vmem:[%s2108_s24 + $0xc] sm:$0x1]  ;;  %v1931_v55 = vld [vmem:[%s2423_s1 + $0x158] sm:$0xff]  }
  0x1e   : > { %1693 = vmatprep.subr.bf16.mxu1 %v2006_v1  ;;  %v1465_v56 = vcombine.low %v1447_v53, %v1448_v54  ;;  %v1932_v57 = vld [vmem:[%s2423_s1 + $0x110] sm:$0xff]   ;;  %v1934_v60 = vld [vmem:[%s2423_s1 + $0x108] sm:$0xff]   ;;  %v1936_v2 = vld [vmem:[%s2423_s1 + $0x100] sm:$0xff]  }
  0x1f   : > { %v1933_v58 = vld [vmem:[%s2423_s1 + $0x150] sm:$0xff]   ;;  %v1935_v61 = vld [vmem:[%s2423_s1 + $0x148] sm:$0xff]   ;;  %v1937_v4 = vld [vmem:[%s2423_s1 + $0x140] sm:$0xff]  }
  0x20   : > { %1674 = vmatpush3.bf16.msra.mxu0 %v1896_v9  ;;  %v696_v59 = vshll.u32 %v1465_v56, 16  ;;  %v1474_v62 = vld [vmem:[%s2108_s24 + $0x8] sm:$0xe]  ;;  %v694_v63 = vshrl.u32 %v1465_v56, 16  ;;  %v1939_v6 = vld [vmem:[%s2423_s1 + $0x1b8] sm:$0xff]   ;;  %v1942_v9 = vld [vmem:[%s2423_s1 + $0x1b0] sm:$0xff]  }
  0x21   : > { %1694 = vmatpush3.bf16.msra.mxu1 %v1897_v10  ;;  %1675 = vmatprep.subr.bf16.mxu0 %v2006_v1  ;;  %v1491_v3 = vcombine.low %v1474_v62, %v1448_v54  ;;  %v1941_v8 = vld [vmem:[%s2423_s1 + $0x1f8] sm:$0xff]   ;;  %v1943_v10 = vld [vmem:[%s2423_s1 + $0x1f0] sm:$0xff]   ;;  %v1945_v12 = vld [vmem:[%s2423_s1 + $0x1e8] sm:$0xff]  }
  0x22   : > { %1695 = vmatprep.subr.bf16.mxu1 %v2006_v1  ;;  %v698_v0 = vrot.slane %v696_v59, 1  ;;  %v1946_v13 = vld [vmem:[%s2423_s1 + $0x1a0] sm:$0xff]   ;;  %v1949_v16 = vld [vmem:[%s2423_s1 + $0x1d8] sm:$0xff]   ;;  %v1950_v19 = vld [vmem:[%s2423_s1 + $0x190] sm:$0xff]  }
  0x23   : > { %v811_v7 = vrot.slane %v1491_v3, 1  ;;  %v1553_v38 = vld [vmem:[%s2108_s24 + $0x10] sm:$0xe] }
  0x24   : > { %1676 = vmatpush3.bf16.msra.mxu0 %v1898_v14  ;;  %v699_v5 = vor.u32 %v698_v0, %v694_v63  ;;  %v1947_v14 = vld [vmem:[%s2423_s1 + $0x1e0] sm:$0xff]  }
  0x25   : > { %1696 = vmatpush3.bf16.msra.mxu1 %v1899_v15  ;;  %1677 = vmatprep.subr.bf16.mxu0 %v2006_v1  ;;  %v1948_v15 = vld [vmem:[%s2423_s1 + $0x198] sm:$0xff]  }
  0x26   : > { %1697 = vmatprep.subr.bf16.mxu1 %v2006_v1 }
  0x28   : > { %1678 = vmatpush3.bf16.msra.mxu0 %v1900_v17  ;;  %v1526_v17 = vld [vmem:[%s2108_s24 + $0x10] sm:$0xf] }
  0x29   : > { %1698 = vmatpush3.bf16.msra.mxu1 %v1901_v18  ;;  %1679 = vmatprep.subr.bf16.mxu0 %v2006_v1  ;;  %v1527_v18 = vld [vmem:[%s2108_s24 + $0x14] sm:$0x1] }
  0x2a   : > { %1699 = vmatprep.subr.bf16.mxu1 %v2006_v1  ;;  %v1544_v20 = vcombine.low %v1526_v17, %v1527_v18  ;;  %v1570_v39 = vcombine.low %v1553_v38, %v1527_v18  ;;  %v1579_v18 = vld [vmem:[%s2424_s2] ss:$0 sm:$0xff] }
  0x2c   : > { %1680 = vmatpush3.bf16.msra.mxu0 %v1902_v21  ;;  %v1951_v21 = vld [vmem:[%s2423_s1 + $0x1d0] sm:$0xff]  }
  0x2d   : > { %1700 = vmatpush3.bf16.msra.mxu1 %v1903_v22  ;;  %1705 = vmatprep.subr.bf16.mxu0 %v2006_v1  ;;  %v1952_v22 = vld [vmem:[%s2423_s1 + $0x188] sm:$0xff]  }
  0x2e   : > { %1725 = vmatprep.subr.bf16.mxu1 %v2006_v1 }
  0x2f   : > { %1682 = vmatmul.mubr.bf16.vlgmr.msra.gmra.mxu0 %v268_v23  ;;  %v1040_v23 = vshll.u32 %v1544_v20, 16 }
  0x30   : > { %1702 = vmatmul.mubr.bf16.vlgmr.msra.gmra.mxu1 %v222_v11  ;;  %1706 = vmatpush3.bf16.msra.mxu0 %v1905_v24  ;;  %v1944_v11 = vld [vmem:[%s2423_s1 + $0x1a8] sm:$0xff]  }
  0x31   : > { %1726 = vmatpush3.bf16.msra.mxu1 %v1906_v25  ;;  %1707 = vmatprep.subr.bf16.mxu0 %v2006_v1  ;;  %v1953_v24 = vld [vmem:[%s2423_s1 + $0x1c8] sm:$0xff]   ;;  %v1954_v25 = vld [vmem:[%s2423_s1 + $0x180] sm:$0xff]  }
  0x32   : > { %1727 = vmatprep.subr.bf16.mxu1 %v2006_v1  ;;  %1721 = vmatprep.mubr.msk.bf16.mxu0 %vm2007_vm0, %v2006_v1 }
  0x33   : > { %1741 = vmatprep.mubr.msk.bf16.mxu1 %vm2007_vm0, %v2006_v1 }
  0x34   : > { %1708 = vmatpush3.bf16.msra.mxu0 %v1907_v26  ;;  %v1038_v26 = vshrl.u32 %v1544_v20, 16  ;;  %v1580_v20 = vld [vmem:[%s2425_s3] ss:$0 sm:$0xff] }
  0x35   : > { %1728 = vmatpush3.bf16.msra.mxu1 %v1908_v27  ;;  %1709 = vmatprep.subr.bf16.mxu0 %v2006_v1  ;;  %v1042_v27 = vrot.slane %v1040_v23, 1 }
  0x36   : > { %1729 = vmatprep.subr.bf16.mxu1 %v2006_v1 }
  0x38   : > { %1710 = vmatpush3.bf16.msra.mxu0 %v1909_v28  ;;  %v1955_v28 = vld [vmem:[%s2423_s1 + $0x1c0] sm:$0xff]  }
  0x39   : > { %1730 = vmatpush3.bf16.msra.mxu1 %v1910_v29  ;;  %1711 = vmatprep.subr.bf16.mxu0 %v2006_v1  ;;  %v1501_v29 = vld [vmem:[%s2108_s24 + $0x10] sm:$0xf]  ;;  %s1359_s24 = sshll.u32 %s2438_s16, 3 }
  0x3a   : > { %1731 = vmatprep.subr.bf16.mxu1 %v2006_v1  ;;  %s215_s29 = sadd.s32 %s1359_s24, %s2440_s15 }
  0x3b   : > { %s1360_s6 = sshll.u32 %s215_s29, 2 }
  0x3c   : > { %1712 = vmatpush3.bf16.msra.mxu0 %v1911_v30  ;;  %v1956_v30 = vld [vmem:[%s2423_s1 + $0x238] sm:$0xff]   ;;  %s217_s8 = scalar_lea.vmem %s2426_s4, %s1360_s6 }
  0x3d   : > { %1732 = vmatpush3.bf16.msra.mxu1 %v1912_v31  ;;  %1713 = vmatprep.subr.bf16.mxu0 %v2006_v1  ;;  %v1043_v31 = vor.u32 %v1042_v27, %v1038_v26 }
  0x3e   : > { %1733 = vmatprep.subr.bf16.mxu1 %v2006_v1 }
  0x40   : > { %1714 = vmatpush3.bf16.msra.mxu0 %v1913_v32  ;;  %v1958_v32 = vld [vmem:[%s2423_s1 + $0x230] sm:$0xff]  }
  0x41   : > { %1734 = vmatpush3.bf16.msra.mxu1 %v1914_v33  ;;  %1715 = vmatprep.subr.bf16.mxu0 %v2006_v1  ;;  %v1959_v33 = vld [vmem:[%s2423_s1 + $0x228] sm:$0xff]  }
  0x42   : > { %1735 = vmatprep.subr.bf16.mxu1 %v2006_v1 }
  0x44   : > { %1716 = vmatpush3.bf16.msra.mxu0 %v1915_v34  ;;  %v1960_v34 = vld [vmem:[%s2423_s1 + $0x220] sm:$0xff]  }
  0x45   : > { %1736 = vmatpush3.bf16.msra.mxu1 %v1916_v35  ;;  %1717 = vmatprep.subr.bf16.mxu0 %v2006_v1  ;;  %v1961_v35 = vld [vmem:[%s2423_s1 + $0x218] sm:$0xff]  }
  0x46   : > { %1737 = vmatprep.subr.bf16.mxu1 %v2006_v1 }
  0x48   : > { %1718 = vmatpush3.bf16.msra.mxu0 %v1917_v36  ;;  %v1962_v36 = vld [vmem:[%s2423_s1 + $0x210] sm:$0xff]  }
  0x49   : > { %1738 = vmatpush3.bf16.msra.mxu1 %v1918_v37  ;;  %1719 = vmatprep.subr.bf16.mxu0 %v2006_v1  ;;  %v1963_v37 = vld [vmem:[%s2423_s1 + $0x208] sm:$0xff]  }
  0x4a   : > { %1739 = vmatprep.subr.bf16.mxu1 %v2006_v1 }
  0x4c   : > { %1720 = vmatpush3.bf16.msra.mxu0 %v1919_v40  ;;  %v1964_v40 = vld [vmem:[%s2423_s1 + $0x200] sm:$0xff]  }
  0x4d   : > { %1740 = vmatpush3.bf16.msra.mxu1 %v1920_v41  ;;  %1745 = vmatprep.subr.bf16.mxu0 %v2006_v1  ;;  %v1155_v41 = vrot.slane %v1570_v39, 1 }
  0x4e   : > { %1765 = vmatprep.subr.bf16.mxu1 %v2006_v1 }
  0x4f   : > { %1722 = vmatmul.mubr.bf16.vlgmr.msra.gmra.mxu0 %v467_v42 }
  0x50   : > { %1746 = vmatpush3.bf16.msra.mxu0 %v1922_v43  ;;  %1742 = vmatmul.mubr.bf16.vlgmr.msra.gmra.mxu1 %v1422_v44 }
  0x51   : > { %1766 = vmatpush3.bf16.msra.mxu1 %v1923_v45  ;;  %1747 = vmatprep.subr.bf16.mxu0 %v2006_v1 }
  0x52   : > { %1767 = vmatprep.subr.bf16.mxu1 %v2006_v1  ;;  %1761 = vmatprep.mubr.msk.bf16.mxu0 %vm2007_vm0, %v2006_v1 }
  0x53   : > { %1781 = vmatprep.mubr.msk.bf16.mxu1 %vm2007_vm0, %v2006_v1 }
  0x54   : > { %1748 = vmatpush3.bf16.msra.mxu0 %v1924_v46 }
  0x55   : > { %1768 = vmatpush3.bf16.msra.mxu1 %v1925_v47  ;;  %1749 = vmatprep.subr.bf16.mxu0 %v2006_v1 }
  0x56   : > { %1769 = vmatprep.subr.bf16.mxu1 %v2006_v1 }
  0x58   : > { %1750 = vmatpush3.bf16.msra.mxu0 %v1926_v48 }
  0x59   : > { %1770 = vmatpush3.bf16.msra.mxu1 %v1927_v49  ;;  %1751 = vmatprep.subr.bf16.mxu0 %v2006_v1 }
  0x5a   : > { %1771 = vmatprep.subr.bf16.mxu1 %v2006_v1 }
  0x5c   : > { %1752 = vmatpush3.bf16.msra.mxu0 %v1928_v50 }
  0x5d   : > { %1772 = vmatpush3.bf16.msra.mxu1 %v1929_v51  ;;  %1753 = vmatprep.subr.bf16.mxu0 %v2006_v1 }
  0x5e   : > { %1773 = vmatprep.subr.bf16.mxu1 %v2006_v1 }
  0x60   : > { %1754 = vmatpush3.bf16.msra.mxu0 %v1930_v52 }
  0x61   : > { %1774 = vmatpush3.bf16.msra.mxu1 %v1931_v55  ;;  %1755 = vmatprep.subr.bf16.mxu0 %v2006_v1 }
  0x62   : > { %1775 = vmatprep.subr.bf16.mxu1 %v2006_v1 }
  0x64   : > { %1756 = vmatpush3.bf16.msra.mxu0 %v1932_v57 }
  0x65   : > { %1776 = vmatpush3.bf16.msra.mxu1 %v1933_v58  ;;  %1757 = vmatprep.subr.bf16.mxu0 %v2006_v1 }
  0x66   : > { %1777 = vmatprep.subr.bf16.mxu1 %v2006_v1 }
  0x68   : > { %1758 = vmatpush3.bf16.msra.mxu0 %v1934_v60 }
  0x69   : > { %1778 = vmatpush3.bf16.msra.mxu1 %v1935_v61  ;;  %1759 = vmatprep.subr.bf16.mxu0 %v2006_v1 }
  0x6a   : > { %1779 = vmatprep.subr.bf16.mxu1 %v2006_v1 }
  0x6c   : > { %1760 = vmatpush3.bf16.msra.mxu0 %v1936_v2 }
  0x6d   : > { %1780 = vmatpush3.bf16.msra.mxu1 %v1937_v4  ;;  %1785 = vmatprep.subr.bf16.mxu0 %v2006_v1 }
  0x6e   : > { %1805 = vmatprep.subr.bf16.mxu1 %v2006_v1 }
  0x6f   : > { %1762 = vmatmul.mubr.bf16.vlgmr.msra.gmra.mxu0 %v699_v5 }
  0x70   : > { %1786 = vmatpush3.bf16.msra.mxu0 %v1939_v6  ;;  %1782 = vmatmul.mubr.bf16.vlgmr.msra.gmra.mxu1 %v811_v7 }
  0x71   : > { %1806 = vmatpush3.bf16.msra.mxu1 %v1941_v8  ;;  %1787 = vmatprep.subr.bf16.mxu0 %v2006_v1 }
  0x72   : > { %1807 = vmatprep.subr.bf16.mxu1 %v2006_v1  ;;  %1801 = vmatprep.mubr.msk.bf16.mxu0 %vm2007_vm0, %v2006_v1 }
  0x73   : > { %1821 = vmatprep.mubr.msk.bf16.mxu1 %vm2007_vm0, %v2006_v1 }
  0x74   : > { %1788 = vmatpush3.bf16.msra.mxu0 %v1942_v9 }
  0x75   : > { %1808 = vmatpush3.bf16.msra.mxu1 %v1943_v10  ;;  %1789 = vmatprep.subr.bf16.mxu0 %v2006_v1 }
  0x76   : > { %1809 = vmatprep.subr.bf16.mxu1 %v2006_v1 }
  0x78   : > { %1790 = vmatpush3.bf16.msra.mxu0 %v1944_v11 }
  0x79   : > { %1810 = vmatpush3.bf16.msra.mxu1 %v1945_v12  ;;  %1791 = vmatprep.subr.bf16.mxu0 %v2006_v1 }
  0x7a   : > { %1811 = vmatprep.subr.bf16.mxu1 %v2006_v1 }
  0x7c   : > { %1792 = vmatpush3.bf16.msra.mxu0 %v1946_v13 }
  0x7d   : > { %1812 = vmatpush3.bf16.msra.mxu1 %v1947_v14  ;;  %1793 = vmatprep.subr.bf16.mxu0 %v2006_v1 }
  0x7e   : > { %1813 = vmatprep.subr.bf16.mxu1 %v2006_v1 }
  0x80   : > { %1794 = vmatpush3.bf16.msra.mxu0 %v1948_v15 }
  0x81   : > { %1814 = vmatpush3.bf16.msra.mxu1 %v1949_v16  ;;  %1795 = vmatprep.subr.bf16.mxu0 %v2006_v1 }
  0x82   : > { %1815 = vmatprep.subr.bf16.mxu1 %v2006_v1 }
  0x84   : > { %1796 = vmatpush3.bf16.msra.mxu0 %v1950_v19 }
  0x85   : > { %1816 = vmatpush3.bf16.msra.mxu1 %v1951_v21  ;;  %1797 = vmatprep.subr.bf16.mxu0 %v2006_v1 }
  0x86   : > { %1817 = vmatprep.subr.bf16.mxu1 %v2006_v1 }
  0x88   : > { %1798 = vmatpush3.bf16.msra.mxu0 %v1952_v22 }
  0x89   : > { %1818 = vmatpush3.bf16.msra.mxu1 %v1953_v24  ;;  %1799 = vmatprep.subr.bf16.mxu0 %v2006_v1 }
  0x8a   : > { %1819 = vmatprep.subr.bf16.mxu1 %v2006_v1 }
  0x8c   : > { %1800 = vmatpush3.bf16.msra.mxu0 %v1954_v25 }
  0x8d   : > { %1820 = vmatpush3.bf16.msra.mxu1 %v1955_v28  ;;  %1825 = vmatprep.subr.bf16.mxu0 %v2006_v1 }
  0x8f   : > { %1802 = vmatmul.mubr.bf16.vlgmr.msra.gmra.mxu0 %v1501_v29 }
  0x90   : > { %1826 = vmatpush3.bf16.msra.mxu0 %v1956_v30  ;;  %1822 = vmatmul.mubr.bf16.vlgmr.msra.gmra.mxu1 %v1043_v31 }
  0x91   : > { %1827 = vmatprep.subr.bf16.mxu0 %v2006_v1  ;;  %1841 = vmatprep.mubr.msk.bf16.mxu0 %vm2007_vm0, %v2006_v1 }
  0x94   : > { %1828 = vmatpush3.bf16.msra.mxu0 %v1958_v32 }
  0x95   : > { %1829 = vmatprep.subr.bf16.mxu0 %v2006_v1 }
  0x98   : > { %1830 = vmatpush3.bf16.msra.mxu0 %v1959_v33 }
  0x99   : > { %1831 = vmatprep.subr.bf16.mxu0 %v2006_v1 }
  0x9c   : > { %1832 = vmatpush3.bf16.msra.mxu0 %v1960_v34 }
  0x9d   : > { %1833 = vmatprep.subr.bf16.mxu0 %v2006_v1 }
  0xa0   : > { %1834 = vmatpush3.bf16.msra.mxu0 %v1961_v35 }
  0xa1   : > { %1835 = vmatprep.subr.bf16.mxu0 %v2006_v1 }
  0xa4   : > { %1836 = vmatpush3.bf16.msra.mxu0 %v1962_v36 }
  0xa5   : > { %1837 = vmatprep.subr.bf16.mxu0 %v2006_v1 }
  0xa8   : > { %1838 = vmatpush3.bf16.msra.mxu0 %v1963_v37 }
  0xa9   : > { %1839 = vmatprep.subr.bf16.mxu0 %v2006_v1 }
  0xac   : > { %1840 = vmatpush3.bf16.msra.mxu0 %v1964_v40 }
  0xaf   : > { %1842 = vmatmul.mubr.bf16.vlgmr.msra.gmra.mxu0 %v1155_v41 }
  0xef   : > { %v352_v42 = vpop.f32.mrf.mxu0 }
  0xf0   : > { %v440_v43 = vpop.f32.mrf.mxu1 }
  0xf1   : > { %v441_v44 = vadd.f32 %v440_v43, %v352_v42  ;;  %v1683_v45 = vpop.f32.mrf.mxu0 }
  0xf2   : > { %v1703_v46 = vpop.f32.mrf.mxu1 }
  0xf3   : > { %v355_v47 = vpop.f32.mrf.mxu0 }
  0xf4   : > { %v443_v48 = vpop.f32.mrf.mxu1 }
  0xf5   : > { %v1684_v49 = vpop.f32.mrf.mxu0 }
  0xf6   : > { %v1704_v50 = vpop.f32.mrf.mxu1 }
 0x10f   : > { %v551_v51 = vpop.f32.mrf.mxu0 }
 0x110   : > { %v557_v52 = vadd.f32 %v551_v51, %v441_v44  ;;  %v662_v53 = vpop.f32.mrf.mxu1 }
 0x111   : > { %v1723_v54 = vpop.f32.mrf.mxu0 }
 0x112   : > { %v668_v55 = vadd.f32 %v662_v53, %v557_v52  ;;  %v1743_v56 = vpop.f32.mrf.mxu1 }
 0x113   : > { %v554_v57 = vpop.f32.mrf.mxu0 }
 0x114   : > { %v665_v1 = vpop.f32.mrf.mxu1 }
 0x115   : > { %v1724_v58 = vpop.f32.mrf.mxu0 }
 0x116   : > { %v1744_v59 = vpop.f32.mrf.mxu1 }
 0x12f   : > { %v783_v60 = vpop.f32.mrf.mxu0 }
 0x130   : > { %v895_v61 = vpop.f32.mrf.mxu1  ;;  %v789_v13 = vadd.f32 %v783_v60, %v668_v55 }
 0x131   : > { %v1763_v62 = vpop.f32.mrf.mxu0 }
 0x132   : > { %v1783_v63 = vpop.f32.mrf.mxu1  ;;  %v901_v14 = vadd.f32 %v895_v61, %v789_v13 }
 0x133   : > { %v786_v0 = vpop.f32.mrf.mxu0 }
 0x134   : > { %v898_v2 = vpop.f32.mrf.mxu1 }
 0x135   : > { %v1764_v3 = vpop.f32.mrf.mxu0 }
 0x136   : > { %v1784_v4 = vpop.f32.mrf.mxu1 }
 0x14f   : > { %v1006_v5 = vpop.f32.mrf.mxu0 }
 0x150   : > { %v1127_v6 = vpop.f32.mrf.mxu1  ;;  %v1012_v15 = vadd.f32 %v1006_v5, %v901_v14 }
 0x151   : > { %v1803_v7 = vpop.f32.mrf.mxu0 }
 0x152   : > { %v1823_v8 = vpop.f32.mrf.mxu1  ;;  %v1133_v16 = vadd.f32 %v1127_v6, %v1012_v15 }
 0x153   : > { %v1009_v9 = vpop.f32.mrf.mxu0 }
 0x154   : > { %v1130_v10 = vpop.f32.mrf.mxu1 }
 0x155   : > { %v1804_v11 = vpop.f32.mrf.mxu0 }
 0x156   : > { %v1824_v12 = vpop.f32.mrf.mxu1 }
 0x16f   : > { %v1239_v17 = vpop.f32.mrf.mxu0 }
 0x170   : > { %v1245_v19 = vadd.f32 %v1239_v17, %v1133_v16 }
 0x171   : > { %v1843_v21 = vpop.f32.mrf.mxu0 }
 0x172   : > { %v1253_v22 = vmul.f32 %v1579_v18, %v1245_v19 }
 0x173   : > { %v1242_v23 = vpop.f32.mrf.mxu0 }
 0x174   : > { %v1261_v24 = vadd.f32 %v1580_v20, %v1253_v22 }
 0x175   : > { %v1844_v25 = vpop.f32.mrf.mxu0 }
 0x176   : > { %v1262_v26 = vmax.f32 %v1261_v24, 0.0 }
 0x178   : > { %v1263_v27 = vpack.c.bf16 %v1262_v26, %v1262_v26 }
 0x17a   : > { %1264 = vst [vmem:[%s217_s8] sm:$0xf] %v1263_v27 }
 0x17b PF: > { %s14_s19 = sadd.s32 1, %s2004_s19   ;;  %s2427_s15 = smov %s1996_s17 }
 0x17c   : > { %p11_p7 = scmp.ge.s32.totalorder %s14_s19, 18   ;;  %s2428_s16 = smov %s2000_s18 }
 0x17d   : > { %s2429_s17 = smov %s2432_s20  ;;  %s2430_s18 = smov %s2436_s21 }
 0x17e   :  { %13 = sbr.rel (!%p11_p7) target bundleno = 3 (0x3), region = 77 }

// kernel: _lambda_.17
= control target key start
LH: loop header
LB: loop body
LE: loop exit
PB: predicated region body
PF: predicated region fallthrough
CT: control target
= control target key end

     0   :  { %s2095_s18 = smov 0   ;;  %s2097_s19 = smov 0   ;;  %s2487_s0 = inlined_call_operand.vmem [shape: bf16[2,10,5,128], index: 0, kind: input, shape index: {}]   ;;  %s2488_s1 = inlined_call_operand.vmem [shape: bf16[2,10,5,128], index: 1, kind: input, shape index: {}]   ;;  %s2489_s2 = inlined_call_operand.vmem [shape: bf16[9,128,128], index: 2, kind: input, shape index: {}]   ;;  %s2490_s3 = inlined_call_operand.vmem [shape: f32[1,128], index: 3, kind: input, shape index: {}]   ;;  %s2491_s4 = inlined_call_operand.vmem [shape: f32[1,128], index: 4, kind: input, shape index: {}]   ;;  %s2492_s5 = inlined_call_operand.vmem [shape: bf16[2,4,4,128], index: 5, kind: output, shape index: {}]  }
   0x1   :  { %s2099_s20 = smov 0   ;;  %s2101_s21 = smov 0  }
   0x2   :  { %s2103_s22 = smov 0  }
   0x3 LB: > { %s24_s23 = sadd.s32 1, %s2053_s20  ;;  %s27_s24 = sadd.s32 1, %s2057_s21  ;;  %s2061_s22 = sphi %s2103_s22, %s15_s22   ;;  %s2057_s21 = sphi %s2101_s21, %s2496_s21   ;;  %s2053_s20 = sphi %s2099_s20, %s2495_s20   ;;  %s2049_s19 = sphi %s2097_s19, %s2494_s19   ;;  %s2045_s18 = sphi %s2095_s18, %s2493_s18  }
   0x4   : > { %p25_p0 = scmp.ge.s32.totalorder %s24_s23, 4  ;;  %p1409_p1 = scmp.ge.s32.totalorder %s2061_s22, 1 }
   0x5   : > { %p211_p2 = scmp.lt.s32.totalorder %s2061_s22, 9 }
   0x6   : > { %s2498_s23 = smov (%p25_p0, %s24_s23), 0  ;;  %s2500_s24 = smov (!%p25_p0, %s27_s24), %s2057_s21 }
   0x7   : > { %p212_p3 = pnand %p1409_p1, %p211_p2  ;;  %p29_p4 = scmp.ge.s32.totalorder %s2500_s24, 2 }
   0x8   : > { %p247_p5 = scmp.lt.s32.totalorder (!%p212_p3), %s2049_s19, 1  ;;  %s1638_s12 = sshll.u32 (!%p212_p3), %s2045_s18, 3 }
   0x9   : > { %s2502_s24 = smov (%p29_p4, %s2500_s24), 0  ;;  %215 = sbr.rel (%p212_p3) target bundleno = 379 (0x17b), region = 40 }
   0xa   : > { %p259_p6 = scmp.lt.s32.totalorder (!%p212_p3), %s2045_s18, 3 }
   0xe   : > { %v1948_v0 = vld [vmem:[%s2489_s2 + $0x78] sm:$0xff]   ;;  %v2063_v1 = vmov 0.0   ;;  %v1950_v3 = vld [vmem:[%s2489_s2 + $0x70] sm:$0xff]   ;;  %vm2064_vm0 = vmmov 0   ;;  %v1952_v5 = vld [vmem:[%s2489_s2 + $0x68] sm:$0xff]   ;;  %s2504_s19 = smov (!%p247_p5, %s2049_s19), 1 }
   0xf   : > { %1725 = vmatprep.subr.bf16.mxu0 %v2063_v1  ;;  %1745 = vmatprep.subr.bf16.mxu1 %v2063_v1  ;;  %v1949_v2 = vld [vmem:[%s2489_s2 + $0x38] sm:$0xff]   ;;  %v1951_v4 = vld [vmem:[%s2489_s2 + $0x30] sm:$0xff]   ;;  %v1953_v6 = vld [vmem:[%s2489_s2 + $0x28] sm:$0xff]   ;;  %s1905_s29 = smul.u32 40, %s2504_s19  ;;  %s2506_s18 = smov (!%p259_p6, %s2045_s18), 3 }
  0x10   : > { %1726 = vmatpush3.bf16.msra.mxu0 %v1948_v0  ;;  %1741 = vmatprep.mubr.msk.bf16.mxu0 %vm2064_vm0, %v2063_v1  ;;  %v1954_v7 = vld [vmem:[%s2489_s2 + $0x60] sm:$0xff]   ;;  %v1956_v9 = vld [vmem:[%s2489_s2 + $0x58] sm:$0xff]   ;;  %v1958_v11 = vld [vmem:[%s2489_s2 + $0x50] sm:$0xff]   ;;  %s1412_s30 = sshll.u32 %s2504_s19, 2 }
  0x11   : > { %1746 = vmatpush3.bf16.msra.mxu1 %v1949_v2  ;;  %1727 = vmatprep.subr.bf16.mxu0 %v2063_v1  ;;  %v1955_v8 = vld [vmem:[%s2489_s2 + $0x20] sm:$0xff]   ;;  %v1957_v10 = vld [vmem:[%s2489_s2 + $0x18] sm:$0xff]   ;;  %v1959_v12 = vld [vmem:[%s2489_s2 + $0x10] sm:$0xff]   ;;  %s256_s11 = scalar_lea.vmem %s2488_s1, %s1905_s29  ;;  %s251_s17 = scalar_lea.vmem %s2487_s0, %s1905_s29 }
  0x12   : > { %1747 = vmatprep.subr.bf16.mxu1 %v2063_v1  ;;  %1761 = vmatprep.mubr.msk.bf16.mxu1 %vm2064_vm0, %v2063_v1  ;;  %v1960_v13 = vld [vmem:[%s2489_s2 + $0x48] sm:$0xff]   ;;  %s2201_s25 = scalar_lea.vmem %s256_s11, %s1638_s12  ;;  %v1962_v15 = vld [vmem:[%s2489_s2 + $0x40] sm:$0xff]   ;;  %s2206_s28 = scalar_lea.vmem %s251_s17, %s1638_s12  ;;  %v1964_v19 = vld [vmem:[%s2489_s2 + $0xb8] sm:$0xff]  }
  0x13   : > { %v1961_v14 = vld [vmem:[%s2489_s2 + $0x8] sm:$0xff]   ;;  %v1963_v16 = vld [vmem:[%s2489_s2] sm:$0xff]   ;;  %v1965_v20 = vld [vmem:[%s2489_s2 + $0xf8] sm:$0xff]   ;;  %s262_s7 = sadd.s32 %s1412_s30, %s2506_s18 }
  0x14   : > { %1728 = vmatpush3.bf16.msra.mxu0 %v1950_v3  ;;  %v288_v17 = vld [vmem:[%s2201_s25] sm:$0x3]  ;;  %v1966_v21 = vld [vmem:[%s2489_s2 + $0xb0] sm:$0xff]   ;;  %v1968_v23 = vld [vmem:[%s2489_s2 + $0xa8] sm:$0xff]   ;;  %s1413_s10 = sshll.u32 %s262_s7, 1 }
  0x15   : > { %1748 = vmatpush3.bf16.msra.mxu1 %v1951_v4  ;;  %1729 = vmatprep.subr.bf16.mxu0 %v2063_v1  ;;  %v269_v18 = vld [vmem:[%s2206_s28] sm:$0x3]  ;;  %v1967_v22 = vld [vmem:[%s2489_s2 + $0xf0] sm:$0xff]   ;;  %v1969_v24 = vld [vmem:[%s2489_s2 + $0xe8] sm:$0xff]  }
  0x16   : > { %1749 = vmatprep.subr.bf16.mxu1 %v2063_v1  ;;  %v1970_v25 = vld [vmem:[%s2489_s2 + $0xa0] sm:$0xff]   ;;  %v1972_v27 = vld [vmem:[%s2489_s2 + $0x98] sm:$0xff]   ;;  %v1974_v30 = vld [vmem:[%s2489_s2 + $0x90] sm:$0xff]  }
  0x17   : > { %v1971_v26 = vld [vmem:[%s2489_s2 + $0xe0] sm:$0xff]   ;;  %v1973_v28 = vld [vmem:[%s2489_s2 + $0xd8] sm:$0xff]   ;;  %v1975_v31 = vld [vmem:[%s2489_s2 + $0xd0] sm:$0xff]  }
  0x18   : > { %1730 = vmatpush3.bf16.msra.mxu0 %v1952_v5  ;;  %v1980_v29 = vld [vmem:[%s2206_s28] ss:$0 sps:$4 sm:$0x77]   ;;  %v1976_v32 = vld [vmem:[%s2489_s2 + $0x88] sm:$0xff]   ;;  %v1981_v40 = vld [vmem:[%s2489_s2 + $0x138] sm:$0xff]  }
  0x19   : > { %1750 = vmatpush3.bf16.msra.mxu1 %v1953_v6  ;;  %1731 = vmatprep.subr.bf16.mxu0 %v2063_v1  ;;  %v506_v33 = vshll.u32 %v1980_v29, 16  ;;  %v1977_v34 = vld [vmem:[%s2489_s2 + $0xc8] sm:$0xff]   ;;  %v504_v35 = vshrl.u32 %v1980_v29, 16  ;;  %v1978_v37 = vld [vmem:[%s2489_s2 + $0x80] sm:$0xff]   ;;  %v1982_v42 = vld [vmem:[%s2489_s2 + $0x178] sm:$0xff]  }
  0x1a   : > { %1751 = vmatprep.subr.bf16.mxu1 %v2063_v1  ;;  %v1979_v38 = vld [vmem:[%s2489_s2 + $0xc0] sm:$0xff]   ;;  %v1983_v43 = vld [vmem:[%s2489_s2 + $0x130] sm:$0xff]   ;;  %v1985_v45 = vld [vmem:[%s2489_s2 + $0x128] sm:$0xff]  }
  0x1b   : > { %v508_v36 = vrot.slane %v506_v33, 1  ;;  %v1476_v41 = vld [vmem:[%s2206_s28 + $0x4] sm:$0x3]  ;;  %v1984_v44 = vld [vmem:[%s2489_s2 + $0x170] sm:$0xff]   ;;  %v1986_v46 = vld [vmem:[%s2489_s2 + $0x168] sm:$0xff]  }
  0x1c   : > { %1732 = vmatpush3.bf16.msra.mxu0 %v1954_v7  ;;  %v1987_v47 = vld [vmem:[%s2489_s2 + $0x120] sm:$0xff]   ;;  %v1989_v49 = vld [vmem:[%s2489_s2 + $0x118] sm:$0xff]   ;;  %v1991_v51 = vld [vmem:[%s2489_s2 + $0x110] sm:$0xff]  }
  0x1d   : > { %1752 = vmatpush3.bf16.msra.mxu1 %v1955_v8  ;;  %1733 = vmatprep.subr.bf16.mxu0 %v2063_v1  ;;  %v509_v39 = vor.u32 %v508_v36, %v504_v35  ;;  %v1988_v48 = vld [vmem:[%s2489_s2 + $0x160] sm:$0xff]   ;;  %v1990_v50 = vld [vmem:[%s2489_s2 + $0x158] sm:$0xff]   ;;  %v1992_v53 = vld [vmem:[%s2489_s2 + $0x150] sm:$0xff]  }
  0x1e   : > { %1753 = vmatprep.subr.bf16.mxu1 %v2063_v1  ;;  %v1998_v52 = vld [vmem:[%s2206_s28 + $0x4] ss:$0 sps:$4 sm:$0x77]   ;;  %v1993_v54 = vld [vmem:[%s2489_s2 + $0x108] sm:$0xff]   ;;  %v1997_v62 = vld [vmem:[%s2489_s2 + $0x1b8] sm:$0xff]  }
  0x1f   : > { %v843_v55 = vshll.u32 %v1998_v52, 16  ;;  %v1994_v56 = vld [vmem:[%s2489_s2 + $0x148] sm:$0xff]   ;;  %v1995_v57 = vld [vmem:[%s2489_s2 + $0x100] sm:$0xff]   ;;  %v841_v58 = vshrl.u32 %v1998_v52, 16  ;;  %v1999_v0 = vld [vmem:[%s2489_s2 + $0x1f8] sm:$0xff]  }
  0x20   : > { %1734 = vmatpush3.bf16.msra.mxu0 %v1956_v9  ;;  %v1996_v60 = vld [vmem:[%s2489_s2 + $0x140] sm:$0xff]   ;;  %v2000_v2 = vld [vmem:[%s2489_s2 + $0x1b0] sm:$0xff]   ;;  %v2002_v4 = vld [vmem:[%s2489_s2 + $0x1a8] sm:$0xff]  }
  0x21   : > { %1754 = vmatpush3.bf16.msra.mxu1 %v1957_v10  ;;  %1735 = vmatprep.subr.bf16.mxu0 %v2063_v1  ;;  %v845_v59 = vrot.slane %v843_v55, 1  ;;  %v1503_v61 = vld [vmem:[%s2201_s25 + $0x4] sm:$0x3]  ;;  %v2001_v3 = vld [vmem:[%s2489_s2 + $0x1f0] sm:$0xff]   ;;  %v2003_v5 = vld [vmem:[%s2489_s2 + $0x1e8] sm:$0xff]  }
  0x22   : > { %1755 = vmatprep.subr.bf16.mxu1 %v2063_v1  ;;  %v2004_v6 = vld [vmem:[%s2489_s2 + $0x1a0] sm:$0xff]   ;;  %v2006_v8 = vld [vmem:[%s2489_s2 + $0x198] sm:$0xff]   ;;  %v2008_v10 = vld [vmem:[%s2489_s2 + $0x190] sm:$0xff]  }
  0x23   : > { %v846_v63 = vor.u32 %v845_v59, %v841_v58  ;;  %v2005_v7 = vld [vmem:[%s2489_s2 + $0x1e0] sm:$0xff]   ;;  %v2007_v9 = vld [vmem:[%s2489_s2 + $0x1d8] sm:$0xff]  }
  0x24   : > { %1736 = vmatpush3.bf16.msra.mxu0 %v1958_v11  ;;  %v2009_v11 = vld [vmem:[%s2489_s2 + $0x1d0] sm:$0xff]   ;;  %v2021_v29 = vld [vmem:[%s2489_s2 + $0x200] sm:$0xff]  }
  0x25   : > { %1756 = vmatpush3.bf16.msra.mxu1 %v1959_v12  ;;  %1737 = vmatprep.subr.bf16.mxu0 %v2063_v1  ;;  %v2010_v12 = vld [vmem:[%s2489_s2 + $0x188] sm:$0xff]  }
  0x26   : > { %1757 = vmatprep.subr.bf16.mxu1 %v2063_v1 }
  0x28   : > { %1738 = vmatpush3.bf16.msra.mxu0 %v1960_v13  ;;  %v2011_v13 = vld [vmem:[%s2489_s2 + $0x1c8] sm:$0xff]  }
  0x29   : > { %1758 = vmatpush3.bf16.msra.mxu1 %v1961_v14  ;;  %1739 = vmatprep.subr.bf16.mxu0 %v2063_v1  ;;  %v2012_v14 = vld [vmem:[%s2489_s2 + $0x180] sm:$0xff]  }
  0x2a   : > { %1759 = vmatprep.subr.bf16.mxu1 %v2063_v1 }
  0x2c   : > { %1740 = vmatpush3.bf16.msra.mxu0 %v1962_v15  ;;  %v2013_v15 = vld [vmem:[%s2489_s2 + $0x1c0] sm:$0xff]  }
  0x2d   : > { %1760 = vmatpush3.bf16.msra.mxu1 %v1963_v16  ;;  %1765 = vmatprep.subr.bf16.mxu0 %v2063_v1  ;;  %v1556_v16 = vld [vmem:[%s2206_s28 + $0x8] sm:$0x3] }
  0x2e   : > { %1785 = vmatprep.subr.bf16.mxu1 %v2063_v1 }
  0x2f   : > { %1742 = vmatmul.mubr.bf16.vlgmr.msra.gmra.mxu0 %v288_v17  ;;  %v2014_v17 = vld [vmem:[%s2489_s2 + $0x238] sm:$0xff]  }
  0x30   : > { %1762 = vmatmul.mubr.bf16.vlgmr.msra.gmra.mxu1 %v269_v18  ;;  %1766 = vmatpush3.bf16.msra.mxu0 %v1964_v19  ;;  %v1583_v18 = vld [vmem:[%s2201_s25 + $0x8] sm:$0x3]  ;;  %v2015_v19 = vld [vmem:[%s2489_s2 + $0x230] sm:$0xff]   ;;  %s264_s25 = scalar_lea.vmem %s2492_s5, %s1413_s10 }
  0x31   : > { %1786 = vmatpush3.bf16.msra.mxu1 %v1965_v20  ;;  %1767 = vmatprep.subr.bf16.mxu0 %v2063_v1  ;;  %v2016_v20 = vld [vmem:[%s2489_s2 + $0x228] sm:$0xff]  }
  0x32   : > { %1787 = vmatprep.subr.bf16.mxu1 %v2063_v1  ;;  %1781 = vmatprep.mubr.msk.bf16.mxu0 %vm2064_vm0, %v2063_v1 }
  0x33   : > { %1801 = vmatprep.mubr.msk.bf16.mxu1 %vm2064_vm0, %v2063_v1 }
  0x34   : > { %1768 = vmatpush3.bf16.msra.mxu0 %v1966_v21  ;;  %v2017_v21 = vld [vmem:[%s2489_s2 + $0x220] sm:$0xff]  }
  0x35   : > { %1788 = vmatpush3.bf16.msra.mxu1 %v1967_v22  ;;  %1769 = vmatprep.subr.bf16.mxu0 %v2063_v1  ;;  %v2018_v22 = vld [vmem:[%s2489_s2 + $0x218] sm:$0xff]  }
  0x36   : > { %1789 = vmatprep.subr.bf16.mxu1 %v2063_v1 }
  0x38   : > { %1770 = vmatpush3.bf16.msra.mxu0 %v1968_v23  ;;  %v2022_v23 = vld [vmem:[%s2206_s28 + $0x8] ss:$0 sps:$4 sm:$0x77]  }
  0x39   : > { %1790 = vmatpush3.bf16.msra.mxu1 %v1969_v24  ;;  %1771 = vmatprep.subr.bf16.mxu0 %v2063_v1  ;;  %v2019_v24 = vld [vmem:[%s2489_s2 + $0x210] sm:$0xff]  }
  0x3a   : > { %1791 = vmatprep.subr.bf16.mxu1 %v2063_v1 }
  0x3c   : > { %1772 = vmatpush3.bf16.msra.mxu0 %v1970_v25  ;;  %v1180_v25 = vshll.u32 %v2022_v23, 16 }
  0x3d   : > { %1792 = vmatpush3.bf16.msra.mxu1 %v1971_v26  ;;  %1773 = vmatprep.subr.bf16.mxu0 %v2063_v1  ;;  %v2020_v26 = vld [vmem:[%s2489_s2 + $0x208] sm:$0xff]  }
  0x3e   : > { %1793 = vmatprep.subr.bf16.mxu1 %v2063_v1 }
  0x40   : > { %1774 = vmatpush3.bf16.msra.mxu0 %v1972_v27  ;;  %v1178_v27 = vshrl.u32 %v2022_v23, 16 }
  0x41   : > { %1794 = vmatpush3.bf16.msra.mxu1 %v1973_v28  ;;  %1775 = vmatprep.subr.bf16.mxu0 %v2063_v1  ;;  %v1182_v28 = vrot.slane %v1180_v25, 1 }
  0x42   : > { %1795 = vmatprep.subr.bf16.mxu1 %v2063_v1 }
  0x44   : > { %1776 = vmatpush3.bf16.msra.mxu0 %v1974_v30  ;;  %v1183_v30 = vor.u32 %v1182_v28, %v1178_v27 }
  0x45   : > { %1796 = vmatpush3.bf16.msra.mxu1 %v1975_v31  ;;  %1777 = vmatprep.subr.bf16.mxu0 %v2063_v1 }
  0x46   : > { %1797 = vmatprep.subr.bf16.mxu1 %v2063_v1 }
  0x48   : > { %1778 = vmatpush3.bf16.msra.mxu0 %v1976_v32 }
  0x49   : > { %1798 = vmatpush3.bf16.msra.mxu1 %v1977_v34  ;;  %1779 = vmatprep.subr.bf16.mxu0 %v2063_v1 }
  0x4a   : > { %1799 = vmatprep.subr.bf16.mxu1 %v2063_v1 }
  0x4c   : > { %1780 = vmatpush3.bf16.msra.mxu0 %v1978_v37 }
  0x4d   : > { %1800 = vmatpush3.bf16.msra.mxu1 %v1979_v38  ;;  %1805 = vmatprep.subr.bf16.mxu0 %v2063_v1 }
  0x4e   : > { %1825 = vmatprep.subr.bf16.mxu1 %v2063_v1 }
  0x4f   : > { %1782 = vmatmul.mubr.bf16.vlgmr.msra.gmra.mxu0 %v509_v39 }
  0x50   : > { %1806 = vmatpush3.bf16.msra.mxu0 %v1981_v40  ;;  %1802 = vmatmul.mubr.bf16.vlgmr.msra.gmra.mxu1 %v1476_v41 }
  0x51   : > { %1826 = vmatpush3.bf16.msra.mxu1 %v1982_v42  ;;  %1807 = vmatprep.subr.bf16.mxu0 %v2063_v1 }
  0x52   : > { %1827 = vmatprep.subr.bf16.mxu1 %v2063_v1  ;;  %1821 = vmatprep.mubr.msk.bf16.mxu0 %vm2064_vm0, %v2063_v1 }
  0x53   : > { %1841 = vmatprep.mubr.msk.bf16.mxu1 %vm2064_vm0, %v2063_v1 }
  0x54   : > { %1808 = vmatpush3.bf16.msra.mxu0 %v1983_v43 }
  0x55   : > { %1828 = vmatpush3.bf16.msra.mxu1 %v1984_v44  ;;  %1809 = vmatprep.subr.bf16.mxu0 %v2063_v1 }
  0x56   : > { %1829 = vmatprep.subr.bf16.mxu1 %v2063_v1 }
  0x58   : > { %1810 = vmatpush3.bf16.msra.mxu0 %v1985_v45 }
  0x59   : > { %1830 = vmatpush3.bf16.msra.mxu1 %v1986_v46  ;;  %1811 = vmatprep.subr.bf16.mxu0 %v2063_v1 }
  0x5a   : > { %1831 = vmatprep.subr.bf16.mxu1 %v2063_v1 }
  0x5c   : > { %1812 = vmatpush3.bf16.msra.mxu0 %v1987_v47 }
  0x5d   : > { %1832 = vmatpush3.bf16.msra.mxu1 %v1988_v48  ;;  %1813 = vmatprep.subr.bf16.mxu0 %v2063_v1 }
  0x5e   : > { %1833 = vmatprep.subr.bf16.mxu1 %v2063_v1 }
  0x60   : > { %1814 = vmatpush3.bf16.msra.mxu0 %v1989_v49 }
  0x61   : > { %1834 = vmatpush3.bf16.msra.mxu1 %v1990_v50  ;;  %1815 = vmatprep.subr.bf16.mxu0 %v2063_v1 }
  0x62   : > { %1835 = vmatprep.subr.bf16.mxu1 %v2063_v1 }
  0x64   : > { %1816 = vmatpush3.bf16.msra.mxu0 %v1991_v51 }
  0x65   : > { %1836 = vmatpush3.bf16.msra.mxu1 %v1992_v53  ;;  %1817 = vmatprep.subr.bf16.mxu0 %v2063_v1 }
  0x66   : > { %1837 = vmatprep.subr.bf16.mxu1 %v2063_v1 }
  0x68   : > { %1818 = vmatpush3.bf16.msra.mxu0 %v1993_v54 }
  0x69   : > { %1838 = vmatpush3.bf16.msra.mxu1 %v1994_v56  ;;  %1819 = vmatprep.subr.bf16.mxu0 %v2063_v1 }
  0x6a   : > { %1839 = vmatprep.subr.bf16.mxu1 %v2063_v1 }
  0x6c   : > { %1820 = vmatpush3.bf16.msra.mxu0 %v1995_v57 }
  0x6d   : > { %1840 = vmatpush3.bf16.msra.mxu1 %v1996_v60  ;;  %1845 = vmatprep.subr.bf16.mxu0 %v2063_v1 }
  0x6e   : > { %1865 = vmatprep.subr.bf16.mxu1 %v2063_v1 }
  0x6f   : > { %1822 = vmatmul.mubr.bf16.vlgmr.msra.gmra.mxu0 %v1503_v61 }
  0x70   : > { %1846 = vmatpush3.bf16.msra.mxu0 %v1997_v62  ;;  %1842 = vmatmul.mubr.bf16.vlgmr.msra.gmra.mxu1 %v846_v63 }
  0x71   : > { %1866 = vmatpush3.bf16.msra.mxu1 %v1999_v0  ;;  %1847 = vmatprep.subr.bf16.mxu0 %v2063_v1 }
  0x72   : > { %1867 = vmatprep.subr.bf16.mxu1 %v2063_v1  ;;  %1861 = vmatprep.mubr.msk.bf16.mxu0 %vm2064_vm0, %v2063_v1 }
  0x73   : > { %1881 = vmatprep.mubr.msk.bf16.mxu1 %vm2064_vm0, %v2063_v1 }
  0x74   : > { %1848 = vmatpush3.bf16.msra.mxu0 %v2000_v2 }
  0x75   : > { %1868 = vmatpush3.bf16.msra.mxu1 %v2001_v3  ;;  %1849 = vmatprep.subr.bf16.mxu0 %v2063_v1 }
  0x76   : > { %1869 = vmatprep.subr.bf16.mxu1 %v2063_v1 }
  0x78   : > { %1850 = vmatpush3.bf16.msra.mxu0 %v2002_v4 }
  0x79   : > { %1870 = vmatpush3.bf16.msra.mxu1 %v2003_v5  ;;  %1851 = vmatprep.subr.bf16.mxu0 %v2063_v1 }
  0x7a   : > { %1871 = vmatprep.subr.bf16.mxu1 %v2063_v1 }
  0x7c   : > { %1852 = vmatpush3.bf16.msra.mxu0 %v2004_v6 }
  0x7d   : > { %1872 = vmatpush3.bf16.msra.mxu1 %v2005_v7  ;;  %1853 = vmatprep.subr.bf16.mxu0 %v2063_v1  ;;  %v1634_v7 = vld [vmem:[%s2490_s3] ss:$0 sm:$0xff] }
  0x7e   : > { %1873 = vmatprep.subr.bf16.mxu1 %v2063_v1 }
  0x80   : > { %1854 = vmatpush3.bf16.msra.mxu0 %v2006_v8 }
  0x81   : > { %1874 = vmatpush3.bf16.msra.mxu1 %v2007_v9  ;;  %1855 = vmatprep.subr.bf16.mxu0 %v2063_v1  ;;  %v1635_v9 = vld [vmem:[%s2491_s4] ss:$0 sm:$0xff] }
  0x82   : > { %1875 = vmatprep.subr.bf16.mxu1 %v2063_v1 }
  0x84   : > { %1856 = vmatpush3.bf16.msra.mxu0 %v2008_v10 }
  0x85   : > { %1876 = vmatpush3.bf16.msra.mxu1 %v2009_v11  ;;  %1857 = vmatprep.subr.bf16.mxu0 %v2063_v1 }
  0x86   : > { %1877 = vmatprep.subr.bf16.mxu1 %v2063_v1 }
  0x88   : > { %1858 = vmatpush3.bf16.msra.mxu0 %v2010_v12 }
  0x89   : > { %1878 = vmatpush3.bf16.msra.mxu1 %v2011_v13  ;;  %1859 = vmatprep.subr.bf16.mxu0 %v2063_v1 }
  0x8a   : > { %1879 = vmatprep.subr.bf16.mxu1 %v2063_v1 }
  0x8c   : > { %1860 = vmatpush3.bf16.msra.mxu0 %v2012_v14 }
  0x8d   : > { %1880 = vmatpush3.bf16.msra.mxu1 %v2013_v15  ;;  %1885 = vmatprep.subr.bf16.mxu0 %v2063_v1 }
  0x8f   : > { %1862 = vmatmul.mubr.bf16.vlgmr.msra.gmra.mxu0 %v1556_v16 }
  0x90   : > { %1886 = vmatpush3.bf16.msra.mxu0 %v2014_v17  ;;  %1882 = vmatmul.mubr.bf16.vlgmr.msra.gmra.mxu1 %v1583_v18 }
  0x91   : > { %1887 = vmatprep.subr.bf16.mxu0 %v2063_v1  ;;  %1901 = vmatprep.mubr.msk.bf16.mxu0 %vm2064_vm0, %v2063_v1 }
  0x94   : > { %1888 = vmatpush3.bf16.msra.mxu0 %v2015_v19 }
  0x95   : > { %1889 = vmatprep.subr.bf16.mxu0 %v2063_v1 }
  0x98   : > { %1890 = vmatpush3.bf16.msra.mxu0 %v2016_v20 }
  0x99   : > { %1891 = vmatprep.subr.bf16.mxu0 %v2063_v1 }
  0x9c   : > { %1892 = vmatpush3.bf16.msra.mxu0 %v2017_v21 }
  0x9d   : > { %1893 = vmatprep.subr.bf16.mxu0 %v2063_v1 }
  0xa0   : > { %1894 = vmatpush3.bf16.msra.mxu0 %v2018_v22 }
  0xa1   : > { %1895 = vmatprep.subr.bf16.mxu0 %v2063_v1 }
  0xa4   : > { %1896 = vmatpush3.bf16.msra.mxu0 %v2019_v24 }
  0xa5   : > { %1897 = vmatprep.subr.bf16.mxu0 %v2063_v1 }
  0xa8   : > { %1898 = vmatpush3.bf16.msra.mxu0 %v2020_v26 }
  0xa9   : > { %1899 = vmatprep.subr.bf16.mxu0 %v2063_v1 }
  0xac   : > { %1900 = vmatpush3.bf16.msra.mxu0 %v2021_v29 }
  0xaf   : > { %1902 = vmatmul.mubr.bf16.vlgmr.msra.gmra.mxu0 %v1183_v30 }
  0xef   : > { %v388_v31 = vpop.f32.mrf.mxu0 }
  0xf0   : > { %v476_v32 = vpop.f32.mrf.mxu1 }
  0xf1   : > { %v477_v33 = vadd.f32 %v476_v32, %v388_v31  ;;  %v1743_v34 = vpop.f32.mrf.mxu0 }
  0xf2   : > { %v1763_v35 = vpop.f32.mrf.mxu1 }
  0xf3   : > { %v391_v36 = vpop.f32.mrf.mxu0 }
  0xf4   : > { %v479_v37 = vpop.f32.mrf.mxu1 }
  0xf5   : > { %v1744_v38 = vpop.f32.mrf.mxu0 }
  0xf6   : > { %v1764_v39 = vpop.f32.mrf.mxu1 }
 0x10f   : > { %v593_v40 = vpop.f32.mrf.mxu0 }
 0x110   : > { %v599_v41 = vadd.f32 %v593_v40, %v477_v33  ;;  %v703_v42 = vpop.f32.mrf.mxu1 }
 0x111   : > { %v1783_v43 = vpop.f32.mrf.mxu0 }
 0x112   : > { %v709_v44 = vadd.f32 %v703_v42, %v599_v41  ;;  %v1803_v45 = vpop.f32.mrf.mxu1 }
 0x113   : > { %v596_v46 = vpop.f32.mrf.mxu0 }
 0x114   : > { %v706_v1 = vpop.f32.mrf.mxu1 }
 0x115   : > { %v1784_v47 = vpop.f32.mrf.mxu0 }
 0x116   : > { %v1804_v48 = vpop.f32.mrf.mxu1 }
 0x12f   : > { %v812_v49 = vpop.f32.mrf.mxu0 }
 0x130   : > { %v930_v50 = vpop.f32.mrf.mxu1  ;;  %v818_v2 = vadd.f32 %v812_v49, %v709_v44 }
 0x131   : > { %v1823_v51 = vpop.f32.mrf.mxu0 }
 0x132   : > { %v1843_v52 = vpop.f32.mrf.mxu1  ;;  %v936_v3 = vadd.f32 %v930_v50, %v818_v2 }
 0x133   : > { %v815_v53 = vpop.f32.mrf.mxu0 }
 0x134   : > { %v933_v54 = vpop.f32.mrf.mxu1 }
 0x135   : > { %v1824_v55 = vpop.f32.mrf.mxu0 }
 0x136   : > { %v1844_v56 = vpop.f32.mrf.mxu1 }
 0x14f   : > { %v1040_v57 = vpop.f32.mrf.mxu0 }
 0x150   : > { %v1149_v58 = vpop.f32.mrf.mxu1  ;;  %v1046_v4 = vadd.f32 %v1040_v57, %v936_v3 }
 0x151   : > { %v1863_v59 = vpop.f32.mrf.mxu0 }
 0x152   : > { %v1883_v60 = vpop.f32.mrf.mxu1  ;;  %v1155_v5 = vadd.f32 %v1149_v58, %v1046_v4 }
 0x153   : > { %v1043_v61 = vpop.f32.mrf.mxu0 }
 0x154   : > { %v1152_v62 = vpop.f32.mrf.mxu1 }
 0x155   : > { %v1864_v63 = vpop.f32.mrf.mxu0 }
 0x156   : > { %v1884_v0 = vpop.f32.mrf.mxu1 }
 0x16f   : > { %v1267_v6 = vpop.f32.mrf.mxu0 }
 0x170   : > { %v1273_v8 = vadd.f32 %v1267_v6, %v1155_v5 }
 0x171   : > { %v1903_v10 = vpop.f32.mrf.mxu0 }
 0x172   : > { %v1281_v11 = vmul.f32 %v1634_v7, %v1273_v8 }
 0x173   : > { %v1270_v12 = vpop.f32.mrf.mxu0 }
 0x174   : > { %v1289_v13 = vadd.f32 %v1635_v9, %v1281_v11 }
 0x175   : > { %v1904_v14 = vpop.f32.mrf.mxu0 }
 0x176   : > { %v1290_v15 = vmax.f32 %v1289_v13, 0.0 }
 0x178   : > { %v1291_v16 = vpack.c.bf16 %v1290_v15, %v1290_v15 }
 0x17a   : > { %1292 = vst [vmem:[%s264_s25] sm:$0x3] %v1291_v16 }
 0x17b PF: > { %s15_s22 = sadd.s32 1, %s2061_s22   ;;  %s2493_s18 = smov %s2053_s20 }
 0x17c   : > { %p12_p7 = scmp.ge.s32.totalorder %s15_s22, 10   ;;  %s2494_s19 = smov %s2057_s21 }
 0x17d   : > { %s2495_s20 = smov %s2498_s23  ;;  %s2496_s21 = smov %s2502_s24 }
 0x17e   :  { %14 = sbr.rel (!%p12_p7) target bundleno = 3 (0x3), region = 87 }

// kernel: _lambda_.18
= control target key start
LH: loop header
LB: loop body
LE: loop exit
PB: predicated region body
PF: predicated region fallthrough
CT: control target
= control target key end

     0   :  { %s598_s15 = smov 0   ;;  %s600_s16 = smov 0   ;;  %s688_s0 = inlined_call_operand.vmem [shape: bf16[2,8,4,128], index: 0, kind: input, shape index: {}]   ;;  %s689_s1 = inlined_call_operand.vmem [shape: bf16[1,128,128], index: 1, kind: input, shape index: {}]   ;;  %s690_s2 = inlined_call_operand.vmem [shape: f32[1,128], index: 2, kind: input, shape index: {}]   ;;  %s691_s3 = inlined_call_operand.vmem [shape: f32[1,128], index: 3, kind: input, shape index: {}]   ;;  %s692_s4 = inlined_call_operand.vmem [shape: bf16[2,4,4,128], index: 4, kind: output, shape index: {}]  }
   0x1   :  { %s602_s17 = smov 0   ;;  %s604_s18 = smov 0  }
   0x2   :  { %s606_s19 = smov 0  }
   0x3 LB: > { %s23_s20 = sadd.s32 1, %s561_s17  ;;  %s26_s21 = sadd.s32 1, %s565_s18  ;;  %s569_s19 = sphi %s606_s19, %s14_s19   ;;  %s565_s18 = sphi %s604_s18, %s696_s18   ;;  %s561_s17 = sphi %s602_s17, %s695_s17   ;;  %s557_s16 = sphi %s600_s16, %s694_s16   ;;  %s553_s15 = sphi %s598_s15, %s693_s15  }
   0x4   : > { %p24_p0 = scmp.ge.s32.totalorder %s23_s20, 4  ;;  %p431_p1 = scmp.ge.s32.totalorder %s569_s19, 1 }
   0x5   : > { %p176_p2 = scmp.lt.s32.totalorder %s569_s19, 9 }
   0x6   : > { %s698_s20 = smov (%p24_p0, %s23_s20), 0  ;;  %s700_s21 = smov (!%p24_p0, %s26_s21), %s565_s18 }
   0x7   : > { %p177_p3 = pnand %p431_p1, %p176_p2  ;;  %p28_p4 = scmp.ge.s32.totalorder %s700_s21, 2 }
   0x8   : > { %p205_p5 = scmp.lt.s32.totalorder (!%p177_p3), %s557_s16, 1  ;;  %s451_s14 = sshll.u32 (!%p177_p3), %s553_s15, 2 }
   0x9   : > { %s702_s21 = smov (%p28_p4, %s700_s21), 0  ;;  %180 = sbr.rel (%p177_p3) target bundleno = 247 (0xf7), region = 36 }
   0xa   : > { %p212_p6 = scmp.lt.s32.totalorder (!%p177_p3), %s553_s15, 3 }
   0xe   : > { %v523_v0 = vld [vmem:[%s689_s1 + $0x38] sm:$0xff]   ;;  %v571_v1 = vmov 0.0   ;;  %v524_v2 = vld [vmem:[%s689_s1 + $0x30] sm:$0xff]   ;;  %vm572_vm0 = vmmov 0   ;;  %v525_v3 = vld [vmem:[%s689_s1 + $0x28] sm:$0xff]   ;;  %s704_s16 = smov (!%p205_p5, %s557_s16), 1 }
   0xf   : > { %461 = vmatprep.subr.bf16.mxu0 %v571_v1  ;;  %477 = vmatprep.mubr.msk.bf16.mxu0 %vm572_vm0, %v571_v1  ;;  %v526_v4 = vld [vmem:[%s689_s1 + $0x20] sm:$0xff]   ;;  %v527_v5 = vld [vmem:[%s689_s1 + $0x18] sm:$0xff]   ;;  %v528_v6 = vld [vmem:[%s689_s1 + $0x10] sm:$0xff]   ;;  %s450_s8 = sshll.u32 %s704_s16, 4  ;;  %s706_s15 = smov (!%p212_p6, %s553_s15), 3 }
  0x10   : > { %462 = vmatpush3.bf16.msra.mxu0 %v523_v0  ;;  %v529_v7 = vld [vmem:[%s689_s1 + $0x8] sm:$0xff]   ;;  %s209_s13 = scalar_lea.vmem %s688_s0, %s450_s8  ;;  %v530_v8 = vld [vmem:[%s689_s1] sm:$0xff]   ;;  %s434_s25 = sshll.u32 %s704_s16, 2 }
  0x11   : > { %463 = vmatprep.subr.bf16.mxu0 %v571_v1  ;;  %s221_s24 = scalar_lea.vmem %s209_s13, %s451_s14  ;;  %s215_s26 = sadd.s32 %s434_s25, %s706_s15  ;;  %v446_v10 = vld [vmem:[%s690_s2] ss:$0 sm:$0xff] }
  0x12   : > { %v222_v9 = vld [vmem:[%s221_s24] sm:$0x3]  ;;  %s435_s5 = sshll.u32 %s215_s26, 1 }
  0x13   : > { %v447_v12 = vld [vmem:[%s691_s3] ss:$0 sm:$0xff]  ;;  %s217_s8 = scalar_lea.vmem %s692_s4, %s435_s5 }
  0x14   : > { %464 = vmatpush3.bf16.msra.mxu0 %v524_v2 }
  0x15   : > { %465 = vmatprep.subr.bf16.mxu0 %v571_v1 }
  0x18   : > { %466 = vmatpush3.bf16.msra.mxu0 %v525_v3 }
  0x19   : > { %467 = vmatprep.subr.bf16.mxu0 %v571_v1 }
  0x1c   : > { %468 = vmatpush3.bf16.msra.mxu0 %v526_v4 }
  0x1d   : > { %469 = vmatprep.subr.bf16.mxu0 %v571_v1 }
  0x20   : > { %470 = vmatpush3.bf16.msra.mxu0 %v527_v5 }
  0x21   : > { %471 = vmatprep.subr.bf16.mxu0 %v571_v1 }
  0x24   : > { %472 = vmatpush3.bf16.msra.mxu0 %v528_v6 }
  0x25   : > { %473 = vmatprep.subr.bf16.mxu0 %v571_v1 }
  0x28   : > { %474 = vmatpush3.bf16.msra.mxu0 %v529_v7 }
  0x29   : > { %475 = vmatprep.subr.bf16.mxu0 %v571_v1 }
  0x2c   : > { %476 = vmatpush3.bf16.msra.mxu0 %v530_v8 }
  0x2f   : > { %478 = vmatmul.mubr.bf16.vlgmr.msra.gmra.mxu0 %v222_v9 }
  0xef   : > { %v321_v11 = vpop.f32.mrf.mxu0 }
  0xf0   : > { %v334_v13 = vmul.f32 %v446_v10, %v321_v11 }
  0xf1   : > { %v479_v14 = vpop.f32.mrf.mxu0 }
  0xf2   : > { %v342_v15 = vadd.f32 %v447_v12, %v334_v13 }
  0xf3   : > { %v324_v16 = vpop.f32.mrf.mxu0 }
  0xf4   : > { %v343_v17 = vpack.c.bf16 %v342_v15, %v342_v15 }
  0xf5   : > { %v480_v18 = vpop.f32.mrf.mxu0 }
  0xf6   : > { %344 = vst [vmem:[%s217_s8] sm:$0x3] %v343_v17 }
  0xf7 PF: > { %s14_s19 = sadd.s32 1, %s569_s19   ;;  %s693_s15 = smov %s561_s17 }
  0xf8   : > { %p11_p7 = scmp.ge.s32.totalorder %s14_s19, 10   ;;  %s694_s16 = smov %s565_s18 }
  0xf9   : > { %s695_s17 = smov %s698_s20  ;;  %s696_s18 = smov %s702_s21 }
  0xfa   :  { %13 = sbr.rel (!%p11_p7) target bundleno = 3 (0x3), region = 67 }

// kernel: _lambda_.19
= control target key start
LH: loop header
LB: loop body
LE: loop exit
PB: predicated region body
PF: predicated region fallthrough
CT: control target
= control target key end

     0   :  { %s2104_s18 = smov 0   ;;  %s2106_s19 = smov 0   ;;  %s2490_s0 = inlined_call_operand.vmem [shape: bf16[2,6,6,128], index: 0, kind: input, shape index: {}]   ;;  %s2491_s1 = inlined_call_operand.vmem [shape: bf16[9,128,128], index: 1, kind: input, shape index: {}]   ;;  %s2492_s2 = inlined_call_operand.vmem [shape: f32[1,128], index: 2, kind: input, shape index: {}]   ;;  %s2493_s3 = inlined_call_operand.vmem [shape: f32[1,128], index: 3, kind: input, shape index: {}]   ;;  %s2494_s4 = inlined_call_operand.vmem [shape: bf16[2,4,4,128], index: 4, kind: input, shape index: {}]   ;;  %s2495_s5 = inlined_call_operand.vmem [shape: bf16[2,4,4,128], index: 5, kind: output, shape index: {}]  }
   0x1   :  { %s2108_s20 = smov 0   ;;  %s2110_s21 = smov 0  }
   0x2   :  { %s2112_s22 = smov 0  }
   0x3 LB: > { %s24_s23 = sadd.s32 1, %s2062_s20  ;;  %s27_s24 = sadd.s32 1, %s2066_s21  ;;  %s2070_s22 = sphi %s2112_s22, %s15_s22   ;;  %s2066_s21 = sphi %s2110_s21, %s2499_s21   ;;  %s2062_s20 = sphi %s2108_s20, %s2498_s20   ;;  %s2058_s19 = sphi %s2106_s19, %s2497_s19   ;;  %s2054_s18 = sphi %s2104_s18, %s2496_s18  }
   0x4   : > { %p25_p0 = scmp.ge.s32.totalorder %s24_s23, 4  ;;  %p1425_p1 = scmp.ge.s32.totalorder %s2070_s22, 1 }
   0x5   : > { %p216_p2 = scmp.lt.s32.totalorder %s2070_s22, 9 }
   0x6   : > { %s2501_s23 = smov (%p25_p0, %s24_s23), 0  ;;  %s2503_s24 = smov (!%p25_p0, %s27_s24), %s2066_s21 }
   0x7   : > { %p217_p3 = pnand %p1425_p1, %p216_p2  ;;  %p29_p4 = scmp.ge.s32.totalorder %s2503_s24, 2 }
   0x8   : > { %p255_p5 = scmp.lt.s32.totalorder (!%p217_p3), %s2058_s19, 1  ;;  %s1431_s25 = sshll.u32 (!%p217_p3), %s2054_s18, 2 }
   0x9   : > { %s2505_s24 = smov (%p29_p4, %s2503_s24), 0  ;;  %220 = sbr.rel (%p217_p3) target bundleno = 381 (0x17d), region = 40 }
   0xa   : > { %p262_p6 = scmp.lt.s32.totalorder (!%p217_p3), %s2054_s18, 3 }
   0xe   : > { %v1954_v0 = vld [vmem:[%s2491_s1 + $0x78] sm:$0xff]   ;;  %v2072_v1 = vmov 0.0   ;;  %v1956_v3 = vld [vmem:[%s2491_s1 + $0x70] sm:$0xff]   ;;  %vm2073_vm0 = vmmov 0   ;;  %s2507_s19 = smov (!%p255_p5, %s2058_s19), 1  ;;  %v1958_v5 = vld [vmem:[%s2491_s1 + $0x68] sm:$0xff]  }
   0xf   : > { %1731 = vmatprep.subr.bf16.mxu0 %v2072_v1  ;;  %1751 = vmatprep.subr.bf16.mxu1 %v2072_v1  ;;  %v1955_v2 = vld [vmem:[%s2491_s1 + $0x38] sm:$0xff]   ;;  %v1957_v4 = vld [vmem:[%s2491_s1 + $0x30] sm:$0xff]   ;;  %s1911_s10 = smul.u32 24, %s2507_s19  ;;  %v1959_v6 = vld [vmem:[%s2491_s1 + $0x28] sm:$0xff]   ;;  %s2509_s18 = smov (!%p262_p6, %s2054_s18), 3 }
  0x10   : > { %1732 = vmatpush3.bf16.msra.mxu0 %v1954_v0  ;;  %1747 = vmatprep.mubr.msk.bf16.mxu0 %vm2073_vm0, %v2072_v1  ;;  %v1960_v7 = vld [vmem:[%s2491_s1 + $0x60] sm:$0xff]   ;;  %v1962_v9 = vld [vmem:[%s2491_s1 + $0x58] sm:$0xff]   ;;  %v1964_v12 = vld [vmem:[%s2491_s1 + $0x50] sm:$0xff]  }
  0x11   : > { %1752 = vmatpush3.bf16.msra.mxu1 %v1955_v2  ;;  %1733 = vmatprep.subr.bf16.mxu0 %v2072_v1  ;;  %s259_s17 = scalar_lea.vmem %s2490_s0, %s1911_s10  ;;  %v1961_v8 = vld [vmem:[%s2491_s1 + $0x20] sm:$0xff]   ;;  %v1963_v10 = vld [vmem:[%s2491_s1 + $0x18] sm:$0xff]   ;;  %v1965_v13 = vld [vmem:[%s2491_s1 + $0x10] sm:$0xff]  }
  0x12   : > { %1753 = vmatprep.subr.bf16.mxu1 %v2072_v1  ;;  %1767 = vmatprep.mubr.msk.bf16.mxu1 %vm2073_vm0, %v2072_v1  ;;  %s2179_s28 = scalar_lea.vmem %s259_s17, %s1431_s25  ;;  %v1966_v15 = vld [vmem:[%s2491_s1 + $0x48] sm:$0xff]   ;;  %v1968_v19 = vld [vmem:[%s2491_s1 + $0x40] sm:$0xff]   ;;  %v1971_v22 = vld [vmem:[%s2491_s1 + $0xb8] sm:$0xff]  }
  0x13   : > { %v1970_v11 = vld [vmem:[%s2179_s28] ss:$0 sps:$4 sm:$0x77]   ;;  %v1967_v16 = vld [vmem:[%s2491_s1 + $0x8] sm:$0xff]   ;;  %v1972_v24 = vld [vmem:[%s2491_s1 + $0xf8] sm:$0xff]  }
  0x14   : > { %1734 = vmatpush3.bf16.msra.mxu0 %v1956_v3  ;;  %v320_v14 = vshll.u32 %v1970_v11, 16  ;;  %v318_v17 = vshrl.u32 %v1970_v11, 16  ;;  %v1969_v20 = vld [vmem:[%s2491_s1] sm:$0xff]   ;;  %v1973_v25 = vld [vmem:[%s2491_s1 + $0xb0] sm:$0xff]   ;;  %v1975_v27 = vld [vmem:[%s2491_s1 + $0xa8] sm:$0xff]  }
  0x15   : > { %1754 = vmatpush3.bf16.msra.mxu1 %v1957_v4  ;;  %1735 = vmatprep.subr.bf16.mxu0 %v2072_v1  ;;  %v279_v23 = vld [vmem:[%s2179_s28] sm:$0x3]  ;;  %v1974_v26 = vld [vmem:[%s2491_s1 + $0xf0] sm:$0xff]   ;;  %v1976_v28 = vld [vmem:[%s2491_s1 + $0xe8] sm:$0xff]  }
  0x16   : > { %1755 = vmatprep.subr.bf16.mxu1 %v2072_v1  ;;  %v322_v18 = vrot.slane %v320_v14, 1  ;;  %v1977_v29 = vld [vmem:[%s2491_s1 + $0xa0] sm:$0xff]   ;;  %v1979_v31 = vld [vmem:[%s2491_s1 + $0x98] sm:$0xff]   ;;  %v1981_v33 = vld [vmem:[%s2491_s1 + $0x90] sm:$0xff]  }
  0x17   : > { %v1978_v30 = vld [vmem:[%s2491_s1 + $0xe0] sm:$0xff]   ;;  %v1980_v32 = vld [vmem:[%s2491_s1 + $0xd8] sm:$0xff]   ;;  %v1982_v34 = vld [vmem:[%s2491_s1 + $0xd0] sm:$0xff]  }
  0x18   : > { %1736 = vmatpush3.bf16.msra.mxu0 %v1958_v5  ;;  %v323_v21 = vor.u32 %v322_v18, %v318_v17  ;;  %v1983_v35 = vld [vmem:[%s2491_s1 + $0x88] sm:$0xff]   ;;  %v1987_v37 = vld [vmem:[%s2179_s28] ss:$0 sps:$4 sm:$0x66]   ;;  %v1988_v41 = vld [vmem:[%s2491_s1 + $0x138] sm:$0xff]  }
  0x19   : > { %1756 = vmatpush3.bf16.msra.mxu1 %v1959_v6  ;;  %1737 = vmatprep.subr.bf16.mxu0 %v2072_v1  ;;  %v1984_v36 = vld [vmem:[%s2491_s1 + $0xc8] sm:$0xff]   ;;  %v1985_v38 = vld [vmem:[%s2491_s1 + $0x80] sm:$0xff]   ;;  %v522_v40 = vrot.slane %v1987_v37, 1  ;;  %v1989_v43 = vld [vmem:[%s2491_s1 + $0x178] sm:$0xff]  }
  0x1a   : > { %1757 = vmatprep.subr.bf16.mxu1 %v2072_v1  ;;  %v1986_v39 = vld [vmem:[%s2491_s1 + $0xc0] sm:$0xff]   ;;  %v1990_v44 = vld [vmem:[%s2491_s1 + $0x130] sm:$0xff]   ;;  %v1992_v46 = vld [vmem:[%s2491_s1 + $0x128] sm:$0xff]  }
  0x1b   : > { %v1491_v42 = vld [vmem:[%s2179_s28 + $0x4] sm:$0x3]  ;;  %v1991_v45 = vld [vmem:[%s2491_s1 + $0x170] sm:$0xff]   ;;  %v1993_v47 = vld [vmem:[%s2491_s1 + $0x168] sm:$0xff]  }
  0x1c   : > { %1738 = vmatpush3.bf16.msra.mxu0 %v1960_v7  ;;  %v1994_v48 = vld [vmem:[%s2491_s1 + $0x120] sm:$0xff]   ;;  %v1996_v50 = vld [vmem:[%s2491_s1 + $0x118] sm:$0xff]   ;;  %v1998_v53 = vld [vmem:[%s2491_s1 + $0x110] sm:$0xff]  }
  0x1d   : > { %1758 = vmatpush3.bf16.msra.mxu1 %v1961_v8  ;;  %1739 = vmatprep.subr.bf16.mxu0 %v2072_v1  ;;  %v1995_v49 = vld [vmem:[%s2491_s1 + $0x160] sm:$0xff]   ;;  %v1997_v51 = vld [vmem:[%s2491_s1 + $0x158] sm:$0xff]   ;;  %v1999_v54 = vld [vmem:[%s2491_s1 + $0x150] sm:$0xff]  }
  0x1e   : > { %1759 = vmatprep.subr.bf16.mxu1 %v2072_v1  ;;  %v2004_v52 = vld [vmem:[%s2179_s28 + $0x4] ss:$0 sps:$4 sm:$0x77]   ;;  %v2000_v56 = vld [vmem:[%s2491_s1 + $0x108] sm:$0xff]   ;;  %v2005_v0 = vld [vmem:[%s2491_s1 + $0x1b8] sm:$0xff]  }
  0x1f   : > { %v747_v55 = vshll.u32 %v2004_v52, 16  ;;  %v2001_v57 = vld [vmem:[%s2491_s1 + $0x148] sm:$0xff]   ;;  %v745_v58 = vshrl.u32 %v2004_v52, 16  ;;  %v2002_v60 = vld [vmem:[%s2491_s1 + $0x100] sm:$0xff]   ;;  %v2007_v3 = vld [vmem:[%s2491_s1 + $0x1f8] sm:$0xff]  }
  0x20   : > { %1740 = vmatpush3.bf16.msra.mxu0 %v1962_v9  ;;  %v2006_v61 = vld [vmem:[%s2179_s28 + $0x4] ss:$0 sps:$4 sm:$0x66]   ;;  %v2008_v4 = vld [vmem:[%s2491_s1 + $0x1b0] sm:$0xff]   ;;  %v2010_v6 = vld [vmem:[%s2491_s1 + $0x1a8] sm:$0xff]  }
  0x21   : > { %1760 = vmatpush3.bf16.msra.mxu1 %v1963_v10  ;;  %1741 = vmatprep.subr.bf16.mxu0 %v2072_v1  ;;  %v749_v59 = vrot.slane %v747_v55, 1  ;;  %v2003_v62 = vld [vmem:[%s2491_s1 + $0x140] sm:$0xff]   ;;  %v862_v2 = vrot.slane %v2006_v61, 1  ;;  %v2009_v5 = vld [vmem:[%s2491_s1 + $0x1f0] sm:$0xff]   ;;  %v2011_v7 = vld [vmem:[%s2491_s1 + $0x1e8] sm:$0xff]  }
  0x22   : > { %1761 = vmatprep.subr.bf16.mxu1 %v2072_v1  ;;  %v2012_v8 = vld [vmem:[%s2491_s1 + $0x1a0] sm:$0xff]   ;;  %v2014_v10 = vld [vmem:[%s2491_s1 + $0x198] sm:$0xff]   ;;  %v2017_v14 = vld [vmem:[%s2491_s1 + $0x1d0] sm:$0xff]  }
  0x23   : > { %v750_v63 = vor.u32 %v749_v59, %v745_v58  ;;  %v2013_v9 = vld [vmem:[%s2491_s1 + $0x1e0] sm:$0xff]   ;;  %v2015_v11 = vld [vmem:[%s2491_s1 + $0x1d8] sm:$0xff]   ;;  %v2019_v17 = vld [vmem:[%s2491_s1 + $0x1c8] sm:$0xff]  }
  0x24   : > { %1742 = vmatpush3.bf16.msra.mxu0 %v1964_v12  ;;  %v2016_v12 = vld [vmem:[%s2491_s1 + $0x190] sm:$0xff]   ;;  %v2020_v18 = vld [vmem:[%s2491_s1 + $0x180] sm:$0xff]  }
  0x25   : > { %1762 = vmatpush3.bf16.msra.mxu1 %v1965_v13  ;;  %1743 = vmatprep.subr.bf16.mxu0 %v2072_v1  ;;  %v2023_v13 = vld [vmem:[%s2179_s28 + $0x8] ss:$0 sps:$4 sm:$0x77]  }
  0x26   : > { %1763 = vmatprep.subr.bf16.mxu1 %v2072_v1 }
  0x28   : > { %1744 = vmatpush3.bf16.msra.mxu0 %v1966_v15  ;;  %v2018_v15 = vld [vmem:[%s2491_s1 + $0x188] sm:$0xff]  }
  0x29   : > { %1764 = vmatpush3.bf16.msra.mxu1 %v1967_v16  ;;  %1745 = vmatprep.subr.bf16.mxu0 %v2072_v1  ;;  %v1087_v16 = vshll.u32 %v2023_v13, 16 }
  0x2a   : > { %1765 = vmatprep.subr.bf16.mxu1 %v2072_v1 }
  0x2c   : > { %1746 = vmatpush3.bf16.msra.mxu0 %v1968_v19  ;;  %v1085_v19 = vshrl.u32 %v2023_v13, 16  ;;  %v1647_v13 = vld [vmem:[%s2493_s3] ss:$0 sm:$0xff] }
  0x2d   : > { %1766 = vmatpush3.bf16.msra.mxu1 %v1969_v20  ;;  %1771 = vmatprep.subr.bf16.mxu0 %v2072_v1  ;;  %v1089_v20 = vrot.slane %v1087_v16, 1 }
  0x2e   : > { %1791 = vmatprep.subr.bf16.mxu1 %v2072_v1 }
  0x2f   : > { %1748 = vmatmul.mubr.bf16.vlgmr.msra.gmra.mxu0 %v323_v21  ;;  %v2021_v21 = vld [vmem:[%s2491_s1 + $0x1c0] sm:$0xff]  }
  0x30   : > { %1768 = vmatmul.mubr.bf16.vlgmr.msra.gmra.mxu1 %v279_v23  ;;  %1772 = vmatpush3.bf16.msra.mxu0 %v1971_v22  ;;  %v1569_v22 = vld [vmem:[%s2179_s28 + $0x8] sm:$0x3]  ;;  %v2022_v23 = vld [vmem:[%s2491_s1 + $0x238] sm:$0xff]  }
  0x31   : > { %1792 = vmatpush3.bf16.msra.mxu1 %v1972_v24  ;;  %1773 = vmatprep.subr.bf16.mxu0 %v2072_v1  ;;  %v1090_v24 = vor.u32 %v1089_v20, %v1085_v19 }
  0x32   : > { %1793 = vmatprep.subr.bf16.mxu1 %v2072_v1  ;;  %1787 = vmatprep.mubr.msk.bf16.mxu0 %vm2073_vm0, %v2072_v1 }
  0x33   : > { %1807 = vmatprep.mubr.msk.bf16.mxu1 %vm2073_vm0, %v2072_v1 }
  0x34   : > { %1774 = vmatpush3.bf16.msra.mxu0 %v1973_v25  ;;  %v2024_v25 = vld [vmem:[%s2491_s1 + $0x230] sm:$0xff]  }
  0x35   : > { %1794 = vmatpush3.bf16.msra.mxu1 %v1974_v26  ;;  %1775 = vmatprep.subr.bf16.mxu0 %v2072_v1  ;;  %v2025_v26 = vld [vmem:[%s2491_s1 + $0x228] sm:$0xff]  }
  0x36   : > { %1795 = vmatprep.subr.bf16.mxu1 %v2072_v1 }
  0x38   : > { %1776 = vmatpush3.bf16.msra.mxu0 %v1975_v27  ;;  %v2026_v27 = vld [vmem:[%s2491_s1 + $0x220] sm:$0xff]  }
  0x39   : > { %1796 = vmatpush3.bf16.msra.mxu1 %v1976_v28  ;;  %1777 = vmatprep.subr.bf16.mxu0 %v2072_v1  ;;  %v2027_v28 = vld [vmem:[%s2491_s1 + $0x218] sm:$0xff]  }
  0x3a   : > { %1797 = vmatprep.subr.bf16.mxu1 %v2072_v1 }
  0x3c   : > { %1778 = vmatpush3.bf16.msra.mxu0 %v1977_v29  ;;  %v2028_v29 = vld [vmem:[%s2491_s1 + $0x210] sm:$0xff]  }
  0x3d   : > { %1798 = vmatpush3.bf16.msra.mxu1 %v1978_v30  ;;  %1779 = vmatprep.subr.bf16.mxu0 %v2072_v1  ;;  %v2029_v30 = vld [vmem:[%s2491_s1 + $0x208] sm:$0xff]  }
  0x3e   : > { %1799 = vmatprep.subr.bf16.mxu1 %v2072_v1 }
  0x40   : > { %1780 = vmatpush3.bf16.msra.mxu0 %v1979_v31  ;;  %v2031_v31 = vld [vmem:[%s2179_s28 + $0x8] ss:$0 sps:$4 sm:$0x66]   ;;  %s1427_s28 = sshll.u32 %s2507_s19, 2 }
  0x41   : > { %1800 = vmatpush3.bf16.msra.mxu1 %v1980_v32  ;;  %1781 = vmatprep.subr.bf16.mxu0 %v2072_v1  ;;  %v2030_v32 = vld [vmem:[%s2491_s1 + $0x200] sm:$0xff]   ;;  %s265_s13 = sadd.s32 %s1427_s28, %s2509_s18 }
  0x42   : > { %1801 = vmatprep.subr.bf16.mxu1 %v2072_v1  ;;  %s1428_s14 = sshll.u32 %s265_s13, 1 }
  0x43   : > { %s267_s17 = scalar_lea.vmem %s2494_s4, %s1428_s14  ;;  %s275_s30 = scalar_lea.vmem %s2495_s5, %s1428_s14 }
  0x44   : > { %1782 = vmatpush3.bf16.msra.mxu0 %v1981_v33  ;;  %v1202_v33 = vrot.slane %v2031_v31, 1 }
  0x45   : > { %1802 = vmatpush3.bf16.msra.mxu1 %v1982_v34  ;;  %1783 = vmatprep.subr.bf16.mxu0 %v2072_v1 }
  0x46   : > { %1803 = vmatprep.subr.bf16.mxu1 %v2072_v1 }
  0x48   : > { %1784 = vmatpush3.bf16.msra.mxu0 %v1983_v35 }
  0x49   : > { %1804 = vmatpush3.bf16.msra.mxu1 %v1984_v36  ;;  %1785 = vmatprep.subr.bf16.mxu0 %v2072_v1 }
  0x4a   : > { %1805 = vmatprep.subr.bf16.mxu1 %v2072_v1 }
  0x4c   : > { %1786 = vmatpush3.bf16.msra.mxu0 %v1985_v38 }
  0x4d   : > { %1806 = vmatpush3.bf16.msra.mxu1 %v1986_v39  ;;  %1811 = vmatprep.subr.bf16.mxu0 %v2072_v1 }
  0x4e   : > { %1831 = vmatprep.subr.bf16.mxu1 %v2072_v1 }
  0x4f   : > { %1788 = vmatmul.mubr.bf16.vlgmr.msra.gmra.mxu0 %v522_v40 }
  0x50   : > { %1812 = vmatpush3.bf16.msra.mxu0 %v1988_v41  ;;  %1808 = vmatmul.mubr.bf16.vlgmr.msra.gmra.mxu1 %v1491_v42 }
  0x51   : > { %1832 = vmatpush3.bf16.msra.mxu1 %v1989_v43  ;;  %1813 = vmatprep.subr.bf16.mxu0 %v2072_v1 }
  0x52   : > { %1833 = vmatprep.subr.bf16.mxu1 %v2072_v1  ;;  %1827 = vmatprep.mubr.msk.bf16.mxu0 %vm2073_vm0, %v2072_v1 }
  0x53   : > { %1847 = vmatprep.mubr.msk.bf16.mxu1 %vm2073_vm0, %v2072_v1 }
  0x54   : > { %1814 = vmatpush3.bf16.msra.mxu0 %v1990_v44 }
  0x55   : > { %1834 = vmatpush3.bf16.msra.mxu1 %v1991_v45  ;;  %1815 = vmatprep.subr.bf16.mxu0 %v2072_v1 }
  0x56   : > { %1835 = vmatprep.subr.bf16.mxu1 %v2072_v1 }
  0x58   : > { %1816 = vmatpush3.bf16.msra.mxu0 %v1992_v46 }
  0x59   : > { %1836 = vmatpush3.bf16.msra.mxu1 %v1993_v47  ;;  %1817 = vmatprep.subr.bf16.mxu0 %v2072_v1 }
  0x5a   : > { %1837 = vmatprep.subr.bf16.mxu1 %v2072_v1 }
  0x5c   : > { %1818 = vmatpush3.bf16.msra.mxu0 %v1994_v48 }
  0x5d   : > { %1838 = vmatpush3.bf16.msra.mxu1 %v1995_v49  ;;  %1819 = vmatprep.subr.bf16.mxu0 %v2072_v1 }
  0x5e   : > { %1839 = vmatprep.subr.bf16.mxu1 %v2072_v1 }
  0x60   : > { %1820 = vmatpush3.bf16.msra.mxu0 %v1996_v50 }
  0x61   : > { %1840 = vmatpush3.bf16.msra.mxu1 %v1997_v51  ;;  %1821 = vmatprep.subr.bf16.mxu0 %v2072_v1 }
  0x62   : > { %1841 = vmatprep.subr.bf16.mxu1 %v2072_v1 }
  0x64   : > { %1822 = vmatpush3.bf16.msra.mxu0 %v1998_v53 }
  0x65   : > { %1842 = vmatpush3.bf16.msra.mxu1 %v1999_v54  ;;  %1823 = vmatprep.subr.bf16.mxu0 %v2072_v1 }
  0x66   : > { %1843 = vmatprep.subr.bf16.mxu1 %v2072_v1 }
  0x68   : > { %1824 = vmatpush3.bf16.msra.mxu0 %v2000_v56 }
  0x69   : > { %1844 = vmatpush3.bf16.msra.mxu1 %v2001_v57  ;;  %1825 = vmatprep.subr.bf16.mxu0 %v2072_v1 }
  0x6a   : > { %1845 = vmatprep.subr.bf16.mxu1 %v2072_v1 }
  0x6c   : > { %1826 = vmatpush3.bf16.msra.mxu0 %v2002_v60 }
  0x6d   : > { %1846 = vmatpush3.bf16.msra.mxu1 %v2003_v62  ;;  %1851 = vmatprep.subr.bf16.mxu0 %v2072_v1 }
  0x6e   : > { %1871 = vmatprep.subr.bf16.mxu1 %v2072_v1 }
  0x6f   : > { %1828 = vmatmul.mubr.bf16.vlgmr.msra.gmra.mxu0 %v750_v63 }
  0x70   : > { %1852 = vmatpush3.bf16.msra.mxu0 %v2005_v0  ;;  %1848 = vmatmul.mubr.bf16.vlgmr.msra.gmra.mxu1 %v862_v2 }
  0x71   : > { %1872 = vmatpush3.bf16.msra.mxu1 %v2007_v3  ;;  %1853 = vmatprep.subr.bf16.mxu0 %v2072_v1 }
  0x72   : > { %1873 = vmatprep.subr.bf16.mxu1 %v2072_v1  ;;  %1867 = vmatprep.mubr.msk.bf16.mxu0 %vm2073_vm0, %v2072_v1 }
  0x73   : > { %1887 = vmatprep.mubr.msk.bf16.mxu1 %vm2073_vm0, %v2072_v1 }
  0x74   : > { %1854 = vmatpush3.bf16.msra.mxu0 %v2008_v4 }
  0x75   : > { %1874 = vmatpush3.bf16.msra.mxu1 %v2009_v5  ;;  %1855 = vmatprep.subr.bf16.mxu0 %v2072_v1 }
  0x76   : > { %1875 = vmatprep.subr.bf16.mxu1 %v2072_v1 }
  0x78   : > { %1856 = vmatpush3.bf16.msra.mxu0 %v2010_v6 }
  0x79   : > { %1876 = vmatpush3.bf16.msra.mxu1 %v2011_v7  ;;  %1857 = vmatprep.subr.bf16.mxu0 %v2072_v1 }
  0x7a   : > { %1877 = vmatprep.subr.bf16.mxu1 %v2072_v1 }
  0x7c   : > { %1858 = vmatpush3.bf16.msra.mxu0 %v2012_v8 }
  0x7d   : > { %1878 = vmatpush3.bf16.msra.mxu1 %v2013_v9  ;;  %1859 = vmatprep.subr.bf16.mxu0 %v2072_v1 }
  0x7e   : > { %1879 = vmatprep.subr.bf16.mxu1 %v2072_v1 }
  0x80   : > { %1860 = vmatpush3.bf16.msra.mxu0 %v2014_v10  ;;  %v1646_v10 = vld [vmem:[%s2492_s2] ss:$0 sm:$0xff] }
  0x81   : > { %1880 = vmatpush3.bf16.msra.mxu1 %v2015_v11  ;;  %1861 = vmatprep.subr.bf16.mxu0 %v2072_v1  ;;  %v1309_v11 = vld [vmem:[%s267_s17] sm:$0x3] }
  0x82   : > { %1881 = vmatprep.subr.bf16.mxu1 %v2072_v1  ;;  %v1310_v16 = vunpack.c.l.bf16 %v1309_v11 }
  0x84   : > { %1862 = vmatpush3.bf16.msra.mxu0 %v2016_v12 }
  0x85   : > { %1882 = vmatpush3.bf16.msra.mxu1 %v2017_v14  ;;  %1863 = vmatprep.subr.bf16.mxu0 %v2072_v1 }
  0x86   : > { %1883 = vmatprep.subr.bf16.mxu1 %v2072_v1 }
  0x88   : > { %1864 = vmatpush3.bf16.msra.mxu0 %v2018_v15 }
  0x89   : > { %1884 = vmatpush3.bf16.msra.mxu1 %v2019_v17  ;;  %1865 = vmatprep.subr.bf16.mxu0 %v2072_v1 }
  0x8a   : > { %1885 = vmatprep.subr.bf16.mxu1 %v2072_v1 }
  0x8c   : > { %1866 = vmatpush3.bf16.msra.mxu0 %v2020_v18 }
  0x8d   : > { %1886 = vmatpush3.bf16.msra.mxu1 %v2021_v21  ;;  %1891 = vmatprep.subr.bf16.mxu0 %v2072_v1 }
  0x8f   : > { %1868 = vmatmul.mubr.bf16.vlgmr.msra.gmra.mxu0 %v1569_v22 }
  0x90   : > { %1892 = vmatpush3.bf16.msra.mxu0 %v2022_v23  ;;  %1888 = vmatmul.mubr.bf16.vlgmr.msra.gmra.mxu1 %v1090_v24 }
  0x91   : > { %1893 = vmatprep.subr.bf16.mxu0 %v2072_v1  ;;  %1907 = vmatprep.mubr.msk.bf16.mxu0 %vm2073_vm0, %v2072_v1 }
  0x94   : > { %1894 = vmatpush3.bf16.msra.mxu0 %v2024_v25 }
  0x95   : > { %1895 = vmatprep.subr.bf16.mxu0 %v2072_v1 }
  0x98   : > { %1896 = vmatpush3.bf16.msra.mxu0 %v2025_v26 }
  0x99   : > { %1897 = vmatprep.subr.bf16.mxu0 %v2072_v1 }
  0x9c   : > { %1898 = vmatpush3.bf16.msra.mxu0 %v2026_v27 }
  0x9d   : > { %1899 = vmatprep.subr.bf16.mxu0 %v2072_v1 }
  0xa0   : > { %1900 = vmatpush3.bf16.msra.mxu0 %v2027_v28 }
  0xa1   : > { %1901 = vmatprep.subr.bf16.mxu0 %v2072_v1 }
  0xa4   : > { %1902 = vmatpush3.bf16.msra.mxu0 %v2028_v29 }
  0xa5   : > { %1903 = vmatprep.subr.bf16.mxu0 %v2072_v1 }
  0xa8   : > { %1904 = vmatpush3.bf16.msra.mxu0 %v2029_v30 }
  0xa9   : > { %1905 = vmatprep.subr.bf16.mxu0 %v2072_v1 }
  0xac   : > { %1906 = vmatpush3.bf16.msra.mxu0 %v2030_v32 }
  0xaf   : > { %1908 = vmatmul.mubr.bf16.vlgmr.msra.gmra.mxu0 %v1202_v33 }
  0xef   : > { %v407_v34 = vpop.f32.mrf.mxu0 }
  0xf0   : > { %v495_v35 = vpop.f32.mrf.mxu1 }
  0xf1   : > { %v496_v36 = vadd.f32 %v495_v35, %v407_v34  ;;  %v1749_v37 = vpop.f32.mrf.mxu0 }
  0xf2   : > { %v1769_v38 = vpop.f32.mrf.mxu1 }
  0xf3   : > { %v410_v39 = vpop.f32.mrf.mxu0 }
  0xf4   : > { %v498_v40 = vpop.f32.mrf.mxu1 }
  0xf5   : > { %v1750_v41 = vpop.f32.mrf.mxu0 }
  0xf6   : > { %v1770_v42 = vpop.f32.mrf.mxu1 }
 0x10f   : > { %v606_v43 = vpop.f32.mrf.mxu0 }
 0x110   : > { %v612_v44 = vadd.f32 %v606_v43, %v496_v36  ;;  %v716_v45 = vpop.f32.mrf.mxu1 }
 0x111   : > { %v1789_v46 = vpop.f32.mrf.mxu0 }
 0x112   : > { %v722_v47 = vadd.f32 %v716_v45, %v612_v44  ;;  %v1809_v48 = vpop.f32.mrf.mxu1 }
 0x113   : > { %v609_v49 = vpop.f32.mrf.mxu0 }
 0x114   : > { %v719_v1 = vpop.f32.mrf.mxu1 }
 0x115   : > { %v1790_v50 = vpop.f32.mrf.mxu0 }
 0x116   : > { %v1810_v51 = vpop.f32.mrf.mxu1 }
 0x12f   : > { %v834_v52 = vpop.f32.mrf.mxu0 }
 0x130   : > { %v946_v53 = vpop.f32.mrf.mxu1  ;;  %v840_v5 = vadd.f32 %v834_v52, %v722_v47 }
 0x131   : > { %v1829_v54 = vpop.f32.mrf.mxu0 }
 0x132   : > { %v1849_v55 = vpop.f32.mrf.mxu1  ;;  %v952_v6 = vadd.f32 %v946_v53, %v840_v5 }
 0x133   : > { %v837_v56 = vpop.f32.mrf.mxu0 }
 0x134   : > { %v949_v57 = vpop.f32.mrf.mxu1 }
 0x135   : > { %v1830_v58 = vpop.f32.mrf.mxu0 }
 0x136   : > { %v1850_v59 = vpop.f32.mrf.mxu1 }
 0x14f   : > { %v1056_v60 = vpop.f32.mrf.mxu0 }
 0x150   : > { %v1174_v61 = vpop.f32.mrf.mxu1  ;;  %v1062_v7 = vadd.f32 %v1056_v60, %v952_v6 }
 0x151   : > { %v1869_v62 = vpop.f32.mrf.mxu0 }
 0x152   : > { %v1889_v63 = vpop.f32.mrf.mxu1  ;;  %v1180_v8 = vadd.f32 %v1174_v61, %v1062_v7 }
 0x153   : > { %v1059_v0 = vpop.f32.mrf.mxu0 }
 0x154   : > { %v1177_v2 = vpop.f32.mrf.mxu1 }
 0x155   : > { %v1870_v3 = vpop.f32.mrf.mxu0 }
 0x156   : > { %v1890_v4 = vpop.f32.mrf.mxu1 }
 0x16f   : > { %v1286_v9 = vpop.f32.mrf.mxu0 }
 0x170   : > { %v1292_v12 = vadd.f32 %v1286_v9, %v1180_v8 }
 0x171   : > { %v1909_v14 = vpop.f32.mrf.mxu0 }
 0x172   : > { %v1300_v15 = vmul.f32 %v1646_v10, %v1292_v12 }
 0x173   : > { %v1289_v17 = vpop.f32.mrf.mxu0 }
 0x174   : > { %v1308_v18 = vadd.f32 %v1647_v13, %v1300_v15 }
 0x175   : > { %v1910_v19 = vpop.f32.mrf.mxu0 }
 0x176   : > { %v1311_v20 = vadd.f32 %v1310_v16, %v1308_v18 }
 0x178   : > { %v1312_v21 = vmax.f32 %v1311_v20, 0.0 }
 0x17a   : > { %v1313_v22 = vpack.c.bf16 %v1312_v21, %v1312_v21 }
 0x17c   : > { %1314 = vst [vmem:[%s275_s30] sm:$0x3] %v1313_v22 }
 0x17d PF: > { %s15_s22 = sadd.s32 1, %s2070_s22   ;;  %s2496_s18 = smov %s2062_s20 }
 0x17e   : > { %p12_p7 = scmp.ge.s32.totalorder %s15_s22, 10   ;;  %s2497_s19 = smov %s2066_s21 }
 0x17f   : > { %s2498_s20 = smov %s2501_s23  ;;  %s2499_s21 = smov %s2505_s24 }
 0x180   :  { %14 = sbr.rel (!%p12_p7) target bundleno = 3 (0x3), region = 84 }

// kernel: _lambda_.21
= control target key start
LH: loop header
LB: loop body
LE: loop exit
PB: predicated region body
PF: predicated region fallthrough
CT: control target
= control target key end

     0   :  { %s581_s15 = smov 0   ;;  %s583_s16 = smov 0   ;;  %s671_s0 = inlined_call_operand.vmem [shape: bf16[2,4,2,128], index: 0, kind: input, shape index: {}]   ;;  %s672_s1 = inlined_call_operand.vmem [shape: bf16[1,128,128], index: 1, kind: input, shape index: {}]   ;;  %s673_s2 = inlined_call_operand.vmem [shape: f32[1,128], index: 2, kind: input, shape index: {}]   ;;  %s674_s3 = inlined_call_operand.vmem [shape: f32[1,128], index: 3, kind: input, shape index: {}]   ;;  %s675_s4 = inlined_call_operand.vmem [shape: bf16[2,2,2,128], index: 4, kind: output, shape index: {}]  }
   0x1   :  { %s585_s17 = smov 0   ;;  %s587_s18 = smov 0  }
   0x2   :  { %s589_s19 = smov 0  }
   0x3 LB: > { %s23_s20 = sadd.s32 1, %s544_s17  ;;  %s26_s21 = sadd.s32 1, %s548_s18  ;;  %s552_s19 = sphi %s589_s19, %s14_s19   ;;  %s548_s18 = sphi %s587_s18, %s679_s18   ;;  %s544_s17 = sphi %s585_s17, %s678_s17   ;;  %s540_s16 = sphi %s583_s16, %s677_s16   ;;  %s536_s15 = sphi %s581_s15, %s676_s15  }
   0x4   : > { %p24_p0 = scmp.ge.s32.totalorder %s23_s20, 2  ;;  %p419_p1 = scmp.ge.s32.totalorder %s552_s19, 1 }
   0x5   : > { %p175_p2 = scmp.lt.s32.totalorder %s552_s19, 5 }
   0x6   : > { %s681_s20 = smov (%p24_p0, %s23_s20), 0  ;;  %s683_s21 = smov (!%p24_p0, %s26_s21), %s548_s18 }
   0x7   : > { %p176_p3 = pnand %p419_p1, %p175_p2  ;;  %p28_p4 = scmp.ge.s32.totalorder %s683_s21, 2 }
   0x8   : > { %p202_p5 = scmp.lt.s32.totalorder (!%p176_p3), %s540_s16, 1  ;;  %s422_s14 = sshll.u32 (!%p176_p3), %s536_s15, 1 }
   0x9   : > { %s685_s21 = smov (%p28_p4, %s683_s21), 0  ;;  %179 = sbr.rel (%p176_p3) target bundleno = 247 (0xf7), region = 36 }
   0xa   : > { %p208_p6 = scmp.lt.s32.totalorder (!%p176_p3), %s536_s15, 1 }
   0xe   : > { %v506_v0 = vld [vmem:[%s672_s1 + $0x38] sm:$0xff]   ;;  %v554_v1 = vmov 0.0   ;;  %v507_v2 = vld [vmem:[%s672_s1 + $0x30] sm:$0xff]   ;;  %vm555_vm0 = vmmov 0   ;;  %v508_v3 = vld [vmem:[%s672_s1 + $0x28] sm:$0xff]   ;;  %s687_s16 = smov (!%p202_p5, %s540_s16), 1 }
   0xf   : > { %444 = vmatprep.subr.bf16.mxu0 %v554_v1  ;;  %460 = vmatprep.mubr.msk.bf16.mxu0 %vm555_vm0, %v554_v1  ;;  %v509_v4 = vld [vmem:[%s672_s1 + $0x20] sm:$0xff]   ;;  %v510_v5 = vld [vmem:[%s672_s1 + $0x18] sm:$0xff]   ;;  %v511_v6 = vld [vmem:[%s672_s1 + $0x10] sm:$0xff]   ;;  %s420_s8 = sshll.u32 %s687_s16, 2  ;;  %s689_s15 = smov (!%p208_p6, %s536_s15), 1 }
  0x10   : > { %445 = vmatpush3.bf16.msra.mxu0 %v506_v0  ;;  %v512_v7 = vld [vmem:[%s672_s1 + $0x8] sm:$0xff]   ;;  %s205_s13 = scalar_lea.vmem %s671_s0, %s420_s8  ;;  %v513_v8 = vld [vmem:[%s672_s1] sm:$0xff]   ;;  %s421_s25 = sshll.u32 %s687_s16, 1 }
  0x11   : > { %446 = vmatprep.subr.bf16.mxu0 %v554_v1  ;;  %s215_s24 = scalar_lea.vmem %s205_s13, %s422_s14  ;;  %v431_v10 = vld [vmem:[%s673_s2] ss:$0 sm:$0xff]  ;;  %s211_s30 = sadd.s32 %s421_s25, %s689_s15 }
  0x12   : > { %v216_v9 = vld [vmem:[%s215_s24] sm:$0x1]  ;;  %s212_s7 = scalar_lea.vmem %s675_s4, %s211_s30 }
  0x13   : > { %v432_v12 = vld [vmem:[%s674_s3] ss:$0 sm:$0xff] }
  0x14   : > { %447 = vmatpush3.bf16.msra.mxu0 %v507_v2 }
  0x15   : > { %448 = vmatprep.subr.bf16.mxu0 %v554_v1 }
  0x18   : > { %449 = vmatpush3.bf16.msra.mxu0 %v508_v3 }
  0x19   : > { %450 = vmatprep.subr.bf16.mxu0 %v554_v1 }
  0x1c   : > { %451 = vmatpush3.bf16.msra.mxu0 %v509_v4 }
  0x1d   : > { %452 = vmatprep.subr.bf16.mxu0 %v554_v1 }
  0x20   : > { %453 = vmatpush3.bf16.msra.mxu0 %v510_v5 }
  0x21   : > { %454 = vmatprep.subr.bf16.mxu0 %v554_v1 }
  0x24   : > { %455 = vmatpush3.bf16.msra.mxu0 %v511_v6 }
  0x25   : > { %456 = vmatprep.subr.bf16.mxu0 %v554_v1 }
  0x28   : > { %457 = vmatpush3.bf16.msra.mxu0 %v512_v7 }
  0x29   : > { %458 = vmatprep.subr.bf16.mxu0 %v554_v1 }
  0x2c   : > { %459 = vmatpush3.bf16.msra.mxu0 %v513_v8 }
  0x2f   : > { %461 = vmatmul.mubr.bf16.vlgmr.msra.gmra.mxu0 %v216_v9 }
  0xef   : > { %v315_v11 = vpop.f32.mrf.mxu0 }
  0xf0   : > { %v328_v13 = vmul.f32 %v431_v10, %v315_v11 }
  0xf1   : > { %v462_v14 = vpop.f32.mrf.mxu0 }
  0xf2   : > { %v336_v15 = vadd.f32 %v432_v12, %v328_v13 }
  0xf3   : > { %v318_v16 = vpop.f32.mrf.mxu0 }
  0xf4   : > { %v337_v17 = vpack.c.bf16 %v336_v15, %v336_v15 }
  0xf5   : > { %v463_v18 = vpop.f32.mrf.mxu0 }
  0xf6   : > { %338 = vst [vmem:[%s212_s7] sm:$0x1] %v337_v17 }
  0xf7 PF: > { %s14_s19 = sadd.s32 1, %s552_s19   ;;  %s676_s15 = smov %s544_s17 }
  0xf8   : > { %p11_p7 = scmp.ge.s32.totalorder %s14_s19, 6   ;;  %s677_s16 = smov %s548_s18 }
  0xf9   : > { %s678_s17 = smov %s681_s20  ;;  %s679_s18 = smov %s685_s21 }
  0xfa   :  { %13 = sbr.rel (!%p11_p7) target bundleno = 3 (0x3), region = 67 }

// kernel: _lambda_.20
= control target key start
LH: loop header
LB: loop body
LE: loop exit
PB: predicated region body
PF: predicated region fallthrough
CT: control target
= control target key end

     0   :  { %s2098_s18 = smov 0   ;;  %s2100_s19 = smov 0   ;;  %s2490_s0 = inlined_call_operand.vmem [shape: bf16[2,6,3,128], index: 0, kind: input, shape index: {}]   ;;  %s2491_s1 = inlined_call_operand.vmem [shape: bf16[2,6,3,128], index: 1, kind: input, shape index: {}]   ;;  %s2492_s2 = inlined_call_operand.vmem [shape: bf16[9,128,128], index: 2, kind: input, shape index: {}]   ;;  %s2493_s3 = inlined_call_operand.vmem [shape: f32[1,128], index: 3, kind: input, shape index: {}]   ;;  %s2494_s4 = inlined_call_operand.vmem [shape: f32[1,128], index: 4, kind: input, shape index: {}]   ;;  %s2495_s5 = inlined_call_operand.vmem [shape: bf16[2,2,2,128], index: 5, kind: output, shape index: {}]  }
   0x1   :  { %s2102_s20 = smov 0   ;;  %s2104_s21 = smov 0  }
   0x2   :  { %s2106_s22 = smov 0  }
   0x3 LB: > { %s24_s23 = sadd.s32 1, %s2056_s20  ;;  %s27_s24 = sadd.s32 1, %s2060_s21  ;;  %s2064_s22 = sphi %s2106_s22, %s15_s22   ;;  %s2060_s21 = sphi %s2104_s21, %s2499_s21   ;;  %s2056_s20 = sphi %s2102_s20, %s2498_s20   ;;  %s2052_s19 = sphi %s2100_s19, %s2497_s19   ;;  %s2048_s18 = sphi %s2098_s18, %s2496_s18  }
   0x4   : > { %p25_p0 = scmp.ge.s32.totalorder %s24_s23, 2  ;;  %p1416_p1 = scmp.ge.s32.totalorder %s2064_s22, 1 }
   0x5   : > { %p211_p2 = scmp.lt.s32.totalorder %s2064_s22, 5 }
   0x6   : > { %s2501_s23 = smov (%p25_p0, %s24_s23), 0  ;;  %s2503_s24 = smov (!%p25_p0, %s27_s24), %s2060_s21 }
   0x7   : > { %p212_p3 = pnand %p1416_p1, %p211_p2  ;;  %p29_p4 = scmp.ge.s32.totalorder %s2503_s24, 2 }
   0x8   : > { %p246_p5 = scmp.lt.s32.totalorder (!%p212_p3), %s2052_s19, 1  ;;  %s1644_s12 = sshll.u32 (!%p212_p3), %s2048_s18, 2 }
   0x9   : > { %s2505_s24 = smov (%p29_p4, %s2503_s24), 0  ;;  %215 = sbr.rel (%p212_p3) target bundleno = 379 (0x17b), region = 40 }
   0xa   : > { %p258_p6 = scmp.lt.s32.totalorder (!%p212_p3), %s2048_s18, 1 }
   0xe   : > { %v1954_v0 = vld [vmem:[%s2492_s2 + $0x78] sm:$0xff]   ;;  %v2066_v1 = vmov 0.0   ;;  %v1956_v3 = vld [vmem:[%s2492_s2 + $0x70] sm:$0xff]   ;;  %vm2067_vm0 = vmmov 0   ;;  %v1958_v5 = vld [vmem:[%s2492_s2 + $0x68] sm:$0xff]   ;;  %s2507_s19 = smov (!%p246_p5, %s2052_s19), 1 }
   0xf   : > { %1731 = vmatprep.subr.bf16.mxu0 %v2066_v1  ;;  %1751 = vmatprep.subr.bf16.mxu1 %v2066_v1  ;;  %v1955_v2 = vld [vmem:[%s2492_s2 + $0x38] sm:$0xff]   ;;  %v1957_v4 = vld [vmem:[%s2492_s2 + $0x30] sm:$0xff]   ;;  %v1959_v6 = vld [vmem:[%s2492_s2 + $0x28] sm:$0xff]   ;;  %s1911_s29 = smul.u32 12, %s2507_s19  ;;  %s2509_s18 = smov (!%p258_p6, %s2048_s18), 1 }
  0x10   : > { %1732 = vmatpush3.bf16.msra.mxu0 %v1954_v0  ;;  %1747 = vmatprep.mubr.msk.bf16.mxu0 %vm2067_vm0, %v2066_v1  ;;  %v1960_v7 = vld [vmem:[%s2492_s2 + $0x60] sm:$0xff]   ;;  %v1962_v9 = vld [vmem:[%s2492_s2 + $0x58] sm:$0xff]   ;;  %v1964_v11 = vld [vmem:[%s2492_s2 + $0x50] sm:$0xff]  }
  0x11   : > { %1752 = vmatpush3.bf16.msra.mxu1 %v1955_v2  ;;  %1733 = vmatprep.subr.bf16.mxu0 %v2066_v1  ;;  %v1961_v8 = vld [vmem:[%s2492_s2 + $0x20] sm:$0xff]   ;;  %v1963_v10 = vld [vmem:[%s2492_s2 + $0x18] sm:$0xff]   ;;  %v1965_v12 = vld [vmem:[%s2492_s2 + $0x10] sm:$0xff]   ;;  %s255_s11 = scalar_lea.vmem %s2491_s1, %s1911_s29  ;;  %s250_s17 = scalar_lea.vmem %s2490_s0, %s1911_s29 }
  0x12   : > { %1753 = vmatprep.subr.bf16.mxu1 %v2066_v1  ;;  %1767 = vmatprep.mubr.msk.bf16.mxu1 %vm2067_vm0, %v2066_v1  ;;  %v1966_v13 = vld [vmem:[%s2492_s2 + $0x48] sm:$0xff]   ;;  %s2204_s25 = scalar_lea.vmem %s255_s11, %s1644_s12  ;;  %v1968_v15 = vld [vmem:[%s2492_s2 + $0x40] sm:$0xff]   ;;  %s2209_s28 = scalar_lea.vmem %s250_s17, %s1644_s12  ;;  %v1970_v19 = vld [vmem:[%s2492_s2 + $0xb8] sm:$0xff]  }
  0x13   : > { %v1967_v14 = vld [vmem:[%s2492_s2 + $0x8] sm:$0xff]   ;;  %v1969_v16 = vld [vmem:[%s2492_s2] sm:$0xff]   ;;  %v1971_v20 = vld [vmem:[%s2492_s2 + $0xf8] sm:$0xff]   ;;  %s1419_s29 = sshll.u32 %s2507_s19, 1 }
  0x14   : > { %1734 = vmatpush3.bf16.msra.mxu0 %v1956_v3  ;;  %v286_v17 = vld [vmem:[%s2204_s25] sm:$0x1]  ;;  %v1972_v21 = vld [vmem:[%s2492_s2 + $0xb0] sm:$0xff]   ;;  %v1974_v23 = vld [vmem:[%s2492_s2 + $0xa8] sm:$0xff]   ;;  %s261_s9 = sadd.s32 %s1419_s29, %s2509_s18 }
  0x15   : > { %1754 = vmatpush3.bf16.msra.mxu1 %v1957_v4  ;;  %1735 = vmatprep.subr.bf16.mxu0 %v2066_v1  ;;  %v267_v18 = vld [vmem:[%s2209_s28] sm:$0x1]  ;;  %v1973_v22 = vld [vmem:[%s2492_s2 + $0xf0] sm:$0xff]   ;;  %v1975_v24 = vld [vmem:[%s2492_s2 + $0xe8] sm:$0xff]  }
  0x16   : > { %1755 = vmatprep.subr.bf16.mxu1 %v2066_v1  ;;  %v1976_v25 = vld [vmem:[%s2492_s2 + $0xa0] sm:$0xff]   ;;  %v1978_v27 = vld [vmem:[%s2492_s2 + $0x98] sm:$0xff]   ;;  %v1980_v30 = vld [vmem:[%s2492_s2 + $0x90] sm:$0xff]  }
  0x17   : > { %v1977_v26 = vld [vmem:[%s2492_s2 + $0xe0] sm:$0xff]   ;;  %v1979_v28 = vld [vmem:[%s2492_s2 + $0xd8] sm:$0xff]   ;;  %v1981_v31 = vld [vmem:[%s2492_s2 + $0xd0] sm:$0xff]  }
  0x18   : > { %1736 = vmatpush3.bf16.msra.mxu0 %v1958_v5  ;;  %v1471_v29 = vld.sshfl [vmem:[%s2209_s28] sm:$0x3 pattern:$0x76325410]  ;;  %v1982_v33 = vld [vmem:[%s2492_s2 + $0x88] sm:$0xff]   ;;  %v1986_v40 = vld [vmem:[%s2492_s2 + $0x138] sm:$0xff]  }
  0x19   : > { %1756 = vmatpush3.bf16.msra.mxu1 %v1959_v6  ;;  %1737 = vmatprep.subr.bf16.mxu0 %v2066_v1  ;;  %v509_v32 = vshll.u32 %v1471_v29, 16  ;;  %v1983_v34 = vld [vmem:[%s2492_s2 + $0xc8] sm:$0xff]   ;;  %v507_v35 = vshrl.u32 %v1471_v29, 16  ;;  %v1984_v37 = vld [vmem:[%s2492_s2 + $0x80] sm:$0xff]   ;;  %v1987_v42 = vld [vmem:[%s2492_s2 + $0x178] sm:$0xff]  }
  0x1a   : > { %1757 = vmatprep.subr.bf16.mxu1 %v2066_v1  ;;  %v1985_v38 = vld [vmem:[%s2492_s2 + $0xc0] sm:$0xff]   ;;  %v1988_v43 = vld [vmem:[%s2492_s2 + $0x130] sm:$0xff]   ;;  %v1990_v45 = vld [vmem:[%s2492_s2 + $0x128] sm:$0xff]  }
  0x1b   : > { %v511_v36 = vrot.slane %v509_v32, 1  ;;  %v1482_v41 = vld [vmem:[%s2209_s28 + $0x2] sm:$0x1]  ;;  %v1989_v44 = vld [vmem:[%s2492_s2 + $0x170] sm:$0xff]   ;;  %v1991_v46 = vld [vmem:[%s2492_s2 + $0x168] sm:$0xff]  }
  0x1c   : > { %1738 = vmatpush3.bf16.msra.mxu0 %v1960_v7  ;;  %v1992_v47 = vld [vmem:[%s2492_s2 + $0x120] sm:$0xff]   ;;  %v1994_v49 = vld [vmem:[%s2492_s2 + $0x118] sm:$0xff]   ;;  %v1996_v51 = vld [vmem:[%s2492_s2 + $0x110] sm:$0xff]  }
  0x1d   : > { %1758 = vmatpush3.bf16.msra.mxu1 %v1961_v8  ;;  %1739 = vmatprep.subr.bf16.mxu0 %v2066_v1  ;;  %v512_v39 = vor.u32 %v511_v36, %v507_v35  ;;  %v1993_v48 = vld [vmem:[%s2492_s2 + $0x160] sm:$0xff]   ;;  %v1995_v50 = vld [vmem:[%s2492_s2 + $0x158] sm:$0xff]   ;;  %v1997_v52 = vld [vmem:[%s2492_s2 + $0x150] sm:$0xff]  }
  0x1e   : > { %1759 = vmatprep.subr.bf16.mxu1 %v2066_v1  ;;  %v1551_v53 = vld.sshfl [vmem:[%s2209_s28 + $0x2] sm:$0x3 pattern:$0x76325410]  ;;  %v1998_v54 = vld [vmem:[%s2492_s2 + $0x108] sm:$0xff]   ;;  %v2002_v62 = vld [vmem:[%s2492_s2 + $0x1b8] sm:$0xff]  }
  0x1f   : > { %v851_v55 = vshll.u32 %v1551_v53, 16  ;;  %v1999_v56 = vld [vmem:[%s2492_s2 + $0x148] sm:$0xff]   ;;  %v2000_v57 = vld [vmem:[%s2492_s2 + $0x100] sm:$0xff]   ;;  %v849_v58 = vshrl.u32 %v1551_v53, 16  ;;  %v2003_v0 = vld [vmem:[%s2492_s2 + $0x1f8] sm:$0xff]  }
  0x20   : > { %1740 = vmatpush3.bf16.msra.mxu0 %v1962_v9  ;;  %v2001_v60 = vld [vmem:[%s2492_s2 + $0x140] sm:$0xff]   ;;  %v2004_v2 = vld [vmem:[%s2492_s2 + $0x1b0] sm:$0xff]   ;;  %v2006_v4 = vld [vmem:[%s2492_s2 + $0x1a8] sm:$0xff]  }
  0x21   : > { %1760 = vmatpush3.bf16.msra.mxu1 %v1963_v10  ;;  %1741 = vmatprep.subr.bf16.mxu0 %v2066_v1  ;;  %v853_v59 = vrot.slane %v851_v55, 1  ;;  %v1509_v61 = vld [vmem:[%s2204_s25 + $0x2] sm:$0x1]  ;;  %v2005_v3 = vld [vmem:[%s2492_s2 + $0x1f0] sm:$0xff]   ;;  %v2007_v5 = vld [vmem:[%s2492_s2 + $0x1e8] sm:$0xff]  }
  0x22   : > { %1761 = vmatprep.subr.bf16.mxu1 %v2066_v1  ;;  %v2008_v6 = vld [vmem:[%s2492_s2 + $0x1a0] sm:$0xff]   ;;  %v2010_v8 = vld [vmem:[%s2492_s2 + $0x198] sm:$0xff]   ;;  %v2012_v10 = vld [vmem:[%s2492_s2 + $0x190] sm:$0xff]  }
  0x23   : > { %v854_v63 = vor.u32 %v853_v59, %v849_v58  ;;  %v2009_v7 = vld [vmem:[%s2492_s2 + $0x1e0] sm:$0xff]   ;;  %v2011_v9 = vld [vmem:[%s2492_s2 + $0x1d8] sm:$0xff]  }
  0x24   : > { %1742 = vmatpush3.bf16.msra.mxu0 %v1964_v11  ;;  %v2013_v11 = vld [vmem:[%s2492_s2 + $0x1d0] sm:$0xff]   ;;  %v2025_v29 = vld [vmem:[%s2492_s2 + $0x200] sm:$0xff]  }
  0x25   : > { %1762 = vmatpush3.bf16.msra.mxu1 %v1965_v12  ;;  %1743 = vmatprep.subr.bf16.mxu0 %v2066_v1  ;;  %v2014_v12 = vld [vmem:[%s2492_s2 + $0x188] sm:$0xff]  }
  0x26   : > { %1763 = vmatprep.subr.bf16.mxu1 %v2066_v1 }
  0x28   : > { %1744 = vmatpush3.bf16.msra.mxu0 %v1966_v13  ;;  %v2015_v13 = vld [vmem:[%s2492_s2 + $0x1c8] sm:$0xff]  }
  0x29   : > { %1764 = vmatpush3.bf16.msra.mxu1 %v1967_v14  ;;  %1745 = vmatprep.subr.bf16.mxu0 %v2066_v1  ;;  %v2016_v14 = vld [vmem:[%s2492_s2 + $0x180] sm:$0xff]  }
  0x2a   : > { %1765 = vmatprep.subr.bf16.mxu1 %v2066_v1 }
  0x2c   : > { %1746 = vmatpush3.bf16.msra.mxu0 %v1968_v15  ;;  %v2017_v15 = vld [vmem:[%s2492_s2 + $0x1c0] sm:$0xff]  }
  0x2d   : > { %1766 = vmatpush3.bf16.msra.mxu1 %v1969_v16  ;;  %1771 = vmatprep.subr.bf16.mxu0 %v2066_v1  ;;  %v1562_v16 = vld [vmem:[%s2209_s28 + $0x4] sm:$0x1] }
  0x2e   : > { %1791 = vmatprep.subr.bf16.mxu1 %v2066_v1 }
  0x2f   : > { %1748 = vmatmul.mubr.bf16.vlgmr.msra.gmra.mxu0 %v286_v17  ;;  %v2018_v17 = vld [vmem:[%s2492_s2 + $0x238] sm:$0xff]  }
  0x30   : > { %1768 = vmatmul.mubr.bf16.vlgmr.msra.gmra.mxu1 %v267_v18  ;;  %1772 = vmatpush3.bf16.msra.mxu0 %v1970_v19  ;;  %v1589_v18 = vld [vmem:[%s2204_s25 + $0x4] sm:$0x1]  ;;  %v2019_v19 = vld [vmem:[%s2492_s2 + $0x230] sm:$0xff]   ;;  %s262_s25 = scalar_lea.vmem %s2495_s5, %s261_s9 }
  0x31   : > { %1792 = vmatpush3.bf16.msra.mxu1 %v1971_v20  ;;  %1773 = vmatprep.subr.bf16.mxu0 %v2066_v1  ;;  %v2020_v20 = vld [vmem:[%s2492_s2 + $0x228] sm:$0xff]  }
  0x32   : > { %1793 = vmatprep.subr.bf16.mxu1 %v2066_v1  ;;  %1787 = vmatprep.mubr.msk.bf16.mxu0 %vm2067_vm0, %v2066_v1 }
  0x33   : > { %1807 = vmatprep.mubr.msk.bf16.mxu1 %vm2067_vm0, %v2066_v1 }
  0x34   : > { %1774 = vmatpush3.bf16.msra.mxu0 %v1972_v21  ;;  %v2021_v21 = vld [vmem:[%s2492_s2 + $0x220] sm:$0xff]  }
  0x35   : > { %1794 = vmatpush3.bf16.msra.mxu1 %v1973_v22  ;;  %1775 = vmatprep.subr.bf16.mxu0 %v2066_v1  ;;  %v2022_v22 = vld [vmem:[%s2492_s2 + $0x218] sm:$0xff]  }
  0x36   : > { %1795 = vmatprep.subr.bf16.mxu1 %v2066_v1 }
  0x38   : > { %1776 = vmatpush3.bf16.msra.mxu0 %v1974_v23  ;;  %v2023_v23 = vld [vmem:[%s2492_s2 + $0x210] sm:$0xff]  }
  0x39   : > { %1796 = vmatpush3.bf16.msra.mxu1 %v1975_v24  ;;  %1777 = vmatprep.subr.bf16.mxu0 %v2066_v1  ;;  %v1631_v24 = vld.sshfl [vmem:[%s2209_s28 + $0x4] sm:$0x3 pattern:$0x76325410] }
  0x3a   : > { %1797 = vmatprep.subr.bf16.mxu1 %v2066_v1 }
  0x3c   : > { %1778 = vmatpush3.bf16.msra.mxu0 %v1976_v25  ;;  %v1193_v25 = vshll.u32 %v1631_v24, 16 }
  0x3d   : > { %1798 = vmatpush3.bf16.msra.mxu1 %v1977_v26  ;;  %1779 = vmatprep.subr.bf16.mxu0 %v2066_v1  ;;  %v2024_v26 = vld [vmem:[%s2492_s2 + $0x208] sm:$0xff]  }
  0x3e   : > { %1799 = vmatprep.subr.bf16.mxu1 %v2066_v1 }
  0x40   : > { %1780 = vmatpush3.bf16.msra.mxu0 %v1978_v27  ;;  %v1191_v27 = vshrl.u32 %v1631_v24, 16 }
  0x41   : > { %1800 = vmatpush3.bf16.msra.mxu1 %v1979_v28  ;;  %1781 = vmatprep.subr.bf16.mxu0 %v2066_v1  ;;  %v1195_v28 = vrot.slane %v1193_v25, 1 }
  0x42   : > { %1801 = vmatprep.subr.bf16.mxu1 %v2066_v1 }
  0x44   : > { %1782 = vmatpush3.bf16.msra.mxu0 %v1980_v30  ;;  %v1196_v30 = vor.u32 %v1195_v28, %v1191_v27 }
  0x45   : > { %1802 = vmatpush3.bf16.msra.mxu1 %v1981_v31  ;;  %1783 = vmatprep.subr.bf16.mxu0 %v2066_v1 }
  0x46   : > { %1803 = vmatprep.subr.bf16.mxu1 %v2066_v1 }
  0x48   : > { %1784 = vmatpush3.bf16.msra.mxu0 %v1982_v33 }
  0x49   : > { %1804 = vmatpush3.bf16.msra.mxu1 %v1983_v34  ;;  %1785 = vmatprep.subr.bf16.mxu0 %v2066_v1 }
  0x4a   : > { %1805 = vmatprep.subr.bf16.mxu1 %v2066_v1 }
  0x4c   : > { %1786 = vmatpush3.bf16.msra.mxu0 %v1984_v37 }
  0x4d   : > { %1806 = vmatpush3.bf16.msra.mxu1 %v1985_v38  ;;  %1811 = vmatprep.subr.bf16.mxu0 %v2066_v1 }
  0x4e   : > { %1831 = vmatprep.subr.bf16.mxu1 %v2066_v1 }
  0x4f   : > { %1788 = vmatmul.mubr.bf16.vlgmr.msra.gmra.mxu0 %v512_v39 }
  0x50   : > { %1812 = vmatpush3.bf16.msra.mxu0 %v1986_v40  ;;  %1808 = vmatmul.mubr.bf16.vlgmr.msra.gmra.mxu1 %v1482_v41 }
  0x51   : > { %1832 = vmatpush3.bf16.msra.mxu1 %v1987_v42  ;;  %1813 = vmatprep.subr.bf16.mxu0 %v2066_v1 }
  0x52   : > { %1833 = vmatprep.subr.bf16.mxu1 %v2066_v1  ;;  %1827 = vmatprep.mubr.msk.bf16.mxu0 %vm2067_vm0, %v2066_v1 }
  0x53   : > { %1847 = vmatprep.mubr.msk.bf16.mxu1 %vm2067_vm0, %v2066_v1 }
  0x54   : > { %1814 = vmatpush3.bf16.msra.mxu0 %v1988_v43 }
  0x55   : > { %1834 = vmatpush3.bf16.msra.mxu1 %v1989_v44  ;;  %1815 = vmatprep.subr.bf16.mxu0 %v2066_v1 }
  0x56   : > { %1835 = vmatprep.subr.bf16.mxu1 %v2066_v1 }
  0x58   : > { %1816 = vmatpush3.bf16.msra.mxu0 %v1990_v45 }
  0x59   : > { %1836 = vmatpush3.bf16.msra.mxu1 %v1991_v46  ;;  %1817 = vmatprep.subr.bf16.mxu0 %v2066_v1 }
  0x5a   : > { %1837 = vmatprep.subr.bf16.mxu1 %v2066_v1 }
  0x5c   : > { %1818 = vmatpush3.bf16.msra.mxu0 %v1992_v47 }
  0x5d   : > { %1838 = vmatpush3.bf16.msra.mxu1 %v1993_v48  ;;  %1819 = vmatprep.subr.bf16.mxu0 %v2066_v1 }
  0x5e   : > { %1839 = vmatprep.subr.bf16.mxu1 %v2066_v1 }
  0x60   : > { %1820 = vmatpush3.bf16.msra.mxu0 %v1994_v49 }
  0x61   : > { %1840 = vmatpush3.bf16.msra.mxu1 %v1995_v50  ;;  %1821 = vmatprep.subr.bf16.mxu0 %v2066_v1 }
  0x62   : > { %1841 = vmatprep.subr.bf16.mxu1 %v2066_v1 }
  0x64   : > { %1822 = vmatpush3.bf16.msra.mxu0 %v1996_v51 }
  0x65   : > { %1842 = vmatpush3.bf16.msra.mxu1 %v1997_v52  ;;  %1823 = vmatprep.subr.bf16.mxu0 %v2066_v1 }
  0x66   : > { %1843 = vmatprep.subr.bf16.mxu1 %v2066_v1 }
  0x68   : > { %1824 = vmatpush3.bf16.msra.mxu0 %v1998_v54 }
  0x69   : > { %1844 = vmatpush3.bf16.msra.mxu1 %v1999_v56  ;;  %1825 = vmatprep.subr.bf16.mxu0 %v2066_v1 }
  0x6a   : > { %1845 = vmatprep.subr.bf16.mxu1 %v2066_v1 }
  0x6c   : > { %1826 = vmatpush3.bf16.msra.mxu0 %v2000_v57 }
  0x6d   : > { %1846 = vmatpush3.bf16.msra.mxu1 %v2001_v60  ;;  %1851 = vmatprep.subr.bf16.mxu0 %v2066_v1 }
  0x6e   : > { %1871 = vmatprep.subr.bf16.mxu1 %v2066_v1 }
  0x6f   : > { %1828 = vmatmul.mubr.bf16.vlgmr.msra.gmra.mxu0 %v1509_v61 }
  0x70   : > { %1852 = vmatpush3.bf16.msra.mxu0 %v2002_v62  ;;  %1848 = vmatmul.mubr.bf16.vlgmr.msra.gmra.mxu1 %v854_v63 }
  0x71   : > { %1872 = vmatpush3.bf16.msra.mxu1 %v2003_v0  ;;  %1853 = vmatprep.subr.bf16.mxu0 %v2066_v1 }
  0x72   : > { %1873 = vmatprep.subr.bf16.mxu1 %v2066_v1  ;;  %1867 = vmatprep.mubr.msk.bf16.mxu0 %vm2067_vm0, %v2066_v1 }
  0x73   : > { %1887 = vmatprep.mubr.msk.bf16.mxu1 %vm2067_vm0, %v2066_v1 }
  0x74   : > { %1854 = vmatpush3.bf16.msra.mxu0 %v2004_v2 }
  0x75   : > { %1874 = vmatpush3.bf16.msra.mxu1 %v2005_v3  ;;  %1855 = vmatprep.subr.bf16.mxu0 %v2066_v1 }
  0x76   : > { %1875 = vmatprep.subr.bf16.mxu1 %v2066_v1 }
  0x78   : > { %1856 = vmatpush3.bf16.msra.mxu0 %v2006_v4 }
  0x79   : > { %1876 = vmatpush3.bf16.msra.mxu1 %v2007_v5  ;;  %1857 = vmatprep.subr.bf16.mxu0 %v2066_v1 }
  0x7a   : > { %1877 = vmatprep.subr.bf16.mxu1 %v2066_v1 }
  0x7c   : > { %1858 = vmatpush3.bf16.msra.mxu0 %v2008_v6 }
  0x7d   : > { %1878 = vmatpush3.bf16.msra.mxu1 %v2009_v7  ;;  %1859 = vmatprep.subr.bf16.mxu0 %v2066_v1  ;;  %v1640_v7 = vld [vmem:[%s2493_s3] ss:$0 sm:$0xff] }
  0x7e   : > { %1879 = vmatprep.subr.bf16.mxu1 %v2066_v1 }
  0x80   : > { %1860 = vmatpush3.bf16.msra.mxu0 %v2010_v8 }
  0x81   : > { %1880 = vmatpush3.bf16.msra.mxu1 %v2011_v9  ;;  %1861 = vmatprep.subr.bf16.mxu0 %v2066_v1  ;;  %v1641_v9 = vld [vmem:[%s2494_s4] ss:$0 sm:$0xff] }
  0x82   : > { %1881 = vmatprep.subr.bf16.mxu1 %v2066_v1 }
  0x84   : > { %1862 = vmatpush3.bf16.msra.mxu0 %v2012_v10 }
  0x85   : > { %1882 = vmatpush3.bf16.msra.mxu1 %v2013_v11  ;;  %1863 = vmatprep.subr.bf16.mxu0 %v2066_v1 }
  0x86   : > { %1883 = vmatprep.subr.bf16.mxu1 %v2066_v1 }
  0x88   : > { %1864 = vmatpush3.bf16.msra.mxu0 %v2014_v12 }
  0x89   : > { %1884 = vmatpush3.bf16.msra.mxu1 %v2015_v13  ;;  %1865 = vmatprep.subr.bf16.mxu0 %v2066_v1 }
  0x8a   : > { %1885 = vmatprep.subr.bf16.mxu1 %v2066_v1 }
  0x8c   : > { %1866 = vmatpush3.bf16.msra.mxu0 %v2016_v14 }
  0x8d   : > { %1886 = vmatpush3.bf16.msra.mxu1 %v2017_v15  ;;  %1891 = vmatprep.subr.bf16.mxu0 %v2066_v1 }
  0x8f   : > { %1868 = vmatmul.mubr.bf16.vlgmr.msra.gmra.mxu0 %v1562_v16 }
  0x90   : > { %1892 = vmatpush3.bf16.msra.mxu0 %v2018_v17  ;;  %1888 = vmatmul.mubr.bf16.vlgmr.msra.gmra.mxu1 %v1589_v18 }
  0x91   : > { %1893 = vmatprep.subr.bf16.mxu0 %v2066_v1  ;;  %1907 = vmatprep.mubr.msk.bf16.mxu0 %vm2067_vm0, %v2066_v1 }
  0x94   : > { %1894 = vmatpush3.bf16.msra.mxu0 %v2019_v19 }
  0x95   : > { %1895 = vmatprep.subr.bf16.mxu0 %v2066_v1 }
  0x98   : > { %1896 = vmatpush3.bf16.msra.mxu0 %v2020_v20 }
  0x99   : > { %1897 = vmatprep.subr.bf16.mxu0 %v2066_v1 }
  0x9c   : > { %1898 = vmatpush3.bf16.msra.mxu0 %v2021_v21 }
  0x9d   : > { %1899 = vmatprep.subr.bf16.mxu0 %v2066_v1 }
  0xa0   : > { %1900 = vmatpush3.bf16.msra.mxu0 %v2022_v22 }
  0xa1   : > { %1901 = vmatprep.subr.bf16.mxu0 %v2066_v1 }
  0xa4   : > { %1902 = vmatpush3.bf16.msra.mxu0 %v2023_v23 }
  0xa5   : > { %1903 = vmatprep.subr.bf16.mxu0 %v2066_v1 }
  0xa8   : > { %1904 = vmatpush3.bf16.msra.mxu0 %v2024_v26 }
  0xa9   : > { %1905 = vmatprep.subr.bf16.mxu0 %v2066_v1 }
  0xac   : > { %1906 = vmatpush3.bf16.msra.mxu0 %v2025_v29 }
  0xaf   : > { %1908 = vmatmul.mubr.bf16.vlgmr.msra.gmra.mxu0 %v1196_v30 }
  0xef   : > { %v386_v31 = vpop.f32.mrf.mxu0 }
  0xf0   : > { %v474_v32 = vpop.f32.mrf.mxu1 }
  0xf1   : > { %v475_v33 = vadd.f32 %v474_v32, %v386_v31  ;;  %v1749_v34 = vpop.f32.mrf.mxu0 }
  0xf2   : > { %v1769_v35 = vpop.f32.mrf.mxu1 }
  0xf3   : > { %v389_v36 = vpop.f32.mrf.mxu0 }
  0xf4   : > { %v477_v37 = vpop.f32.mrf.mxu1 }
  0xf5   : > { %v1750_v38 = vpop.f32.mrf.mxu0 }
  0xf6   : > { %v1770_v39 = vpop.f32.mrf.mxu1 }
 0x10f   : > { %v596_v40 = vpop.f32.mrf.mxu0 }
 0x110   : > { %v602_v41 = vadd.f32 %v596_v40, %v475_v33  ;;  %v706_v42 = vpop.f32.mrf.mxu1 }
 0x111   : > { %v1789_v43 = vpop.f32.mrf.mxu0 }
 0x112   : > { %v712_v44 = vadd.f32 %v706_v42, %v602_v41  ;;  %v1809_v45 = vpop.f32.mrf.mxu1 }
 0x113   : > { %v599_v46 = vpop.f32.mrf.mxu0 }
 0x114   : > { %v709_v1 = vpop.f32.mrf.mxu1 }
 0x115   : > { %v1790_v47 = vpop.f32.mrf.mxu0 }
 0x116   : > { %v1810_v48 = vpop.f32.mrf.mxu1 }
 0x12f   : > { %v815_v49 = vpop.f32.mrf.mxu0 }
 0x130   : > { %v938_v50 = vpop.f32.mrf.mxu1  ;;  %v821_v2 = vadd.f32 %v815_v49, %v712_v44 }
 0x131   : > { %v1829_v51 = vpop.f32.mrf.mxu0 }
 0x132   : > { %v1849_v52 = vpop.f32.mrf.mxu1  ;;  %v944_v3 = vadd.f32 %v938_v50, %v821_v2 }
 0x133   : > { %v818_v53 = vpop.f32.mrf.mxu0 }
 0x134   : > { %v941_v54 = vpop.f32.mrf.mxu1 }
 0x135   : > { %v1830_v55 = vpop.f32.mrf.mxu0 }
 0x136   : > { %v1850_v56 = vpop.f32.mrf.mxu1 }
 0x14f   : > { %v1048_v57 = vpop.f32.mrf.mxu0 }
 0x150   : > { %v1157_v58 = vpop.f32.mrf.mxu1  ;;  %v1054_v4 = vadd.f32 %v1048_v57, %v944_v3 }
 0x151   : > { %v1869_v59 = vpop.f32.mrf.mxu0 }
 0x152   : > { %v1889_v60 = vpop.f32.mrf.mxu1  ;;  %v1163_v5 = vadd.f32 %v1157_v58, %v1054_v4 }
 0x153   : > { %v1051_v61 = vpop.f32.mrf.mxu0 }
 0x154   : > { %v1160_v62 = vpop.f32.mrf.mxu1 }
 0x155   : > { %v1870_v63 = vpop.f32.mrf.mxu0 }
 0x156   : > { %v1890_v0 = vpop.f32.mrf.mxu1 }
 0x16f   : > { %v1280_v6 = vpop.f32.mrf.mxu0 }
 0x170   : > { %v1286_v8 = vadd.f32 %v1280_v6, %v1163_v5 }
 0x171   : > { %v1909_v10 = vpop.f32.mrf.mxu0 }
 0x172   : > { %v1294_v11 = vmul.f32 %v1640_v7, %v1286_v8 }
 0x173   : > { %v1283_v12 = vpop.f32.mrf.mxu0 }
 0x174   : > { %v1302_v13 = vadd.f32 %v1641_v9, %v1294_v11 }
 0x175   : > { %v1910_v14 = vpop.f32.mrf.mxu0 }
 0x176   : > { %v1303_v15 = vmax.f32 %v1302_v13, 0.0 }
 0x178   : > { %v1304_v16 = vpack.c.bf16 %v1303_v15, %v1303_v15 }
 0x17a   : > { %1305 = vst [vmem:[%s262_s25] sm:$0x1] %v1304_v16 }
 0x17b PF: > { %s15_s22 = sadd.s32 1, %s2064_s22   ;;  %s2496_s18 = smov %s2056_s20 }
 0x17c   : > { %p12_p7 = scmp.ge.s32.totalorder %s15_s22, 6   ;;  %s2497_s19 = smov %s2060_s21 }
 0x17d   : > { %s2498_s20 = smov %s2501_s23  ;;  %s2499_s21 = smov %s2505_s24 }
 0x17e   :  { %14 = sbr.rel (!%p12_p7) target bundleno = 3 (0x3), region = 87 }

// kernel: _lambda_.23
= control target key start
LH: loop header
LB: loop body
LE: loop exit
PB: predicated region body
PF: predicated region fallthrough
CT: control target
= control target key end

     0   :  { %v228_v1 = vmov 0.0   ;;  %vm229_vm0 = vmmov 0   ;;  %vm19_vm1 = vcmask 1043456   ;;  %s328_s0 = inlined_call_operand.vmem [shape: bf16[2,4,128], index: 0, kind: input, shape index: {}]   ;;  %s329_s1 = inlined_call_operand.vmem [shape: f32[128,128], index: 1, kind: input, shape index: {}]   ;;  %s330_s2 = inlined_call_operand.vmem [shape: f32[1,128], index: 2, kind: input, shape index: {}]   ;;  %s331_s3 = inlined_call_operand.hbm [shape: f32[2,128], index: 3, kind: output, shape index: {}]  }
   0x1   :  { %v52_v0 = vld [vmem:[%s329_s1 + $0x78] sm:$0xff]  ;;  %168 = vmatprep.subr.mxu0 %v228_v1  ;;  %v51_v2 = vld [vmem:[%s329_s1 + $0x70] sm:$0xff]  ;;  %200 = vmatprep.mubr.msk.f32.mxu0 %vm229_vm0, %v228_v1  ;;  %v50_v3 = vld [vmem:[%s329_s1 + $0x68] sm:$0xff] }
   0x2   :  { %169 = vmatpush3.msra.mxu0 %v52_v0  ;;  %v49_v4 = vld [vmem:[%s329_s1 + $0x60] sm:$0xff] }
   0x3   :  { %170 = vmatprep.subr.mxu0 %v228_v1  ;;  %v15_v5 = vld [vmem:[%s328_s0] sm:$0x3]  ;;  %v16_v6 = vld [vmem:[%s328_s0 + $0x2] sm:$0x3] }
   0x4   :  { %171 = vmatpush3.msra.mxu0 %v51_v2  ;;  %v17_v7 = vunpack.c.l.bf16 %v15_v5  ;;  %v18_v8 = vunpack.c.l.bf16 %v16_v6 }
   0x5   :  { %172 = vmatprep.subr.mxu0 %v228_v1 }
   0x6   :  { %173 = vmatpush3.msra.mxu0 %v50_v3 }
   0x7   :  { %8 = vsyncpa [#allocation3], 0  ;;  %174 = vmatprep.subr.mxu0 %v228_v1  ;;  %v48_v9 = vld [vmem:[%s329_s1 + $0x58] sm:$0xff]  ;;  %v20_v10 = vsel %vm19_vm1, %v17_v7, 0.0  ;;  %v27_v11 = vsel %vm19_vm1, %v18_v8, 0.0  ;;  %v47_v12 = vld [vmem:[%s329_s1 + $0x50] sm:$0xff] }
   0x8   :  { %175 = vmatpush3.msra.mxu0 %v49_v4  ;;  %v21_v13 = vrot.slane %v20_v10, 4  ;;  %v28_v14 = vrot.slane %v27_v11, 4  ;;  %v46_v15 = vld [vmem:[%s329_s1 + $0x48] sm:$0xff]  ;;  %v45_v18 = vld [vmem:[%s329_s1 + $0x40] sm:$0xff]  ;;  %v44_v21 = vld [vmem:[%s329_s1 + $0x38] sm:$0xff]  ;;  %vm62_vm2 = vcmask 1041409  }
   0x9   :  { %176 = vmatprep.subr.mxu0 %v228_v1  ;;  %v43_v24 = vld [vmem:[%s329_s1 + $0x30] sm:$0xff]  ;;  %v42_v27 = vld [vmem:[%s329_s1 + $0x28] sm:$0xff]  ;;  %v41_v28 = vld [vmem:[%s329_s1 + $0x20] sm:$0xff]  ;;  %s230_s22 = smov [#allocation2]  }
   0xa   :  { %177 = vmatpush3.msra.mxu0 %v48_v9  ;;  %v22_v16 = vadd.f32 %v21_v13, %v20_v10  ;;  %v29_v17 = vadd.f32 %v28_v14, %v27_v11  ;;  %v40_v31 = vld [vmem:[%s329_s1 + $0x18] sm:$0xff]  ;;  %v39_v32 = vld [vmem:[%s329_s1 + $0x10] sm:$0xff]  ;;  %v38_v35 = vld [vmem:[%s329_s1 + $0x8] sm:$0xff]  ;;  %s142_s23 = sshll.u32 %s230_s22, 4  ;;  %s143_s23 = int_to_ptr.vmem [resolvable:$true] %s142_s23 }
   0xb   :  { %178 = vmatprep.subr.mxu0 %v228_v1  ;;  %v37_v36 = vld [vmem:[%s329_s1] sm:$0xff]  ;;  %s206_s24 = scalar_lea.vmem %s143_s23, 32  ;;  %p211_p1 = scmp.lt.s32.totalorder %s143_s23, %s143_s23 }
   0xc   :  { %179 = vmatpush3.msra.mxu0 %v47_v12  ;;  %v23_v19 = vrot.slane %v22_v16, 2  ;;  %v30_v20 = vrot.slane %v29_v17, 2  ;;  %v150_v38 = vld [vmem:[%s330_s2] ss:$0 sm:$0xff]  ;;  %p207_p0 = scmp.ne.s32.totalorder %s143_s23, %s206_s24  ;;  %p212_p2 = scmp.lt.s32.totalorder %s206_s24, %s206_s24 }
   0xd   :  { %180 = vmatprep.subr.mxu0 %v228_v1 }
   0xe   :  { %181 = vmatpush3.msra.mxu0 %v46_v15  ;;  %v24_v22 = vadd.f32 %v23_v19, %v22_v16  ;;  %v31_v23 = vadd.f32 %v30_v20, %v29_v17  ;;  %p213_p3 = por %p212_p2, %p211_p1 }
   0xf   :  { %182 = vmatprep.subr.mxu0 %v228_v1 }
  0x10   :  { %183 = vmatpush3.msra.mxu0 %v45_v18  ;;  %v25_v25 = vrot.slane %v24_v22, 1  ;;  %v32_v26 = vrot.slane %v31_v23, 1  ;;  %p214_p4 = pnand %p213_p3, %p207_p0 }
  0x11   :  { %184 = vmatprep.subr.mxu0 %v228_v1 }
  0x12   :  { %185 = vmatpush3.msra.mxu0 %v44_v21  ;;  %v26_v29 = vadd.f32 %v25_v25, %v24_v22  ;;  %v33_v30 = vadd.f32 %v32_v26, %v31_v23 }
  0x13   :  { %186 = vmatprep.subr.mxu0 %v228_v1 }
  0x14   :  { %187 = vmatpush3.msra.mxu0 %v43_v24  ;;  %v35_v33 = vmul.f32 0.25, %v26_v29  ;;  %v36_v34 = vmul.f32 0.25, %v33_v30 }
  0x15   :  { %188 = vmatprep.subr.mxu0 %v228_v1 }
  0x16   :  { %189 = vmatpush3.msra.mxu0 %v42_v27  ;;  %v63_v37 = vsel %vm62_vm2, %v36_v34, %v35_v33 }
  0x17   :  { %190 = vmatprep.subr.mxu0 %v228_v1 }
  0x18   :  { %191 = vmatpush3.msra.mxu0 %v41_v28 }
  0x19   :  { %192 = vmatprep.subr.mxu0 %v228_v1 }
  0x1a   :  { %193 = vmatpush3.msra.mxu0 %v40_v31 }
  0x1b   :  { %194 = vmatprep.subr.mxu0 %v228_v1 }
  0x1c   :  { %195 = vmatpush3.msra.mxu0 %v39_v32 }
  0x1d   :  { %196 = vmatprep.subr.mxu0 %v228_v1 }
  0x1e   :  { %197 = vmatpush3.msra.mxu0 %v38_v35 }
  0x1f   :  { %198 = vmatprep.subr.mxu0 %v228_v1 }
  0x20   :  { %199 = vmatpush3.msra.mxu0 %v37_v36 }
  0x21   :  { %201 = vmatmul.mubr.f32.vlgmr.msra.gmra.mxu0 %v63_v37 }
  0xe1   :  { %v131_v39 = vpop.f32.mrf.mxu0 }
  0xe2   :  { %v132_v40 = vadd.f32 %v150_v38, %v131_v39 }
  0xe3   :  { %v202_v41 = vpop.f32.mrf.mxu0 }
  0xe4   :  { %135 = vst [vmem:[#allocation2] sm:$0x3] %v132_v40 }
  0xe5   :  { %217 = shalt.err (!%p214_p4)
}
  0xe6   :  { %145 = dma.vmem_to_hbm [thread:$0]  %s143_s23, 32, %s331_s3, [#allocation3]  }
  0xe7   :  { %226 = dma.done.wait [#allocation3], 32  }
  0xe8   :  { %227 = vsyncadd [#allocation3], 4294967264 }
  0xe9   :  { %149 = vsyncpa [#allocation3], 1 }

// kernel: _lambda_.22
= control target key start
LH: loop header
LB: loop body
LE: loop exit
PB: predicated region body
PF: predicated region fallthrough
CT: control target
= control target key end

     0   :  { %s2113_s18 = smov 0   ;;  %s2115_s19 = smov 0   ;;  %s2499_s0 = inlined_call_operand.vmem [shape: bf16[2,4,4,128], index: 0, kind: input, shape index: {}]   ;;  %s2500_s1 = inlined_call_operand.vmem [shape: bf16[9,128,128], index: 1, kind: input, shape index: {}]   ;;  %s2501_s2 = inlined_call_operand.vmem [shape: f32[1,128], index: 2, kind: input, shape index: {}]   ;;  %s2502_s3 = inlined_call_operand.vmem [shape: f32[1,128], index: 3, kind: input, shape index: {}]   ;;  %s2503_s4 = inlined_call_operand.vmem [shape: bf16[2,2,2,128], index: 4, kind: input, shape index: {}]   ;;  %s2504_s5 = inlined_call_operand.vmem [shape: bf16[2,2,2,128], index: 5, kind: output, shape index: {}]  }
   0x1   :  { %s2117_s20 = smov 0   ;;  %s2119_s21 = smov 0  }
   0x2   :  { %s2121_s22 = smov 0  }
   0x3 LB: > { %s24_s23 = sadd.s32 1, %s2071_s20  ;;  %s27_s24 = sadd.s32 1, %s2075_s21  ;;  %s2079_s22 = sphi %s2121_s22, %s15_s22   ;;  %s2075_s21 = sphi %s2119_s21, %s2508_s21   ;;  %s2071_s20 = sphi %s2117_s20, %s2507_s20   ;;  %s2067_s19 = sphi %s2115_s19, %s2506_s19   ;;  %s2063_s18 = sphi %s2113_s18, %s2505_s18  }
   0x4   : > { %p25_p0 = scmp.ge.s32.totalorder %s24_s23, 2  ;;  %p1441_p1 = scmp.ge.s32.totalorder %s2079_s22, 1 }
   0x5   : > { %p215_p2 = scmp.lt.s32.totalorder %s2079_s22, 5 }
   0x6   : > { %s2510_s23 = smov (%p25_p0, %s24_s23), 0  ;;  %s2512_s24 = smov (!%p25_p0, %s27_s24), %s2075_s21 }
   0x7   : > { %p216_p3 = pnand %p1441_p1, %p215_p2  ;;  %p29_p4 = scmp.ge.s32.totalorder %s2512_s24, 2 }
   0x8   : > { %p252_p5 = scmp.lt.s32.totalorder (!%p216_p3), %s2067_s19, 1  ;;  %s1446_s25 = sshll.u32 (!%p216_p3), %s2063_s18, 1 }
   0x9   : > { %s2514_s24 = smov (%p29_p4, %s2512_s24), 0  ;;  %219 = sbr.rel (%p216_p3) target bundleno = 381 (0x17d), region = 40 }
   0xa   : > { %p259_p6 = scmp.lt.s32.totalorder (!%p216_p3), %s2063_s18, 1 }
   0xe   : > { %v1969_v0 = vld [vmem:[%s2500_s1 + $0x78] sm:$0xff]   ;;  %v2081_v1 = vmov 0.0   ;;  %v1971_v3 = vld [vmem:[%s2500_s1 + $0x70] sm:$0xff]   ;;  %vm2082_vm0 = vmmov 0   ;;  %s2516_s19 = smov (!%p252_p5, %s2067_s19), 1  ;;  %v1973_v5 = vld [vmem:[%s2500_s1 + $0x68] sm:$0xff]  }
   0xf   : > { %1747 = vmatprep.subr.bf16.mxu0 %v2081_v1  ;;  %1767 = vmatprep.subr.bf16.mxu1 %v2081_v1  ;;  %v1970_v2 = vld [vmem:[%s2500_s1 + $0x38] sm:$0xff]   ;;  %v1972_v4 = vld [vmem:[%s2500_s1 + $0x30] sm:$0xff]   ;;  %v1974_v6 = vld [vmem:[%s2500_s1 + $0x28] sm:$0xff]   ;;  %s1665_s12 = sshll.u32 %s2516_s19, 3  ;;  %s2518_s18 = smov (!%p259_p6, %s2063_s18), 1 }
  0x10   : > { %1748 = vmatpush3.bf16.msra.mxu0 %v1969_v0  ;;  %1763 = vmatprep.mubr.msk.bf16.mxu0 %vm2082_vm0, %v2081_v1  ;;  %v1975_v7 = vld [vmem:[%s2500_s1 + $0x60] sm:$0xff]   ;;  %s256_s17 = scalar_lea.vmem %s2499_s0, %s1665_s12  ;;  %v1977_v9 = vld [vmem:[%s2500_s1 + $0x58] sm:$0xff]   ;;  %v1979_v12 = vld [vmem:[%s2500_s1 + $0x50] sm:$0xff]  }
  0x11   : > { %1768 = vmatpush3.bf16.msra.mxu1 %v1970_v2  ;;  %1749 = vmatprep.subr.bf16.mxu0 %v2081_v1  ;;  %v1976_v8 = vld [vmem:[%s2500_s1 + $0x20] sm:$0xff]   ;;  %s2188_s28 = scalar_lea.vmem %s256_s17, %s1446_s25  ;;  %v1978_v10 = vld [vmem:[%s2500_s1 + $0x18] sm:$0xff]   ;;  %v1980_v13 = vld [vmem:[%s2500_s1 + $0x10] sm:$0xff]  }
  0x12   : > { %1769 = vmatprep.subr.bf16.mxu1 %v2081_v1  ;;  %1783 = vmatprep.mubr.msk.bf16.mxu1 %vm2082_vm0, %v2081_v1  ;;  %v1463_v11 = vld.sshfl [vmem:[%s2188_s28] sm:$0x3 pattern:$0x76325410]  ;;  %v1981_v15 = vld [vmem:[%s2500_s1 + $0x48] sm:$0xff]   ;;  %v1985_v23 = vld [vmem:[%s2500_s1 + $0xb8] sm:$0xff]  }
  0x13   : > { %v320_v14 = vshll.u32 %v1463_v11, 16  ;;  %v1982_v16 = vld [vmem:[%s2500_s1 + $0x8] sm:$0xff]   ;;  %v318_v17 = vshrl.u32 %v1463_v11, 16  ;;  %v1983_v19 = vld [vmem:[%s2500_s1 + $0x40] sm:$0xff]   ;;  %v1986_v24 = vld [vmem:[%s2500_s1 + $0xf8] sm:$0xff]  }
  0x14   : > { %1750 = vmatpush3.bf16.msra.mxu0 %v1971_v3  ;;  %v1984_v20 = vld [vmem:[%s2500_s1] sm:$0xff]   ;;  %v1987_v25 = vld [vmem:[%s2500_s1 + $0xb0] sm:$0xff]   ;;  %v1989_v27 = vld [vmem:[%s2500_s1 + $0xa8] sm:$0xff]  }
  0x15   : > { %1770 = vmatpush3.bf16.msra.mxu1 %v1972_v4  ;;  %1751 = vmatprep.subr.bf16.mxu0 %v2081_v1  ;;  %v322_v18 = vrot.slane %v320_v14, 1  ;;  %v274_v22 = vld [vmem:[%s2188_s28] sm:$0x1]  ;;  %v1988_v26 = vld [vmem:[%s2500_s1 + $0xf0] sm:$0xff]   ;;  %v1990_v28 = vld [vmem:[%s2500_s1 + $0xe8] sm:$0xff]  }
  0x16   : > { %1771 = vmatprep.subr.bf16.mxu1 %v2081_v1  ;;  %v1991_v29 = vld [vmem:[%s2500_s1 + $0xa0] sm:$0xff]   ;;  %v1993_v31 = vld [vmem:[%s2500_s1 + $0x98] sm:$0xff]   ;;  %v1995_v33 = vld [vmem:[%s2500_s1 + $0x90] sm:$0xff]  }
  0x17   : > { %v323_v21 = vor.u32 %v322_v18, %v318_v17  ;;  %v1992_v30 = vld [vmem:[%s2500_s1 + $0xe0] sm:$0xff]   ;;  %v1994_v32 = vld [vmem:[%s2500_s1 + $0xd8] sm:$0xff]   ;;  %v1996_v34 = vld [vmem:[%s2500_s1 + $0xd0] sm:$0xff]  }
  0x18   : > { %1752 = vmatpush3.bf16.msra.mxu0 %v1973_v5  ;;  %v1997_v35 = vld [vmem:[%s2500_s1 + $0x88] sm:$0xff]   ;;  %v1496_v37 = vld.sshfl [vmem:[%s2188_s28] sm:$0x2 pattern:$0x76325410]  ;;  %v2001_v41 = vld [vmem:[%s2500_s1 + $0x138] sm:$0xff]  }
  0x19   : > { %1772 = vmatpush3.bf16.msra.mxu1 %v1974_v6  ;;  %1753 = vmatprep.subr.bf16.mxu0 %v2081_v1  ;;  %v1998_v36 = vld [vmem:[%s2500_s1 + $0xc8] sm:$0xff]   ;;  %v1999_v38 = vld [vmem:[%s2500_s1 + $0x80] sm:$0xff]   ;;  %v527_v40 = vrot.slane %v1496_v37, 1  ;;  %v2002_v42 = vld [vmem:[%s2500_s1 + $0x178] sm:$0xff]  }
  0x1a   : > { %1773 = vmatprep.subr.bf16.mxu1 %v2081_v1  ;;  %v2000_v39 = vld [vmem:[%s2500_s1 + $0xc0] sm:$0xff]   ;;  %v2003_v44 = vld [vmem:[%s2500_s1 + $0x130] sm:$0xff]   ;;  %v2005_v46 = vld [vmem:[%s2500_s1 + $0x128] sm:$0xff]  }
  0x1b   : > { %v1506_v43 = vld [vmem:[%s2188_s28 + $0x2] sm:$0x1]  ;;  %v2004_v45 = vld [vmem:[%s2500_s1 + $0x170] sm:$0xff]   ;;  %v2006_v47 = vld [vmem:[%s2500_s1 + $0x168] sm:$0xff]  }
  0x1c   : > { %1754 = vmatpush3.bf16.msra.mxu0 %v1975_v7  ;;  %v2007_v48 = vld [vmem:[%s2500_s1 + $0x120] sm:$0xff]   ;;  %v2009_v50 = vld [vmem:[%s2500_s1 + $0x118] sm:$0xff]   ;;  %v2011_v52 = vld [vmem:[%s2500_s1 + $0x110] sm:$0xff]  }
  0x1d   : > { %1774 = vmatpush3.bf16.msra.mxu1 %v1976_v8  ;;  %1755 = vmatprep.subr.bf16.mxu0 %v2081_v1  ;;  %v2008_v49 = vld [vmem:[%s2500_s1 + $0x160] sm:$0xff]   ;;  %v2010_v51 = vld [vmem:[%s2500_s1 + $0x158] sm:$0xff]   ;;  %v2012_v54 = vld [vmem:[%s2500_s1 + $0x150] sm:$0xff]  }
  0x1e   : > { %1775 = vmatprep.subr.bf16.mxu1 %v2081_v1  ;;  %v1548_v53 = vld.sshfl [vmem:[%s2188_s28 + $0x2] sm:$0x3 pattern:$0x76325410]  ;;  %v2013_v56 = vld [vmem:[%s2500_s1 + $0x108] sm:$0xff]   ;;  %v2017_v0 = vld [vmem:[%s2500_s1 + $0x1b8] sm:$0xff]  }
  0x1f   : > { %v757_v55 = vshll.u32 %v1548_v53, 16  ;;  %v2014_v57 = vld [vmem:[%s2500_s1 + $0x148] sm:$0xff]   ;;  %v755_v58 = vshrl.u32 %v1548_v53, 16  ;;  %v2015_v60 = vld [vmem:[%s2500_s1 + $0x100] sm:$0xff]   ;;  %v2018_v3 = vld [vmem:[%s2500_s1 + $0x1f8] sm:$0xff]  }
  0x20   : > { %1756 = vmatpush3.bf16.msra.mxu0 %v1977_v9  ;;  %v2016_v61 = vld [vmem:[%s2500_s1 + $0x140] sm:$0xff]   ;;  %v2019_v4 = vld [vmem:[%s2500_s1 + $0x1b0] sm:$0xff]   ;;  %v2021_v6 = vld [vmem:[%s2500_s1 + $0x1a8] sm:$0xff]  }
  0x21   : > { %1776 = vmatpush3.bf16.msra.mxu1 %v1978_v10  ;;  %1757 = vmatprep.subr.bf16.mxu0 %v2081_v1  ;;  %v759_v59 = vrot.slane %v757_v55, 1  ;;  %v1574_v62 = vld.sshfl [vmem:[%s2188_s28 + $0x2] sm:$0x2 pattern:$0x76325410]  ;;  %v2020_v5 = vld [vmem:[%s2500_s1 + $0x1f0] sm:$0xff]  }
  0x22   : > { %1777 = vmatprep.subr.bf16.mxu1 %v2081_v1  ;;  %v877_v2 = vrot.slane %v1574_v62, 1  ;;  %v2022_v7 = vld [vmem:[%s2500_s1 + $0x1e8] sm:$0xff]   ;;  %v2023_v8 = vld [vmem:[%s2500_s1 + $0x1a0] sm:$0xff]   ;;  %v2025_v10 = vld [vmem:[%s2500_s1 + $0x198] sm:$0xff]  }
  0x23   : > { %v760_v63 = vor.u32 %v759_v59, %v755_v58  ;;  %v2024_v9 = vld [vmem:[%s2500_s1 + $0x1e0] sm:$0xff]   ;;  %v2026_v11 = vld [vmem:[%s2500_s1 + $0x1d8] sm:$0xff]   ;;  %v2030_v17 = vld [vmem:[%s2500_s1 + $0x1c8] sm:$0xff]  }
  0x24   : > { %1758 = vmatpush3.bf16.msra.mxu0 %v1979_v12  ;;  %v2027_v12 = vld [vmem:[%s2500_s1 + $0x190] sm:$0xff]   ;;  %v1626_v14 = vld.sshfl [vmem:[%s2188_s28 + $0x4] sm:$0x3 pattern:$0x76325410] }
  0x25   : > { %1778 = vmatpush3.bf16.msra.mxu1 %v1980_v13  ;;  %1759 = vmatprep.subr.bf16.mxu0 %v2081_v1  ;;  %v2028_v13 = vld [vmem:[%s2500_s1 + $0x1d0] sm:$0xff]   ;;  %v2031_v18 = vld [vmem:[%s2500_s1 + $0x180] sm:$0xff]  }
  0x26   : > { %1779 = vmatprep.subr.bf16.mxu1 %v2081_v1 }
  0x28   : > { %1760 = vmatpush3.bf16.msra.mxu0 %v1981_v15  ;;  %v2029_v15 = vld [vmem:[%s2500_s1 + $0x188] sm:$0xff]  }
  0x29   : > { %1780 = vmatpush3.bf16.msra.mxu1 %v1982_v16  ;;  %1761 = vmatprep.subr.bf16.mxu0 %v2081_v1  ;;  %v1107_v16 = vshll.u32 %v1626_v14, 16 }
  0x2a   : > { %1781 = vmatprep.subr.bf16.mxu1 %v2081_v1 }
  0x2c   : > { %1762 = vmatpush3.bf16.msra.mxu0 %v1983_v19  ;;  %v1105_v19 = vshrl.u32 %v1626_v14, 16 }
  0x2d   : > { %1782 = vmatpush3.bf16.msra.mxu1 %v1984_v20  ;;  %1787 = vmatprep.subr.bf16.mxu0 %v2081_v1  ;;  %v1109_v20 = vrot.slane %v1107_v16, 1 }
  0x2e   : > { %1807 = vmatprep.subr.bf16.mxu1 %v2081_v1 }
  0x2f   : > { %1764 = vmatmul.mubr.bf16.vlgmr.msra.gmra.mxu0 %v323_v21  ;;  %v2032_v21 = vld [vmem:[%s2500_s1 + $0x1c0] sm:$0xff]  }
  0x30   : > { %1784 = vmatmul.mubr.bf16.vlgmr.msra.gmra.mxu1 %v274_v22  ;;  %1788 = vmatpush3.bf16.msra.mxu0 %v1985_v23  ;;  %v1584_v22 = vld [vmem:[%s2188_s28 + $0x4] sm:$0x1]  ;;  %v2033_v23 = vld [vmem:[%s2500_s1 + $0x238] sm:$0xff]  }
  0x31   : > { %1808 = vmatpush3.bf16.msra.mxu1 %v1986_v24  ;;  %1789 = vmatprep.subr.bf16.mxu0 %v2081_v1  ;;  %v1110_v24 = vor.u32 %v1109_v20, %v1105_v19 }
  0x32   : > { %1809 = vmatprep.subr.bf16.mxu1 %v2081_v1  ;;  %1803 = vmatprep.mubr.msk.bf16.mxu0 %vm2082_vm0, %v2081_v1 }
  0x33   : > { %1823 = vmatprep.mubr.msk.bf16.mxu1 %vm2082_vm0, %v2081_v1 }
  0x34   : > { %1790 = vmatpush3.bf16.msra.mxu0 %v1987_v25  ;;  %v2034_v25 = vld [vmem:[%s2500_s1 + $0x230] sm:$0xff]  }
  0x35   : > { %1810 = vmatpush3.bf16.msra.mxu1 %v1988_v26  ;;  %1791 = vmatprep.subr.bf16.mxu0 %v2081_v1  ;;  %v2035_v26 = vld [vmem:[%s2500_s1 + $0x228] sm:$0xff]  }
  0x36   : > { %1811 = vmatprep.subr.bf16.mxu1 %v2081_v1 }
  0x38   : > { %1792 = vmatpush3.bf16.msra.mxu0 %v1989_v27  ;;  %v2036_v27 = vld [vmem:[%s2500_s1 + $0x220] sm:$0xff]  }
  0x39   : > { %1812 = vmatpush3.bf16.msra.mxu1 %v1990_v28  ;;  %1793 = vmatprep.subr.bf16.mxu0 %v2081_v1  ;;  %v2037_v28 = vld [vmem:[%s2500_s1 + $0x218] sm:$0xff]  }
  0x3a   : > { %1813 = vmatprep.subr.bf16.mxu1 %v2081_v1 }
  0x3c   : > { %1794 = vmatpush3.bf16.msra.mxu0 %v1991_v29  ;;  %v2038_v29 = vld [vmem:[%s2500_s1 + $0x210] sm:$0xff]  }
  0x3d   : > { %1814 = vmatpush3.bf16.msra.mxu1 %v1992_v30  ;;  %1795 = vmatprep.subr.bf16.mxu0 %v2081_v1  ;;  %v2039_v30 = vld [vmem:[%s2500_s1 + $0x208] sm:$0xff]  }
  0x3e   : > { %1815 = vmatprep.subr.bf16.mxu1 %v2081_v1 }
  0x40   : > { %1796 = vmatpush3.bf16.msra.mxu0 %v1993_v31  ;;  %v2040_v31 = vld [vmem:[%s2500_s1 + $0x200] sm:$0xff]  }
  0x41   : > { %1816 = vmatpush3.bf16.msra.mxu1 %v1994_v32  ;;  %1797 = vmatprep.subr.bf16.mxu0 %v2081_v1  ;;  %v1652_v32 = vld.sshfl [vmem:[%s2188_s28 + $0x4] sm:$0x2 pattern:$0x76325410]  ;;  %s1444_s28 = sshll.u32 %s2516_s19, 1 }
  0x42   : > { %1817 = vmatprep.subr.bf16.mxu1 %v2081_v1  ;;  %s262_s13 = sadd.s32 %s1444_s28, %s2518_s18 }
  0x43   : > { %s263_s16 = scalar_lea.vmem %s2503_s4, %s262_s13  ;;  %s270_s29 = scalar_lea.vmem %s2504_s5, %s262_s13 }
  0x44   : > { %1798 = vmatpush3.bf16.msra.mxu0 %v1995_v33  ;;  %v1227_v33 = vrot.slane %v1652_v32, 1 }
  0x45   : > { %1818 = vmatpush3.bf16.msra.mxu1 %v1996_v34  ;;  %1799 = vmatprep.subr.bf16.mxu0 %v2081_v1 }
  0x46   : > { %1819 = vmatprep.subr.bf16.mxu1 %v2081_v1 }
  0x48   : > { %1800 = vmatpush3.bf16.msra.mxu0 %v1997_v35 }
  0x49   : > { %1820 = vmatpush3.bf16.msra.mxu1 %v1998_v36  ;;  %1801 = vmatprep.subr.bf16.mxu0 %v2081_v1 }
  0x4a   : > { %1821 = vmatprep.subr.bf16.mxu1 %v2081_v1 }
  0x4c   : > { %1802 = vmatpush3.bf16.msra.mxu0 %v1999_v38 }
  0x4d   : > { %1822 = vmatpush3.bf16.msra.mxu1 %v2000_v39  ;;  %1827 = vmatprep.subr.bf16.mxu0 %v2081_v1 }
  0x4e   : > { %1847 = vmatprep.subr.bf16.mxu1 %v2081_v1 }
  0x4f   : > { %1804 = vmatmul.mubr.bf16.vlgmr.msra.gmra.mxu0 %v527_v40 }
  0x50   : > { %1828 = vmatpush3.bf16.msra.mxu0 %v2001_v41  ;;  %1824 = vmatmul.mubr.bf16.vlgmr.msra.gmra.mxu1 %v1506_v43 }
  0x51   : > { %1848 = vmatpush3.bf16.msra.mxu1 %v2002_v42  ;;  %1829 = vmatprep.subr.bf16.mxu0 %v2081_v1 }
  0x52   : > { %1849 = vmatprep.subr.bf16.mxu1 %v2081_v1  ;;  %1843 = vmatprep.mubr.msk.bf16.mxu0 %vm2082_vm0, %v2081_v1 }
  0x53   : > { %1863 = vmatprep.mubr.msk.bf16.mxu1 %vm2082_vm0, %v2081_v1 }
  0x54   : > { %1830 = vmatpush3.bf16.msra.mxu0 %v2003_v44 }
  0x55   : > { %1850 = vmatpush3.bf16.msra.mxu1 %v2004_v45  ;;  %1831 = vmatprep.subr.bf16.mxu0 %v2081_v1 }
  0x56   : > { %1851 = vmatprep.subr.bf16.mxu1 %v2081_v1 }
  0x58   : > { %1832 = vmatpush3.bf16.msra.mxu0 %v2005_v46 }
  0x59   : > { %1852 = vmatpush3.bf16.msra.mxu1 %v2006_v47  ;;  %1833 = vmatprep.subr.bf16.mxu0 %v2081_v1 }
  0x5a   : > { %1853 = vmatprep.subr.bf16.mxu1 %v2081_v1 }
  0x5c   : > { %1834 = vmatpush3.bf16.msra.mxu0 %v2007_v48 }
  0x5d   : > { %1854 = vmatpush3.bf16.msra.mxu1 %v2008_v49  ;;  %1835 = vmatprep.subr.bf16.mxu0 %v2081_v1 }
  0x5e   : > { %1855 = vmatprep.subr.bf16.mxu1 %v2081_v1 }
  0x60   : > { %1836 = vmatpush3.bf16.msra.mxu0 %v2009_v50 }
  0x61   : > { %1856 = vmatpush3.bf16.msra.mxu1 %v2010_v51  ;;  %1837 = vmatprep.subr.bf16.mxu0 %v2081_v1 }
  0x62   : > { %1857 = vmatprep.subr.bf16.mxu1 %v2081_v1 }
  0x64   : > { %1838 = vmatpush3.bf16.msra.mxu0 %v2011_v52 }
  0x65   : > { %1858 = vmatpush3.bf16.msra.mxu1 %v2012_v54  ;;  %1839 = vmatprep.subr.bf16.mxu0 %v2081_v1 }
  0x66   : > { %1859 = vmatprep.subr.bf16.mxu1 %v2081_v1 }
  0x68   : > { %1840 = vmatpush3.bf16.msra.mxu0 %v2013_v56 }
  0x69   : > { %1860 = vmatpush3.bf16.msra.mxu1 %v2014_v57  ;;  %1841 = vmatprep.subr.bf16.mxu0 %v2081_v1 }
  0x6a   : > { %1861 = vmatprep.subr.bf16.mxu1 %v2081_v1 }
  0x6c   : > { %1842 = vmatpush3.bf16.msra.mxu0 %v2015_v60 }
  0x6d   : > { %1862 = vmatpush3.bf16.msra.mxu1 %v2016_v61  ;;  %1867 = vmatprep.subr.bf16.mxu0 %v2081_v1 }
  0x6e   : > { %1887 = vmatprep.subr.bf16.mxu1 %v2081_v1 }
  0x6f   : > { %1844 = vmatmul.mubr.bf16.vlgmr.msra.gmra.mxu0 %v760_v63 }
  0x70   : > { %1868 = vmatpush3.bf16.msra.mxu0 %v2017_v0  ;;  %1864 = vmatmul.mubr.bf16.vlgmr.msra.gmra.mxu1 %v877_v2 }
  0x71   : > { %1888 = vmatpush3.bf16.msra.mxu1 %v2018_v3  ;;  %1869 = vmatprep.subr.bf16.mxu0 %v2081_v1 }
  0x72   : > { %1889 = vmatprep.subr.bf16.mxu1 %v2081_v1  ;;  %1883 = vmatprep.mubr.msk.bf16.mxu0 %vm2082_vm0, %v2081_v1 }
  0x73   : > { %1903 = vmatprep.mubr.msk.bf16.mxu1 %vm2082_vm0, %v2081_v1 }
  0x74   : > { %1870 = vmatpush3.bf16.msra.mxu0 %v2019_v4 }
  0x75   : > { %1890 = vmatpush3.bf16.msra.mxu1 %v2020_v5  ;;  %1871 = vmatprep.subr.bf16.mxu0 %v2081_v1 }
  0x76   : > { %1891 = vmatprep.subr.bf16.mxu1 %v2081_v1 }
  0x78   : > { %1872 = vmatpush3.bf16.msra.mxu0 %v2021_v6 }
  0x79   : > { %1892 = vmatpush3.bf16.msra.mxu1 %v2022_v7  ;;  %1873 = vmatprep.subr.bf16.mxu0 %v2081_v1 }
  0x7a   : > { %1893 = vmatprep.subr.bf16.mxu1 %v2081_v1 }
  0x7c   : > { %1874 = vmatpush3.bf16.msra.mxu0 %v2023_v8 }
  0x7d   : > { %1894 = vmatpush3.bf16.msra.mxu1 %v2024_v9  ;;  %1875 = vmatprep.subr.bf16.mxu0 %v2081_v1 }
  0x7e   : > { %1895 = vmatprep.subr.bf16.mxu1 %v2081_v1 }
  0x80   : > { %1876 = vmatpush3.bf16.msra.mxu0 %v2025_v10  ;;  %v1661_v10 = vld [vmem:[%s2501_s2] ss:$0 sm:$0xff] }
  0x81   : > { %1896 = vmatpush3.bf16.msra.mxu1 %v2026_v11  ;;  %1877 = vmatprep.subr.bf16.mxu0 %v2081_v1  ;;  %v1334_v11 = vld [vmem:[%s263_s16] sm:$0x1] }
  0x82   : > { %1897 = vmatprep.subr.bf16.mxu1 %v2081_v1  ;;  %v1335_v16 = vunpack.c.l.bf16 %v1334_v11 }
  0x84   : > { %1878 = vmatpush3.bf16.msra.mxu0 %v2027_v12 }
  0x85   : > { %1898 = vmatpush3.bf16.msra.mxu1 %v2028_v13  ;;  %1879 = vmatprep.subr.bf16.mxu0 %v2081_v1  ;;  %v1662_v13 = vld [vmem:[%s2502_s3] ss:$0 sm:$0xff] }
  0x86   : > { %1899 = vmatprep.subr.bf16.mxu1 %v2081_v1 }
  0x88   : > { %1880 = vmatpush3.bf16.msra.mxu0 %v2029_v15 }
  0x89   : > { %1900 = vmatpush3.bf16.msra.mxu1 %v2030_v17  ;;  %1881 = vmatprep.subr.bf16.mxu0 %v2081_v1 }
  0x8a   : > { %1901 = vmatprep.subr.bf16.mxu1 %v2081_v1 }
  0x8c   : > { %1882 = vmatpush3.bf16.msra.mxu0 %v2031_v18 }
  0x8d   : > { %1902 = vmatpush3.bf16.msra.mxu1 %v2032_v21  ;;  %1907 = vmatprep.subr.bf16.mxu0 %v2081_v1 }
  0x8f   : > { %1884 = vmatmul.mubr.bf16.vlgmr.msra.gmra.mxu0 %v1584_v22 }
  0x90   : > { %1908 = vmatpush3.bf16.msra.mxu0 %v2033_v23  ;;  %1904 = vmatmul.mubr.bf16.vlgmr.msra.gmra.mxu1 %v1110_v24 }
  0x91   : > { %1909 = vmatprep.subr.bf16.mxu0 %v2081_v1  ;;  %1923 = vmatprep.mubr.msk.bf16.mxu0 %vm2082_vm0, %v2081_v1 }
  0x94   : > { %1910 = vmatpush3.bf16.msra.mxu0 %v2034_v25 }
  0x95   : > { %1911 = vmatprep.subr.bf16.mxu0 %v2081_v1 }
  0x98   : > { %1912 = vmatpush3.bf16.msra.mxu0 %v2035_v26 }
  0x99   : > { %1913 = vmatprep.subr.bf16.mxu0 %v2081_v1 }
  0x9c   : > { %1914 = vmatpush3.bf16.msra.mxu0 %v2036_v27 }
  0x9d   : > { %1915 = vmatprep.subr.bf16.mxu0 %v2081_v1 }
  0xa0   : > { %1916 = vmatpush3.bf16.msra.mxu0 %v2037_v28 }
  0xa1   : > { %1917 = vmatprep.subr.bf16.mxu0 %v2081_v1 }
  0xa4   : > { %1918 = vmatpush3.bf16.msra.mxu0 %v2038_v29 }
  0xa5   : > { %1919 = vmatprep.subr.bf16.mxu0 %v2081_v1 }
  0xa8   : > { %1920 = vmatpush3.bf16.msra.mxu0 %v2039_v30 }
  0xa9   : > { %1921 = vmatprep.subr.bf16.mxu0 %v2081_v1 }
  0xac   : > { %1922 = vmatpush3.bf16.msra.mxu0 %v2040_v31 }
  0xaf   : > { %1924 = vmatmul.mubr.bf16.vlgmr.msra.gmra.mxu0 %v1227_v33 }
  0xef   : > { %v407_v34 = vpop.f32.mrf.mxu0 }
  0xf0   : > { %v495_v35 = vpop.f32.mrf.mxu1 }
  0xf1   : > { %v496_v36 = vadd.f32 %v495_v35, %v407_v34  ;;  %v1765_v37 = vpop.f32.mrf.mxu0 }
  0xf2   : > { %v1785_v38 = vpop.f32.mrf.mxu1 }
  0xf3   : > { %v410_v39 = vpop.f32.mrf.mxu0 }
  0xf4   : > { %v498_v40 = vpop.f32.mrf.mxu1 }
  0xf5   : > { %v1766_v41 = vpop.f32.mrf.mxu0 }
  0xf6   : > { %v1786_v42 = vpop.f32.mrf.mxu1 }
 0x10f   : > { %v611_v43 = vpop.f32.mrf.mxu0 }
 0x110   : > { %v617_v44 = vadd.f32 %v611_v43, %v496_v36  ;;  %v721_v45 = vpop.f32.mrf.mxu1 }
 0x111   : > { %v1805_v46 = vpop.f32.mrf.mxu0 }
 0x112   : > { %v727_v47 = vadd.f32 %v721_v45, %v617_v44  ;;  %v1825_v48 = vpop.f32.mrf.mxu1 }
 0x113   : > { %v614_v49 = vpop.f32.mrf.mxu0 }
 0x114   : > { %v724_v1 = vpop.f32.mrf.mxu1 }
 0x115   : > { %v1806_v50 = vpop.f32.mrf.mxu0 }
 0x116   : > { %v1826_v51 = vpop.f32.mrf.mxu1 }
 0x12f   : > { %v844_v52 = vpop.f32.mrf.mxu0 }
 0x130   : > { %v961_v53 = vpop.f32.mrf.mxu1  ;;  %v850_v5 = vadd.f32 %v844_v52, %v727_v47 }
 0x131   : > { %v1845_v54 = vpop.f32.mrf.mxu0 }
 0x132   : > { %v1865_v55 = vpop.f32.mrf.mxu1  ;;  %v967_v6 = vadd.f32 %v961_v53, %v850_v5 }
 0x133   : > { %v847_v56 = vpop.f32.mrf.mxu0 }
 0x134   : > { %v964_v57 = vpop.f32.mrf.mxu1 }
 0x135   : > { %v1846_v58 = vpop.f32.mrf.mxu0 }
 0x136   : > { %v1866_v59 = vpop.f32.mrf.mxu1 }
 0x14f   : > { %v1071_v60 = vpop.f32.mrf.mxu0 }
 0x150   : > { %v1194_v61 = vpop.f32.mrf.mxu1  ;;  %v1077_v7 = vadd.f32 %v1071_v60, %v967_v6 }
 0x151   : > { %v1885_v62 = vpop.f32.mrf.mxu0 }
 0x152   : > { %v1905_v63 = vpop.f32.mrf.mxu1  ;;  %v1200_v8 = vadd.f32 %v1194_v61, %v1077_v7 }
 0x153   : > { %v1074_v0 = vpop.f32.mrf.mxu0 }
 0x154   : > { %v1197_v2 = vpop.f32.mrf.mxu1 }
 0x155   : > { %v1886_v3 = vpop.f32.mrf.mxu0 }
 0x156   : > { %v1906_v4 = vpop.f32.mrf.mxu1 }
 0x16f   : > { %v1311_v9 = vpop.f32.mrf.mxu0 }
 0x170   : > { %v1317_v12 = vadd.f32 %v1311_v9, %v1200_v8 }
 0x171   : > { %v1925_v14 = vpop.f32.mrf.mxu0 }
 0x172   : > { %v1325_v15 = vmul.f32 %v1661_v10, %v1317_v12 }
 0x173   : > { %v1314_v17 = vpop.f32.mrf.mxu0 }
 0x174   : > { %v1333_v18 = vadd.f32 %v1662_v13, %v1325_v15 }
 0x175   : > { %v1926_v19 = vpop.f32.mrf.mxu0 }
 0x176   : > { %v1336_v20 = vadd.f32 %v1335_v16, %v1333_v18 }
 0x178   : > { %v1337_v21 = vmax.f32 %v1336_v20, 0.0 }
 0x17a   : > { %v1338_v22 = vpack.c.bf16 %v1337_v21, %v1337_v21 }
 0x17c   : > { %1339 = vst [vmem:[%s270_s29] sm:$0x1] %v1338_v22 }
 0x17d PF: > { %s15_s22 = sadd.s32 1, %s2079_s22   ;;  %s2505_s18 = smov %s2071_s20 }
 0x17e   : > { %p12_p7 = scmp.ge.s32.totalorder %s15_s22, 6   ;;  %s2506_s19 = smov %s2075_s21 }
 0x17f   : > { %s2507_s20 = smov %s2510_s23  ;;  %s2508_s21 = smov %s2514_s24 }
 0x180   :  { %14 = sbr.rel (!%p12_p7) target bundleno = 3 (0x3), region = 84 }

</bundles_post_ra>
